<compile_context>
chip_gen: v5e
topology: v5e:2x2
jax: 0.10.0
libtpu: 0.0.40
codegen_flags: <defaults>
</compile_context>

<pallas_src>
import functools

import jax
import jax.numpy as jnp
from jax.experimental import pallas as pl
from jax.experimental.pallas import tpu as pltpu

LANE = 128                      # network-wide channel padding (lane-dense stores)
_COMPUTE_DTYPE = jnp.bfloat16   # MXU operand / activation storage dtype


# ----------------------------- Pallas kernels ------------------------------

def _conv_bn_kernel(p_ref, w_ref, s_ref, b_ref, o_ref, *, apply_relu):
    # (tm, K) bf16 @ (K, 128) bf16 -> f32 acc -> BN affine -> optional ReLU -> bf16
    acc = jnp.dot(p_ref[...], w_ref[...], preferred_element_type=jnp.float32)
    acc = acc * s_ref[...] + b_ref[...]
    if apply_relu:
        acc = jnp.maximum(acc, 0.0)
    o_ref[...] = acc.astype(o_ref.dtype)


def _conv_bn_add_relu_kernel(p_ref, w_ref, s_ref, b_ref, r_ref, o_ref):
    # (tm, K) @ (K, 128) -> BN affine -> residual add -> ReLU  (BasicBlock tail)
    acc = jnp.dot(p_ref[...], w_ref[...], preferred_element_type=jnp.float32)
    acc = acc * s_ref[...] + b_ref[...] + r_ref[...].astype(jnp.float32)
    o_ref[...] = jnp.maximum(acc, 0.0).astype(o_ref.dtype)


def _head_kernel(x_ref, w_ref, b_ref, o_ref):
    # global average pool over spatial axis + fully-connected layer (f32)
    pooled = jnp.mean(x_ref[...].astype(jnp.float32), axis=1)          # (N, 128)
    o_ref[...] = jnp.dot(pooled, w_ref[...],
                         preferred_element_type=jnp.float32) + b_ref[...]


# ------------------------ pallas_call wrappers (tiled) -----------------------

_CPARAMS = pltpu.CompilerParams(
    dimension_semantics=("parallel",),       # megacore: split M tiles across TCs
    vmem_limit_bytes=32 * 1024 * 1024,       # safe on v5e/v6e/v7x; tiles are small
)

_VMEM_FULL = pl.BlockSpec(memory_space=pltpu.MemorySpace.VMEM)


def _tile_m(m):
    # Largest clean tile; all M values here (2048/512/128) are multiples of 8.
    for tm in (512, 256, 128):
        if m >= tm and m % tm == 0:
            return tm
    return m


def conv_bn(p, w, scale, shift, *, relu):
    m, k = p.shape
    cout = w.shape[1]
    tm = _tile_m(m)
    return pl.pallas_call(
        functools.partial(_conv_bn_kernel, apply_relu=relu),
        out_shape=jax.ShapeDtypeStruct((m, cout), _COMPUTE_DTYPE),
        grid=(m // tm,),
        in_specs=[
            pl.BlockSpec((tm, k), lambda i: (i, 0)),        # patches: tiled over M
            pl.BlockSpec((k, cout), lambda i: (0, 0)),      # weights: resident
            pl.BlockSpec((1, cout), lambda i: (0, 0)),      # BN scale
            pl.BlockSpec((1, cout), lambda i: (0, 0)),      # BN shift
        ],
        out_specs=pl.BlockSpec((tm, cout), lambda i: (i, 0)),
        compiler_params=_CPARAMS,
    )(p, w, scale, shift)


def conv_bn_add_relu(p, w, scale, shift, residual):
    m, k = p.shape
    cout = w.shape[1]
    tm = _tile_m(m)
    return pl.pallas_call(
        _conv_bn_add_relu_kernel,
        out_shape=jax.ShapeDtypeStruct((m, cout), _COMPUTE_DTYPE),
        grid=(m // tm,),
        in_specs=[
            pl.BlockSpec((tm, k), lambda i: (i, 0)),
            pl.BlockSpec((k, cout), lambda i: (0, 0)),
            pl.BlockSpec((1, cout), lambda i: (0, 0)),
            pl.BlockSpec((1, cout), lambda i: (0, 0)),
            pl.BlockSpec((tm, cout), lambda i: (i, 0)),     # residual: tiled over M
        ],
        out_specs=pl.BlockSpec((tm, cout), lambda i: (i, 0)),
        compiler_params=_CPARAMS,
    )(p, w, scale, shift, residual)


def head(x, w, b):
    n = x.shape[0]
    num_out = w.shape[1]
    return pl.pallas_call(
        _head_kernel,
        out_shape=jax.ShapeDtypeStruct((n, num_out), jnp.float32),
        in_specs=[_VMEM_FULL] * 3,
        out_specs=_VMEM_FULL,
    )(x, w, b)


# ------------------------------- JAX glue -----------------------------------

def _round_up(v, m):
    return ((v + m - 1) // m) * m


def im2col(x, cin_real, kh, kw, stride, padding):
    """x: (N, H, W, C>=cin_real) -> bf16 (N*Ho*Wo, kh*kw*cin_pad8) patches.

    Only the first `cin_real` channels (padded to a multiple of 8) feed K, so K
    stays small even though activations are carried at 128 channels.
    Patch element order = (i, j, c), matching conv_w_to_mat.
    """
    n, h, w, _ = x.shape
    cin = _round_up(cin_real, 8)
    xc = x[..., :cin_real]
    if cin != cin_real:
        xc = jnp.pad(xc, ((0, 0), (0, 0), (0, 0), (0, cin - cin_real)))
    xp = jnp.pad(xc, ((0, 0), (padding, padding), (padding, padding), (0, 0)))
    ho = (h + 2 * padding - kh) // stride + 1
    wo = (w + 2 * padding - kw) // stride + 1
    cols = []
    for i in range(kh):
        for j in range(kw):
            cols.append(xp[:,
                           i:i + stride * (ho - 1) + 1:stride,
                           j:j + stride * (wo - 1) + 1:stride, :])
    p = jnp.concatenate(cols, axis=-1)                    # (N, Ho, Wo, kh*kw*cin)
    return p.reshape(n * ho * wo, kh * kw * cin).astype(_COMPUTE_DTYPE), ho, wo


def conv_w_to_mat(w):
    """PyTorch conv weight (Cout, Cin, kh, kw) -> bf16 (kh*kw*Cin_pad8, 128)."""
    cout, cin, kh, kw = w.shape
    cin_p = _round_up(cin, 8)
    wt = jnp.transpose(w, (2, 3, 1, 0))                   # (kh, kw, cin, cout)
    wt = jnp.pad(wt, ((0, 0), (0, 0), (0, cin_p - cin), (0, LANE - cout)))
    return wt.reshape(kh * kw * cin_p, LANE).astype(_COMPUTE_DTYPE)


def fold_bn(gamma, beta, mean, var, eps=1e-5):
    scale = gamma / jnp.sqrt(var + eps)
    shift = beta - mean * scale
    pad = LANE - scale.shape[0]
    scale = jnp.pad(scale, (0, pad), constant_values=1.0)   # padded channels stay 0
    shift = jnp.pad(shift, (0, pad))
    return (scale.reshape(1, -1).astype(jnp.float32),
            shift.reshape(1, -1).astype(jnp.float32))


def conv_bn_layer(x, w_mat, scale, shift, *, cin_real, stride, k, padding, relu):
    n = x.shape[0]
    p, ho, wo = im2col(x, cin_real, k, k, stride, padding)
    out = conv_bn(p, w_mat, scale, shift, relu=relu)        # (M, 128) bf16
    return out.reshape(n, ho, wo, LANE)


def basic_block(x, bp, stride):
    n = x.shape[0]
    # conv1 + bn1 + relu (fused, tiled)
    h = conv_bn_layer(x, bp['w1'], bp['s1'], bp['b1'],
                      cin_real=bp['cin'], stride=stride, k=3, padding=1, relu=True)
    # shortcut (projection 1x1 conv + bn, or identity)
    if 'ws' in bp:
        sc = conv_bn_layer(x, bp['ws'], bp['ss'], bp['bs'],
                           cin_real=bp['cin'], stride=stride, k=1, padding=0,
                           relu=False)
    else:
        sc = x
    # conv2 + bn2 + residual add + relu (single fused, tiled kernel)
    p, ho, wo = im2col(h, bp['cout'], 3, 3, 1, 1)
    out = conv_bn_add_relu(p, bp['w2'], bp['s2'], bp['b2'],
                           sc.reshape(n * ho * wo, LANE))
    return out.reshape(n, ho, wo, LANE)


def resnet_forward(x_nchw, params):
    x = jnp.transpose(x_nchw, (0, 2, 3, 1)).astype(_COMPUTE_DTYPE)   # NCHW -> NHWC
    x = conv_bn_layer(x, params['stem_w'], params['stem_s'], params['stem_b'],
                      cin_real=3, stride=1, k=3, padding=1, relu=True)
    for bp, stride in params['blocks']:
        x = basic_block(x, bp, stride)
    n, h, w, c = x.shape                                   # (N, 8, 8, 128)
    x = x.reshape(n, h * w, c)
    logits = head(x, params['fc_w'], params['fc_b'])       # (N, 128) f32
    return logits[:, :params['num_classes']]               # slice padded classes


# ------------------------- deterministic parameter init ---------------------

def make_conv(key, cin, cout, k):
    fan_in = cin * k * k
    return jax.random.normal(key, (cout, cin, k, k), jnp.float32) * (2.0 / fan_in) ** 0.5


def make_bn(key, c):
    k1, k2, k3, k4 = jax.random.split(key, 4)
    gamma = jax.random.uniform(k1, (c,), jnp.float32, 0.5, 1.5)
    beta = jax.random.normal(k2, (c,), jnp.float32) * 0.1
    mean = jax.random.normal(k3, (c,), jnp.float32) * 0.1
    var = jax.random.uniform(k4, (c,), jnp.float32, 0.5, 1.5)
    return gamma, beta, mean, var


def init_params(key, num_blocks, num_classes=10):
    # Weights are converted to matmul-ready, 128-padded bf16 matrices ONCE here.
    params = {'num_classes': num_classes}
    k_stem_w, k_stem_bn, k_fc, k_blocks = jax.random.split(key, 4)

    params['stem_w'] = conv_w_to_mat(make_conv(k_stem_w, 3, 16, 3))
    params['stem_s'], params['stem_b'] = fold_bn(*make_bn(k_stem_bn, 16))

    blocks = []
    in_c = 16
    stage_cfg = [(16, num_blocks[0], 1), (32, num_blocks[1], 2), (64, num_blocks[2], 2)]
    bkeys = jax.random.split(k_blocks, 6 * sum(num_blocks) + 1)
    ki = 0
    for out_c, n, stage_stride in stage_cfg:
        strides = [stage_stride] + [1] * (n - 1)
        for s in strides:
            bp = {'cin': in_c, 'cout': out_c}
            bp['w1'] = conv_w_to_mat(make_conv(bkeys[ki], in_c, out_c, 3)); ki += 1
            bp['s1'], bp['b1'] = fold_bn(*make_bn(bkeys[ki], out_c)); ki += 1
            bp['w2'] = conv_w_to_mat(make_conv(bkeys[ki], out_c, out_c, 3)); ki += 1
            bp['s2'], bp['b2'] = fold_bn(*make_bn(bkeys[ki], out_c)); ki += 1
            if s != 1 or in_c != out_c:
                bp['ws'] = conv_w_to_mat(make_conv(bkeys[ki], in_c, out_c, 1)); ki += 1
                bp['ss'], bp['bs'] = fold_bn(*make_bn(bkeys[ki], out_c)); ki += 1
            blocks.append((bp, s))
            in_c = out_c
    params['blocks'] = blocks

    kfw, kfb = jax.random.split(k_fc)
    fc_w = jax.random.normal(kfw, (64, num_classes), jnp.float32) * (1.0 / 64) ** 0.5
    fc_b = jax.random.normal(kfb, (1, num_classes), jnp.float32) * 0.01
    params['fc_w'] = jnp.pad(fc_w, ((0, LANE - 64), (0, LANE - num_classes)))
    params['fc_b'] = jnp.pad(fc_b, ((0, 0), (0, LANE - num_classes)))
    return params


# ---------------------------------- main -------------------------------------

if __name__ == "__main__":
    key = jax.random.PRNGKey(0)
    k_params, k_x = jax.random.split(key)

    num_blocks = [1, 1, 1]          # tiny ResNet (BasicBlock), CIFAR geometry
    params = init_params(k_params, num_blocks, num_classes=10)

    # CIFAR-style input: 32x32 spatial so AvgPool2d(8) sees an 8x8 map at layer3.
    x = jax.random.normal(k_x, (2, 3, 32, 32), jnp.float32)

    forward = jax.jit(lambda inp: resnet_forward(inp, params))
    out = jax.block_until_ready(forward(x))
    assert out.shape == (2, 10) and out.dtype == jnp.float32
    print("KERNEL_OK")
</pallas_src>

<mosaic_0001>
module attributes {stable_mosaic.version = 11 : i64} {
  func.func @_conv_bn_kernel(%arg0: i32, %arg1: memref<512x72xbf16, #tpu.memory_space<vmem>>, %arg2: memref<72x128xbf16, #tpu.memory_space<vmem>>, %arg3: memref<1x128xf32, #tpu.memory_space<vmem>>, %arg4: memref<1x128xf32, #tpu.memory_space<vmem>>, %arg5: memref<512x128xbf16, #tpu.memory_space<vmem>>) attributes {dimension_semantics = [#tpu.dimension_semantics<parallel>], iteration_bounds = array<i64: 4>, scalar_prefetch = 0 : i64, scratch_operands = 0 : i64, tpu.core_type = #tpu.core_type<tc>, window_params = [{transform_indices = @transform_0, window_bounds = array<i64: 512, 72>}, {pipeline_mode = #tpu.pipeline_mode<synchronous>, transform_indices = @transform_1, window_bounds = array<i64: 72, 128>}, {pipeline_mode = #tpu.pipeline_mode<synchronous>, transform_indices = @transform_2, window_bounds = array<i64: 1, 128>}, {pipeline_mode = #tpu.pipeline_mode<synchronous>, transform_indices = @transform_3, window_bounds = array<i64: 1, 128>}, {transform_indices = @transform_4, window_bounds = array<i64: 512, 128>}]} {
    %c0 = arith.constant 0 : index
    %c0_0 = arith.constant 0 : index
    %0 = vector.load %arg1[%c0, %c0_0] : memref<512x72xbf16, #tpu.memory_space<vmem>>, vector<512x72xbf16>
    %c0_1 = arith.constant 0 : index
    %c0_2 = arith.constant 0 : index
    %1 = vector.load %arg2[%c0_1, %c0_2] : memref<72x128xbf16, #tpu.memory_space<vmem>>, vector<72x128xbf16>
    %cst = arith.constant dense<0.000000e+00> : vector<512x128xf32>
    %2 = tpu.matmul %0, %1, %cst {dimension_numbers = #tpu.dot_dimension_numbers<[1], [0], [0], [1], [0, 0, 1, 1], [], []>} : vector<512x72xbf16>, vector<72x128xbf16>, vector<512x128xf32> -> vector<512x128xf32>
    %c0_3 = arith.constant 0 : index
    %c0_4 = arith.constant 0 : index
    %3 = vector.load %arg3[%c0_3, %c0_4] : memref<1x128xf32, #tpu.memory_space<vmem>>, vector<1x128xf32>
    %4 = vector.broadcast %3 : vector<1x128xf32> to vector<512x128xf32>
    %5 = arith.mulf %2, %4 : vector<512x128xf32>
    %c0_5 = arith.constant 0 : index
    %c0_6 = arith.constant 0 : index
    %6 = vector.load %arg4[%c0_5, %c0_6] : memref<1x128xf32, #tpu.memory_space<vmem>>, vector<1x128xf32>
    %7 = vector.broadcast %6 : vector<1x128xf32> to vector<512x128xf32>
    %8 = arith.addf %5, %7 : vector<512x128xf32>
    %cst_7 = arith.constant 0.000000e+00 : f32
    %9 = vector.broadcast %cst_7 : f32 to vector<512x128xf32>
    %10 = arith.maximumf %8, %9 : vector<512x128xf32>
    %11 = arith.truncf %10 : vector<512x128xf32> to vector<512x128xbf16>
    %c0_8 = arith.constant 0 : index
    %c0_9 = arith.constant 0 : index
    %12 = vector.load %arg5[%c0_8, %c0_9] : memref<512x128xbf16, #tpu.memory_space<vmem>>, vector<512x128xbf16>
    tpu.vector_store %arg5[%c0_8, %c0_9], %11 {strides = array<i32>} : memref<512x128xbf16, #tpu.memory_space<vmem>>, vector<512x128xbf16>,
    return
  }
  func.func @transform_0(%arg0: i32) -> (i32, i32) {
    %c0_i32 = arith.constant 0 : i32
    %c0_i32_0 = arith.constant 0 : i32
    return %arg0, %c0_i32 : i32, i32
  }
  func.func @transform_1(%arg0: i32) -> (i32, i32) {
    %c0_i32 = arith.constant 0 : i32
    %c0_i32_0 = arith.constant 0 : i32
    %c0_i32_1 = arith.constant 0 : i32
    return %c0_i32, %c0_i32_0 : i32, i32
  }
  func.func @transform_2(%arg0: i32) -> (i32, i32) {
    %c0_i32 = arith.constant 0 : i32
    %c0_i32_0 = arith.constant 0 : i32
    %c0_i32_1 = arith.constant 0 : i32
    return %c0_i32, %c0_i32_0 : i32, i32
  }
  func.func @transform_3(%arg0: i32) -> (i32, i32) {
    %c0_i32 = arith.constant 0 : i32
    %c0_i32_0 = arith.constant 0 : i32
    %c0_i32_1 = arith.constant 0 : i32
    return %c0_i32, %c0_i32_0 : i32, i32
  }
  func.func @transform_4(%arg0: i32) -> (i32, i32) {
    %c0_i32 = arith.constant 0 : i32
    %c0_i32_0 = arith.constant 0 : i32
    return %arg0, %c0_i32 : i32, i32
  }
}

module attributes {stable_mosaic.version = 11 : i64} {
  func.func @_conv_bn_kernel(%arg0: i32, %arg1: memref<512x144xbf16, #tpu.memory_space<vmem>>, %arg2: memref<144x128xbf16, #tpu.memory_space<vmem>>, %arg3: memref<1x128xf32, #tpu.memory_space<vmem>>, %arg4: memref<1x128xf32, #tpu.memory_space<vmem>>, %arg5: memref<512x128xbf16, #tpu.memory_space<vmem>>) attributes {dimension_semantics = [#tpu.dimension_semantics<parallel>], iteration_bounds = array<i64: 4>, scalar_prefetch = 0 : i64, scratch_operands = 0 : i64, tpu.core_type = #tpu.core_type<tc>, window_params = [{transform_indices = @transform_0, window_bounds = array<i64: 512, 144>}, {pipeline_mode = #tpu.pipeline_mode<synchronous>, transform_indices = @transform_1, window_bounds = array<i64: 144, 128>}, {pipeline_mode = #tpu.pipeline_mode<synchronous>, transform_indices = @transform_2, window_bounds = array<i64: 1, 128>}, {pipeline_mode = #tpu.pipeline_mode<synchronous>, transform_indices = @transform_3, window_bounds = array<i64: 1, 128>}, {transform_indices = @transform_4, window_bounds = array<i64: 512, 128>}]} {
    %c0 = arith.constant 0 : index
    %c0_0 = arith.constant 0 : index
    %0 = vector.load %arg1[%c0, %c0_0] : memref<512x144xbf16, #tpu.memory_space<vmem>>, vector<512x144xbf16>
    %c0_1 = arith.constant 0 : index
    %c0_2 = arith.constant 0 : index
    %1 = vector.load %arg2[%c0_1, %c0_2] : memref<144x128xbf16, #tpu.memory_space<vmem>>, vector<144x128xbf16>
    %cst = arith.constant dense<0.000000e+00> : vector<512x128xf32>
    %2 = tpu.matmul %0, %1, %cst {dimension_numbers = #tpu.dot_dimension_numbers<[1], [0], [0], [1], [0, 0, 1, 1], [], []>} : vector<512x144xbf16>, vector<144x128xbf16>, vector<512x128xf32> -> vector<512x128xf32>
    %c0_3 = arith.constant 0 : index
    %c0_4 = arith.constant 0 : index
    %3 = vector.load %arg3[%c0_3, %c0_4] : memref<1x128xf32, #tpu.memory_space<vmem>>, vector<1x128xf32>
    %4 = vector.broadcast %3 : vector<1x128xf32> to vector<512x128xf32>
    %5 = arith.mulf %2, %4 : vector<512x128xf32>
    %c0_5 = arith.constant 0 : index
    %c0_6 = arith.constant 0 : index
    %6 = vector.load %arg4[%c0_5, %c0_6] : memref<1x128xf32, #tpu.memory_space<vmem>>, vector<1x128xf32>
    %7 = vector.broadcast %6 : vector<1x128xf32> to vector<512x128xf32>
    %8 = arith.addf %5, %7 : vector<512x128xf32>
    %cst_7 = arith.constant 0.000000e+00 : f32
    %9 = vector.broadcast %cst_7 : f32 to vector<512x128xf32>
    %10 = arith.maximumf %8, %9 : vector<512x128xf32>
    %11 = arith.truncf %10 : vector<512x128xf32> to vector<512x128xbf16>
    %c0_8 = arith.constant 0 : index
    %c0_9 = arith.constant 0 : index
    %12 = vector.load %arg5[%c0_8, %c0_9] : memref<512x128xbf16, #tpu.memory_space<vmem>>, vector<512x128xbf16>
    tpu.vector_store %arg5[%c0_8, %c0_9], %11 {strides = array<i32>} : memref<512x128xbf16, #tpu.memory_space<vmem>>, vector<512x128xbf16>,
    return
  }
  func.func @transform_0(%arg0: i32) -> (i32, i32) {
    %c0_i32 = arith.constant 0 : i32
    %c0_i32_0 = arith.constant 0 : i32
    return %arg0, %c0_i32 : i32, i32
  }
  func.func @transform_1(%arg0: i32) -> (i32, i32) {
    %c0_i32 = arith.constant 0 : i32
    %c0_i32_0 = arith.constant 0 : i32
    %c0_i32_1 = arith.constant 0 : i32
    return %c0_i32, %c0_i32_0 : i32, i32
  }
  func.func @transform_2(%arg0: i32) -> (i32, i32) {
    %c0_i32 = arith.constant 0 : i32
    %c0_i32_0 = arith.constant 0 : i32
    %c0_i32_1 = arith.constant 0 : i32
    return %c0_i32, %c0_i32_0 : i32, i32
  }
  func.func @transform_3(%arg0: i32) -> (i32, i32) {
    %c0_i32 = arith.constant 0 : i32
    %c0_i32_0 = arith.constant 0 : i32
    %c0_i32_1 = arith.constant 0 : i32
    return %c0_i32, %c0_i32_0 : i32, i32
  }
  func.func @transform_4(%arg0: i32) -> (i32, i32) {
    %c0_i32 = arith.constant 0 : i32
    %c0_i32_0 = arith.constant 0 : i32
    return %arg0, %c0_i32 : i32, i32
  }
}

module attributes {stable_mosaic.version = 11 : i64} {
  func.func @_conv_bn_add_relu_kernel(%arg0: i32, %arg1: memref<512x144xbf16, #tpu.memory_space<vmem>>, %arg2: memref<144x128xbf16, #tpu.memory_space<vmem>>, %arg3: memref<1x128xf32, #tpu.memory_space<vmem>>, %arg4: memref<1x128xf32, #tpu.memory_space<vmem>>, %arg5: memref<512x128xbf16, #tpu.memory_space<vmem>>, %arg6: memref<512x128xbf16, #tpu.memory_space<vmem>>) attributes {dimension_semantics = [#tpu.dimension_semantics<parallel>], iteration_bounds = array<i64: 4>, scalar_prefetch = 0 : i64, scratch_operands = 0 : i64, tpu.core_type = #tpu.core_type<tc>, window_params = [{transform_indices = @transform_0, window_bounds = array<i64: 512, 144>}, {pipeline_mode = #tpu.pipeline_mode<synchronous>, transform_indices = @transform_1, window_bounds = array<i64: 144, 128>}, {pipeline_mode = #tpu.pipeline_mode<synchronous>, transform_indices = @transform_2, window_bounds = array<i64: 1, 128>}, {pipeline_mode = #tpu.pipeline_mode<synchronous>, transform_indices = @transform_3, window_bounds = array<i64: 1, 128>}, {transform_indices = @transform_4, window_bounds = array<i64: 512, 128>}, {transform_indices = @transform_5, window_bounds = array<i64: 512, 128>}]} {
    %c0 = arith.constant 0 : index
    %c0_0 = arith.constant 0 : index
    %0 = vector.load %arg1[%c0, %c0_0] : memref<512x144xbf16, #tpu.memory_space<vmem>>, vector<512x144xbf16>
    %c0_1 = arith.constant 0 : index
    %c0_2 = arith.constant 0 : index
    %1 = vector.load %arg2[%c0_1, %c0_2] : memref<144x128xbf16, #tpu.memory_space<vmem>>, vector<144x128xbf16>
    %cst = arith.constant dense<0.000000e+00> : vector<512x128xf32>
    %2 = tpu.matmul %0, %1, %cst {dimension_numbers = #tpu.dot_dimension_numbers<[1], [0], [0], [1], [0, 0, 1, 1], [], []>} : vector<512x144xbf16>, vector<144x128xbf16>, vector<512x128xf32> -> vector<512x128xf32>
    %c0_3 = arith.constant 0 : index
    %c0_4 = arith.constant 0 : index
    %3 = vector.load %arg3[%c0_3, %c0_4] : memref<1x128xf32, #tpu.memory_space<vmem>>, vector<1x128xf32>
    %4 = vector.broadcast %3 : vector<1x128xf32> to vector<512x128xf32>
    %5 = arith.mulf %2, %4 : vector<512x128xf32>
    %c0_5 = arith.constant 0 : index
    %c0_6 = arith.constant 0 : index
    %6 = vector.load %arg4[%c0_5, %c0_6] : memref<1x128xf32, #tpu.memory_space<vmem>>, vector<1x128xf32>
    %7 = vector.broadcast %6 : vector<1x128xf32> to vector<512x128xf32>
    %8 = arith.addf %5, %7 : vector<512x128xf32>
    %c0_7 = arith.constant 0 : index
    %c0_8 = arith.constant 0 : index
    %9 = vector.load %arg5[%c0_7, %c0_8] : memref<512x128xbf16, #tpu.memory_space<vmem>>, vector<512x128xbf16>
    %10 = arith.extf %9 : vector<512x128xbf16> to vector<512x128xf32>
    %11 = arith.addf %8, %10 : vector<512x128xf32>
    %cst_9 = arith.constant 0.000000e+00 : f32
    %12 = vector.broadcast %cst_9 : f32 to vector<512x128xf32>
    %13 = arith.maximumf %11, %12 : vector<512x128xf32>
    %14 = arith.truncf %13 : vector<512x128xf32> to vector<512x128xbf16>
    %c0_10 = arith.constant 0 : index
    %c0_11 = arith.constant 0 : index
    %15 = vector.load %arg6[%c0_10, %c0_11] : memref<512x128xbf16, #tpu.memory_space<vmem>>, vector<512x128xbf16>
    tpu.vector_store %arg6[%c0_10, %c0_11], %14 {strides = array<i32>} : memref<512x128xbf16, #tpu.memory_space<vmem>>, vector<512x128xbf16>,
    return
  }
  func.func @transform_0(%arg0: i32) -> (i32, i32) {
    %c0_i32 = arith.constant 0 : i32
    %c0_i32_0 = arith.constant 0 : i32
    return %arg0, %c0_i32 : i32, i32
  }
  func.func @transform_1(%arg0: i32) -> (i32, i32) {
    %c0_i32 = arith.constant 0 : i32
    %c0_i32_0 = arith.constant 0 : i32
    %c0_i32_1 = arith.constant 0 : i32
    return %c0_i32, %c0_i32_0 : i32, i32
  }
  func.func @transform_2(%arg0: i32) -> (i32, i32) {
    %c0_i32 = arith.constant 0 : i32
    %c0_i32_0 = arith.constant 0 : i32
    %c0_i32_1 = arith.constant 0 : i32
    return %c0_i32, %c0_i32_0 : i32, i32
  }
  func.func @transform_3(%arg0: i32) -> (i32, i32) {
    %c0_i32 = arith.constant 0 : i32
    %c0_i32_0 = arith.constant 0 : i32
    %c0_i32_1 = arith.constant 0 : i32
    return %c0_i32, %c0_i32_0 : i32, i32
  }
  func.func @transform_4(%arg0: i32) -> (i32, i32) {
    %c0_i32 = arith.constant 0 : i32
    %c0_i32_0 = arith.constant 0 : i32
    return %arg0, %c0_i32 : i32, i32
  }
  func.func @transform_5(%arg0: i32) -> (i32, i32) {
    %c0_i32 = arith.constant 0 : i32
    %c0_i32_0 = arith.constant 0 : i32
    return %arg0, %c0_i32 : i32, i32
  }
}

module attributes {stable_mosaic.version = 11 : i64} {
  func.func @_conv_bn_kernel(%arg0: i32, %arg1: memref<512x16xbf16, #tpu.memory_space<vmem>>, %arg2: memref<16x128xbf16, #tpu.memory_space<vmem>>, %arg3: memref<1x128xf32, #tpu.memory_space<vmem>>, %arg4: memref<1x128xf32, #tpu.memory_space<vmem>>, %arg5: memref<512x128xbf16, #tpu.memory_space<vmem>>) attributes {dimension_semantics = [#tpu.dimension_semantics<parallel>], iteration_bounds = array<i64: 1>, scalar_prefetch = 0 : i64, scratch_operands = 0 : i64, tpu.core_type = #tpu.core_type<tc>, window_params = [{transform_indices = @transform_0, window_bounds = array<i64: 512, 16>}, {pipeline_mode = #tpu.pipeline_mode<synchronous>, transform_indices = @transform_1, window_bounds = array<i64: 16, 128>}, {pipeline_mode = #tpu.pipeline_mode<synchronous>, transform_indices = @transform_2, window_bounds = array<i64: 1, 128>}, {pipeline_mode = #tpu.pipeline_mode<synchronous>, transform_indices = @transform_3, window_bounds = array<i64: 1, 128>}, {transform_indices = @transform_4, window_bounds = array<i64: 512, 128>}]} {
    %c0 = arith.constant 0 : index
    %c0_0 = arith.constant 0 : index
    %0 = vector.load %arg1[%c0, %c0_0] : memref<512x16xbf16, #tpu.memory_space<vmem>>, vector<512x16xbf16>
    %c0_1 = arith.constant 0 : index
    %c0_2 = arith.constant 0 : index
    %1 = vector.load %arg2[%c0_1, %c0_2] : memref<16x128xbf16, #tpu.memory_space<vmem>>, vector<16x128xbf16>
    %cst = arith.constant dense<0.000000e+00> : vector<512x128xf32>
    %2 = tpu.matmul %0, %1, %cst {dimension_numbers = #tpu.dot_dimension_numbers<[1], [0], [0], [1], [0, 0, 1, 1], [], []>} : vector<512x16xbf16>, vector<16x128xbf16>, vector<512x128xf32> -> vector<512x128xf32>
    %c0_3 = arith.constant 0 : index
    %c0_4 = arith.constant 0 : index
    %3 = vector.load %arg3[%c0_3, %c0_4] : memref<1x128xf32, #tpu.memory_space<vmem>>, vector<1x128xf32>
    %4 = vector.broadcast %3 : vector<1x128xf32> to vector<512x128xf32>
    %5 = arith.mulf %2, %4 : vector<512x128xf32>
    %c0_5 = arith.constant 0 : index
    %c0_6 = arith.constant 0 : index
    %6 = vector.load %arg4[%c0_5, %c0_6] : memref<1x128xf32, #tpu.memory_space<vmem>>, vector<1x128xf32>
    %7 = vector.broadcast %6 : vector<1x128xf32> to vector<512x128xf32>
    %8 = arith.addf %5, %7 : vector<512x128xf32>
    %9 = arith.truncf %8 : vector<512x128xf32> to vector<512x128xbf16>
    %c0_7 = arith.constant 0 : index
    %c0_8 = arith.constant 0 : index
    %10 = vector.load %arg5[%c0_7, %c0_8] : memref<512x128xbf16, #tpu.memory_space<vmem>>, vector<512x128xbf16>
    tpu.vector_store %arg5[%c0_7, %c0_8], %9 {strides = array<i32>} : memref<512x128xbf16, #tpu.memory_space<vmem>>, vector<512x128xbf16>,
    return
  }
  func.func @transform_0(%arg0: i32) -> (i32, i32) {
    %c0_i32 = arith.constant 0 : i32
    %c0_i32_0 = arith.constant 0 : i32
    return %arg0, %c0_i32 : i32, i32
  }
  func.func @transform_1(%arg0: i32) -> (i32, i32) {
    %c0_i32 = arith.constant 0 : i32
    %c0_i32_0 = arith.constant 0 : i32
    %c0_i32_1 = arith.constant 0 : i32
    return %c0_i32, %c0_i32_0 : i32, i32
  }
  func.func @transform_2(%arg0: i32) -> (i32, i32) {
    %c0_i32 = arith.constant 0 : i32
    %c0_i32_0 = arith.constant 0 : i32
    %c0_i32_1 = arith.constant 0 : i32
    return %c0_i32, %c0_i32_0 : i32, i32
  }
  func.func @transform_3(%arg0: i32) -> (i32, i32) {
    %c0_i32 = arith.constant 0 : i32
    %c0_i32_0 = arith.constant 0 : i32
    %c0_i32_1 = arith.constant 0 : i32
    return %c0_i32, %c0_i32_0 : i32, i32
  }
  func.func @transform_4(%arg0: i32) -> (i32, i32) {
    %c0_i32 = arith.constant 0 : i32
    %c0_i32_0 = arith.constant 0 : i32
    return %arg0, %c0_i32 : i32, i32
  }
}

module attributes {stable_mosaic.version = 11 : i64} {
  func.func @_conv_bn_kernel(%arg0: i32, %arg1: memref<512x144xbf16, #tpu.memory_space<vmem>>, %arg2: memref<144x128xbf16, #tpu.memory_space<vmem>>, %arg3: memref<1x128xf32, #tpu.memory_space<vmem>>, %arg4: memref<1x128xf32, #tpu.memory_space<vmem>>, %arg5: memref<512x128xbf16, #tpu.memory_space<vmem>>) attributes {dimension_semantics = [#tpu.dimension_semantics<parallel>], iteration_bounds = array<i64: 1>, scalar_prefetch = 0 : i64, scratch_operands = 0 : i64, tpu.core_type = #tpu.core_type<tc>, window_params = [{transform_indices = @transform_0, window_bounds = array<i64: 512, 144>}, {pipeline_mode = #tpu.pipeline_mode<synchronous>, transform_indices = @transform_1, window_bounds = array<i64: 144, 128>}, {pipeline_mode = #tpu.pipeline_mode<synchronous>, transform_indices = @transform_2, window_bounds = array<i64: 1, 128>}, {pipeline_mode = #tpu.pipeline_mode<synchronous>, transform_indices = @transform_3, window_bounds = array<i64: 1, 128>}, {transform_indices = @transform_4, window_bounds = array<i64: 512, 128>}]} {
    %c0 = arith.constant 0 : index
    %c0_0 = arith.constant 0 : index
    %0 = vector.load %arg1[%c0, %c0_0] : memref<512x144xbf16, #tpu.memory_space<vmem>>, vector<512x144xbf16>
    %c0_1 = arith.constant 0 : index
    %c0_2 = arith.constant 0 : index
    %1 = vector.load %arg2[%c0_1, %c0_2] : memref<144x128xbf16, #tpu.memory_space<vmem>>, vector<144x128xbf16>
    %cst = arith.constant dense<0.000000e+00> : vector<512x128xf32>
    %2 = tpu.matmul %0, %1, %cst {dimension_numbers = #tpu.dot_dimension_numbers<[1], [0], [0], [1], [0, 0, 1, 1], [], []>} : vector<512x144xbf16>, vector<144x128xbf16>, vector<512x128xf32> -> vector<512x128xf32>
    %c0_3 = arith.constant 0 : index
    %c0_4 = arith.constant 0 : index
    %3 = vector.load %arg3[%c0_3, %c0_4] : memref<1x128xf32, #tpu.memory_space<vmem>>, vector<1x128xf32>
    %4 = vector.broadcast %3 : vector<1x128xf32> to vector<512x128xf32>
    %5 = arith.mulf %2, %4 : vector<512x128xf32>
    %c0_5 = arith.constant 0 : index
    %c0_6 = arith.constant 0 : index
    %6 = vector.load %arg4[%c0_5, %c0_6] : memref<1x128xf32, #tpu.memory_space<vmem>>, vector<1x128xf32>
    %7 = vector.broadcast %6 : vector<1x128xf32> to vector<512x128xf32>
    %8 = arith.addf %5, %7 : vector<512x128xf32>
    %cst_7 = arith.constant 0.000000e+00 : f32
    %9 = vector.broadcast %cst_7 : f32 to vector<512x128xf32>
    %10 = arith.maximumf %8, %9 : vector<512x128xf32>
    %11 = arith.truncf %10 : vector<512x128xf32> to vector<512x128xbf16>
    %c0_8 = arith.constant 0 : index
    %c0_9 = arith.constant 0 : index
    %12 = vector.load %arg5[%c0_8, %c0_9] : memref<512x128xbf16, #tpu.memory_space<vmem>>, vector<512x128xbf16>
    tpu.vector_store %arg5[%c0_8, %c0_9], %11 {strides = array<i32>} : memref<512x128xbf16, #tpu.memory_space<vmem>>, vector<512x128xbf16>,
    return
  }
  func.func @transform_0(%arg0: i32) -> (i32, i32) {
    %c0_i32 = arith.constant 0 : i32
    %c0_i32_0 = arith.constant 0 : i32
    return %arg0, %c0_i32 : i32, i32
  }
  func.func @transform_1(%arg0: i32) -> (i32, i32) {
    %c0_i32 = arith.constant 0 : i32
    %c0_i32_0 = arith.constant 0 : i32
    %c0_i32_1 = arith.constant 0 : i32
    return %c0_i32, %c0_i32_0 : i32, i32
  }
  func.func @transform_2(%arg0: i32) -> (i32, i32) {
    %c0_i32 = arith.constant 0 : i32
    %c0_i32_0 = arith.constant 0 : i32
    %c0_i32_1 = arith.constant 0 : i32
    return %c0_i32, %c0_i32_0 : i32, i32
  }
  func.func @transform_3(%arg0: i32) -> (i32, i32) {
    %c0_i32 = arith.constant 0 : i32
    %c0_i32_0 = arith.constant 0 : i32
    %c0_i32_1 = arith.constant 0 : i32
    return %c0_i32, %c0_i32_0 : i32, i32
  }
  func.func @transform_4(%arg0: i32) -> (i32, i32) {
    %c0_i32 = arith.constant 0 : i32
    %c0_i32_0 = arith.constant 0 : i32
    return %arg0, %c0_i32 : i32, i32
  }
}

module attributes {stable_mosaic.version = 11 : i64} {
  func.func @_conv_bn_add_relu_kernel(%arg0: i32, %arg1: memref<512x288xbf16, #tpu.memory_space<vmem>>, %arg2: memref<288x128xbf16, #tpu.memory_space<vmem>>, %arg3: memref<1x128xf32, #tpu.memory_space<vmem>>, %arg4: memref<1x128xf32, #tpu.memory_space<vmem>>, %arg5: memref<512x128xbf16, #tpu.memory_space<vmem>>, %arg6: memref<512x128xbf16, #tpu.memory_space<vmem>>) attributes {dimension_semantics = [#tpu.dimension_semantics<parallel>], iteration_bounds = array<i64: 1>, scalar_prefetch = 0 : i64, scratch_operands = 0 : i64, tpu.core_type = #tpu.core_type<tc>, window_params = [{transform_indices = @transform_0, window_bounds = array<i64: 512, 288>}, {pipeline_mode = #tpu.pipeline_mode<synchronous>, transform_indices = @transform_1, window_bounds = array<i64: 288, 128>}, {pipeline_mode = #tpu.pipeline_mode<synchronous>, transform_indices = @transform_2, window_bounds = array<i64: 1, 128>}, {pipeline_mode = #tpu.pipeline_mode<synchronous>, transform_indices = @transform_3, window_bounds = array<i64: 1, 128>}, {transform_indices = @transform_4, window_bounds = array<i64: 512, 128>}, {transform_indices = @transform_5, window_bounds = array<i64: 512, 128>}]} {
    %c0 = arith.constant 0 : index
    %c0_0 = arith.constant 0 : index
    %0 = vector.load %arg1[%c0, %c0_0] : memref<512x288xbf16, #tpu.memory_space<vmem>>, vector<512x288xbf16>
    %c0_1 = arith.constant 0 : index
    %c0_2 = arith.constant 0 : index
    %1 = vector.load %arg2[%c0_1, %c0_2] : memref<288x128xbf16, #tpu.memory_space<vmem>>, vector<288x128xbf16>
    %cst = arith.constant dense<0.000000e+00> : vector<512x128xf32>
    %2 = tpu.matmul %0, %1, %cst {dimension_numbers = #tpu.dot_dimension_numbers<[1], [0], [0], [1], [0, 0, 1, 1], [], []>} : vector<512x288xbf16>, vector<288x128xbf16>, vector<512x128xf32> -> vector<512x128xf32>
    %c0_3 = arith.constant 0 : index
    %c0_4 = arith.constant 0 : index
    %3 = vector.load %arg3[%c0_3, %c0_4] : memref<1x128xf32, #tpu.memory_space<vmem>>, vector<1x128xf32>
    %4 = vector.broadcast %3 : vector<1x128xf32> to vector<512x128xf32>
    %5 = arith.mulf %2, %4 : vector<512x128xf32>
    %c0_5 = arith.constant 0 : index
    %c0_6 = arith.constant 0 : index
    %6 = vector.load %arg4[%c0_5, %c0_6] : memref<1x128xf32, #tpu.memory_space<vmem>>, vector<1x128xf32>
    %7 = vector.broadcast %6 : vector<1x128xf32> to vector<512x128xf32>
    %8 = arith.addf %5, %7 : vector<512x128xf32>
    %c0_7 = arith.constant 0 : index
    %c0_8 = arith.constant 0 : index
    %9 = vector.load %arg5[%c0_7, %c0_8] : memref<512x128xbf16, #tpu.memory_space<vmem>>, vector<512x128xbf16>
    %10 = arith.extf %9 : vector<512x128xbf16> to vector<512x128xf32>
    %11 = arith.addf %8, %10 : vector<512x128xf32>
    %cst_9 = arith.constant 0.000000e+00 : f32
    %12 = vector.broadcast %cst_9 : f32 to vector<512x128xf32>
    %13 = arith.maximumf %11, %12 : vector<512x128xf32>
    %14 = arith.truncf %13 : vector<512x128xf32> to vector<512x128xbf16>
    %c0_10 = arith.constant 0 : index
    %c0_11 = arith.constant 0 : index
    %15 = vector.load %arg6[%c0_10, %c0_11] : memref<512x128xbf16, #tpu.memory_space<vmem>>, vector<512x128xbf16>
    tpu.vector_store %arg6[%c0_10, %c0_11], %14 {strides = array<i32>} : memref<512x128xbf16, #tpu.memory_space<vmem>>, vector<512x128xbf16>,
    return
  }
  func.func @transform_0(%arg0: i32) -> (i32, i32) {
    %c0_i32 = arith.constant 0 : i32
    %c0_i32_0 = arith.constant 0 : i32
    return %arg0, %c0_i32 : i32, i32
  }
  func.func @transform_1(%arg0: i32) -> (i32, i32) {
    %c0_i32 = arith.constant 0 : i32
    %c0_i32_0 = arith.constant 0 : i32
    %c0_i32_1 = arith.constant 0 : i32
    return %c0_i32, %c0_i32_0 : i32, i32
  }
  func.func @transform_2(%arg0: i32) -> (i32, i32) {
    %c0_i32 = arith.constant 0 : i32
    %c0_i32_0 = arith.constant 0 : i32
    %c0_i32_1 = arith.constant 0 : i32
    return %c0_i32, %c0_i32_0 : i32, i32
  }
  func.func @transform_3(%arg0: i32) -> (i32, i32) {
    %c0_i32 = arith.constant 0 : i32
    %c0_i32_0 = arith.constant 0 : i32
    %c0_i32_1 = arith.constant 0 : i32
    return %c0_i32, %c0_i32_0 : i32, i32
  }
  func.func @transform_4(%arg0: i32) -> (i32, i32) {
    %c0_i32 = arith.constant 0 : i32
    %c0_i32_0 = arith.constant 0 : i32
    return %arg0, %c0_i32 : i32, i32
  }
  func.func @transform_5(%arg0: i32) -> (i32, i32) {
    %c0_i32 = arith.constant 0 : i32
    %c0_i32_0 = arith.constant 0 : i32
    return %arg0, %c0_i32 : i32, i32
  }
}

module attributes {stable_mosaic.version = 11 : i64} {
  func.func @_conv_bn_kernel(%arg0: i32, %arg1: memref<128x32xbf16, #tpu.memory_space<vmem>>, %arg2: memref<32x128xbf16, #tpu.memory_space<vmem>>, %arg3: memref<1x128xf32, #tpu.memory_space<vmem>>, %arg4: memref<1x128xf32, #tpu.memory_space<vmem>>, %arg5: memref<128x128xbf16, #tpu.memory_space<vmem>>) attributes {dimension_semantics = [#tpu.dimension_semantics<parallel>], iteration_bounds = array<i64: 1>, scalar_prefetch = 0 : i64, scratch_operands = 0 : i64, tpu.core_type = #tpu.core_type<tc>, window_params = [{transform_indices = @transform_0, window_bounds = array<i64: 128, 32>}, {pipeline_mode = #tpu.pipeline_mode<synchronous>, transform_indices = @transform_1, window_bounds = array<i64: 32, 128>}, {pipeline_mode = #tpu.pipeline_mode<synchronous>, transform_indices = @transform_2, window_bounds = array<i64: 1, 128>}, {pipeline_mode = #tpu.pipeline_mode<synchronous>, transform_indices = @transform_3, window_bounds = array<i64: 1, 128>}, {transform_indices = @transform_4, window_bounds = array<i64: 128, 128>}]} {
    %c0 = arith.constant 0 : index
    %c0_0 = arith.constant 0 : index
    %0 = vector.load %arg1[%c0, %c0_0] : memref<128x32xbf16, #tpu.memory_space<vmem>>, vector<128x32xbf16>
    %c0_1 = arith.constant 0 : index
    %c0_2 = arith.constant 0 : index
    %1 = vector.load %arg2[%c0_1, %c0_2] : memref<32x128xbf16, #tpu.memory_space<vmem>>, vector<32x128xbf16>
    %cst = arith.constant dense<0.000000e+00> : vector<128x128xf32>
    %2 = tpu.matmul %0, %1, %cst {dimension_numbers = #tpu.dot_dimension_numbers<[1], [0], [0], [1], [0, 0, 1, 1], [], []>} : vector<128x32xbf16>, vector<32x128xbf16>, vector<128x128xf32> -> vector<128x128xf32>
    %c0_3 = arith.constant 0 : index
    %c0_4 = arith.constant 0 : index
    %3 = vector.load %arg3[%c0_3, %c0_4] : memref<1x128xf32, #tpu.memory_space<vmem>>, vector<1x128xf32>
    %4 = vector.broadcast %3 : vector<1x128xf32> to vector<128x128xf32>
    %5 = arith.mulf %2, %4 : vector<128x128xf32>
    %c0_5 = arith.constant 0 : index
    %c0_6 = arith.constant 0 : index
    %6 = vector.load %arg4[%c0_5, %c0_6] : memref<1x128xf32, #tpu.memory_space<vmem>>, vector<1x128xf32>
    %7 = vector.broadcast %6 : vector<1x128xf32> to vector<128x128xf32>
    %8 = arith.addf %5, %7 : vector<128x128xf32>
    %9 = arith.truncf %8 : vector<128x128xf32> to vector<128x128xbf16>
    %c0_7 = arith.constant 0 : index
    %c0_8 = arith.constant 0 : index
    %10 = vector.load %arg5[%c0_7, %c0_8] : memref<128x128xbf16, #tpu.memory_space<vmem>>, vector<128x128xbf16>
    tpu.vector_store %arg5[%c0_7, %c0_8], %9 {strides = array<i32>} : memref<128x128xbf16, #tpu.memory_space<vmem>>, vector<128x128xbf16>,
    return
  }
  func.func @transform_0(%arg0: i32) -> (i32, i32) {
    %c0_i32 = arith.constant 0 : i32
    %c0_i32_0 = arith.constant 0 : i32
    return %arg0, %c0_i32 : i32, i32
  }
  func.func @transform_1(%arg0: i32) -> (i32, i32) {
    %c0_i32 = arith.constant 0 : i32
    %c0_i32_0 = arith.constant 0 : i32
    %c0_i32_1 = arith.constant 0 : i32
    return %c0_i32, %c0_i32_0 : i32, i32
  }
  func.func @transform_2(%arg0: i32) -> (i32, i32) {
    %c0_i32 = arith.constant 0 : i32
    %c0_i32_0 = arith.constant 0 : i32
    %c0_i32_1 = arith.constant 0 : i32
    return %c0_i32, %c0_i32_0 : i32, i32
  }
  func.func @transform_3(%arg0: i32) -> (i32, i32) {
    %c0_i32 = arith.constant 0 : i32
    %c0_i32_0 = arith.constant 0 : i32
    %c0_i32_1 = arith.constant 0 : i32
    return %c0_i32, %c0_i32_0 : i32, i32
  }
  func.func @transform_4(%arg0: i32) -> (i32, i32) {
    %c0_i32 = arith.constant 0 : i32
    %c0_i32_0 = arith.constant 0 : i32
    return %arg0, %c0_i32 : i32, i32
  }
}

module attributes {stable_mosaic.version = 11 : i64} {
  func.func @_conv_bn_kernel(%arg0: i32, %arg1: memref<128x288xbf16, #tpu.memory_space<vmem>>, %arg2: memref<288x128xbf16, #tpu.memory_space<vmem>>, %arg3: memref<1x128xf32, #tpu.memory_space<vmem>>, %arg4: memref<1x128xf32, #tpu.memory_space<vmem>>, %arg5: memref<128x128xbf16, #tpu.memory_space<vmem>>) attributes {dimension_semantics = [#tpu.dimension_semantics<parallel>], iteration_bounds = array<i64: 1>, scalar_prefetch = 0 : i64, scratch_operands = 0 : i64, tpu.core_type = #tpu.core_type<tc>, window_params = [{transform_indices = @transform_0, window_bounds = array<i64: 128, 288>}, {pipeline_mode = #tpu.pipeline_mode<synchronous>, transform_indices = @transform_1, window_bounds = array<i64: 288, 128>}, {pipeline_mode = #tpu.pipeline_mode<synchronous>, transform_indices = @transform_2, window_bounds = array<i64: 1, 128>}, {pipeline_mode = #tpu.pipeline_mode<synchronous>, transform_indices = @transform_3, window_bounds = array<i64: 1, 128>}, {transform_indices = @transform_4, window_bounds = array<i64: 128, 128>}]} {
    %c0 = arith.constant 0 : index
    %c0_0 = arith.constant 0 : index
    %0 = vector.load %arg1[%c0, %c0_0] : memref<128x288xbf16, #tpu.memory_space<vmem>>, vector<128x288xbf16>
    %c0_1 = arith.constant 0 : index
    %c0_2 = arith.constant 0 : index
    %1 = vector.load %arg2[%c0_1, %c0_2] : memref<288x128xbf16, #tpu.memory_space<vmem>>, vector<288x128xbf16>
    %cst = arith.constant dense<0.000000e+00> : vector<128x128xf32>
    %2 = tpu.matmul %0, %1, %cst {dimension_numbers = #tpu.dot_dimension_numbers<[1], [0], [0], [1], [0, 0, 1, 1], [], []>} : vector<128x288xbf16>, vector<288x128xbf16>, vector<128x128xf32> -> vector<128x128xf32>
    %c0_3 = arith.constant 0 : index
    %c0_4 = arith.constant 0 : index
    %3 = vector.load %arg3[%c0_3, %c0_4] : memref<1x128xf32, #tpu.memory_space<vmem>>, vector<1x128xf32>
    %4 = vector.broadcast %3 : vector<1x128xf32> to vector<128x128xf32>
    %5 = arith.mulf %2, %4 : vector<128x128xf32>
    %c0_5 = arith.constant 0 : index
    %c0_6 = arith.constant 0 : index
    %6 = vector.load %arg4[%c0_5, %c0_6] : memref<1x128xf32, #tpu.memory_space<vmem>>, vector<1x128xf32>
    %7 = vector.broadcast %6 : vector<1x128xf32> to vector<128x128xf32>
    %8 = arith.addf %5, %7 : vector<128x128xf32>
    %cst_7 = arith.constant 0.000000e+00 : f32
    %9 = vector.broadcast %cst_7 : f32 to vector<128x128xf32>
    %10 = arith.maximumf %8, %9 : vector<128x128xf32>
    %11 = arith.truncf %10 : vector<128x128xf32> to vector<128x128xbf16>
    %c0_8 = arith.constant 0 : index
    %c0_9 = arith.constant 0 : index
    %12 = vector.load %arg5[%c0_8, %c0_9] : memref<128x128xbf16, #tpu.memory_space<vmem>>, vector<128x128xbf16>
    tpu.vector_store %arg5[%c0_8, %c0_9], %11 {strides = array<i32>} : memref<128x128xbf16, #tpu.memory_space<vmem>>, vector<128x128xbf16>,
    return
  }
  func.func @transform_0(%arg0: i32) -> (i32, i32) {
    %c0_i32 = arith.constant 0 : i32
    %c0_i32_0 = arith.constant 0 : i32
    return %arg0, %c0_i32 : i32, i32
  }
  func.func @transform_1(%arg0: i32) -> (i32, i32) {
    %c0_i32 = arith.constant 0 : i32
    %c0_i32_0 = arith.constant 0 : i32
    %c0_i32_1 = arith.constant 0 : i32
    return %c0_i32, %c0_i32_0 : i32, i32
  }
  func.func @transform_2(%arg0: i32) -> (i32, i32) {
    %c0_i32 = arith.constant 0 : i32
    %c0_i32_0 = arith.constant 0 : i32
    %c0_i32_1 = arith.constant 0 : i32
    return %c0_i32, %c0_i32_0 : i32, i32
  }
  func.func @transform_3(%arg0: i32) -> (i32, i32) {
    %c0_i32 = arith.constant 0 : i32
    %c0_i32_0 = arith.constant 0 : i32
    %c0_i32_1 = arith.constant 0 : i32
    return %c0_i32, %c0_i32_0 : i32, i32
  }
  func.func @transform_4(%arg0: i32) -> (i32, i32) {
    %c0_i32 = arith.constant 0 : i32
    %c0_i32_0 = arith.constant 0 : i32
    return %arg0, %c0_i32 : i32, i32
  }
}

module attributes {stable_mosaic.version = 11 : i64} {
  func.func @_conv_bn_add_relu_kernel(%arg0: i32, %arg1: memref<128x576xbf16, #tpu.memory_space<vmem>>, %arg2: memref<576x128xbf16, #tpu.memory_space<vmem>>, %arg3: memref<1x128xf32, #tpu.memory_space<vmem>>, %arg4: memref<1x128xf32, #tpu.memory_space<vmem>>, %arg5: memref<128x128xbf16, #tpu.memory_space<vmem>>, %arg6: memref<128x128xbf16, #tpu.memory_space<vmem>>) attributes {dimension_semantics = [#tpu.dimension_semantics<parallel>], iteration_bounds = array<i64: 1>, scalar_prefetch = 0 : i64, scratch_operands = 0 : i64, tpu.core_type = #tpu.core_type<tc>, window_params = [{transform_indices = @transform_0, window_bounds = array<i64: 128, 576>}, {pipeline_mode = #tpu.pipeline_mode<synchronous>, transform_indices = @transform_1, window_bounds = array<i64: 576, 128>}, {pipeline_mode = #tpu.pipeline_mode<synchronous>, transform_indices = @transform_2, window_bounds = array<i64: 1, 128>}, {pipeline_mode = #tpu.pipeline_mode<synchronous>, transform_indices = @transform_3, window_bounds = array<i64: 1, 128>}, {transform_indices = @transform_4, window_bounds = array<i64: 128, 128>}, {transform_indices = @transform_5, window_bounds = array<i64: 128, 128>}]} {
    %c0 = arith.constant 0 : index
    %c0_0 = arith.constant 0 : index
    %0 = vector.load %arg1[%c0, %c0_0] : memref<128x576xbf16, #tpu.memory_space<vmem>>, vector<128x576xbf16>
    %c0_1 = arith.constant 0 : index
    %c0_2 = arith.constant 0 : index
    %1 = vector.load %arg2[%c0_1, %c0_2] : memref<576x128xbf16, #tpu.memory_space<vmem>>, vector<576x128xbf16>
    %cst = arith.constant dense<0.000000e+00> : vector<128x128xf32>
    %2 = tpu.matmul %0, %1, %cst {dimension_numbers = #tpu.dot_dimension_numbers<[1], [0], [0], [1], [0, 0, 1, 1], [], []>} : vector<128x576xbf16>, vector<576x128xbf16>, vector<128x128xf32> -> vector<128x128xf32>
    %c0_3 = arith.constant 0 : index
    %c0_4 = arith.constant 0 : index
    %3 = vector.load %arg3[%c0_3, %c0_4] : memref<1x128xf32, #tpu.memory_space<vmem>>, vector<1x128xf32>
    %4 = vector.broadcast %3 : vector<1x128xf32> to vector<128x128xf32>
    %5 = arith.mulf %2, %4 : vector<128x128xf32>
    %c0_5 = arith.constant 0 : index
    %c0_6 = arith.constant 0 : index
    %6 = vector.load %arg4[%c0_5, %c0_6] : memref<1x128xf32, #tpu.memory_space<vmem>>, vector<1x128xf32>
    %7 = vector.broadcast %6 : vector<1x128xf32> to vector<128x128xf32>
    %8 = arith.addf %5, %7 : vector<128x128xf32>
    %c0_7 = arith.constant 0 : index
    %c0_8 = arith.constant 0 : index
    %9 = vector.load %arg5[%c0_7, %c0_8] : memref<128x128xbf16, #tpu.memory_space<vmem>>, vector<128x128xbf16>
    %10 = arith.extf %9 : vector<128x128xbf16> to vector<128x128xf32>
    %11 = arith.addf %8, %10 : vector<128x128xf32>
    %cst_9 = arith.constant 0.000000e+00 : f32
    %12 = vector.broadcast %cst_9 : f32 to vector<128x128xf32>
    %13 = arith.maximumf %11, %12 : vector<128x128xf32>
    %14 = arith.truncf %13 : vector<128x128xf32> to vector<128x128xbf16>
    %c0_10 = arith.constant 0 : index
    %c0_11 = arith.constant 0 : index
    %15 = vector.load %arg6[%c0_10, %c0_11] : memref<128x128xbf16, #tpu.memory_space<vmem>>, vector<128x128xbf16>
    tpu.vector_store %arg6[%c0_10, %c0_11], %14 {strides = array<i32>} : memref<128x128xbf16, #tpu.memory_space<vmem>>, vector<128x128xbf16>,
    return
  }
  func.func @transform_0(%arg0: i32) -> (i32, i32) {
    %c0_i32 = arith.constant 0 : i32
    %c0_i32_0 = arith.constant 0 : i32
    return %arg0, %c0_i32 : i32, i32
  }
  func.func @transform_1(%arg0: i32) -> (i32, i32) {
    %c0_i32 = arith.constant 0 : i32
    %c0_i32_0 = arith.constant 0 : i32
    %c0_i32_1 = arith.constant 0 : i32
    return %c0_i32, %c0_i32_0 : i32, i32
  }
  func.func @transform_2(%arg0: i32) -> (i32, i32) {
    %c0_i32 = arith.constant 0 : i32
    %c0_i32_0 = arith.constant 0 : i32
    %c0_i32_1 = arith.constant 0 : i32
    return %c0_i32, %c0_i32_0 : i32, i32
  }
  func.func @transform_3(%arg0: i32) -> (i32, i32) {
    %c0_i32 = arith.constant 0 : i32
    %c0_i32_0 = arith.constant 0 : i32
    %c0_i32_1 = arith.constant 0 : i32
    return %c0_i32, %c0_i32_0 : i32, i32
  }
  func.func @transform_4(%arg0: i32) -> (i32, i32) {
    %c0_i32 = arith.constant 0 : i32
    %c0_i32_0 = arith.constant 0 : i32
    return %arg0, %c0_i32 : i32, i32
  }
  func.func @transform_5(%arg0: i32) -> (i32, i32) {
    %c0_i32 = arith.constant 0 : i32
    %c0_i32_0 = arith.constant 0 : i32
    return %arg0, %c0_i32 : i32, i32
  }
}

module attributes {stable_mosaic.version = 11 : i64} {
  func.func @_head_kernel(%arg0: memref<2x64x128xbf16, #tpu.memory_space<vmem>>, %arg1: memref<128x128xf32, #tpu.memory_space<vmem>>, %arg2: memref<1x128xf32, #tpu.memory_space<vmem>>, %arg3: memref<2x128xf32, #tpu.memory_space<vmem>>) attributes {dimension_semantics = [], scalar_prefetch = 0 : i64, scratch_operands = 0 : i64, tpu.core_type = #tpu.core_type<tc>} {
    %c0 = arith.constant 0 : index
    %c0_0 = arith.constant 0 : index
    %c0_1 = arith.constant 0 : index
    %0 = vector.load %arg0[%c0, %c0_0, %c0_1] : memref<2x64x128xbf16, #tpu.memory_space<vmem>>, vector<2x64x128xbf16>
    %1 = arith.extf %0 : vector<2x64x128xbf16> to vector<2x64x128xf32>
    %cst = arith.constant dense<0.000000e+00> : vector<2x128xf32>
    %2 = vector.multi_reduction <add>, %1, %cst [1] : vector<2x64x128xf32> to vector<2x128xf32>
    %cst_2 = arith.constant 6.400000e+01 : f32
    %3 = vector.broadcast %cst_2 : f32 to vector<2x128xf32>
    %4 = arith.divf %2, %3 : vector<2x128xf32>
    %c0_3 = arith.constant 0 : index
    %c0_4 = arith.constant 0 : index
    %5 = vector.load %arg1[%c0_3, %c0_4] : memref<128x128xf32, #tpu.memory_space<vmem>>, vector<128x128xf32>
    %cst_5 = arith.constant dense<0.000000e+00> : vector<2x128xf32>
    %6 = tpu.matmul %4, %5, %cst_5 {dimension_numbers = #tpu.dot_dimension_numbers<[1], [0], [0], [1], [0, 0, 1, 1], [], []>} : vector<2x128xf32>, vector<128x128xf32>, vector<2x128xf32> -> vector<2x128xf32>
    %c0_6 = arith.constant 0 : index
    %c0_7 = arith.constant 0 : index
    %7 = vector.load %arg2[%c0_6, %c0_7] : memref<1x128xf32, #tpu.memory_space<vmem>>, vector<1x128xf32>
    %8 = vector.broadcast %7 : vector<1x128xf32> to vector<2x128xf32>
    %9 = arith.addf %6, %8 : vector<2x128xf32>
    %c0_8 = arith.constant 0 : index
    %c0_9 = arith.constant 0 : index
    %10 = vector.load %arg3[%c0_8, %c0_9] : memref<2x128xf32, #tpu.memory_space<vmem>>, vector<2x128xf32>
    tpu.vector_store %arg3[%c0_8, %c0_9], %9 {strides = array<i32>} : memref<2x128xf32, #tpu.memory_space<vmem>>, vector<2x128xf32>,
    return
  }
}

</mosaic_0001>

<bundles_post_ra>
// kernel: _lambda_.10
= control target key start
LH: loop header
LB: loop body
LE: loop exit
PB: predicated region body
PF: predicated region fallthrough
CT: control target
= control target key end

     0   :  { %s1588_s15 = smov 0   ;;  %s1865_s0 = inlined_call_operand.vmem [shape: bf16[2048,72], index: 0, kind: input, shape index: {}]   ;;  %s1866_s1 = inlined_call_operand.vmem [shape: bf16[72,128], index: 1, kind: input, shape index: {}]   ;;  %s1867_s2 = inlined_call_operand.vmem [shape: f32[1,128], index: 2, kind: input, shape index: {}]   ;;  %s1868_s3 = inlined_call_operand.vmem [shape: f32[1,128], index: 3, kind: input, shape index: {}]   ;;  %s1869_s4 = inlined_call_operand.vmem [shape: bf16[2048,128], index: 4, kind: output, shape index: {}]  }
   0x1 LB: > { %s1116_s16 = sadd.s32 4294967295, %s1561_s15   ;;  %p1120_p0 = scmp.ge.s32.totalorder %s1561_s15, 1  ;;  %s1561_s15 = sphi %s1588_s15, %s14_s15  }
   0x2   : > { %p163_p1 = scmp.lt.s32.totalorder %s1561_s15, 5 }
   0x4   : > { %p164_p2 = pnand %p1120_p0, %p163_p1 }
   0x5   : > { %s1121_s19 = sshll.u32 (!%p164_p2), %s1116_s16, 6 }
   0x6   : > { %167 = sbr.rel (%p164_p2) target bundleno = 299 (0x12b), region = 36  ;;  %p190_p3 = scmp.lt.s32.totalorder (!%p164_p2), %s1121_s19, 255 }
   0xb   : > { %v274_v0 = vld [vmem:[%s1866_s1 + $0x20] sm:$0xf]  ;;  %vm559_vm0 = vcmask 1043456   ;;  %v1338_v4 = vld [vmem:[%s1866_s1 + $0x18] sm:$0xff]  ;;  %v1337_v5 = vld [vmem:[%s1866_s1 + $0x10] sm:$0xff]  ;;  %s1871_s19 = smov (!%p190_p3, %s1121_s19), 255 }
   0xc   : > { %v452_v1 = vunpack.c.l.b16 %v274_v0  ;;  %v1336_v6 = vld [vmem:[%s1866_s1 + $0x8] sm:$0xff]  ;;  %s1122_s26 = sshll.u32 %s1871_s19, 2  ;;  %v1335_v7 = vld [vmem:[%s1866_s1] sm:$0xff]  ;;  %vm462_vm1 = vcmask 588800  }
   0xd   : > { %s1619_s5 = scalar_lea.vmem %s1865_s0, %s1122_s26  ;;  %v1688_v42 = vld [vmem:[%s1867_s2] ss:$0 sm:$0xff]  ;;  %s1710_s12 = scalar_lea.vmem %s1869_s4, %s1122_s26 }
   0xe   : > { %v457_v2 = vpack.c.b16 %v452_v1, %v452_v1  ;;  %v1303_v8 = vld [vmem:[%s1619_s5] sm:$0xff]  ;;  %v1304_v12 = vld [vmem:[%s1619_s5 + $0x8] sm:$0xff]  ;;  %v1305_v16 = vld [vmem:[%s1619_s5 + $0x10] sm:$0xff] }
   0xf   : > { %v1311_v9 = vld [vmem:[%s1619_s5 + $0x40] sm:$0xff]  ;;  %v1312_v13 = vld [vmem:[%s1619_s5 + $0x48] sm:$0xff]  ;;  %v1313_v17 = vld [vmem:[%s1619_s5 + $0x50] sm:$0xff] }
  0x10   : > { %v561_v3 = vsel %vm559_vm0, %v457_v2, 0  ;;  %v1319_v10 = vld [vmem:[%s1619_s5 + $0x80] sm:$0xff]  ;;  %v1320_v14 = vld [vmem:[%s1619_s5 + $0x88] sm:$0xff]  ;;  %v1321_v18 = vld [vmem:[%s1619_s5 + $0x90] sm:$0xff] }
  0x11   : > { %566 = vmatpush.bf16.msra.mxu0 %v561_v3  ;;  %1530 = vmatpush.bf16.msra.mxu1 %v561_v3  ;;  %v1327_v11 = vld [vmem:[%s1619_s5 + $0xc0] sm:$0xff]  ;;  %v1328_v15 = vld [vmem:[%s1619_s5 + $0xc8] sm:$0xff]  ;;  %v1329_v19 = vld [vmem:[%s1619_s5 + $0xd0] sm:$0xff] }
  0x12   : > { %1531 = vmatpush.bf16.msra.mxu2 %v561_v3  ;;  %1532 = vmatpush.bf16.msra.mxu3 %v561_v3  ;;  %v1306_v20 = vld [vmem:[%s1619_s5 + $0x18] sm:$0xff]  ;;  %v1307_v24 = vld [vmem:[%s1619_s5 + $0x20] sm:$0xff]  ;;  %v1308_v28 = vld [vmem:[%s1619_s5 + $0x28] sm:$0xff] }
  0x13   : > { %v1314_v21 = vld [vmem:[%s1619_s5 + $0x58] sm:$0xff]  ;;  %v1315_v25 = vld [vmem:[%s1619_s5 + $0x60] sm:$0xff]  ;;  %v1316_v29 = vld [vmem:[%s1619_s5 + $0x68] sm:$0xff] }
  0x14   : > { %v1322_v22 = vld [vmem:[%s1619_s5 + $0x98] sm:$0xff]  ;;  %v1323_v26 = vld [vmem:[%s1619_s5 + $0xa0] sm:$0xff]  ;;  %v1324_v30 = vld [vmem:[%s1619_s5 + $0xa8] sm:$0xff] }
  0x15   : > { %567 = vmatpush.bf16.msra.mxu0 %v1338_v4  ;;  %1533 = vmatpush.bf16.msra.mxu1 %v1338_v4  ;;  %v1330_v23 = vld [vmem:[%s1619_s5 + $0xd8] sm:$0xff]  ;;  %v1331_v27 = vld [vmem:[%s1619_s5 + $0xe0] sm:$0xff]  ;;  %v1332_v31 = vld [vmem:[%s1619_s5 + $0xe8] sm:$0xff] }
  0x16   : > { %1534 = vmatpush.bf16.msra.mxu2 %v1338_v4  ;;  %1535 = vmatpush.bf16.msra.mxu3 %v1338_v4  ;;  %v1309_v32 = vld [vmem:[%s1619_s5 + $0x30] sm:$0xff]  ;;  %v1310_v36 = vld [vmem:[%s1619_s5 + $0x38] sm:$0xff]  ;;  %v1694_v44 = vld [vmem:[%s1868_s3] ss:$0 sm:$0xff] }
  0x17   : > { %v1317_v33 = vld [vmem:[%s1619_s5 + $0x70] sm:$0xff]  ;;  %v1318_v37 = vld [vmem:[%s1619_s5 + $0x78] sm:$0xff] }
  0x18   : > { %v1325_v34 = vld [vmem:[%s1619_s5 + $0xb0] sm:$0xff]  ;;  %v1326_v38 = vld [vmem:[%s1619_s5 + $0xb8] sm:$0xff] }
  0x19   : > { %568 = vmatpush.bf16.msra.mxu0 %v1337_v5  ;;  %1536 = vmatpush.bf16.msra.mxu1 %v1337_v5  ;;  %v1333_v35 = vld [vmem:[%s1619_s5 + $0xf0] sm:$0xff]  ;;  %v1334_v39 = vld [vmem:[%s1619_s5 + $0xf8] sm:$0xff] }
  0x1a   : > { %1537 = vmatpush.bf16.msra.mxu2 %v1337_v5  ;;  %1538 = vmatpush.bf16.msra.mxu3 %v1337_v5 }
  0x1d   : > { %569 = vmatpush.bf16.msra.mxu0 %v1336_v6  ;;  %1539 = vmatpush.bf16.msra.mxu1 %v1336_v6 }
  0x1e   : > { %1540 = vmatpush.bf16.msra.mxu2 %v1336_v6  ;;  %1541 = vmatpush.bf16.msra.mxu3 %v1336_v6 }
  0x21   : > { %570 = vmatpush.bf16.msra.mxu0 %v1335_v7  ;;  %1542 = vmatpush.bf16.msra.mxu1 %v1335_v7 }
  0x22   : > { %1543 = vmatpush.bf16.msra.mxu2 %v1335_v7  ;;  %1544 = vmatpush.bf16.msra.mxu3 %v1335_v7 }
  0x24   : > { %1269 = vmatmul.msk.bf16.vlgmr.msra.gmra.mxu0 %vm462_vm1, %v1303_v8  ;;  %1277 = vmatmul.msk.bf16.vlgmr.msra.gmra.mxu1 %vm462_vm1, %v1311_v9 }
  0x25   : > { %1285 = vmatmul.msk.bf16.vlgmr.msra.gmra.mxu2 %vm462_vm1, %v1319_v10  ;;  %1293 = vmatmul.msk.bf16.vlgmr.msra.gmra.mxu3 %vm462_vm1, %v1327_v11 }
  0x34   : > { %1270 = vmatmul.msk.bf16.gmra.mxu0 %vm462_vm1, %v1304_v12  ;;  %1278 = vmatmul.msk.bf16.gmra.mxu1 %vm462_vm1, %v1312_v13 }
  0x35   : > { %1286 = vmatmul.msk.bf16.gmra.mxu2 %vm462_vm1, %v1320_v14  ;;  %1294 = vmatmul.msk.bf16.gmra.mxu3 %vm462_vm1, %v1328_v15 }
  0x44   : > { %1271 = vmatmul.msk.bf16.gmra.mxu0 %vm462_vm1, %v1305_v16  ;;  %1279 = vmatmul.msk.bf16.gmra.mxu1 %vm462_vm1, %v1313_v17 }
  0x45   : > { %1287 = vmatmul.msk.bf16.gmra.mxu2 %vm462_vm1, %v1321_v18  ;;  %1295 = vmatmul.msk.bf16.gmra.mxu3 %vm462_vm1, %v1329_v19 }
  0x54   : > { %1272 = vmatmul.msk.bf16.gmra.mxu0 %vm462_vm1, %v1306_v20  ;;  %1280 = vmatmul.msk.bf16.gmra.mxu1 %vm462_vm1, %v1314_v21 }
  0x55   : > { %1288 = vmatmul.msk.bf16.gmra.mxu2 %vm462_vm1, %v1322_v22  ;;  %1296 = vmatmul.msk.bf16.gmra.mxu3 %vm462_vm1, %v1330_v23 }
  0x64   : > { %1273 = vmatmul.msk.bf16.gmra.mxu0 %vm462_vm1, %v1307_v24  ;;  %1281 = vmatmul.msk.bf16.gmra.mxu1 %vm462_vm1, %v1315_v25 }
  0x65   : > { %1289 = vmatmul.msk.bf16.gmra.mxu2 %vm462_vm1, %v1323_v26  ;;  %1297 = vmatmul.msk.bf16.gmra.mxu3 %vm462_vm1, %v1331_v27 }
  0x74   : > { %1274 = vmatmul.msk.bf16.gmra.mxu0 %vm462_vm1, %v1308_v28  ;;  %1282 = vmatmul.msk.bf16.gmra.mxu1 %vm462_vm1, %v1316_v29 }
  0x75   : > { %1290 = vmatmul.msk.bf16.gmra.mxu2 %vm462_vm1, %v1324_v30  ;;  %1298 = vmatmul.msk.bf16.gmra.mxu3 %vm462_vm1, %v1332_v31 }
  0x84   : > { %1275 = vmatmul.msk.bf16.gmra.mxu0 %vm462_vm1, %v1309_v32  ;;  %1283 = vmatmul.msk.bf16.gmra.mxu1 %vm462_vm1, %v1317_v33 }
  0x85   : > { %1291 = vmatmul.msk.bf16.gmra.mxu2 %vm462_vm1, %v1325_v34  ;;  %1299 = vmatmul.msk.bf16.gmra.mxu3 %vm462_vm1, %v1333_v35 }
  0x94   : > { %1276 = vmatmul.msk.bf16.gmra.mxu0 %vm462_vm1, %v1310_v36  ;;  %1284 = vmatmul.msk.bf16.gmra.mxu1 %vm462_vm1, %v1318_v37 }
  0x95   : > { %1292 = vmatmul.msk.bf16.gmra.mxu2 %vm462_vm1, %v1326_v38  ;;  %1300 = vmatmul.msk.bf16.gmra.mxu3 %vm462_vm1, %v1334_v39 }
  0xa1   : > { %v572_v40 = vpop.f32.mrf.mxu0  ;;  %v612_v41 = vpop.f32.mrf.mxu1 }
  0xa2   : > { %v736_v43 = vmul.f32 %v1688_v42, %v572_v40  ;;  %v752_v45 = vmul.f32 %v1688_v42, %v612_v41 }
  0xa4   : > { %v804_v50 = vadd.f32 %v1694_v44, %v736_v43  ;;  %v820_v51 = vadd.f32 %v1694_v44, %v752_v45 }
  0xa6   : > { %v868_v58 = vmax.f32 %v804_v50, 0.0  ;;  %v884_v59 = vmax.f32 %v820_v51, 0.0 }
  0xa8   : > { %v652_v46 = vpop.f32.mrf.mxu2  ;;  %v692_v47 = vpop.f32.mrf.mxu3 }
  0xa9   : > { %v574_v48 = vpop.f32.mrf.mxu0  ;;  %v614_v49 = vpop.f32.mrf.mxu1  ;;  %v768_v56 = vmul.f32 %v1688_v42, %v652_v46  ;;  %v784_v57 = vmul.f32 %v1688_v42, %v692_v47 }
  0xaa   : > { %v737_v52 = vmul.f32 %v1688_v42, %v574_v48  ;;  %v753_v53 = vmul.f32 %v1688_v42, %v614_v49 }
  0xab   : > { %v836_v2 = vadd.f32 %v1694_v44, %v768_v56  ;;  %v852_v3 = vadd.f32 %v1694_v44, %v784_v57 }
  0xac   : > { %v805_v54 = vadd.f32 %v1694_v44, %v737_v52  ;;  %v821_v55 = vadd.f32 %v1694_v44, %v753_v53 }
  0xad   : > { %v900_v10 = vmax.f32 %v836_v2, 0.0  ;;  %v916_v11 = vmax.f32 %v852_v3, 0.0 }
  0xae   : > { %v869_v60 = vmax.f32 %v805_v54, 0.0  ;;  %v885_v61 = vmax.f32 %v821_v55, 0.0 }
  0xb0   : > { %v1342_v62 = vpack.c.bf16 %v869_v60, %v868_v58  ;;  %v1382_v63 = vpack.c.bf16 %v885_v61, %v884_v59  ;;  %v654_v0 = vpop.f32.mrf.mxu2  ;;  %v694_v1 = vpop.f32.mrf.mxu3 }
  0xb1   : > { %v769_v4 = vmul.f32 %v1688_v42, %v654_v0  ;;  %v785_v5 = vmul.f32 %v1688_v42, %v694_v1  ;;  %v577_v6 = vpop.f32.mrf.mxu0  ;;  %v617_v7 = vpop.f32.mrf.mxu1 }
  0xb2   : > { %1343 = vst [vmem:[%s1710_s12] sm:$0xff] %v1342_v62   ;;  %v738_v14 = vmul.f32 %v1688_v42, %v577_v6  ;;  %v754_v15 = vmul.f32 %v1688_v42, %v617_v7 }
  0xb3   : > { %1506 = vst [vmem:[%s1710_s12 + $0x40] sm:$0xff] %v1382_v63   ;;  %v837_v8 = vadd.f32 %v1694_v44, %v769_v4  ;;  %v853_v9 = vadd.f32 %v1694_v44, %v785_v5 }
  0xb4   : > { %v806_v22 = vadd.f32 %v1694_v44, %v738_v14  ;;  %v822_v23 = vadd.f32 %v1694_v44, %v754_v15 }
  0xb5   : > { %v901_v12 = vmax.f32 %v837_v8, 0.0  ;;  %v917_v13 = vmax.f32 %v853_v9, 0.0 }
  0xb6   : > { %v870_v30 = vmax.f32 %v806_v22, 0.0  ;;  %v886_v31 = vmax.f32 %v822_v23, 0.0 }
  0xb7   : > { %v1422_v16 = vpack.c.bf16 %v901_v12, %v900_v10  ;;  %v1462_v17 = vpack.c.bf16 %v917_v13, %v916_v11 }
  0xb8   : > { %v657_v18 = vpop.f32.mrf.mxu2  ;;  %v697_v19 = vpop.f32.mrf.mxu3 }
  0xb9   : > { %1514 = vst [vmem:[%s1710_s12 + $0x80] sm:$0xff] %v1422_v16   ;;  %v579_v20 = vpop.f32.mrf.mxu0  ;;  %v619_v21 = vpop.f32.mrf.mxu1  ;;  %v770_v28 = vmul.f32 %v1688_v42, %v657_v18  ;;  %v786_v29 = vmul.f32 %v1688_v42, %v697_v19 }
  0xba   : > { %1522 = vst [vmem:[%s1710_s12 + $0xc0] sm:$0xff] %v1462_v17   ;;  %v739_v24 = vmul.f32 %v1688_v42, %v579_v20  ;;  %v755_v25 = vmul.f32 %v1688_v42, %v619_v21 }
  0xbb   : > { %v838_v38 = vadd.f32 %v1694_v44, %v770_v28  ;;  %v854_v39 = vadd.f32 %v1694_v44, %v786_v29 }
  0xbc   : > { %v807_v26 = vadd.f32 %v1694_v44, %v739_v24  ;;  %v823_v27 = vadd.f32 %v1694_v44, %v755_v25 }
  0xbd   : > { %v902_v48 = vmax.f32 %v838_v38, 0.0  ;;  %v918_v49 = vmax.f32 %v854_v39, 0.0 }
  0xbe   : > { %v871_v32 = vmax.f32 %v807_v26, 0.0  ;;  %v887_v33 = vmax.f32 %v823_v27, 0.0 }
  0xc0   : > { %v1347_v34 = vpack.c.bf16 %v871_v32, %v870_v30  ;;  %v1387_v35 = vpack.c.bf16 %v887_v33, %v886_v31  ;;  %v659_v36 = vpop.f32.mrf.mxu2  ;;  %v699_v37 = vpop.f32.mrf.mxu3 }
  0xc1   : > { %v771_v40 = vmul.f32 %v1688_v42, %v659_v36  ;;  %v787_v41 = vmul.f32 %v1688_v42, %v699_v37  ;;  %v582_v43 = vpop.f32.mrf.mxu0  ;;  %v622_v45 = vpop.f32.mrf.mxu1 }
  0xc2   : > { %1499 = vst [vmem:[%s1710_s12 + $0x8] sm:$0xff] %v1347_v34   ;;  %v740_v52 = vmul.f32 %v1688_v42, %v582_v43  ;;  %v756_v53 = vmul.f32 %v1688_v42, %v622_v45 }
  0xc3   : > { %1507 = vst [vmem:[%s1710_s12 + $0x48] sm:$0xff] %v1387_v35   ;;  %v839_v46 = vadd.f32 %v1694_v44, %v771_v40  ;;  %v855_v47 = vadd.f32 %v1694_v44, %v787_v41 }
  0xc4   : > { %v808_v60 = vadd.f32 %v1694_v44, %v740_v52  ;;  %v824_v61 = vadd.f32 %v1694_v44, %v756_v53 }
  0xc5   : > { %v903_v50 = vmax.f32 %v839_v46, 0.0  ;;  %v919_v51 = vmax.f32 %v855_v47, 0.0 }
  0xc6   : > { %v872_v4 = vmax.f32 %v808_v60, 0.0  ;;  %v888_v5 = vmax.f32 %v824_v61, 0.0 }
  0xc7   : > { %v1427_v54 = vpack.c.bf16 %v903_v50, %v902_v48  ;;  %v1467_v55 = vpack.c.bf16 %v919_v51, %v918_v49 }
  0xc8   : > { %v662_v56 = vpop.f32.mrf.mxu2  ;;  %v702_v57 = vpop.f32.mrf.mxu3 }
  0xc9   : > { %1515 = vst [vmem:[%s1710_s12 + $0x88] sm:$0xff] %v1427_v54   ;;  %v584_v58 = vpop.f32.mrf.mxu0  ;;  %v624_v59 = vpop.f32.mrf.mxu1  ;;  %v772_v2 = vmul.f32 %v1688_v42, %v662_v56  ;;  %v788_v3 = vmul.f32 %v1688_v42, %v702_v57 }
  0xca   : > { %1523 = vst [vmem:[%s1710_s12 + $0xc8] sm:$0xff] %v1467_v55   ;;  %v741_v62 = vmul.f32 %v1688_v42, %v584_v58  ;;  %v757_v63 = vmul.f32 %v1688_v42, %v624_v59 }
  0xcb   : > { %v840_v12 = vadd.f32 %v1694_v44, %v772_v2  ;;  %v856_v13 = vadd.f32 %v1694_v44, %v788_v3 }
  0xcc   : > { %v809_v0 = vadd.f32 %v1694_v44, %v741_v62  ;;  %v825_v1 = vadd.f32 %v1694_v44, %v757_v63 }
  0xcd   : > { %v904_v20 = vmax.f32 %v840_v12, 0.0  ;;  %v920_v21 = vmax.f32 %v856_v13, 0.0 }
  0xce   : > { %v873_v6 = vmax.f32 %v809_v0, 0.0  ;;  %v889_v7 = vmax.f32 %v825_v1, 0.0 }
  0xd0   : > { %v1352_v8 = vpack.c.bf16 %v873_v6, %v872_v4  ;;  %v1392_v9 = vpack.c.bf16 %v889_v7, %v888_v5  ;;  %v664_v10 = vpop.f32.mrf.mxu2  ;;  %v704_v11 = vpop.f32.mrf.mxu3 }
  0xd1   : > { %v773_v14 = vmul.f32 %v1688_v42, %v664_v10  ;;  %v789_v15 = vmul.f32 %v1688_v42, %v704_v11  ;;  %v587_v16 = vpop.f32.mrf.mxu0  ;;  %v627_v17 = vpop.f32.mrf.mxu1 }
  0xd2   : > { %1500 = vst [vmem:[%s1710_s12 + $0x10] sm:$0xff] %v1352_v8   ;;  %v742_v24 = vmul.f32 %v1688_v42, %v587_v16  ;;  %v758_v25 = vmul.f32 %v1688_v42, %v627_v17 }
  0xd3   : > { %1508 = vst [vmem:[%s1710_s12 + $0x50] sm:$0xff] %v1392_v9   ;;  %v841_v18 = vadd.f32 %v1694_v44, %v773_v14  ;;  %v857_v19 = vadd.f32 %v1694_v44, %v789_v15 }
  0xd4   : > { %v810_v32 = vadd.f32 %v1694_v44, %v742_v24  ;;  %v826_v33 = vadd.f32 %v1694_v44, %v758_v25 }
  0xd5   : > { %v905_v22 = vmax.f32 %v841_v18, 0.0  ;;  %v921_v23 = vmax.f32 %v857_v19, 0.0 }
  0xd6   : > { %v874_v40 = vmax.f32 %v810_v32, 0.0  ;;  %v890_v41 = vmax.f32 %v826_v33, 0.0 }
  0xd7   : > { %v1432_v26 = vpack.c.bf16 %v905_v22, %v904_v20  ;;  %v1472_v27 = vpack.c.bf16 %v921_v23, %v920_v21 }
  0xd8   : > { %v667_v28 = vpop.f32.mrf.mxu2  ;;  %v707_v29 = vpop.f32.mrf.mxu3 }
  0xd9   : > { %1516 = vst [vmem:[%s1710_s12 + $0x90] sm:$0xff] %v1432_v26   ;;  %v589_v30 = vpop.f32.mrf.mxu0  ;;  %v629_v31 = vpop.f32.mrf.mxu1  ;;  %v774_v38 = vmul.f32 %v1688_v42, %v667_v28  ;;  %v790_v39 = vmul.f32 %v1688_v42, %v707_v29 }
  0xda   : > { %1524 = vst [vmem:[%s1710_s12 + $0xd0] sm:$0xff] %v1472_v27   ;;  %v743_v34 = vmul.f32 %v1688_v42, %v589_v30  ;;  %v759_v35 = vmul.f32 %v1688_v42, %v629_v31 }
  0xdb   : > { %v842_v50 = vadd.f32 %v1694_v44, %v774_v38  ;;  %v858_v51 = vadd.f32 %v1694_v44, %v790_v39 }
  0xdc   : > { %v811_v36 = vadd.f32 %v1694_v44, %v743_v34  ;;  %v827_v37 = vadd.f32 %v1694_v44, %v759_v35 }
  0xdd   : > { %v906_v58 = vmax.f32 %v842_v50, 0.0  ;;  %v922_v59 = vmax.f32 %v858_v51, 0.0 }
  0xde   : > { %v875_v43 = vmax.f32 %v811_v36, 0.0  ;;  %v891_v45 = vmax.f32 %v827_v37, 0.0 }
  0xe0   : > { %v1357_v46 = vpack.c.bf16 %v875_v43, %v874_v40  ;;  %v1397_v47 = vpack.c.bf16 %v891_v45, %v890_v41  ;;  %v669_v48 = vpop.f32.mrf.mxu2  ;;  %v709_v49 = vpop.f32.mrf.mxu3 }
  0xe1   : > { %v775_v52 = vmul.f32 %v1688_v42, %v669_v48  ;;  %v791_v53 = vmul.f32 %v1688_v42, %v709_v49  ;;  %v592_v54 = vpop.f32.mrf.mxu0  ;;  %v632_v55 = vpop.f32.mrf.mxu1 }
  0xe2   : > { %1501 = vst [vmem:[%s1710_s12 + $0x18] sm:$0xff] %v1357_v46   ;;  %v744_v62 = vmul.f32 %v1688_v42, %v592_v54  ;;  %v760_v63 = vmul.f32 %v1688_v42, %v632_v55 }
  0xe3   : > { %1509 = vst [vmem:[%s1710_s12 + $0x58] sm:$0xff] %v1397_v47   ;;  %v843_v56 = vadd.f32 %v1694_v44, %v775_v52  ;;  %v859_v57 = vadd.f32 %v1694_v44, %v791_v53 }
  0xe4   : > { %v812_v6 = vadd.f32 %v1694_v44, %v744_v62  ;;  %v828_v7 = vadd.f32 %v1694_v44, %v760_v63 }
  0xe5   : > { %v907_v60 = vmax.f32 %v843_v56, 0.0  ;;  %v923_v61 = vmax.f32 %v859_v57, 0.0 }
  0xe6   : > { %v876_v14 = vmax.f32 %v812_v6, 0.0  ;;  %v892_v15 = vmax.f32 %v828_v7, 0.0 }
  0xe7   : > { %v1437_v0 = vpack.c.bf16 %v907_v60, %v906_v58  ;;  %v1477_v1 = vpack.c.bf16 %v923_v61, %v922_v59 }
  0xe8   : > { %v672_v2 = vpop.f32.mrf.mxu2  ;;  %v712_v3 = vpop.f32.mrf.mxu3 }
  0xe9   : > { %1517 = vst [vmem:[%s1710_s12 + $0x98] sm:$0xff] %v1437_v0   ;;  %v594_v4 = vpop.f32.mrf.mxu0  ;;  %v634_v5 = vpop.f32.mrf.mxu1  ;;  %v776_v12 = vmul.f32 %v1688_v42, %v672_v2  ;;  %v792_v13 = vmul.f32 %v1688_v42, %v712_v3 }
  0xea   : > { %1525 = vst [vmem:[%s1710_s12 + $0xd8] sm:$0xff] %v1477_v1   ;;  %v745_v8 = vmul.f32 %v1688_v42, %v594_v4  ;;  %v761_v9 = vmul.f32 %v1688_v42, %v634_v5 }
  0xeb   : > { %v844_v22 = vadd.f32 %v1694_v44, %v776_v12  ;;  %v860_v23 = vadd.f32 %v1694_v44, %v792_v13 }
  0xec   : > { %v813_v10 = vadd.f32 %v1694_v44, %v745_v8  ;;  %v829_v11 = vadd.f32 %v1694_v44, %v761_v9 }
  0xed   : > { %v908_v30 = vmax.f32 %v844_v22, 0.0  ;;  %v924_v31 = vmax.f32 %v860_v23, 0.0 }
  0xee   : > { %v877_v16 = vmax.f32 %v813_v10, 0.0  ;;  %v893_v17 = vmax.f32 %v829_v11, 0.0 }
  0xf0   : > { %v1362_v18 = vpack.c.bf16 %v877_v16, %v876_v14  ;;  %v1402_v19 = vpack.c.bf16 %v893_v17, %v892_v15  ;;  %v674_v20 = vpop.f32.mrf.mxu2  ;;  %v714_v21 = vpop.f32.mrf.mxu3 }
  0xf1   : > { %v777_v24 = vmul.f32 %v1688_v42, %v674_v20  ;;  %v793_v25 = vmul.f32 %v1688_v42, %v714_v21  ;;  %v597_v26 = vpop.f32.mrf.mxu0  ;;  %v637_v27 = vpop.f32.mrf.mxu1 }
  0xf2   : > { %1502 = vst [vmem:[%s1710_s12 + $0x20] sm:$0xff] %v1362_v18   ;;  %v746_v34 = vmul.f32 %v1688_v42, %v597_v26  ;;  %v762_v35 = vmul.f32 %v1688_v42, %v637_v27 }
  0xf3   : > { %1510 = vst [vmem:[%s1710_s12 + $0x60] sm:$0xff] %v1402_v19   ;;  %v845_v28 = vadd.f32 %v1694_v44, %v777_v24  ;;  %v861_v29 = vadd.f32 %v1694_v44, %v793_v25 }
  0xf4   : > { %v814_v43 = vadd.f32 %v1694_v44, %v746_v34  ;;  %v830_v45 = vadd.f32 %v1694_v44, %v762_v35 }
  0xf5   : > { %v909_v32 = vmax.f32 %v845_v28, 0.0  ;;  %v925_v33 = vmax.f32 %v861_v29, 0.0 }
  0xf6   : > { %v878_v52 = vmax.f32 %v814_v43, 0.0  ;;  %v894_v53 = vmax.f32 %v830_v45, 0.0 }
  0xf7   : > { %v1442_v36 = vpack.c.bf16 %v909_v32, %v908_v30  ;;  %v1482_v37 = vpack.c.bf16 %v925_v33, %v924_v31 }
  0xf8   : > { %v677_v38 = vpop.f32.mrf.mxu2  ;;  %v717_v39 = vpop.f32.mrf.mxu3 }
  0xf9   : > { %1518 = vst [vmem:[%s1710_s12 + $0xa0] sm:$0xff] %v1442_v36   ;;  %v599_v40 = vpop.f32.mrf.mxu0  ;;  %v639_v41 = vpop.f32.mrf.mxu1  ;;  %v778_v50 = vmul.f32 %v1688_v42, %v677_v38  ;;  %v794_v51 = vmul.f32 %v1688_v42, %v717_v39 }
  0xfa   : > { %1526 = vst [vmem:[%s1710_s12 + $0xe0] sm:$0xff] %v1482_v37   ;;  %v747_v46 = vmul.f32 %v1688_v42, %v599_v40  ;;  %v763_v47 = vmul.f32 %v1688_v42, %v639_v41 }
  0xfb   : > { %v846_v60 = vadd.f32 %v1694_v44, %v778_v50  ;;  %v862_v61 = vadd.f32 %v1694_v44, %v794_v51 }
  0xfc   : > { %v815_v48 = vadd.f32 %v1694_v44, %v747_v46  ;;  %v831_v49 = vadd.f32 %v1694_v44, %v763_v47 }
  0xfd   : > { %v910_v4 = vmax.f32 %v846_v60, 0.0  ;;  %v926_v5 = vmax.f32 %v862_v61, 0.0 }
  0xfe   : > { %v879_v54 = vmax.f32 %v815_v48, 0.0  ;;  %v895_v55 = vmax.f32 %v831_v49, 0.0 }
 0x100   : > { %v1367_v56 = vpack.c.bf16 %v879_v54, %v878_v52  ;;  %v1407_v57 = vpack.c.bf16 %v895_v55, %v894_v53  ;;  %v679_v58 = vpop.f32.mrf.mxu2  ;;  %v719_v59 = vpop.f32.mrf.mxu3 }
 0x101   : > { %v779_v62 = vmul.f32 %v1688_v42, %v679_v58  ;;  %v795_v63 = vmul.f32 %v1688_v42, %v719_v59  ;;  %v602_v0 = vpop.f32.mrf.mxu0  ;;  %v642_v1 = vpop.f32.mrf.mxu1 }
 0x102   : > { %1503 = vst [vmem:[%s1710_s12 + $0x28] sm:$0xff] %v1367_v56   ;;  %v748_v8 = vmul.f32 %v1688_v42, %v602_v0  ;;  %v764_v9 = vmul.f32 %v1688_v42, %v642_v1 }
 0x103   : > { %1511 = vst [vmem:[%s1710_s12 + $0x68] sm:$0xff] %v1407_v57   ;;  %v847_v2 = vadd.f32 %v1694_v44, %v779_v62  ;;  %v863_v3 = vadd.f32 %v1694_v44, %v795_v63 }
 0x104   : > { %v816_v16 = vadd.f32 %v1694_v44, %v748_v8  ;;  %v832_v17 = vadd.f32 %v1694_v44, %v764_v9 }
 0x105   : > { %v911_v6 = vmax.f32 %v847_v2, 0.0  ;;  %v927_v7 = vmax.f32 %v863_v3, 0.0 }
 0x106   : > { %v880_v24 = vmax.f32 %v816_v16, 0.0  ;;  %v896_v25 = vmax.f32 %v832_v17, 0.0 }
 0x107   : > { %v1447_v10 = vpack.c.bf16 %v911_v6, %v910_v4  ;;  %v1487_v11 = vpack.c.bf16 %v927_v7, %v926_v5 }
 0x108   : > { %v682_v12 = vpop.f32.mrf.mxu2  ;;  %v722_v13 = vpop.f32.mrf.mxu3 }
 0x109   : > { %1519 = vst [vmem:[%s1710_s12 + $0xa8] sm:$0xff] %v1447_v10   ;;  %v604_v14 = vpop.f32.mrf.mxu0  ;;  %v644_v15 = vpop.f32.mrf.mxu1  ;;  %v780_v22 = vmul.f32 %v1688_v42, %v682_v12  ;;  %v796_v23 = vmul.f32 %v1688_v42, %v722_v13 }
 0x10a   : > { %1527 = vst [vmem:[%s1710_s12 + $0xe8] sm:$0xff] %v1487_v11   ;;  %v749_v18 = vmul.f32 %v1688_v42, %v604_v14  ;;  %v765_v19 = vmul.f32 %v1688_v42, %v644_v15 }
 0x10b   : > { %v848_v32 = vadd.f32 %v1694_v44, %v780_v22  ;;  %v864_v33 = vadd.f32 %v1694_v44, %v796_v23 }
 0x10c   : > { %v817_v20 = vadd.f32 %v1694_v44, %v749_v18  ;;  %v833_v21 = vadd.f32 %v1694_v44, %v765_v19 }
 0x10d   : > { %v912_v40 = vmax.f32 %v848_v32, 0.0  ;;  %v928_v41 = vmax.f32 %v864_v33, 0.0 }
 0x10e   : > { %v881_v26 = vmax.f32 %v817_v20, 0.0  ;;  %v897_v27 = vmax.f32 %v833_v21, 0.0 }
 0x110   : > { %v1372_v28 = vpack.c.bf16 %v881_v26, %v880_v24  ;;  %v1412_v29 = vpack.c.bf16 %v897_v27, %v896_v25  ;;  %v684_v30 = vpop.f32.mrf.mxu2  ;;  %v724_v31 = vpop.f32.mrf.mxu3 }
 0x111   : > { %v781_v34 = vmul.f32 %v1688_v42, %v684_v30  ;;  %v797_v35 = vmul.f32 %v1688_v42, %v724_v31  ;;  %v607_v36 = vpop.f32.mrf.mxu0  ;;  %v647_v37 = vpop.f32.mrf.mxu1 }
 0x112   : > { %1504 = vst [vmem:[%s1710_s12 + $0x30] sm:$0xff] %v1372_v28   ;;  %v750_v46 = vmul.f32 %v1688_v42, %v607_v36  ;;  %v766_v47 = vmul.f32 %v1688_v42, %v647_v37 }
 0x113   : > { %1512 = vst [vmem:[%s1710_s12 + $0x70] sm:$0xff] %v1412_v29   ;;  %v849_v38 = vadd.f32 %v1694_v44, %v781_v34  ;;  %v865_v39 = vadd.f32 %v1694_v44, %v797_v35 }
 0x114   : > { %v818_v54 = vadd.f32 %v1694_v44, %v750_v46  ;;  %v834_v55 = vadd.f32 %v1694_v44, %v766_v47 }
 0x115   : > { %v913_v43 = vmax.f32 %v849_v38, 0.0  ;;  %v929_v45 = vmax.f32 %v865_v39, 0.0 }
 0x116   : > { %v882_v62 = vmax.f32 %v818_v54, 0.0  ;;  %v898_v63 = vmax.f32 %v834_v55, 0.0 }
 0x117   : > { %v1452_v48 = vpack.c.bf16 %v913_v43, %v912_v40  ;;  %v1492_v49 = vpack.c.bf16 %v929_v45, %v928_v41 }
 0x118   : > { %v687_v50 = vpop.f32.mrf.mxu2  ;;  %v727_v51 = vpop.f32.mrf.mxu3 }
 0x119   : > { %1520 = vst [vmem:[%s1710_s12 + $0xb0] sm:$0xff] %v1452_v48   ;;  %v609_v52 = vpop.f32.mrf.mxu0  ;;  %v649_v53 = vpop.f32.mrf.mxu1  ;;  %v782_v60 = vmul.f32 %v1688_v42, %v687_v50  ;;  %v798_v61 = vmul.f32 %v1688_v42, %v727_v51 }
 0x11a   : > { %1528 = vst [vmem:[%s1710_s12 + $0xf0] sm:$0xff] %v1492_v49   ;;  %v751_v56 = vmul.f32 %v1688_v42, %v609_v52  ;;  %v767_v57 = vmul.f32 %v1688_v42, %v649_v53 }
 0x11b   : > { %v850_v6 = vadd.f32 %v1694_v44, %v782_v60  ;;  %v866_v7 = vadd.f32 %v1694_v44, %v798_v61 }
 0x11c   : > { %v819_v58 = vadd.f32 %v1694_v44, %v751_v56  ;;  %v835_v59 = vadd.f32 %v1694_v44, %v767_v57 }
 0x11d   : > { %v914_v12 = vmax.f32 %v850_v6, 0.0  ;;  %v930_v13 = vmax.f32 %v866_v7, 0.0 }
 0x11e   : > { %v883_v0 = vmax.f32 %v819_v58, 0.0  ;;  %v899_v1 = vmax.f32 %v835_v59, 0.0 }
 0x120   : > { %v1377_v2 = vpack.c.bf16 %v883_v0, %v882_v62  ;;  %v1417_v3 = vpack.c.bf16 %v899_v1, %v898_v63  ;;  %v689_v4 = vpop.f32.mrf.mxu2  ;;  %v729_v5 = vpop.f32.mrf.mxu3 }
 0x121   : > { %v783_v8 = vmul.f32 %v1688_v42, %v689_v4  ;;  %v799_v9 = vmul.f32 %v1688_v42, %v729_v5 }
 0x122   : > { %1505 = vst [vmem:[%s1710_s12 + $0x38] sm:$0xff] %v1377_v2  }
 0x123   : > { %1513 = vst [vmem:[%s1710_s12 + $0x78] sm:$0xff] %v1417_v3   ;;  %v851_v10 = vadd.f32 %v1694_v44, %v783_v8  ;;  %v867_v11 = vadd.f32 %v1694_v44, %v799_v9 }
 0x125   : > { %v915_v14 = vmax.f32 %v851_v10, 0.0  ;;  %v931_v15 = vmax.f32 %v867_v11, 0.0 }
 0x127   : > { %v1457_v16 = vpack.c.bf16 %v915_v14, %v914_v12  ;;  %v1497_v17 = vpack.c.bf16 %v931_v15, %v930_v13 }
 0x129   : > { %1521 = vst [vmem:[%s1710_s12 + $0xb8] sm:$0xff] %v1457_v16  }
 0x12a   : > { %1529 = vst [vmem:[%s1710_s12 + $0xf8] sm:$0xff] %v1497_v17  }
 0x12b PF: > { %s14_s15 = sadd.s32 1, %s1561_s15  }
 0x12c   : > { %p11_p4 = scmp.ge.s32.totalorder %s14_s15, 6  }
 0x12e   :  { %13 = sbr.rel (!%p11_p4) target bundleno = 1 (0x1), region = 66 }

// kernel: _lambda_.11
= control target key start
LH: loop header
LB: loop body
LE: loop exit
PB: predicated region body
PF: predicated region fallthrough
CT: control target
= control target key end

     0   :  { %s2103_s15 = smov 0   ;;  %s2550_s0 = inlined_call_operand.vmem [shape: bf16[2048,144], index: 0, kind: input, shape index: {}]   ;;  %s2551_s1 = inlined_call_operand.vmem [shape: bf16[144,128], index: 1, kind: input, shape index: {}]   ;;  %s2552_s2 = inlined_call_operand.vmem [shape: f32[1,128], index: 2, kind: input, shape index: {}]   ;;  %s2553_s3 = inlined_call_operand.vmem [shape: f32[1,128], index: 3, kind: input, shape index: {}]   ;;  %s2554_s4 = inlined_call_operand.vmem [shape: bf16[2048,128], index: 4, kind: output, shape index: {}]  }
   0x1 LB: > { %s1448_s16 = sadd.s32 4294967295, %s2076_s15   ;;  %p1452_p0 = scmp.ge.s32.totalorder %s2076_s15, 1  ;;  %s2076_s15 = sphi %s2103_s15, %s14_s15  }
   0x2   : > { %p164_p1 = scmp.lt.s32.totalorder %s2076_s15, 5 }
   0x4   : > { %p165_p2 = pnand %p1452_p0, %p164_p1 }
   0x5   : > { %s1453_s21 = sshll.u32 (!%p165_p2), %s1448_s16, 6 }
   0x6   : > { %168 = sbr.rel (%p165_p2) target bundleno = 434 (0x1b2), region = 36  ;;  %p192_p3 = scmp.lt.s32.totalorder (!%p165_p2), %s1453_s21, 255 }
   0xb   : > { %v1856_v0 = vld [vmem:[%s2551_s1 + $0x38] sm:$0xff]  ;;  %v1857_v1 = vld [vmem:[%s2551_s1 + $0x40] sm:$0xff]  ;;  %v1855_v2 = vld [vmem:[%s2551_s1 + $0x30] sm:$0xff]  ;;  %s2556_s21 = smov (!%p192_p3, %s1453_s21), 255  ;;  %vm629_vm0 = vcmask 130048  }
   0xc   : > { %726 = vmatpush.bf16.msra.mxu0 %v1856_v0  ;;  %2049 = vmatpush.bf16.msra.mxu2 %v1856_v0  ;;  %s1784_s24 = sshll.u32 %s2556_s21, 3  ;;  %v1854_v3 = vld [vmem:[%s2551_s1 + $0x28] sm:$0xff]  ;;  %v1853_v7 = vld [vmem:[%s2551_s1 + $0x20] sm:$0xff]  ;;  %v1852_v11 = vld [vmem:[%s2551_s1 + $0x18] sm:$0xff]  ;;  %s1457_s19 = sshll.u32 %s2556_s21, 2 }
   0xd   : > { %902 = vmatpush.bf16.msra.mxu1 %v1857_v1  ;;  %2057 = vmatpush.bf16.msra.mxu3 %v1857_v1  ;;  %s2126_s27 = scalar_lea.vmem %s2550_s0, %s1784_s24  ;;  %v1851_v12 = vld [vmem:[%s2551_s1 + $0x10] sm:$0xff]  ;;  %v1850_v16 = vld [vmem:[%s2551_s1 + $0x8] sm:$0xff]  ;;  %v1849_v20 = vld [vmem:[%s2551_s1] sm:$0xff]  ;;  %s2284_s23 = scalar_lea.vmem %s2554_s4, %s1457_s19 }
   0xe   : > { %v1785_v4 = vld [vmem:[%s2126_s27 + $0x4] sm:$0xf]  ;;  %v1462_v5 = vld [vmem:[%s2126_s27 + $0x8] sm:$0xf0]  ;;  %v1819_v8 = vld [vmem:[%s2126_s27 + $0x114] sm:$0xf] }
   0xf   : > { %v1465_v6 = vor.u32 %v1785_v4, %v1462_v5  ;;  %v1598_v9 = vld [vmem:[%s2126_s27 + $0x118] sm:$0xf0]  ;;  %v1787_v13 = vld [vmem:[%s2126_s27 + $0x14] sm:$0xf]  ;;  %v1821_v17 = vld [vmem:[%s2126_s27 + $0x124] sm:$0xf] }
  0x10   : > { %727 = vmatpush.bf16.msra.mxu0 %v1855_v2  ;;  %2050 = vmatpush.bf16.msra.mxu2 %v1855_v2  ;;  %v1601_v10 = vor.u32 %v1819_v8, %v1598_v9  ;;  %v1470_v14 = vld [vmem:[%s2126_s27 + $0x18] sm:$0xf0]  ;;  %v1606_v18 = vld [vmem:[%s2126_s27 + $0x128] sm:$0xf0]  ;;  %v1460_v21 = vld [vmem:[%s2126_s27] sm:$0xf] }
  0x11   : > { %1750 = vmatmul.msk.bf16.vlgmr.msra.gmra.mxu1 %vm629_vm0, %v1465_v6  ;;  %v1473_v15 = vor.u32 %v1787_v13, %v1470_v14  ;;  %v1609_v19 = vor.u32 %v1821_v17, %v1606_v18  ;;  %v1786_v22 = vld [vmem:[%s2126_s27 + $0x4] sm:$0xf0]  ;;  %v1588_v23 = vld [vmem:[%s2126_s27 + $0x100] sm:$0xf]  ;;  %v1789_v27 = vld [vmem:[%s2126_s27 + $0x24] sm:$0xf] }
  0x12   : > { %1767 = vmatmul.msk.bf16.vlgmr.msra.gmra.mxu3 %vm629_vm0, %v1601_v10  ;;  %v1818_v24 = vld [vmem:[%s2126_s27 + $0x104] sm:$0xf0]  ;;  %v1461_v25 = vor.u32 %v1786_v22, %v1460_v21  ;;  %v1478_v28 = vld [vmem:[%s2126_s27 + $0x28] sm:$0xf0]  ;;  %v1823_v30 = vld [vmem:[%s2126_s27 + $0x134] sm:$0xf] }
  0x13   : > { %v1589_v26 = vor.u32 %v1818_v24, %v1588_v23  ;;  %v1481_v29 = vor.u32 %v1789_v27, %v1478_v28  ;;  %v1614_v31 = vld [vmem:[%s2126_s27 + $0x138] sm:$0xf0]  ;;  %v1468_v33 = vld [vmem:[%s2126_s27 + $0x10] sm:$0xf]  ;;  %v1788_v34 = vld [vmem:[%s2126_s27 + $0x14] sm:$0xf0] }
  0x14   : > { %728 = vmatpush.bf16.msra.mxu0 %v1854_v3  ;;  %2051 = vmatpush.bf16.msra.mxu2 %v1854_v3  ;;  %v1617_v32 = vor.u32 %v1823_v30, %v1614_v31  ;;  %v1596_v35 = vld [vmem:[%s2126_s27 + $0x110] sm:$0xf]  ;;  %v1820_v36 = vld [vmem:[%s2126_s27 + $0x114] sm:$0xf0]  ;;  %v1469_v37 = vor.u32 %v1788_v34, %v1468_v33  ;;  %v1791_v39 = vld [vmem:[%s2126_s27 + $0x34] sm:$0xf] }
  0x15   : > { %v1597_v38 = vor.u32 %v1820_v36, %v1596_v35  ;;  %v1486_v40 = vld [vmem:[%s2126_s27 + $0x38] sm:$0xf0]  ;;  %v1825_v42 = vld [vmem:[%s2126_s27 + $0x144] sm:$0xf]  ;;  %v1622_v43 = vld [vmem:[%s2126_s27 + $0x148] sm:$0xf0] }
  0x16   : > { %v1489_v41 = vor.u32 %v1791_v39, %v1486_v40  ;;  %v1625_v44 = vor.u32 %v1825_v42, %v1622_v43  ;;  %v1476_v45 = vld [vmem:[%s2126_s27 + $0x20] sm:$0xf]  ;;  %v1790_v46 = vld [vmem:[%s2126_s27 + $0x24] sm:$0xf0]  ;;  %v1793_v51 = vld [vmem:[%s2126_s27 + $0x44] sm:$0xf] }
  0x17   : > { %v1604_v47 = vld [vmem:[%s2126_s27 + $0x120] sm:$0xf]  ;;  %v1822_v48 = vld [vmem:[%s2126_s27 + $0x124] sm:$0xf0]  ;;  %v1477_v49 = vor.u32 %v1790_v46, %v1476_v45  ;;  %v1494_v52 = vld [vmem:[%s2126_s27 + $0x48] sm:$0xf0] }
  0x18   : > { %729 = vmatpush.bf16.msra.mxu0 %v1853_v7  ;;  %2052 = vmatpush.bf16.msra.mxu2 %v1853_v7  ;;  %v1605_v50 = vor.u32 %v1822_v48, %v1604_v47  ;;  %v1497_v53 = vor.u32 %v1793_v51, %v1494_v52  ;;  %v1827_v54 = vld [vmem:[%s2126_s27 + $0x154] sm:$0xf]  ;;  %v1630_v55 = vld [vmem:[%s2126_s27 + $0x158] sm:$0xf0]  ;;  %v1484_v57 = vld [vmem:[%s2126_s27 + $0x30] sm:$0xf] }
  0x19   : > { %v1633_v56 = vor.u32 %v1827_v54, %v1630_v55  ;;  %v1792_v58 = vld [vmem:[%s2126_s27 + $0x34] sm:$0xf0]  ;;  %v1612_v59 = vld [vmem:[%s2126_s27 + $0x130] sm:$0xf]  ;;  %v1795_v63 = vld [vmem:[%s2126_s27 + $0x54] sm:$0xf] }
  0x1a   : > { %v1824_v60 = vld [vmem:[%s2126_s27 + $0x134] sm:$0xf0]  ;;  %v1485_v61 = vor.u32 %v1792_v58, %v1484_v57  ;;  %v1502_v0 = vld [vmem:[%s2126_s27 + $0x58] sm:$0xf0]  ;;  %v1829_v2 = vld [vmem:[%s2126_s27 + $0x164] sm:$0xf] }
  0x1b   : > { %v1613_v62 = vor.u32 %v1824_v60, %v1612_v59  ;;  %v1505_v1 = vor.u32 %v1795_v63, %v1502_v0  ;;  %v1638_v3 = vld [vmem:[%s2126_s27 + $0x168] sm:$0xf0]  ;;  %v1492_v5 = vld [vmem:[%s2126_s27 + $0x40] sm:$0xf]  ;;  %v1794_v6 = vld [vmem:[%s2126_s27 + $0x44] sm:$0xf0] }
  0x1c   : > { %730 = vmatpush.bf16.msra.mxu0 %v1852_v11  ;;  %2053 = vmatpush.bf16.msra.mxu2 %v1852_v11  ;;  %v1641_v4 = vor.u32 %v1829_v2, %v1638_v3  ;;  %v1620_v7 = vld [vmem:[%s2126_s27 + $0x140] sm:$0xf]  ;;  %v1826_v8 = vld [vmem:[%s2126_s27 + $0x144] sm:$0xf0]  ;;  %v1493_v9 = vor.u32 %v1794_v6, %v1492_v5  ;;  %v1797_v11 = vld [vmem:[%s2126_s27 + $0x64] sm:$0xf] }
  0x1d   : > { %v1621_v10 = vor.u32 %v1826_v8, %v1620_v7  ;;  %v1831_v14 = vld [vmem:[%s2126_s27 + $0x174] sm:$0xf]  ;;  %v1500_v17 = vld [vmem:[%s2126_s27 + $0x50] sm:$0xf]  ;;  %v1796_v18 = vld [vmem:[%s2126_s27 + $0x54] sm:$0xf0] }
  0x1e   : > { %v1501_v21 = vor.u32 %v1796_v18, %v1500_v17  ;;  %v1799_v23 = vld [vmem:[%s2126_s27 + $0x74] sm:$0xf]  ;;  %v1518_v24 = vld [vmem:[%s2126_s27 + $0x78] sm:$0xf0]  ;;  %v1654_v27 = vld [vmem:[%s2126_s27 + $0x188] sm:$0xf0] }
  0x1f   : > { %v1798_v30 = vld [vmem:[%s2126_s27 + $0x64] sm:$0xf0]  ;;  %v1636_v31 = vld [vmem:[%s2126_s27 + $0x160] sm:$0xf]  ;;  %v1801_v35 = vld [vmem:[%s2126_s27 + $0x84] sm:$0xf] }
  0x20   : > { %731 = vmatpush.bf16.msra.mxu0 %v1851_v12  ;;  %2054 = vmatpush.bf16.msra.mxu2 %v1851_v12  ;;  %v1510_v12 = vld [vmem:[%s2126_s27 + $0x68] sm:$0xf0]  ;;  %v1835_v39 = vld [vmem:[%s2126_s27 + $0x194] sm:$0xf]  ;;  %v1662_v40 = vld [vmem:[%s2126_s27 + $0x198] sm:$0xf0] }
  0x21   : > { %1751 = vmatmul.msk.bf16.gmra.mxu1 %vm629_vm0, %v1473_v15  ;;  %v1513_v13 = vor.u32 %v1797_v11, %v1510_v12  ;;  %v1646_v15 = vld [vmem:[%s2126_s27 + $0x178] sm:$0xf0]  ;;  %v1526_v36 = vld [vmem:[%s2126_s27 + $0x88] sm:$0xf0]  ;;  %v1516_v42 = vld [vmem:[%s2126_s27 + $0x70] sm:$0xf] }
  0x22   : > { %1768 = vmatmul.msk.bf16.gmra.mxu3 %vm629_vm0, %v1609_v19  ;;  %v1628_v19 = vld [vmem:[%s2126_s27 + $0x150] sm:$0xf]  ;;  %v1800_v43 = vld [vmem:[%s2126_s27 + $0x74] sm:$0xf0]  ;;  %v1534_v51 = vld [vmem:[%s2126_s27 + $0x98] sm:$0xf0] }
  0x23   : > { %v1832_v45 = vld [vmem:[%s2126_s27 + $0x174] sm:$0xf0]  ;;  %v1517_v46 = vor.u32 %v1800_v43, %v1516_v42  ;;  %v1837_v54 = vld [vmem:[%s2126_s27 + $0x1a4] sm:$0xf]  ;;  %v1670_v55 = vld [vmem:[%s2126_s27 + $0x1a8] sm:$0xf0] }
  0x24   : > { %732 = vmatpush.bf16.msra.mxu0 %v1850_v16  ;;  %2055 = vmatpush.bf16.msra.mxu2 %v1850_v16  ;;  %v1649_v16 = vor.u32 %v1831_v14, %v1646_v15  ;;  %v1673_v57 = vor.u32 %v1837_v54, %v1670_v55  ;;  %v1524_v58 = vld [vmem:[%s2126_s27 + $0x80] sm:$0xf]  ;;  %v1802_v59 = vld [vmem:[%s2126_s27 + $0x84] sm:$0xf0]  ;;  %v1805_v5 = vld [vmem:[%s2126_s27 + $0xa4] sm:$0xf] }
  0x25   : > { %v1652_v60 = vld [vmem:[%s2126_s27 + $0x180] sm:$0xf]  ;;  %v1542_v6 = vld [vmem:[%s2126_s27 + $0xa8] sm:$0xf0]  ;;  %v1839_v14 = vld [vmem:[%s2126_s27 + $0x1b4] sm:$0xf] }
  0x26   : > { %v2259_v8 = vld [vmem:[%s2553_s3] ss:$0 sm:$0xff]  ;;  %v1545_v11 = vor.u32 %v1805_v5, %v1542_v6  ;;  %v1678_v15 = vld [vmem:[%s2126_s27 + $0x1b8] sm:$0xf0]  ;;  %v1841_v43 = vld [vmem:[%s2126_s27 + $0x1c4] sm:$0xf] }
  0x27   : > { %v1668_v54 = vld [vmem:[%s2126_s27 + $0x1a0] sm:$0xf]  ;;  %v1838_v55 = vld [vmem:[%s2126_s27 + $0x1a4] sm:$0xf0] }
  0x28   : > { %733 = vmatpush.bf16.msra.mxu0 %v1849_v20  ;;  %2056 = vmatpush.bf16.msra.mxu2 %v1849_v20  ;;  %v1828_v20 = vld [vmem:[%s2126_s27 + $0x154] sm:$0xf0] }
  0x29   : > { %v1629_v22 = vor.u32 %v1828_v20, %v1628_v19  ;;  %v1681_v19 = vor.u32 %v1839_v14, %v1678_v15  ;;  %v1532_v20 = vld [vmem:[%s2126_s27 + $0x90] sm:$0xf] }
  0x2b   : > { %734 = vmatmul.bf16.vlgmr.msra.gmra.mxu0 %v1461_v25  ;;  %814 = vmatmul.bf16.vlgmr.msra.gmra.mxu2 %v1589_v26  ;;  %v1521_v25 = vor.u32 %v1799_v23, %v1518_v24  ;;  %v1833_v26 = vld [vmem:[%s2126_s27 + $0x184] sm:$0xf]  ;;  %v1660_v23 = vld [vmem:[%s2126_s27 + $0x190] sm:$0xf]  ;;  %v1836_v24 = vld [vmem:[%s2126_s27 + $0x194] sm:$0xf0] }
  0x2c   : > { %v1657_v28 = vor.u32 %v1833_v26, %v1654_v27 }
  0x31   : > { %1752 = vmatmul.msk.bf16.gmra.mxu1 %vm629_vm0, %v1481_v29  ;;  %v1508_v29 = vld [vmem:[%s2126_s27 + $0x60] sm:$0xf] }
  0x32   : > { %1769 = vmatmul.msk.bf16.gmra.mxu3 %vm629_vm0, %v1617_v32  ;;  %v1830_v32 = vld [vmem:[%s2126_s27 + $0x164] sm:$0xf0]  ;;  %v1509_v33 = vor.u32 %v1798_v30, %v1508_v29  ;;  %v1661_v30 = vor.u32 %v1836_v24, %v1660_v23  ;;  %v1694_v23 = vld [vmem:[%s2126_s27 + $0x1d8] sm:$0xf0] }
  0x33   : > { %v1637_v34 = vor.u32 %v1830_v32, %v1636_v31 }
  0x3b   : > { %739 = vmatmul.bf16.gmra.mxu0 %v1469_v37  ;;  %819 = vmatmul.bf16.gmra.mxu2 %v1597_v38  ;;  %v1529_v37 = vor.u32 %v1801_v35, %v1526_v36  ;;  %v1807_v35 = vld [vmem:[%s2126_s27 + $0xb4] sm:$0xf]  ;;  %v1550_v36 = vld [vmem:[%s2126_s27 + $0xb8] sm:$0xf0] }
  0x41   : > { %1753 = vmatmul.msk.bf16.gmra.mxu1 %vm629_vm0, %v1489_v41  ;;  %v1665_v41 = vor.u32 %v1835_v39, %v1662_v40  ;;  %v1553_v40 = vor.u32 %v1807_v35, %v1550_v36  ;;  %v1840_v35 = vld [vmem:[%s2126_s27 + $0x1b4] sm:$0xf0] }
  0x42   : > { %1770 = vmatmul.msk.bf16.gmra.mxu3 %vm629_vm0, %v1625_v44  ;;  %v1644_v44 = vld [vmem:[%s2126_s27 + $0x170] sm:$0xf] }
  0x43   : > { %v1645_v47 = vor.u32 %v1832_v45, %v1644_v44  ;;  %v1686_v44 = vld [vmem:[%s2126_s27 + $0x1c8] sm:$0xf0] }
  0x4b   : > { %744 = vmatmul.bf16.gmra.mxu0 %v1477_v49  ;;  %824 = vmatmul.bf16.gmra.mxu2 %v1605_v50  ;;  %v1803_v50 = vld [vmem:[%s2126_s27 + $0x94] sm:$0xf] }
  0x4c   : > { %v1537_v52 = vor.u32 %v1803_v50, %v1534_v51  ;;  %v1689_v50 = vor.u32 %v1841_v43, %v1686_v44  ;;  %v1540_v51 = vld [vmem:[%s2126_s27 + $0xa0] sm:$0xf] }
  0x51   : > { %1754 = vmatmul.msk.bf16.gmra.mxu1 %vm629_vm0, %v1497_v53 }
  0x52   : > { %1771 = vmatmul.msk.bf16.gmra.mxu3 %vm629_vm0, %v1633_v56 }
  0x5b   : > { %749 = vmatmul.bf16.gmra.mxu0 %v1485_v61  ;;  %829 = vmatmul.bf16.gmra.mxu2 %v1613_v62  ;;  %v1834_v61 = vld [vmem:[%s2126_s27 + $0x184] sm:$0xf0]  ;;  %v1525_v62 = vor.u32 %v1802_v59, %v1524_v58 }
  0x5c   : > { %v1653_v0 = vor.u32 %v1834_v61, %v1652_v60 }
  0x61   : > { %1755 = vmatmul.msk.bf16.gmra.mxu1 %vm629_vm0, %v1505_v1 }
  0x62   : > { %1772 = vmatmul.msk.bf16.gmra.mxu3 %vm629_vm0, %v1641_v4  ;;  %v2251_v4 = vld [vmem:[%s2552_s2] ss:$0 sm:$0xff] }
  0x6b   : > { %754 = vmatmul.bf16.gmra.mxu0 %v1493_v9  ;;  %834 = vmatmul.bf16.gmra.mxu2 %v1621_v10 }
  0x71   : > { %1756 = vmatmul.msk.bf16.gmra.mxu1 %vm629_vm0, %v1513_v13 }
  0x72   : > { %1773 = vmatmul.msk.bf16.gmra.mxu3 %vm629_vm0, %v1649_v16 }
  0x7b   : > { %759 = vmatmul.bf16.gmra.mxu0 %v1501_v21  ;;  %839 = vmatmul.bf16.gmra.mxu2 %v1629_v22  ;;  %v1804_v21 = vld [vmem:[%s2126_s27 + $0x94] sm:$0xf0] }
  0x81   : > { %1757 = vmatmul.msk.bf16.gmra.mxu1 %vm629_vm0, %v1521_v25 }
  0x82   : > { %1774 = vmatmul.msk.bf16.gmra.mxu3 %vm629_vm0, %v1657_v28  ;;  %v1533_v28 = vor.u32 %v1804_v21, %v1532_v20 }
  0x8b   : > { %764 = vmatmul.bf16.gmra.mxu0 %v1509_v33  ;;  %844 = vmatmul.bf16.gmra.mxu2 %v1637_v34 }
  0x8e   : > { %v904_v38 = vpop.f32.mrf.mxu1 }
  0x91   : > { %1758 = vmatmul.msk.bf16.gmra.mxu1 %vm629_vm0, %v1529_v37 }
  0x92   : > { %1775 = vmatmul.msk.bf16.gmra.mxu3 %vm629_vm0, %v1665_v41 }
  0x95   : > { %v2232_v49 = vpop.f32.mrf.mxu3 }
  0x96   : > { %v906_v48 = vpop.f32.mrf.mxu1 }
  0x9b   : > { %769 = vmatmul.bf16.gmra.mxu0 %v1517_v46  ;;  %849 = vmatmul.bf16.gmra.mxu2 %v1645_v47 }
  0x9d   : > { %v2238_v56 = vpop.f32.mrf.mxu3 }
  0x9e   : > { %v909_v53 = vpop.f32.mrf.mxu1 }
  0xa1   : > { %1759 = vmatmul.msk.bf16.gmra.mxu1 %vm629_vm0, %v1537_v52  ;;  %v1806_v52 = vld [vmem:[%s2126_s27 + $0xa4] sm:$0xf0] }
  0xa2   : > { %1776 = vmatmul.msk.bf16.gmra.mxu3 %vm629_vm0, %v1673_v57  ;;  %v1541_v60 = vor.u32 %v1806_v52, %v1540_v51 }
  0xa5   : > { %v2246_v2 = vpop.f32.mrf.mxu3 }
  0xa6   : > { %v911_v1 = vpop.f32.mrf.mxu1 }
  0xa8   : > { %v735_v63 = vpop.f32.mrf.mxu0 }
  0xa9   : > { %v905_v3 = vadd.f32 %v904_v38, %v735_v63  ;;  %v1669_v63 = vor.u32 %v1838_v55, %v1668_v54 }
  0xab   : > { %774 = vmatmul.bf16.gmra.mxu0 %v1525_v62  ;;  %854 = vmatmul.bf16.gmra.mxu2 %v1653_v0  ;;  %v1068_v7 = vmul.f32 %v2251_v4, %v905_v3 }
  0xad   : > { %v2267_v16 = vpop.f32.mrf.mxu3  ;;  %v1136_v17 = vadd.f32 %v2259_v8, %v1068_v7 }
  0xae   : > { %v2261_v9 = vpop.f32.mrf.mxu2  ;;  %v2263_v13 = vpop.f32.mrf.mxu1 }
  0xaf   : > { %v1200_v25 = vmax.f32 %v1136_v17, 0.0 }
  0xb0   : > { %v737_v10 = vpop.f32.mrf.mxu0 }
  0xb1   : > { %v907_v12 = vadd.f32 %v906_v48, %v737_v10  ;;  %1760 = vmatmul.msk.bf16.gmra.mxu1 %vm629_vm0, %v1545_v11  ;;  %v1558_v11 = vld [vmem:[%s2126_s27 + $0xc8] sm:$0xf0] }
  0xb2   : > { %1777 = vmatmul.msk.bf16.gmra.mxu3 %vm629_vm0, %v1681_v19 }
  0xb3   : > { %v1069_v18 = vmul.f32 %v2251_v4, %v907_v12 }
  0xb5   : > { %v1137_v22 = vadd.f32 %v2259_v8, %v1069_v18  ;;  %v2286_v33 = vpop.f32.mrf.mxu3 }
  0xb6   : > { %v2278_v27 = vpop.f32.mrf.mxu2  ;;  %v916_v32 = vpop.f32.mrf.mxu1 }
  0xb7   : > { %v1201_v26 = vmax.f32 %v1137_v22, 0.0  ;;  %v1843_v22 = vld [vmem:[%s2126_s27 + $0x1d4] sm:$0xf] }
  0xb8   : > { %v740_v29 = vpop.f32.mrf.mxu0 }
  0xb9   : > { %v1861_v31 = vpack.c.bf16 %v1201_v26, %v1200_v25  ;;  %v910_v34 = vadd.f32 %v909_v53, %v740_v29  ;;  %v1697_v29 = vor.u32 %v1843_v22, %v1694_v23 }
  0xbb   : > { %1862 = vst [vmem:[%s2284_s23] sm:$0xff] %v1861_v31   ;;  %779 = vmatmul.bf16.gmra.mxu0 %v1533_v28  ;;  %859 = vmatmul.bf16.gmra.mxu2 %v1661_v30  ;;  %v1070_v37 = vmul.f32 %v2251_v4, %v910_v34  ;;  %v1548_v30 = vld [vmem:[%s2126_s27 + $0xb0] sm:$0xf]  ;;  %v1808_v31 = vld [vmem:[%s2126_s27 + $0xb4] sm:$0xf0] }
  0xbc   : > { %v1676_v34 = vld [vmem:[%s2126_s27 + $0x1b0] sm:$0xf] }
  0xbd   : > { %v2297_v46 = vpop.f32.mrf.mxu3  ;;  %v1138_v47 = vadd.f32 %v2259_v8, %v1070_v37  ;;  %v1677_v43 = vor.u32 %v1840_v35, %v1676_v34 }
  0xbe   : > { %v820_v38 = vpop.f32.mrf.mxu2  ;;  %v2292_v42 = vpop.f32.mrf.mxu1 }
  0xbf   : > { %v990_v45 = vadd.f32 %v2232_v49, %v820_v38  ;;  %v1202_v58 = vmax.f32 %v1138_v47, 0.0 }
  0xc0   : > { %v742_v39 = vpop.f32.mrf.mxu0 }
  0xc1   : > { %v912_v41 = vadd.f32 %v911_v1, %v742_v39  ;;  %1761 = vmatmul.msk.bf16.gmra.mxu1 %vm629_vm0, %v1553_v40  ;;  %v1102_v57 = vmul.f32 %v2251_v4, %v990_v45  ;;  %v1549_v39 = vor.u32 %v1808_v31, %v1548_v30 }
  0xc2   : > { %1778 = vmatmul.msk.bf16.gmra.mxu3 %vm629_vm0, %v1689_v50 }
  0xc3   : > { %v1071_v48 = vmul.f32 %v2251_v4, %v912_v41  ;;  %v1170_v3 = vadd.f32 %v2259_v8, %v1102_v57 }
  0xc5   : > { %v1139_v53 = vadd.f32 %v2259_v8, %v1071_v48  ;;  %v2312_v6 = vpop.f32.mrf.mxu3  ;;  %v1234_v12 = vmax.f32 %v1170_v3, 0.0 }
  0xc6   : > { %v822_v59 = vpop.f32.mrf.mxu2  ;;  %v921_v1 = vpop.f32.mrf.mxu1 }
  0xc7   : > { %v1203_v49 = vmax.f32 %v1139_v53, 0.0  ;;  %v992_v61 = vadd.f32 %v2238_v56, %v822_v59  ;;  %v1809_v56 = vld [vmem:[%s2126_s27 + $0xc4] sm:$0xf]  ;;  %v1566_v53 = vld [vmem:[%s2126_s27 + $0xd8] sm:$0xf0] }
  0xc8   : > { %v745_v62 = vpop.f32.mrf.mxu0  ;;  %v1561_v20 = vor.u32 %v1809_v56, %v1558_v11  ;;  %v1556_v56 = vld [vmem:[%s2126_s27 + $0xc0] sm:$0xf]  ;;  %v1810_v11 = vld [vmem:[%s2126_s27 + $0xc4] sm:$0xf0] }
  0xc9   : > { %v1866_v0 = vpack.c.bf16 %v1203_v49, %v1202_v58  ;;  %v1103_v5 = vmul.f32 %v2251_v4, %v992_v61  ;;  %v915_v7 = vadd.f32 %v2263_v13, %v745_v62  ;;  %v1845_v62 = vld [vmem:[%s2126_s27 + $0x1e4] sm:$0xf] }
  0xcb   : > { %2018 = vst [vmem:[%s2284_s23 + $0x8] sm:$0xff] %v1866_v0   ;;  %784 = vmatmul.bf16.gmra.mxu0 %v1541_v60  ;;  %v1171_v10 = vadd.f32 %v2259_v8, %v1103_v5  ;;  %864 = vmatmul.bf16.gmra.mxu2 %v1669_v63  ;;  %v1072_v15 = vmul.f32 %v2251_v4, %v915_v7  ;;  %v1702_v63 = vld [vmem:[%s2126_s27 + $0x1e8] sm:$0xf0] }
  0xcd   : > { %v1235_v14 = vmax.f32 %v1171_v10, 0.0  ;;  %v2326_v25 = vpop.f32.mrf.mxu3  ;;  %v1140_v26 = vadd.f32 %v2259_v8, %v1072_v15  ;;  %v1705_v10 = vor.u32 %v1845_v62, %v1702_v63 }
  0xce   : > { %v825_v17 = vpop.f32.mrf.mxu2  ;;  %v2320_v21 = vpop.f32.mrf.mxu1 }
  0xcf   : > { %v1946_v18 = vpack.c.bf16 %v1235_v14, %v1234_v12  ;;  %v995_v24 = vadd.f32 %v2246_v2, %v825_v17  ;;  %v1204_v37 = vmax.f32 %v1140_v26, 0.0  ;;  %v1684_v12 = vld [vmem:[%s2126_s27 + $0x1c0] sm:$0xf]  ;;  %v1842_v14 = vld [vmem:[%s2126_s27 + $0x1c4] sm:$0xf0] }
  0xd0   : > { %v747_v19 = vpop.f32.mrf.mxu0  ;;  %v1685_v22 = vor.u32 %v1842_v14, %v1684_v12 }
  0xd1   : > { %v917_v13 = vadd.f32 %v916_v32, %v747_v19  ;;  %2034 = vst [vmem:[%s2284_s23 + $0x88] sm:$0xff] %v1946_v18   ;;  %1762 = vmatmul.msk.bf16.gmra.mxu1 %vm629_vm0, %v1561_v20  ;;  %v1104_v36 = vmul.f32 %v2251_v4, %v995_v24  ;;  %v1557_v19 = vor.u32 %v1810_v11, %v1556_v56  ;;  %v1815_v11 = vld [vmem:[%s2126_s27 + $0xf4] sm:$0xf] }
  0xd2   : > { %1779 = vmatmul.msk.bf16.gmra.mxu3 %vm629_vm0, %v1697_v29 }
  0xd3   : > { %v1073_v28 = vmul.f32 %v2251_v4, %v917_v13  ;;  %v1172_v47 = vadd.f32 %v2259_v8, %v1104_v36 }
  0xd5   : > { %v1141_v32 = vadd.f32 %v2259_v8, %v1073_v28  ;;  %v2341_v50 = vpop.f32.mrf.mxu3  ;;  %v1236_v54 = vmax.f32 %v1172_v47, 0.0 }
  0xd6   : > { %v827_v38 = vpop.f32.mrf.mxu2  ;;  %v926_v45 = vpop.f32.mrf.mxu1 }
  0xd7   : > { %v1205_v2 = vmax.f32 %v1141_v32, 0.0  ;;  %v997_v40 = vadd.f32 %v2267_v16, %v827_v38  ;;  %v1811_v16 = vld [vmem:[%s2126_s27 + $0xd4] sm:$0xf]  ;;  %v1574_v32 = vld [vmem:[%s2126_s27 + $0xe8] sm:$0xf0] }
  0xd8   : > { %v750_v41 = vpop.f32.mrf.mxu0  ;;  %v1569_v60 = vor.u32 %v1811_v16, %v1566_v53  ;;  %v1564_v16 = vld [vmem:[%s2126_s27 + $0xd0] sm:$0xf]  ;;  %v1812_v53 = vld [vmem:[%s2126_s27 + $0xd4] sm:$0xf0] }
  0xd9   : > { %v1871_v44 = vpack.c.bf16 %v1205_v2, %v1204_v37  ;;  %v1105_v48 = vmul.f32 %v2251_v4, %v997_v40  ;;  %v920_v51 = vadd.f32 %v2292_v42, %v750_v41  ;;  %v1847_v41 = vld [vmem:[%s2126_s27 + $0x1f4] sm:$0xf] }
  0xdb   : > { %2019 = vst [vmem:[%s2284_s23 + $0x10] sm:$0xff] %v1871_v44   ;;  %789 = vmatmul.bf16.gmra.mxu0 %v1549_v39  ;;  %v1173_v52 = vadd.f32 %v2259_v8, %v1105_v48  ;;  %869 = vmatmul.bf16.gmra.mxu2 %v1677_v43  ;;  %v1074_v57 = vmul.f32 %v2251_v4, %v920_v51  ;;  %v1710_v43 = vld [vmem:[%s2126_s27 + $0x1f8] sm:$0xf0] }
  0xdd   : > { %v1237_v55 = vmax.f32 %v1173_v52, 0.0  ;;  %v2355_v3 = vpop.f32.mrf.mxu3  ;;  %v1142_v5 = vadd.f32 %v2259_v8, %v1074_v57  ;;  %v1713_v52 = vor.u32 %v1847_v41, %v1710_v43 }
  0xde   : > { %v830_v58 = vpop.f32.mrf.mxu2  ;;  %v2349_v61 = vpop.f32.mrf.mxu1 }
  0xdf   : > { %v1951_v49 = vpack.c.bf16 %v1237_v55, %v1236_v54  ;;  %v1000_v0 = vadd.f32 %v2286_v33, %v830_v58  ;;  %v1206_v17 = vmax.f32 %v1142_v5, 0.0  ;;  %v1692_v54 = vld [vmem:[%s2126_s27 + $0x1d0] sm:$0xf]  ;;  %v1844_v55 = vld [vmem:[%s2126_s27 + $0x1d4] sm:$0xf0] }
  0xe0   : > { %v752_v59 = vpop.f32.mrf.mxu0  ;;  %v1693_v62 = vor.u32 %v1844_v55, %v1692_v54 }
  0xe1   : > { %v922_v42 = vadd.f32 %v921_v1, %v752_v59  ;;  %2035 = vst [vmem:[%s2284_s23 + $0x90] sm:$0xff] %v1951_v49   ;;  %1763 = vmatmul.msk.bf16.gmra.mxu1 %vm629_vm0, %v1569_v60  ;;  %v1106_v15 = vmul.f32 %v2251_v4, %v1000_v0  ;;  %v1565_v59 = vor.u32 %v1812_v53, %v1564_v16 }
  0xe2   : > { %1780 = vmatmul.msk.bf16.gmra.mxu3 %vm629_vm0, %v1705_v10 }
  0xe3   : > { %v1075_v7 = vmul.f32 %v2251_v4, %v922_v42  ;;  %v1174_v26 = vadd.f32 %v2259_v8, %v1106_v15 }
  0xe5   : > { %v1143_v1 = vadd.f32 %v2259_v8, %v1075_v7  ;;  %v2370_v29 = vpop.f32.mrf.mxu3  ;;  %v1238_v34 = vmax.f32 %v1174_v26, 0.0  ;;  %v1572_v26 = vld [vmem:[%s2126_s27 + $0xe0] sm:$0xf] }
  0xe6   : > { %v832_v18 = vpop.f32.mrf.mxu2  ;;  %v931_v24 = vpop.f32.mrf.mxu1 }
  0xe7   : > { %v1207_v33 = vmax.f32 %v1143_v1, 0.0  ;;  %v1002_v20 = vadd.f32 %v2297_v46, %v832_v18  ;;  %v1813_v46 = vld [vmem:[%s2126_s27 + $0xe4] sm:$0xf]  ;;  %v1582_v1 = vld [vmem:[%s2126_s27 + $0xf8] sm:$0xf0] }
  0xe8   : > { %v755_v13 = vpop.f32.mrf.mxu0  ;;  %v1577_v39 = vor.u32 %v1813_v46, %v1574_v32  ;;  %v1585_v18 = vor.u32 %v1815_v11, %v1582_v1  ;;  %v1846_v46 = vld [vmem:[%s2126_s27 + $0x1e4] sm:$0xf0] }
  0xe9   : > { %v1876_v23 = vpack.c.bf16 %v1207_v33, %v1206_v17  ;;  %v1107_v28 = vmul.f32 %v2251_v4, %v1002_v20  ;;  %v925_v30 = vadd.f32 %v2320_v21, %v755_v13 }
  0xeb   : > { %2020 = vst [vmem:[%s2284_s23 + $0x18] sm:$0xff] %v1876_v23   ;;  %794 = vmatmul.bf16.gmra.mxu0 %v1557_v19  ;;  %v1175_v31 = vadd.f32 %v2259_v8, %v1107_v28  ;;  %874 = vmatmul.bf16.gmra.mxu2 %v1685_v22  ;;  %v1076_v36 = vmul.f32 %v2251_v4, %v925_v30  ;;  %v1814_v28 = vld [vmem:[%s2126_s27 + $0xe4] sm:$0xf0] }
  0xed   : > { %v1239_v35 = vmax.f32 %v1175_v31, 0.0  ;;  %v1144_v47 = vadd.f32 %v2259_v8, %v1076_v36  ;;  %v2386_v51 = vpop.f32.mrf.mxu3  ;;  %v1700_v31 = vld [vmem:[%s2126_s27 + $0x1e0] sm:$0xf] }
  0xee   : > { %v835_v37 = vpop.f32.mrf.mxu2  ;;  %v2378_v40 = vpop.f32.mrf.mxu1 }
  0xef   : > { %v1956_v2 = vpack.c.bf16 %v1239_v35, %v1238_v34  ;;  %v1005_v44 = vadd.f32 %v2312_v6, %v835_v37  ;;  %v1208_v58 = vmax.f32 %v1144_v47, 0.0 }
  0xf0   : > { %v757_v38 = vpop.f32.mrf.mxu0 }
  0xf1   : > { %v927_v21 = vadd.f32 %v926_v45, %v757_v38  ;;  %2036 = vst [vmem:[%s2284_s23 + $0x98] sm:$0xff] %v1956_v2   ;;  %1764 = vmatmul.msk.bf16.gmra.mxu1 %vm629_vm0, %v1577_v39  ;;  %v1108_v57 = vmul.f32 %v2251_v4, %v1005_v44  ;;  %v1701_v38 = vor.u32 %v1846_v46, %v1700_v31 }
  0xf2   : > { %1781 = vmatmul.msk.bf16.gmra.mxu3 %vm629_vm0, %v1713_v52  ;;  %v1590_v52 = vld [vmem:[%s2126_s27 + $0x108] sm:$0xf0] }
  0xf3   : > { %v1077_v48 = vmul.f32 %v2251_v4, %v927_v21  ;;  %v1176_v5 = vadd.f32 %v2259_v8, %v1108_v57 }
  0xf5   : > { %v1145_v45 = vadd.f32 %v2259_v8, %v1077_v48  ;;  %v1240_v12 = vmax.f32 %v1176_v5, 0.0  ;;  %v1817_v48 = vld [vmem:[%s2126_s27 + $0x104] sm:$0xf]  ;;  %v1708_v5 = vld [vmem:[%s2126_s27 + $0x1f0] sm:$0xf] }
  0xf6   : > { %v837_v49 = vpop.f32.mrf.mxu2  ;;  %v936_v0 = vpop.f32.mrf.mxu1  ;;  %v1593_v57 = vor.u32 %v1817_v48, %v1590_v52 }
  0xf7   : > { %v1209_v6 = vmax.f32 %v1145_v45, 0.0  ;;  %v1007_v60 = vadd.f32 %v2326_v25, %v837_v49  ;;  %v2404_v25 = vpop.f32.mrf.mxu3 }
  0xf8   : > { %v760_v42 = vpop.f32.mrf.mxu0 }
  0xf9   : > { %v1881_v63 = vpack.c.bf16 %v1209_v6, %v1208_v58  ;;  %v1109_v7 = vmul.f32 %v2251_v4, %v1007_v60  ;;  %v930_v10 = vadd.f32 %v2349_v61, %v760_v42  ;;  %v1580_v42 = vld [vmem:[%s2126_s27 + $0xf0] sm:$0xf] }
  0xfb   : > { %2021 = vst [vmem:[%s2284_s23 + $0x20] sm:$0xff] %v1881_v63   ;;  %799 = vmatmul.bf16.gmra.mxu0 %v1565_v59  ;;  %v1177_v56 = vadd.f32 %v2259_v8, %v1109_v7  ;;  %879 = vmatmul.bf16.gmra.mxu2 %v1693_v62  ;;  %v1078_v15 = vmul.f32 %v2251_v4, %v930_v10  ;;  %v1816_v62 = vld [vmem:[%s2126_s27 + $0xf4] sm:$0xf0] }
  0xfc   : > { %v1848_v7 = vld [vmem:[%s2126_s27 + $0x1f4] sm:$0xf0]  ;;  %v1581_v1 = vor.u32 %v1816_v62, %v1580_v42 }
  0xfd   : > { %v1241_v14 = vmax.f32 %v1177_v56, 0.0  ;;  %v1146_v22 = vadd.f32 %v2259_v8, %v1078_v15 }
  0xfe   : > { %v840_v17 = vpop.f32.mrf.mxu2  ;;  %v2407_v20 = vpop.f32.mrf.mxu1 }
  0xff   : > { %v1961_v33 = vpack.c.bf16 %v1241_v14, %v1240_v12  ;;  %v1010_v13 = vadd.f32 %v2341_v50, %v840_v17  ;;  %v1210_v32 = vmax.f32 %v1146_v22, 0.0  ;;  %v1573_v50 = vor.u32 %v1814_v28, %v1572_v26  ;;  %v2420_v36 = vpop.f32.mrf.mxu3 }
 0x100   : > { %v762_v61 = vpop.f32.mrf.mxu0  ;;  %v1709_v14 = vor.u32 %v1848_v7, %v1708_v5 }
 0x101   : > { %v932_v19 = vadd.f32 %v931_v24, %v762_v61  ;;  %2037 = vst [vmem:[%s2284_s23 + $0xa0] sm:$0xff] %v1961_v33   ;;  %1765 = vmatmul.msk.bf16.gmra.mxu1 %vm629_vm0, %v1585_v18  ;;  %v1110_v24 = vmul.f32 %v2251_v4, %v1010_v13 }
 0x103   : > { %v1079_v23 = vmul.f32 %v2251_v4, %v932_v19  ;;  %v1178_v41 = vadd.f32 %v2259_v8, %v1110_v24 }
 0x105   : > { %v1147_v30 = vadd.f32 %v2259_v8, %v1079_v23 }
 0x106   : > { %v842_v35 = vpop.f32.mrf.mxu2  ;;  %v941_v21 = vpop.f32.mrf.mxu1 }
 0x107   : > { %v1211_v34 = vmax.f32 %v1147_v30, 0.0  ;;  %v1012_v37 = vadd.f32 %v2355_v3, %v842_v35  ;;  %v1242_v3 = vmax.f32 %v1178_v41, 0.0  ;;  %v2431_v6 = vpop.f32.mrf.mxu3 }
 0x108   : > { %v765_v2 = vpop.f32.mrf.mxu0 }
 0x109   : > { %v1886_v39 = vpack.c.bf16 %v1211_v34, %v1210_v32  ;;  %v1111_v43 = vmul.f32 %v2251_v4, %v1012_v37  ;;  %v935_v44 = vadd.f32 %v2378_v40, %v765_v2 }
 0x10b   : > { %2022 = vst [vmem:[%s2284_s23 + $0x28] sm:$0xff] %v1886_v39   ;;  %804 = vmatmul.bf16.gmra.mxu0 %v1573_v50  ;;  %v1179_v47 = vadd.f32 %v2259_v8, %v1111_v43  ;;  %884 = vmatmul.bf16.gmra.mxu2 %v1701_v38  ;;  %v1080_v53 = vmul.f32 %v2251_v4, %v935_v44 }
 0x10d   : > { %v1243_v16 = vmax.f32 %v1179_v47, 0.0  ;;  %v1148_v59 = vadd.f32 %v2259_v8, %v1080_v53 }
 0x10e   : > { %v845_v45 = vpop.f32.mrf.mxu2  ;;  %v944_v58 = vpop.f32.mrf.mxu1 }
 0x10f   : > { %v1966_v54 = vpack.c.bf16 %v1243_v16, %v1242_v3  ;;  %v1015_v49 = vadd.f32 %v2370_v29, %v845_v45  ;;  %v1212_v10 = vmax.f32 %v1148_v59, 0.0  ;;  %v1026_v19 = vpop.f32.mrf.mxu3 }
 0x110   : > { %v767_v55 = vpop.f32.mrf.mxu0 }
 0x111   : > { %v937_v40 = vadd.f32 %v936_v0, %v767_v55  ;;  %2038 = vst [vmem:[%s2284_s23 + $0xa8] sm:$0xff] %v1966_v54   ;;  %1766 = vmatmul.msk.bf16.gmra.mxu1 %vm629_vm0, %v1593_v57  ;;  %v1112_v0 = vmul.f32 %v2251_v4, %v1015_v49 }
 0x113   : > { %v1081_v60 = vmul.f32 %v2251_v4, %v937_v40  ;;  %v1180_v33 = vadd.f32 %v2259_v8, %v1112_v0 }
 0x115   : > { %v1149_v63 = vadd.f32 %v2259_v8, %v1081_v60  ;;  %v1244_v22 = vmax.f32 %v1180_v33, 0.0 }
 0x116   : > { %v847_v11 = vpop.f32.mrf.mxu2  ;;  %v946_v17 = vpop.f32.mrf.mxu1 }
 0x117   : > { %v1213_v56 = vmax.f32 %v1149_v63, 0.0  ;;  %v1017_v29 = vadd.f32 %v2386_v51, %v847_v11  ;;  %v1029_v35 = vpop.f32.mrf.mxu3 }
 0x118   : > { %v770_v12 = vpop.f32.mrf.mxu0 }
 0x119   : > { %v1891_v15 = vpack.c.bf16 %v1213_v56, %v1212_v10  ;;  %v1113_v61 = vmul.f32 %v2251_v4, %v1017_v29  ;;  %v940_v18 = vadd.f32 %v2407_v20, %v770_v12 }
 0x11b   : > { %2023 = vst [vmem:[%s2284_s23 + $0x30] sm:$0xff] %v1891_v15   ;;  %809 = vmatmul.bf16.gmra.mxu0 %v1581_v1  ;;  %v1181_v13 = vadd.f32 %v2259_v8, %v1113_v61  ;;  %889 = vmatmul.bf16.gmra.mxu2 %v1709_v14  ;;  %v1082_v51 = vmul.f32 %v2251_v4, %v940_v18 }
 0x11d   : > { %v1245_v23 = vmax.f32 %v1181_v13, 0.0  ;;  %v1150_v20 = vadd.f32 %v2259_v8, %v1082_v51 }
 0x11e   : > { %v850_v26 = vpop.f32.mrf.mxu2  ;;  %v949_v46 = vpop.f32.mrf.mxu1 }
 0x11f   : > { %v1971_v28 = vpack.c.bf16 %v1245_v23, %v1244_v22  ;;  %v1020_v24 = vadd.f32 %v2404_v25, %v850_v26  ;;  %v1214_v37 = vmax.f32 %v1150_v20, 0.0  ;;  %v1031_v45 = vpop.f32.mrf.mxu3 }
 0x120   : > { %v772_v30 = vpop.f32.mrf.mxu0 }
 0x121   : > { %v942_v31 = vadd.f32 %v941_v21, %v772_v30  ;;  %2039 = vst [vmem:[%s2284_s23 + $0xb0] sm:$0xff] %v1971_v28   ;;  %v1114_v50 = vmul.f32 %v2251_v4, %v1020_v24 }
 0x123   : > { %v1083_v32 = vmul.f32 %v2251_v4, %v942_v31  ;;  %v1182_v25 = vadd.f32 %v2259_v8, %v1114_v50 }
 0x125   : > { %v1151_v34 = vadd.f32 %v2259_v8, %v1083_v32  ;;  %v1246_v52 = vmax.f32 %v1182_v25, 0.0 }
 0x126   : > { %v852_v38 = vpop.f32.mrf.mxu2  ;;  %v951_v43 = vpop.f32.mrf.mxu1 }
 0x127   : > { %v1215_v2 = vmax.f32 %v1151_v34, 0.0  ;;  %v1022_v39 = vadd.f32 %v2420_v36, %v852_v38  ;;  %v1034_v56 = vpop.f32.mrf.mxu3 }
 0x128   : > { %v775_v21 = vpop.f32.mrf.mxu0 }
 0x129   : > { %v1896_v41 = vpack.c.bf16 %v1215_v2, %v1214_v37  ;;  %v1115_v44 = vmul.f32 %v2251_v4, %v1022_v39  ;;  %v945_v47 = vadd.f32 %v944_v58, %v775_v21 }
 0x12b   : > { %2024 = vst [vmem:[%s2284_s23 + $0x38] sm:$0xff] %v1896_v41   ;;  %v1183_v48 = vadd.f32 %v2259_v8, %v1115_v44  ;;  %v1084_v16 = vmul.f32 %v2251_v4, %v945_v47 }
 0x12d   : > { %v1247_v3 = vmax.f32 %v1183_v48, 0.0  ;;  %v1152_v49 = vadd.f32 %v2259_v8, %v1084_v16 }
 0x12e   : > { %v855_v53 = vpop.f32.mrf.mxu2  ;;  %v954_v57 = vpop.f32.mrf.mxu1 }
 0x12f   : > { %v1976_v54 = vpack.c.bf16 %v1247_v3, %v1246_v52  ;;  %v1025_v40 = vadd.f32 %v2431_v6, %v855_v53  ;;  %v1216_v42 = vmax.f32 %v1152_v49, 0.0  ;;  %v1036_v51 = vpop.f32.mrf.mxu3 }
 0x130   : > { %v777_v36 = vpop.f32.mrf.mxu0 }
 0x131   : > { %v947_v55 = vadd.f32 %v946_v17, %v777_v36  ;;  %2040 = vst [vmem:[%s2284_s23 + $0xb8] sm:$0xff] %v1976_v54   ;;  %v1116_v60 = vmul.f32 %v2251_v4, %v1025_v40 }
 0x133   : > { %v1085_v58 = vmul.f32 %v2251_v4, %v947_v55  ;;  %v1184_v11 = vadd.f32 %v2259_v8, %v1116_v60 }
 0x135   : > { %v1153_v59 = vadd.f32 %v2259_v8, %v1085_v58  ;;  %v1248_v12 = vmax.f32 %v1184_v11, 0.0 }
 0x136   : > { %v857_v63 = vpop.f32.mrf.mxu2  ;;  %v956_v10 = vpop.f32.mrf.mxu1 }
 0x137   : > { %v1217_v62 = vmax.f32 %v1153_v59, 0.0  ;;  %v1027_v5 = vadd.f32 %v1026_v19, %v857_v63  ;;  %v1039_v38 = vpop.f32.mrf.mxu3 }
 0x138   : > { %v780_v7 = vpop.f32.mrf.mxu0 }
 0x139   : > { %v1901_v0 = vpack.c.bf16 %v1217_v62, %v1216_v42  ;;  %v1117_v6 = vmul.f32 %v2251_v4, %v1027_v5  ;;  %v950_v1 = vadd.f32 %v949_v46, %v780_v7 }
 0x13b   : > { %2025 = vst [vmem:[%s2284_s23 + $0x40] sm:$0xff] %v1901_v0   ;;  %v1185_v29 = vadd.f32 %v2259_v8, %v1117_v6  ;;  %v1086_v15 = vmul.f32 %v2251_v4, %v950_v1 }
 0x13d   : > { %v1249_v14 = vmax.f32 %v1185_v29, 0.0  ;;  %v1154_v22 = vadd.f32 %v2259_v8, %v1086_v15 }
 0x13e   : > { %v860_v17 = vpop.f32.mrf.mxu2  ;;  %v959_v19 = vpop.f32.mrf.mxu1 }
 0x13f   : > { %v1981_v33 = vpack.c.bf16 %v1249_v14, %v1248_v12  ;;  %v1030_v13 = vadd.f32 %v1029_v35, %v860_v17  ;;  %v1218_v30 = vmax.f32 %v1154_v22, 0.0 }
 0x140   : > { %v782_v61 = vpop.f32.mrf.mxu0 }
 0x141   : > { %v952_v18 = vadd.f32 %v951_v43, %v782_v61  ;;  %2041 = vst [vmem:[%s2284_s23 + $0xc0] sm:$0xff] %v1981_v33   ;;  %v1118_v28 = vmul.f32 %v2251_v4, %v1030_v13 }
 0x143   : > { %v1087_v23 = vmul.f32 %v2251_v4, %v952_v18  ;;  %v1186_v50 = vadd.f32 %v2259_v8, %v1118_v28 }
 0x145   : > { %v1155_v26 = vadd.f32 %v2259_v8, %v1087_v23  ;;  %v1250_v39 = vmax.f32 %v1186_v50, 0.0 }
 0x146   : > { %v862_v46 = vpop.f32.mrf.mxu2  ;;  %v961_v34 = vpop.f32.mrf.mxu1 }
 0x147   : > { %v1219_v31 = vmax.f32 %v1155_v26, 0.0  ;;  %v1032_v24 = vadd.f32 %v1031_v45, %v862_v46 }
 0x148   : > { %v785_v20 = vpop.f32.mrf.mxu0 }
 0x149   : > { %v1906_v32 = vpack.c.bf16 %v1219_v31, %v1218_v30  ;;  %v1119_v35 = vmul.f32 %v2251_v4, %v1032_v24  ;;  %v955_v37 = vadd.f32 %v954_v57, %v785_v20  ;;  %v1041_v57 = vpop.f32.mrf.mxu3 }
 0x14b   : > { %2026 = vst [vmem:[%s2284_s23 + $0x48] sm:$0xff] %v1906_v32   ;;  %v1187_v2 = vadd.f32 %v2259_v8, %v1119_v35  ;;  %v1088_v41 = vmul.f32 %v2251_v4, %v955_v37 }
 0x14d   : > { %v1251_v21 = vmax.f32 %v1187_v2, 0.0  ;;  %v1156_v3 = vadd.f32 %v2259_v8, %v1088_v41 }
 0x14e   : > { %v865_v43 = vpop.f32.mrf.mxu2  ;;  %v964_v48 = vpop.f32.mrf.mxu1 }
 0x14f   : > { %v1986_v25 = vpack.c.bf16 %v1251_v21, %v1250_v39  ;;  %v1035_v52 = vadd.f32 %v1034_v56, %v865_v43  ;;  %v1220_v54 = vmax.f32 %v1156_v3, 0.0 }
 0x150   : > { %v787_v44 = vpop.f32.mrf.mxu0 }
 0x151   : > { %v957_v47 = vadd.f32 %v956_v10, %v787_v44  ;;  %2042 = vst [vmem:[%s2284_s23 + $0xc8] sm:$0xff] %v1986_v25   ;;  %v1120_v45 = vmul.f32 %v2251_v4, %v1035_v52  ;;  %v1044_v29 = vpop.f32.mrf.mxu3 }
 0x153   : > { %v1089_v16 = vmul.f32 %v2251_v4, %v957_v47  ;;  %v1188_v60 = vadd.f32 %v2259_v8, %v1120_v45 }
 0x155   : > { %v1157_v53 = vadd.f32 %v2259_v8, %v1089_v16  ;;  %v1252_v5 = vmax.f32 %v1188_v60, 0.0 }
 0x156   : > { %v867_v55 = vpop.f32.mrf.mxu2  ;;  %v966_v59 = vpop.f32.mrf.mxu1 }
 0x157   : > { %v1221_v36 = vmax.f32 %v1157_v53, 0.0  ;;  %v1037_v40 = vadd.f32 %v1036_v51, %v867_v55 }
 0x158   : > { %v790_v49 = vpop.f32.mrf.mxu0 }
 0x159   : > { %v1911_v58 = vpack.c.bf16 %v1221_v36, %v1220_v54  ;;  %v1121_v42 = vmul.f32 %v2251_v4, %v1037_v40  ;;  %v960_v62 = vadd.f32 %v959_v19, %v790_v49  ;;  %v1046_v31 = vpop.f32.mrf.mxu3 }
 0x15b   : > { %2027 = vst [vmem:[%s2284_s23 + $0x50] sm:$0xff] %v1911_v58   ;;  %v1189_v63 = vadd.f32 %v2259_v8, %v1121_v42  ;;  %v1090_v0 = vmul.f32 %v2251_v4, %v960_v62 }
 0x15d   : > { %v1253_v7 = vmax.f32 %v1189_v63, 0.0  ;;  %v1158_v14 = vadd.f32 %v2259_v8, %v1090_v0 }
 0x15e   : > { %v870_v10 = vpop.f32.mrf.mxu2  ;;  %v969_v1 = vpop.f32.mrf.mxu1 }
 0x15f   : > { %v1991_v56 = vpack.c.bf16 %v1253_v7, %v1252_v5  ;;  %v1040_v12 = vadd.f32 %v1039_v38, %v870_v10  ;;  %v1222_v61 = vmax.f32 %v1158_v14, 0.0 }
 0x160   : > { %v792_v11 = vpop.f32.mrf.mxu0 }
 0x161   : > { %v962_v6 = vadd.f32 %v961_v34, %v792_v11  ;;  %2043 = vst [vmem:[%s2284_s23 + $0xd0] sm:$0xff] %v1991_v56   ;;  %v1122_v33 = vmul.f32 %v2251_v4, %v1040_v12  ;;  %v1049_v43 = vpop.f32.mrf.mxu3 }
 0x163   : > { %v1091_v15 = vmul.f32 %v2251_v4, %v962_v6  ;;  %v1190_v26 = vadd.f32 %v2259_v8, %v1122_v33 }
 0x165   : > { %v1159_v17 = vadd.f32 %v2259_v8, %v1091_v15  ;;  %v1254_v24 = vmax.f32 %v1190_v26, 0.0 }
 0x166   : > { %v872_v19 = vpop.f32.mrf.mxu2  ;;  %v971_v51 = vpop.f32.mrf.mxu1 }
 0x167   : > { %v1223_v18 = vmax.f32 %v1159_v17, 0.0  ;;  %v1042_v13 = vadd.f32 %v1041_v57, %v872_v19 }
 0x168   : > { %v795_v22 = vpop.f32.mrf.mxu0 }
 0x169   : > { %v1916_v23 = vpack.c.bf16 %v1223_v18, %v1222_v61  ;;  %v1123_v28 = vmul.f32 %v2251_v4, %v1042_v13  ;;  %v965_v30 = vadd.f32 %v964_v48, %v795_v22 }
 0x16b   : > { %2028 = vst [vmem:[%s2284_s23 + $0x58] sm:$0xff] %v1916_v23   ;;  %v1191_v46 = vadd.f32 %v2259_v8, %v1123_v28  ;;  %v1092_v32 = vmul.f32 %v2251_v4, %v965_v30 }
 0x16d   : > { %v1255_v20 = vmax.f32 %v1191_v46, 0.0  ;;  %v1160_v39 = vadd.f32 %v2259_v8, %v1092_v32 }
 0x16e   : > { %v875_v34 = vpop.f32.mrf.mxu2  ;;  %v974_v2 = vpop.f32.mrf.mxu1 }
 0x16f   : > { %v1996_v50 = vpack.c.bf16 %v1255_v20, %v1254_v24  ;;  %v1045_v38 = vadd.f32 %v1044_v29, %v875_v34  ;;  %v1224_v44 = vmax.f32 %v1160_v39, 0.0 }
 0x170   : > { %v797_v35 = vpop.f32.mrf.mxu0 }
 0x171   : > { %v967_v37 = vadd.f32 %v966_v59, %v797_v35  ;;  %2044 = vst [vmem:[%s2284_s23 + $0xd8] sm:$0xff] %v1996_v50   ;;  %v1124_v25 = vmul.f32 %v2251_v4, %v1045_v38  ;;  %v1051_v59 = vpop.f32.mrf.mxu3 }
 0x173   : > { %v1093_v21 = vmul.f32 %v2251_v4, %v967_v37  ;;  %v1192_v45 = vadd.f32 %v2259_v8, %v1124_v25 }
 0x175   : > { %v1161_v41 = vadd.f32 %v2259_v8, %v1093_v21  ;;  %v1256_v57 = vmax.f32 %v1192_v45, 0.0 }
 0x176   : > { %v877_v48 = vpop.f32.mrf.mxu2  ;;  %v976_v53 = vpop.f32.mrf.mxu1 }
 0x177   : > { %v1225_v47 = vmax.f32 %v1161_v41, 0.0  ;;  %v1047_v52 = vadd.f32 %v1046_v31, %v877_v48 }
 0x178   : > { %v800_v3 = vpop.f32.mrf.mxu0 }
 0x179   : > { %v1921_v16 = vpack.c.bf16 %v1225_v47, %v1224_v44  ;;  %v1125_v54 = vmul.f32 %v2251_v4, %v1047_v52  ;;  %v970_v36 = vadd.f32 %v969_v1, %v800_v3  ;;  %v1054_v15 = vpop.f32.mrf.mxu3 }
 0x17b   : > { %2029 = vst [vmem:[%s2284_s23 + $0x60] sm:$0xff] %v1921_v16   ;;  %v1193_v55 = vadd.f32 %v2259_v8, %v1125_v54  ;;  %v1094_v49 = vmul.f32 %v2251_v4, %v970_v36  ;;  %v2068_v16 = vld [vmem:[%s2552_s2] ss:$0 sm:$0xff] }
 0x17d   : > { %v1257_v40 = vmax.f32 %v1193_v55, 0.0  ;;  %v1162_v7 = vadd.f32 %v2259_v8, %v1094_v49 }
 0x17e   : > { %v880_v58 = vpop.f32.mrf.mxu2  ;;  %v979_v63 = vpop.f32.mrf.mxu1 }
 0x17f   : > { %v2001_v60 = vpack.c.bf16 %v1257_v40, %v1256_v57  ;;  %v1050_v5 = vadd.f32 %v1049_v43, %v880_v58  ;;  %v1226_v11 = vmax.f32 %v1162_v7, 0.0 }
 0x180   : > { %v802_v42 = vpop.f32.mrf.mxu0 }
 0x181   : > { %v972_v62 = vadd.f32 %v971_v51, %v802_v42  ;;  %2045 = vst [vmem:[%s2284_s23 + $0xe0] sm:$0xff] %v2001_v60   ;;  %v1126_v56 = vmul.f32 %v2251_v4, %v1050_v5  ;;  %v1056_v20 = vpop.f32.mrf.mxu3 }
 0x183   : > { %v1095_v0 = vmul.f32 %v2251_v4, %v972_v62  ;;  %v1194_v33 = vadd.f32 %v2259_v8, %v1126_v56 }
 0x185   : > { %v1163_v10 = vadd.f32 %v2259_v8, %v1095_v0  ;;  %v1258_v13 = vmax.f32 %v1194_v33, 0.0 }
 0x186   : > { %v882_v1 = vpop.f32.mrf.mxu2  ;;  %v981_v17 = vpop.f32.mrf.mxu1 }
 0x187   : > { %v1227_v6 = vmax.f32 %v1163_v10, 0.0  ;;  %v1052_v29 = vadd.f32 %v1051_v59, %v882_v1 }
 0x188   : > { %v805_v12 = vpop.f32.mrf.mxu0 }
 0x189   : > { %v1926_v14 = vpack.c.bf16 %v1227_v6, %v1226_v11  ;;  %v1127_v61 = vmul.f32 %v2251_v4, %v1052_v29  ;;  %v975_v18 = vadd.f32 %v974_v2, %v805_v12  ;;  %v1059_v45 = vpop.f32.mrf.mxu3 }
 0x18b   : > { %2030 = vst [vmem:[%s2284_s23 + $0x68] sm:$0xff] %v1926_v14   ;;  %v1195_v19 = vadd.f32 %v2259_v8, %v1127_v61  ;;  %v1096_v23 = vmul.f32 %v2251_v4, %v975_v18 }
 0x18d   : > { %v1259_v22 = vmax.f32 %v1195_v19, 0.0  ;;  %v1164_v24 = vadd.f32 %v2259_v8, %v1096_v23 }
 0x18e   : > { %v885_v51 = vpop.f32.mrf.mxu2  ;;  %v984_v31 = vpop.f32.mrf.mxu1 }
 0x18f   : > { %v2006_v26 = vpack.c.bf16 %v1259_v22, %v1258_v13  ;;  %v1055_v46 = vadd.f32 %v1054_v15, %v885_v51  ;;  %v985_v34 = vadd.f32 %v984_v31, %v2261_v9  ;;  %v1228_v37 = vmax.f32 %v1164_v24, 0.0 }
 0x190   : > { %v807_v28 = vpop.f32.mrf.mxu0 }
 0x191   : > { %v977_v30 = vadd.f32 %v976_v53, %v807_v28  ;;  %2046 = vst [vmem:[%s2284_s23 + $0xe8] sm:$0xff] %v2006_v26   ;;  %v1128_v35 = vmul.f32 %v2251_v4, %v1055_v46  ;;  %v1100_v39 = vmul.f32 %v2251_v4, %v985_v34  ;;  %v1061_v10 = vpop.f32.mrf.mxu3 }
 0x193   : > { %v1097_v32 = vmul.f32 %v2251_v4, %v977_v30  ;;  %v1196_v44 = vadd.f32 %v2259_v8, %v1128_v35  ;;  %v1168_v52 = vadd.f32 %v2259_v8, %v1100_v39 }
 0x195   : > { %v1165_v50 = vadd.f32 %v2259_v8, %v1097_v32  ;;  %v1260_v54 = vmax.f32 %v1196_v44, 0.0  ;;  %v1232_v40 = vmax.f32 %v1168_v52, 0.0 }
 0x196   : > { %v887_v38 = vpop.f32.mrf.mxu2  ;;  %v986_v25 = vpop.f32.mrf.mxu1 }
 0x197   : > { %v1229_v2 = vmax.f32 %v1165_v50, 0.0  ;;  %v1057_v21 = vadd.f32 %v1056_v20, %v887_v38  ;;  %v987_v48 = vadd.f32 %v986_v25, %v2278_v27 }
 0x198   : > { %v810_v41 = vpop.f32.mrf.mxu0 }
 0x199   : > { %v1931_v43 = vpack.c.bf16 %v1229_v2, %v1228_v37  ;;  %v1129_v47 = vmul.f32 %v2251_v4, %v1057_v21  ;;  %v980_v9 = vadd.f32 %v979_v63, %v810_v41  ;;  %v1101_v53 = vmul.f32 %v2068_v16, %v987_v48  ;;  %v2069_v4 = vld [vmem:[%s2553_s3] ss:$0 sm:$0xff] }
 0x19b   : > { %2031 = vst [vmem:[%s2284_s23 + $0x70] sm:$0xff] %v1931_v43   ;;  %v1197_v3 = vadd.f32 %v2259_v8, %v1129_v47  ;;  %v1169_v27 = vadd.f32 %v2069_v4, %v1101_v53  ;;  %v1098_v55 = vmul.f32 %v2068_v16, %v980_v9 }
 0x19d   : > { %v1261_v36 = vmax.f32 %v1197_v3, 0.0  ;;  %v1233_v58 = vmax.f32 %v1169_v27, 0.0  ;;  %v1166_v62 = vadd.f32 %v2069_v4, %v1098_v55 }
 0x19e   : > { %v890_v57 = vpop.f32.mrf.mxu2 }
 0x19f   : > { %v2011_v49 = vpack.c.bf16 %v1261_v36, %v1260_v54  ;;  %v1941_v60 = vpack.c.bf16 %v1233_v58, %v1232_v40  ;;  %v1060_v42 = vadd.f32 %v1059_v45, %v890_v57  ;;  %v1230_v0 = vmax.f32 %v1166_v62, 0.0 }
 0x1a0   : > { %v812_v8 = vpop.f32.mrf.mxu0 }
 0x1a1   : > { %v982_v59 = vadd.f32 %v981_v17, %v812_v8  ;;  %2047 = vst [vmem:[%s2284_s23 + $0xf0] sm:$0xff] %v2011_v49   ;;  %v1130_v7 = vmul.f32 %v2068_v16, %v1060_v42 }
 0x1a2   : > { %2033 = vst [vmem:[%s2284_s23 + $0x80] sm:$0xff] %v1941_v60  }
 0x1a3   : > { %v1099_v63 = vmul.f32 %v2068_v16, %v982_v59  ;;  %v1198_v29 = vadd.f32 %v2069_v4, %v1130_v7 }
 0x1a5   : > { %v1167_v5 = vadd.f32 %v2069_v4, %v1099_v63  ;;  %v1262_v15 = vmax.f32 %v1198_v29, 0.0 }
 0x1a6   : > { %v892_v11 = vpop.f32.mrf.mxu2 }
 0x1a7   : > { %v1231_v56 = vmax.f32 %v1167_v5, 0.0  ;;  %v1062_v6 = vadd.f32 %v1061_v10, %v892_v11 }
 0x1a9   : > { %v1936_v1 = vpack.c.bf16 %v1231_v56, %v1230_v0  ;;  %v1131_v12 = vmul.f32 %v2068_v16, %v1062_v6 }
 0x1ab   : > { %2032 = vst [vmem:[%s2284_s23 + $0x78] sm:$0xff] %v1936_v1   ;;  %v1199_v14 = vadd.f32 %v2069_v4, %v1131_v12 }
 0x1ad   : > { %v1263_v17 = vmax.f32 %v1199_v14, 0.0 }
 0x1af   : > { %v2016_v33 = vpack.c.bf16 %v1263_v17, %v1262_v15 }
 0x1b1   : > { %2048 = vst [vmem:[%s2284_s23 + $0xf8] sm:$0xff] %v2016_v33  }
 0x1b2 PF: > { %s14_s15 = sadd.s32 1, %s2076_s15  }
 0x1b3   : > { %p11_p4 = scmp.ge.s32.totalorder %s14_s15, 6  }
 0x1b5   :  { %13 = sbr.rel (!%p11_p4) target bundleno = 1 (0x1), region = 66 }

// kernel: _lambda_.12
= control target key start
LH: loop header
LB: loop body
LE: loop exit
PB: predicated region body
PF: predicated region fallthrough
CT: control target
= control target key end

     0   :  { %s2522_s18 = smov 0   ;;  %s3051_s0 = inlined_call_operand.vmem [shape: bf16[2048,144], index: 0, kind: input, shape index: {}]   ;;  %s3052_s1 = inlined_call_operand.vmem [shape: bf16[144,128], index: 1, kind: input, shape index: {}]   ;;  %s3053_s2 = inlined_call_operand.vmem [shape: f32[1,128], index: 2, kind: input, shape index: {}]   ;;  %s3054_s3 = inlined_call_operand.vmem [shape: f32[1,128], index: 3, kind: input, shape index: {}]   ;;  %s3055_s4 = inlined_call_operand.vmem [shape: bf16[2048,128], index: 4, kind: input, shape index: {}]   ;;  %s3056_s5 = inlined_call_operand.vmem [shape: bf16[2048,128], index: 5, kind: output, shape index: {}]  }
   0x1 LB: > { %s1701_s19 = sadd.s32 4294967295, %s2490_s18   ;;  %p1705_p0 = scmp.ge.s32.totalorder %s2490_s18, 1  ;;  %s2490_s18 = sphi %s2522_s18, %s15_s18  }
   0x2   : > { %p200_p1 = scmp.lt.s32.totalorder %s2490_s18, 5 }
   0x4   : > { %p201_p2 = pnand %p1705_p0, %p200_p1 }
   0x5   : > { %s1706_s24 = sshll.u32 (!%p201_p2), %s1701_s19, 6 }
   0x6   : > { %204 = sbr.rel (%p201_p2) target bundleno = 436 (0x1b4), region = 40  ;;  %p235_p3 = scmp.lt.s32.totalorder (!%p201_p2), %s1706_s24, 255 }
   0xb   : > { %v2111_v0 = vld [vmem:[%s3052_s1 + $0x38] sm:$0xff]  ;;  %v2112_v1 = vld [vmem:[%s3052_s1 + $0x40] sm:$0xff]  ;;  %v2110_v2 = vld [vmem:[%s3052_s1 + $0x30] sm:$0xff]  ;;  %s3058_s24 = smov (!%p235_p3, %s1706_s24), 255  ;;  %vm678_vm0 = vcmask 130048  }
   0xc   : > { %775 = vmatpush.bf16.msra.mxu0 %v2111_v0  ;;  %2463 = vmatpush.bf16.msra.mxu2 %v2111_v0  ;;  %s2039_s27 = sshll.u32 %s3058_s24, 3  ;;  %v2109_v3 = vld [vmem:[%s3052_s1 + $0x28] sm:$0xff]  ;;  %v2108_v7 = vld [vmem:[%s3052_s1 + $0x20] sm:$0xff]  ;;  %v2107_v11 = vld [vmem:[%s3052_s1 + $0x18] sm:$0xff]  ;;  %s1710_s19 = sshll.u32 %s3058_s24, 2 }
   0xd   : > { %951 = vmatpush.bf16.msra.mxu1 %v2112_v1  ;;  %2471 = vmatpush.bf16.msra.mxu3 %v2112_v1  ;;  %s2545_s30 = scalar_lea.vmem %s3051_s0, %s2039_s27  ;;  %v2106_v12 = vld [vmem:[%s3052_s1 + $0x10] sm:$0xff]  ;;  %v2105_v16 = vld [vmem:[%s3052_s1 + $0x8] sm:$0xff]  ;;  %v2104_v20 = vld [vmem:[%s3052_s1] sm:$0xff]  ;;  %s2678_s25 = scalar_lea.vmem %s3055_s4, %s1710_s19 }
   0xe   : > { %v2040_v4 = vld [vmem:[%s2545_s30 + $0x4] sm:$0xf]  ;;  %v1717_v5 = vld [vmem:[%s2545_s30 + $0x8] sm:$0xf0]  ;;  %v2074_v8 = vld [vmem:[%s2545_s30 + $0x114] sm:$0xf]  ;;  %s2715_s6 = scalar_lea.vmem %s3056_s5, %s1710_s19 }
   0xf   : > { %v1720_v6 = vor.u32 %v2040_v4, %v1717_v5  ;;  %v1853_v9 = vld [vmem:[%s2545_s30 + $0x118] sm:$0xf0]  ;;  %v2042_v13 = vld [vmem:[%s2545_s30 + $0x14] sm:$0xf]  ;;  %v2076_v17 = vld [vmem:[%s2545_s30 + $0x124] sm:$0xf] }
  0x10   : > { %776 = vmatpush.bf16.msra.mxu0 %v2110_v2  ;;  %2464 = vmatpush.bf16.msra.mxu2 %v2110_v2  ;;  %v1856_v10 = vor.u32 %v2074_v8, %v1853_v9  ;;  %v1725_v14 = vld [vmem:[%s2545_s30 + $0x18] sm:$0xf0]  ;;  %v1861_v18 = vld [vmem:[%s2545_s30 + $0x128] sm:$0xf0]  ;;  %v1715_v21 = vld [vmem:[%s2545_s30] sm:$0xf] }
  0x11   : > { %2005 = vmatmul.msk.bf16.vlgmr.msra.gmra.mxu1 %vm678_vm0, %v1720_v6  ;;  %v1728_v15 = vor.u32 %v2042_v13, %v1725_v14  ;;  %v1864_v19 = vor.u32 %v2076_v17, %v1861_v18  ;;  %v2041_v22 = vld [vmem:[%s2545_s30 + $0x4] sm:$0xf0]  ;;  %v1843_v23 = vld [vmem:[%s2545_s30 + $0x100] sm:$0xf]  ;;  %v2044_v27 = vld [vmem:[%s2545_s30 + $0x24] sm:$0xf] }
  0x12   : > { %2022 = vmatmul.msk.bf16.vlgmr.msra.gmra.mxu3 %vm678_vm0, %v1856_v10  ;;  %v2073_v24 = vld [vmem:[%s2545_s30 + $0x104] sm:$0xf0]  ;;  %v1716_v25 = vor.u32 %v2041_v22, %v1715_v21  ;;  %v1733_v28 = vld [vmem:[%s2545_s30 + $0x28] sm:$0xf0]  ;;  %v2078_v30 = vld [vmem:[%s2545_s30 + $0x134] sm:$0xf] }
  0x13   : > { %v1844_v26 = vor.u32 %v2073_v24, %v1843_v23  ;;  %v1736_v29 = vor.u32 %v2044_v27, %v1733_v28  ;;  %v1869_v31 = vld [vmem:[%s2545_s30 + $0x138] sm:$0xf0]  ;;  %v1723_v33 = vld [vmem:[%s2545_s30 + $0x10] sm:$0xf]  ;;  %v2043_v34 = vld [vmem:[%s2545_s30 + $0x14] sm:$0xf0] }
  0x14   : > { %777 = vmatpush.bf16.msra.mxu0 %v2109_v3  ;;  %2465 = vmatpush.bf16.msra.mxu2 %v2109_v3  ;;  %v1872_v32 = vor.u32 %v2078_v30, %v1869_v31  ;;  %v1851_v35 = vld [vmem:[%s2545_s30 + $0x110] sm:$0xf]  ;;  %v2075_v36 = vld [vmem:[%s2545_s30 + $0x114] sm:$0xf0]  ;;  %v1724_v37 = vor.u32 %v2043_v34, %v1723_v33  ;;  %v2046_v39 = vld [vmem:[%s2545_s30 + $0x34] sm:$0xf] }
  0x15   : > { %v1852_v38 = vor.u32 %v2075_v36, %v1851_v35  ;;  %v1741_v40 = vld [vmem:[%s2545_s30 + $0x38] sm:$0xf0]  ;;  %v2080_v42 = vld [vmem:[%s2545_s30 + $0x144] sm:$0xf]  ;;  %v1877_v43 = vld [vmem:[%s2545_s30 + $0x148] sm:$0xf0] }
  0x16   : > { %v1744_v41 = vor.u32 %v2046_v39, %v1741_v40  ;;  %v1880_v44 = vor.u32 %v2080_v42, %v1877_v43  ;;  %v1731_v45 = vld [vmem:[%s2545_s30 + $0x20] sm:$0xf]  ;;  %v2045_v46 = vld [vmem:[%s2545_s30 + $0x24] sm:$0xf0]  ;;  %v2048_v51 = vld [vmem:[%s2545_s30 + $0x44] sm:$0xf] }
  0x17   : > { %v1859_v47 = vld [vmem:[%s2545_s30 + $0x120] sm:$0xf]  ;;  %v2077_v48 = vld [vmem:[%s2545_s30 + $0x124] sm:$0xf0]  ;;  %v1732_v49 = vor.u32 %v2045_v46, %v1731_v45  ;;  %v1749_v52 = vld [vmem:[%s2545_s30 + $0x48] sm:$0xf0] }
  0x18   : > { %778 = vmatpush.bf16.msra.mxu0 %v2108_v7  ;;  %2466 = vmatpush.bf16.msra.mxu2 %v2108_v7  ;;  %v1860_v50 = vor.u32 %v2077_v48, %v1859_v47  ;;  %v1752_v53 = vor.u32 %v2048_v51, %v1749_v52  ;;  %v2082_v54 = vld [vmem:[%s2545_s30 + $0x154] sm:$0xf]  ;;  %v1885_v55 = vld [vmem:[%s2545_s30 + $0x158] sm:$0xf0]  ;;  %v1739_v57 = vld [vmem:[%s2545_s30 + $0x30] sm:$0xf] }
  0x19   : > { %v1888_v56 = vor.u32 %v2082_v54, %v1885_v55  ;;  %v2047_v58 = vld [vmem:[%s2545_s30 + $0x34] sm:$0xf0]  ;;  %v1867_v59 = vld [vmem:[%s2545_s30 + $0x130] sm:$0xf]  ;;  %v2050_v63 = vld [vmem:[%s2545_s30 + $0x54] sm:$0xf] }
  0x1a   : > { %v2079_v60 = vld [vmem:[%s2545_s30 + $0x134] sm:$0xf0]  ;;  %v1740_v61 = vor.u32 %v2047_v58, %v1739_v57  ;;  %v1757_v0 = vld [vmem:[%s2545_s30 + $0x58] sm:$0xf0]  ;;  %v2084_v2 = vld [vmem:[%s2545_s30 + $0x164] sm:$0xf] }
  0x1b   : > { %v1868_v62 = vor.u32 %v2079_v60, %v1867_v59  ;;  %v1760_v1 = vor.u32 %v2050_v63, %v1757_v0  ;;  %v1893_v3 = vld [vmem:[%s2545_s30 + $0x168] sm:$0xf0]  ;;  %v1747_v5 = vld [vmem:[%s2545_s30 + $0x40] sm:$0xf]  ;;  %v2049_v6 = vld [vmem:[%s2545_s30 + $0x44] sm:$0xf0] }
  0x1c   : > { %779 = vmatpush.bf16.msra.mxu0 %v2107_v11  ;;  %2467 = vmatpush.bf16.msra.mxu2 %v2107_v11  ;;  %v1896_v4 = vor.u32 %v2084_v2, %v1893_v3  ;;  %v1875_v7 = vld [vmem:[%s2545_s30 + $0x140] sm:$0xf]  ;;  %v2081_v8 = vld [vmem:[%s2545_s30 + $0x144] sm:$0xf0]  ;;  %v1748_v9 = vor.u32 %v2049_v6, %v1747_v5  ;;  %v2052_v11 = vld [vmem:[%s2545_s30 + $0x64] sm:$0xf] }
  0x1d   : > { %v1876_v10 = vor.u32 %v2081_v8, %v1875_v7  ;;  %v2086_v14 = vld [vmem:[%s2545_s30 + $0x174] sm:$0xf]  ;;  %v1755_v17 = vld [vmem:[%s2545_s30 + $0x50] sm:$0xf]  ;;  %v2051_v18 = vld [vmem:[%s2545_s30 + $0x54] sm:$0xf0] }
  0x1e   : > { %v1756_v21 = vor.u32 %v2051_v18, %v1755_v17  ;;  %v2054_v23 = vld [vmem:[%s2545_s30 + $0x74] sm:$0xf]  ;;  %v1773_v24 = vld [vmem:[%s2545_s30 + $0x78] sm:$0xf0]  ;;  %v1909_v27 = vld [vmem:[%s2545_s30 + $0x188] sm:$0xf0] }
  0x1f   : > { %v2053_v30 = vld [vmem:[%s2545_s30 + $0x64] sm:$0xf0]  ;;  %v1891_v31 = vld [vmem:[%s2545_s30 + $0x160] sm:$0xf]  ;;  %v2056_v35 = vld [vmem:[%s2545_s30 + $0x84] sm:$0xf] }
  0x20   : > { %780 = vmatpush.bf16.msra.mxu0 %v2106_v12  ;;  %2468 = vmatpush.bf16.msra.mxu2 %v2106_v12  ;;  %v1765_v12 = vld [vmem:[%s2545_s30 + $0x68] sm:$0xf0]  ;;  %v2090_v39 = vld [vmem:[%s2545_s30 + $0x194] sm:$0xf]  ;;  %v1917_v40 = vld [vmem:[%s2545_s30 + $0x198] sm:$0xf0] }
  0x21   : > { %2006 = vmatmul.msk.bf16.gmra.mxu1 %vm678_vm0, %v1728_v15  ;;  %v1768_v13 = vor.u32 %v2052_v11, %v1765_v12  ;;  %v1901_v15 = vld [vmem:[%s2545_s30 + $0x178] sm:$0xf0]  ;;  %v1781_v36 = vld [vmem:[%s2545_s30 + $0x88] sm:$0xf0]  ;;  %v1771_v42 = vld [vmem:[%s2545_s30 + $0x70] sm:$0xf] }
  0x22   : > { %2023 = vmatmul.msk.bf16.gmra.mxu3 %vm678_vm0, %v1864_v19  ;;  %v1883_v19 = vld [vmem:[%s2545_s30 + $0x150] sm:$0xf]  ;;  %v2055_v43 = vld [vmem:[%s2545_s30 + $0x74] sm:$0xf0]  ;;  %v1789_v51 = vld [vmem:[%s2545_s30 + $0x98] sm:$0xf0] }
  0x23   : > { %v2087_v45 = vld [vmem:[%s2545_s30 + $0x174] sm:$0xf0]  ;;  %v1772_v46 = vor.u32 %v2055_v43, %v1771_v42  ;;  %v2092_v54 = vld [vmem:[%s2545_s30 + $0x1a4] sm:$0xf]  ;;  %v1925_v55 = vld [vmem:[%s2545_s30 + $0x1a8] sm:$0xf0] }
  0x24   : > { %781 = vmatpush.bf16.msra.mxu0 %v2105_v16  ;;  %2469 = vmatpush.bf16.msra.mxu2 %v2105_v16  ;;  %v1904_v16 = vor.u32 %v2086_v14, %v1901_v15  ;;  %v1928_v57 = vor.u32 %v2092_v54, %v1925_v55  ;;  %v1779_v58 = vld [vmem:[%s2545_s30 + $0x80] sm:$0xf]  ;;  %v2057_v59 = vld [vmem:[%s2545_s30 + $0x84] sm:$0xf0]  ;;  %v2060_v7 = vld [vmem:[%s2545_s30 + $0xa4] sm:$0xf] }
  0x25   : > { %v1907_v60 = vld [vmem:[%s2545_s30 + $0x180] sm:$0xf]  ;;  %v1797_v8 = vld [vmem:[%s2545_s30 + $0xa8] sm:$0xf0]  ;;  %v2094_v17 = vld [vmem:[%s2545_s30 + $0x1b4] sm:$0xf] }
  0x26   : > { %v2669_v2 = vld [vmem:[%s3053_s2] ss:$0 sm:$0xff]  ;;  %v1800_v12 = vor.u32 %v2060_v7, %v1797_v8  ;;  %v1933_v18 = vld [vmem:[%s2545_s30 + $0x1b8] sm:$0xf0]  ;;  %v2401_v43 = vld [vmem:[%s2678_s25 + $0x8] sm:$0xff]  }
  0x27   : > { %v2684_v6 = vld [vmem:[%s3054_s3] ss:$0 sm:$0xff]  ;;  %v1805_v42 = vld [vmem:[%s2545_s30 + $0xb8] sm:$0xf0]  ;;  %v1941_v54 = vld [vmem:[%s2545_s30 + $0x1c8] sm:$0xf0] }
  0x28   : > { %782 = vmatpush.bf16.msra.mxu0 %v2104_v20  ;;  %2470 = vmatpush.bf16.msra.mxu2 %v2104_v20  ;;  %v2083_v20 = vld [vmem:[%s2545_s30 + $0x154] sm:$0xf0] }
  0x29   : > { %v1884_v22 = vor.u32 %v2083_v20, %v1883_v19 }
  0x2b   : > { %783 = vmatmul.bf16.vlgmr.msra.gmra.mxu0 %v1716_v25  ;;  %863 = vmatmul.bf16.vlgmr.msra.gmra.mxu2 %v1844_v26  ;;  %v1776_v25 = vor.u32 %v2054_v23, %v1773_v24  ;;  %v2088_v26 = vld [vmem:[%s2545_s30 + $0x184] sm:$0xf]  ;;  %v1787_v23 = vld [vmem:[%s2545_s30 + $0x90] sm:$0xf]  ;;  %v2059_v24 = vld [vmem:[%s2545_s30 + $0x94] sm:$0xf0] }
  0x2c   : > { %v1912_v28 = vor.u32 %v2088_v26, %v1909_v27  ;;  %v1915_v27 = vld [vmem:[%s2545_s30 + $0x190] sm:$0xf] }
  0x31   : > { %2007 = vmatmul.msk.bf16.gmra.mxu1 %vm678_vm0, %v1736_v29  ;;  %v1763_v29 = vld [vmem:[%s2545_s30 + $0x60] sm:$0xf] }
  0x32   : > { %2024 = vmatmul.msk.bf16.gmra.mxu3 %vm678_vm0, %v1872_v32  ;;  %v2085_v32 = vld [vmem:[%s2545_s30 + $0x164] sm:$0xf0]  ;;  %v1764_v33 = vor.u32 %v2053_v30, %v1763_v29 }
  0x33   : > { %v1892_v34 = vor.u32 %v2085_v32, %v1891_v31  ;;  %v1788_v31 = vor.u32 %v2059_v24, %v1787_v23 }
  0x3b   : > { %788 = vmatmul.bf16.gmra.mxu0 %v1724_v37  ;;  %868 = vmatmul.bf16.gmra.mxu2 %v1852_v38  ;;  %v1784_v37 = vor.u32 %v2056_v35, %v1781_v36 }
  0x41   : > { %2008 = vmatmul.msk.bf16.gmra.mxu1 %vm678_vm0, %v1744_v41  ;;  %v1920_v41 = vor.u32 %v2090_v39, %v1917_v40 }
  0x42   : > { %2025 = vmatmul.msk.bf16.gmra.mxu3 %vm678_vm0, %v1880_v44  ;;  %v1899_v44 = vld [vmem:[%s2545_s30 + $0x170] sm:$0xf] }
  0x43   : > { %v1900_v47 = vor.u32 %v2087_v45, %v1899_v44 }
  0x4b   : > { %793 = vmatmul.bf16.gmra.mxu0 %v1732_v49  ;;  %873 = vmatmul.bf16.gmra.mxu2 %v1860_v50  ;;  %v2058_v50 = vld [vmem:[%s2545_s30 + $0x94] sm:$0xf] }
  0x4c   : > { %v1792_v52 = vor.u32 %v2058_v50, %v1789_v51  ;;  %v2119_v50 = vunpack.c.l.bf16 %v2401_v43 }
  0x51   : > { %2009 = vmatmul.msk.bf16.gmra.mxu1 %vm678_vm0, %v1752_v53 }
  0x52   : > { %2026 = vmatmul.msk.bf16.gmra.mxu3 %vm678_vm0, %v1888_v56 }
  0x5b   : > { %798 = vmatmul.bf16.gmra.mxu0 %v1740_v61  ;;  %878 = vmatmul.bf16.gmra.mxu2 %v1868_v62  ;;  %v2089_v61 = vld [vmem:[%s2545_s30 + $0x184] sm:$0xf0]  ;;  %v1780_v62 = vor.u32 %v2057_v59, %v1779_v58  ;;  %v2120_v58 = vunpack.c.h.bf16 %v2401_v43  ;;  %v2098_v43 = vld [vmem:[%s2545_s30 + $0x1d4] sm:$0xf] }
  0x5c   : > { %v1908_v0 = vor.u32 %v2089_v61, %v1907_v60  ;;  %v1795_v60 = vld [vmem:[%s2545_s30 + $0xa0] sm:$0xf]  ;;  %v2061_v61 = vld [vmem:[%s2545_s30 + $0xa4] sm:$0xf0] }
  0x5d   : > { %v1796_v8 = vor.u32 %v2061_v61, %v1795_v60 }
  0x61   : > { %2010 = vmatmul.msk.bf16.gmra.mxu1 %vm678_vm0, %v1760_v1 }
  0x62   : > { %2027 = vmatmul.msk.bf16.gmra.mxu3 %vm678_vm0, %v1896_v4 }
  0x6b   : > { %803 = vmatmul.bf16.gmra.mxu0 %v1748_v9  ;;  %883 = vmatmul.bf16.gmra.mxu2 %v1876_v10  ;;  %v2114_v9 = vld [vmem:[%s2678_s25] sm:$0xff]  }
  0x6c   : > { %v2115_v14 = vunpack.c.l.bf16 %v2114_v9 }
  0x71   : > { %2011 = vmatmul.msk.bf16.gmra.mxu1 %vm678_vm0, %v1768_v13 }
  0x72   : > { %2028 = vmatmul.msk.bf16.gmra.mxu3 %vm678_vm0, %v1904_v16 }
  0x7b   : > { %808 = vmatmul.bf16.gmra.mxu0 %v1756_v21  ;;  %888 = vmatmul.bf16.gmra.mxu2 %v1884_v22  ;;  %v2116_v21 = vunpack.c.h.bf16 %v2114_v9  ;;  %v1936_v22 = vor.u32 %v2094_v17, %v1933_v18 }
  0x81   : > { %2012 = vmatmul.msk.bf16.gmra.mxu1 %vm678_vm0, %v1776_v25 }
  0x82   : > { %2029 = vmatmul.msk.bf16.gmra.mxu3 %vm678_vm0, %v1912_v28  ;;  %v2091_v28 = vld [vmem:[%s2545_s30 + $0x194] sm:$0xf0] }
  0x8b   : > { %813 = vmatmul.bf16.gmra.mxu0 %v1764_v33  ;;  %893 = vmatmul.bf16.gmra.mxu2 %v1892_v34  ;;  %v1916_v33 = vor.u32 %v2091_v28, %v1915_v27  ;;  %v2064_v27 = vld [vmem:[%s2545_s30 + $0xc4] sm:$0xf] }
  0x8e   : > { %v953_v38 = vpop.f32.mrf.mxu1 }
  0x91   : > { %2013 = vmatmul.msk.bf16.gmra.mxu1 %vm678_vm0, %v1784_v37 }
  0x92   : > { %2030 = vmatmul.msk.bf16.gmra.mxu3 %vm678_vm0, %v1920_v41  ;;  %v2062_v41 = vld [vmem:[%s2545_s30 + $0xb4] sm:$0xf] }
  0x95   : > { %v2651_v49 = vpop.f32.mrf.mxu3 }
  0x96   : > { %v955_v48 = vpop.f32.mrf.mxu1 }
  0x9b   : > { %818 = vmatmul.bf16.gmra.mxu0 %v1772_v46  ;;  %898 = vmatmul.bf16.gmra.mxu2 %v1900_v47  ;;  %v1808_v47 = vor.u32 %v2062_v41, %v1805_v42 }
  0x9d   : > { %v2657_v56 = vpop.f32.mrf.mxu3 }
  0x9e   : > { %v958_v53 = vpop.f32.mrf.mxu1 }
  0xa1   : > { %2014 = vmatmul.msk.bf16.gmra.mxu1 %vm678_vm0, %v1792_v52 }
  0xa2   : > { %2031 = vmatmul.msk.bf16.gmra.mxu3 %vm678_vm0, %v1928_v57 }
  0xa5   : > { %v2671_v4 = vpop.f32.mrf.mxu3 }
  0xa6   : > { %v960_v3 = vpop.f32.mrf.mxu1 }
  0xa8   : > { %v784_v63 = vpop.f32.mrf.mxu0 }
  0xa9   : > { %v954_v1 = vadd.f32 %v953_v38, %v784_v63  ;;  %v2417_v63 = vld [vmem:[%s2678_s25 + $0x88] sm:$0xff]  }
  0xab   : > { %823 = vmatmul.bf16.gmra.mxu0 %v1780_v62  ;;  %903 = vmatmul.bf16.gmra.mxu2 %v1908_v0  ;;  %v1117_v5 = vmul.f32 %v2669_v2, %v954_v1  ;;  %v1923_v1 = vld [vmem:[%s2545_s30 + $0x1a0] sm:$0xf] }
  0xad   : > { %v1185_v13 = vadd.f32 %v2684_v6, %v1117_v5  ;;  %v2696_v19 = vpop.f32.mrf.mxu3 }
  0xae   : > { %v2689_v10 = vpop.f32.mrf.mxu2  ;;  %v2692_v16 = vpop.f32.mrf.mxu1 }
  0xaf   : > { %v1377_v25 = vadd.f32 %v2115_v14, %v1185_v13 }
  0xb0   : > { %v786_v11 = vpop.f32.mrf.mxu0 }
  0xb1   : > { %v956_v15 = vadd.f32 %v955_v48, %v786_v11  ;;  %2015 = vmatmul.msk.bf16.gmra.mxu1 %vm678_vm0, %v1800_v12  ;;  %v1441_v34 = vmax.f32 %v1377_v25, 0.0  ;;  %v2183_v11 = vunpack.c.l.bf16 %v2417_v63 }
  0xb2   : > { %2032 = vmatmul.msk.bf16.gmra.mxu3 %vm678_vm0, %v1936_v22  ;;  %v2184_v22 = vunpack.c.h.bf16 %v2417_v63 }
  0xb3   : > { %v1118_v20 = vmul.f32 %v2669_v2, %v956_v15 }
  0xb5   : > { %v1186_v26 = vadd.f32 %v2684_v6, %v1118_v20  ;;  %v2717_v38 = vpop.f32.mrf.mxu3 }
  0xb6   : > { %v2705_v30 = vpop.f32.mrf.mxu2  ;;  %v2708_v37 = vpop.f32.mrf.mxu1 }
  0xb7   : > { %v1378_v29 = vadd.f32 %v2116_v21, %v1186_v26 }
  0xb8   : > { %v789_v32 = vpop.f32.mrf.mxu0 }
  0xb9   : > { %v1442_v35 = vmax.f32 %v1378_v29, 0.0  ;;  %v959_v36 = vadd.f32 %v958_v53, %v789_v32  ;;  %v2096_v53 = vld [vmem:[%s2545_s30 + $0x1c4] sm:$0xf]  ;;  %v2402_v29 = vld [vmem:[%s2678_s25 + $0x10] sm:$0xff]  }
  0xbb   : > { %v2244_v39 = vpack.c.bf16 %v1442_v35, %v1441_v34  ;;  %828 = vmatmul.bf16.gmra.mxu0 %v1788_v31  ;;  %908 = vmatmul.bf16.gmra.mxu2 %v1916_v33  ;;  %v1119_v40 = vmul.f32 %v2669_v2, %v959_v36 }
  0xbd   : > { %2245 = vst [vmem:[%s2715_s6] sm:$0xff] %v2244_v39   ;;  %v1187_v48 = vadd.f32 %v2684_v6, %v1119_v40  ;;  %v2730_v55 = vpop.f32.mrf.mxu3  ;;  %v2123_v40 = vunpack.c.l.bf16 %v2402_v29 }
  0xbe   : > { %v869_v44 = vpop.f32.mrf.mxu2  ;;  %v2726_v52 = vpop.f32.mrf.mxu1 }
  0xbf   : > { %v1039_v45 = vadd.f32 %v2651_v49, %v869_v44  ;;  %v1944_v49 = vor.u32 %v2096_v53, %v1941_v54  ;;  %v1379_v62 = vadd.f32 %v2119_v50, %v1187_v48  ;;  %v1949_v44 = vld [vmem:[%s2545_s30 + $0x1d8] sm:$0xf0]  ;;  %v2418_v54 = vld [vmem:[%s2678_s25 + $0x90] sm:$0xff]  }
  0xc0   : > { %v791_v46 = vpop.f32.mrf.mxu0  ;;  %v1952_v48 = vor.u32 %v2098_v43, %v1949_v44  ;;  %v2187_v63 = vunpack.c.l.bf16 %v2418_v54  ;;  %v1811_v43 = vld [vmem:[%s2545_s30 + $0xc0] sm:$0xf] }
  0xc1   : > { %v961_v51 = vadd.f32 %v960_v3, %v791_v46  ;;  %v1151_v59 = vmul.f32 %v2669_v2, %v1039_v45  ;;  %2016 = vmatmul.msk.bf16.gmra.mxu1 %vm678_vm0, %v1808_v47  ;;  %v2093_v3 = vld [vmem:[%s2545_s30 + $0x1a4] sm:$0xf0]  ;;  %v1443_v15 = vmax.f32 %v1379_v62, 0.0  ;;  %v2124_v47 = vunpack.c.h.bf16 %v2402_v29 }
  0xc2   : > { %2033 = vmatmul.msk.bf16.gmra.mxu3 %vm678_vm0, %v1944_v49  ;;  %v1924_v14 = vor.u32 %v2093_v3, %v1923_v1  ;;  %v2095_v49 = vld [vmem:[%s2545_s30 + $0x1b4] sm:$0xf0] }
  0xc3   : > { %v1120_v57 = vmul.f32 %v2669_v2, %v961_v51  ;;  %v1219_v9 = vadd.f32 %v2684_v6, %v1151_v59  ;;  %v1803_v51 = vld [vmem:[%s2545_s30 + $0xb0] sm:$0xf] }
  0xc5   : > { %v1188_v0 = vadd.f32 %v2684_v6, %v1120_v57  ;;  %v2748_v23 = vpop.f32.mrf.mxu3  ;;  %v1411_v25 = vadd.f32 %v2183_v11, %v1219_v9 }
  0xc6   : > { %v871_v7 = vpop.f32.mrf.mxu2  ;;  %v2745_v20 = vpop.f32.mrf.mxu1 }
  0xc7   : > { %v1380_v5 = vadd.f32 %v2120_v58, %v1188_v0  ;;  %v1041_v12 = vadd.f32 %v2657_v56, %v871_v7  ;;  %v1475_v32 = vmax.f32 %v1411_v25, 0.0  ;;  %v1931_v58 = vld [vmem:[%s2545_s30 + $0x1b0] sm:$0xf] }
  0xc8   : > { %v794_v13 = vpop.f32.mrf.mxu0  ;;  %v1932_v3 = vor.u32 %v2095_v49, %v1931_v58 }
  0xc9   : > { %v1444_v17 = vmax.f32 %v1380_v5, 0.0  ;;  %v964_v18 = vadd.f32 %v2692_v16, %v794_v13  ;;  %v1152_v21 = vmul.f32 %v2669_v2, %v1041_v12  ;;  %v1813_v16 = vld [vmem:[%s2545_s30 + $0xc8] sm:$0xf0]  ;;  %v2188_v12 = vunpack.c.h.bf16 %v2418_v54 }
  0xca   : > { %v1816_v36 = vor.u32 %v2064_v27, %v1813_v16 }
  0xcb   : > { %v2249_v24 = vpack.c.bf16 %v1444_v17, %v1443_v15  ;;  %833 = vmatmul.bf16.gmra.mxu0 %v1796_v8  ;;  %v1220_v56 = vadd.f32 %v2684_v6, %v1152_v21  ;;  %913 = vmatmul.bf16.gmra.mxu2 %v1924_v14  ;;  %v1121_v26 = vmul.f32 %v2669_v2, %v964_v18  ;;  %v2066_v18 = vld [vmem:[%s2545_s30 + $0xd4] sm:$0xf] }
  0xcd   : > { %2432 = vst [vmem:[%s2715_s6 + $0x8] sm:$0xff] %v2249_v24   ;;  %v1412_v28 = vadd.f32 %v2184_v22, %v1220_v56  ;;  %v1189_v39 = vadd.f32 %v2684_v6, %v1121_v26  ;;  %v2763_v46 = vpop.f32.mrf.mxu3  ;;  %v2403_v22 = vld [vmem:[%s2678_s25 + $0x18] sm:$0xff]  }
  0xce   : > { %v874_v31 = vpop.f32.mrf.mxu2  ;;  %v2759_v42 = vpop.f32.mrf.mxu1  ;;  %v2127_v29 = vunpack.c.l.bf16 %v2403_v22 }
  0xcf   : > { %v1476_v33 = vmax.f32 %v1412_v28, 0.0  ;;  %v1044_v34 = vadd.f32 %v2671_v4, %v874_v31  ;;  %v1381_v53 = vadd.f32 %v2123_v40, %v1189_v39  ;;  %v2128_v39 = vunpack.c.h.bf16 %v2403_v22 }
  0xd0   : > { %v796_v35 = vpop.f32.mrf.mxu0 }
  0xd1   : > { %v966_v41 = vadd.f32 %v2708_v37, %v796_v35  ;;  %v2329_v45 = vpack.c.bf16 %v1476_v33, %v1475_v32  ;;  %v1153_v50 = vmul.f32 %v2669_v2, %v1044_v34  ;;  %2017 = vmatmul.msk.bf16.gmra.mxu1 %vm678_vm0, %v1816_v36  ;;  %v2063_v37 = vld [vmem:[%s2545_s30 + $0xb4] sm:$0xf0]  ;;  %v1445_v5 = vmax.f32 %v1381_v53, 0.0  ;;  %v2100_v33 = vld [vmem:[%s2545_s30 + $0x1e4] sm:$0xf] }
  0xd2   : > { %v1804_v61 = vor.u32 %v2063_v37, %v1803_v51  ;;  %2034 = vmatmul.msk.bf16.gmra.mxu3 %vm678_vm0, %v1952_v48  ;;  %v1957_v34 = vld [vmem:[%s2545_s30 + $0x1e8] sm:$0xf0]  ;;  %v2097_v48 = vld [vmem:[%s2545_s30 + $0x1c4] sm:$0xf0] }
  0xd3   : > { %v1122_v4 = vmul.f32 %v2669_v2, %v966_v41  ;;  %2448 = vst [vmem:[%s2715_s6 + $0x88] sm:$0xff] %v2329_v45   ;;  %v1221_v62 = vadd.f32 %v2684_v6, %v1153_v50  ;;  %v1960_v40 = vor.u32 %v2100_v33, %v1957_v34  ;;  %v2419_v45 = vld [vmem:[%s2678_s25 + $0x98] sm:$0xff]   ;;  %v1819_v33 = vld [vmem:[%s2545_s30 + $0xd0] sm:$0xf] }
  0xd4   : > { %v2191_v54 = vunpack.c.l.bf16 %v2419_v45 }
  0xd5   : > { %v1190_v57 = vadd.f32 %v2684_v6, %v1122_v4  ;;  %v2782_v13 = vpop.f32.mrf.mxu3  ;;  %v1413_v15 = vadd.f32 %v2187_v63, %v1221_v62 }
  0xd6   : > { %v876_v60 = vpop.f32.mrf.mxu2  ;;  %v2779_v9 = vpop.f32.mrf.mxu1 }
  0xd7   : > { %v1382_v59 = vadd.f32 %v2124_v47, %v1190_v57  ;;  %v1046_v0 = vadd.f32 %v2696_v19, %v876_v60  ;;  %v1477_v25 = vmax.f32 %v1413_v15, 0.0  ;;  %v1939_v47 = vld [vmem:[%s2545_s30 + $0x1c0] sm:$0xf] }
  0xd8   : > { %v799_v1 = vpop.f32.mrf.mxu0  ;;  %v1940_v49 = vor.u32 %v2097_v48, %v1939_v47 }
  0xd9   : > { %v1446_v7 = vmax.f32 %v1382_v59, 0.0  ;;  %v969_v8 = vadd.f32 %v2726_v52, %v799_v1  ;;  %v1154_v11 = vmul.f32 %v2669_v2, %v1046_v0  ;;  %v1821_v52 = vld [vmem:[%s2545_s30 + $0xd8] sm:$0xf0]  ;;  %v2192_v0 = vunpack.c.h.bf16 %v2419_v45 }
  0xda   : > { %v1824_v16 = vor.u32 %v2066_v18, %v1821_v52 }
  0xdb   : > { %v2254_v14 = vpack.c.bf16 %v1446_v7, %v1445_v5  ;;  %838 = vmatmul.bf16.gmra.mxu0 %v1804_v61  ;;  %v1222_v19 = vadd.f32 %v2684_v6, %v1154_v11  ;;  %918 = vmatmul.bf16.gmra.mxu2 %v1932_v3  ;;  %v1123_v17 = vmul.f32 %v2669_v2, %v969_v8  ;;  %v2068_v8 = vld [vmem:[%s2545_s30 + $0xe4] sm:$0xf] }
  0xdd   : > { %2433 = vst [vmem:[%s2715_s6 + $0x10] sm:$0xff] %v2254_v14   ;;  %v1414_v21 = vadd.f32 %v2188_v12, %v1222_v19  ;;  %v1191_v28 = vadd.f32 %v2684_v6, %v1123_v17  ;;  %v2797_v36 = vpop.f32.mrf.mxu3  ;;  %v2404_v12 = vld [vmem:[%s2678_s25 + $0x20] sm:$0xff]  }
  0xde   : > { %v879_v24 = vpop.f32.mrf.mxu2  ;;  %v2793_v32 = vpop.f32.mrf.mxu1  ;;  %v2131_v22 = vunpack.c.l.bf16 %v2404_v12 }
  0xdf   : > { %v1478_v56 = vmax.f32 %v1414_v21, 0.0  ;;  %v1049_v26 = vadd.f32 %v2717_v38, %v879_v24  ;;  %v1383_v44 = vadd.f32 %v2127_v29, %v1191_v28 }
  0xe0   : > { %v801_v27 = vpop.f32.mrf.mxu0 }
  0xe1   : > { %v971_v31 = vadd.f32 %v2745_v20, %v801_v27  ;;  %v2334_v35 = vpack.c.bf16 %v1478_v56, %v1477_v25  ;;  %v1155_v41 = vmul.f32 %v2669_v2, %v1049_v26  ;;  %2018 = vmatmul.msk.bf16.gmra.mxu1 %vm678_vm0, %v1824_v16  ;;  %v2065_v20 = vld [vmem:[%s2545_s30 + $0xc4] sm:$0xf0]  ;;  %v1447_v59 = vmax.f32 %v1383_v44, 0.0  ;;  %v2102_v56 = vld [vmem:[%s2545_s30 + $0x1f4] sm:$0xf] }
  0xe2   : > { %v1812_v37 = vor.u32 %v2065_v20, %v1811_v43  ;;  %2035 = vmatmul.msk.bf16.gmra.mxu3 %vm678_vm0, %v1960_v40  ;;  %v1965_v26 = vld [vmem:[%s2545_s30 + $0x1f8] sm:$0xf0]  ;;  %v2099_v40 = vld [vmem:[%s2545_s30 + $0x1d4] sm:$0xf0] }
  0xe3   : > { %v1124_v38 = vmul.f32 %v2669_v2, %v971_v31  ;;  %2449 = vst [vmem:[%s2715_s6 + $0x90] sm:$0xff] %v2334_v35   ;;  %v1223_v53 = vadd.f32 %v2684_v6, %v1155_v41  ;;  %v1968_v29 = vor.u32 %v2102_v56, %v1965_v26  ;;  %v2420_v35 = vld [vmem:[%s2678_s25 + $0xa0] sm:$0xff]  }
  0xe4   : > { %v2195_v45 = vunpack.c.l.bf16 %v2420_v35  ;;  %v1955_v26 = vld [vmem:[%s2545_s30 + $0x1e0] sm:$0xf] }
  0xe5   : > { %v1192_v4 = vadd.f32 %v2684_v6, %v1124_v38  ;;  %v2816_v1 = vpop.f32.mrf.mxu3  ;;  %v1415_v5 = vadd.f32 %v2191_v54, %v1223_v53 }
  0xe6   : > { %v881_v51 = vpop.f32.mrf.mxu2  ;;  %v2813_v62 = vpop.f32.mrf.mxu1 }
  0xe7   : > { %v1384_v50 = vadd.f32 %v2128_v39, %v1192_v4  ;;  %v1051_v57 = vadd.f32 %v2730_v55, %v881_v51  ;;  %v1479_v15 = vmax.f32 %v1415_v5, 0.0  ;;  %v1947_v39 = vld [vmem:[%s2545_s30 + $0x1d0] sm:$0xf] }
  0xe8   : > { %v804_v58 = vpop.f32.mrf.mxu0  ;;  %v1948_v48 = vor.u32 %v2099_v40, %v1947_v39 }
  0xe9   : > { %v1448_v60 = vmax.f32 %v1384_v50, 0.0  ;;  %v974_v61 = vadd.f32 %v2759_v42, %v804_v58  ;;  %v1156_v63 = vmul.f32 %v2669_v2, %v1051_v57  ;;  %v1829_v42 = vld [vmem:[%s2545_s30 + $0xe8] sm:$0xf0]  ;;  %v2196_v57 = vunpack.c.h.bf16 %v2420_v35 }
  0xea   : > { %v1832_v52 = vor.u32 %v2068_v8, %v1829_v42 }
  0xeb   : > { %v2259_v3 = vpack.c.bf16 %v1448_v60, %v1447_v59  ;;  %843 = vmatmul.bf16.gmra.mxu0 %v1812_v37  ;;  %v1224_v55 = vadd.f32 %v2684_v6, %v1156_v63  ;;  %923 = vmatmul.bf16.gmra.mxu2 %v1940_v49  ;;  %v1125_v7 = vmul.f32 %v2669_v2, %v974_v61  ;;  %v2070_v60 = vld [vmem:[%s2545_s30 + $0xf4] sm:$0xf]  ;;  %v1837_v61 = vld [vmem:[%s2545_s30 + $0xf8] sm:$0xf0] }
  0xec   : > { %v1840_v42 = vor.u32 %v2070_v60, %v1837_v61 }
  0xed   : > { %2434 = vst [vmem:[%s2715_s6 + $0x18] sm:$0xff] %v2259_v3   ;;  %v1416_v11 = vadd.f32 %v2192_v0, %v1224_v55  ;;  %v1193_v21 = vadd.f32 %v2684_v6, %v1125_v7  ;;  %v2832_v28 = vpop.f32.mrf.mxu3  ;;  %v2405_v0 = vld [vmem:[%s2678_s25 + $0x28] sm:$0xff]  }
  0xee   : > { %v884_v14 = vpop.f32.mrf.mxu2  ;;  %v2827_v25 = vpop.f32.mrf.mxu1 }
  0xef   : > { %v1480_v19 = vmax.f32 %v1416_v11, 0.0  ;;  %v1054_v17 = vadd.f32 %v2748_v23, %v884_v14  ;;  %v2132_v23 = vunpack.c.h.bf16 %v2404_v12  ;;  %v1385_v34 = vadd.f32 %v2131_v22, %v1193_v21  ;;  %v2069_v21 = vld [vmem:[%s2545_s30 + $0xe4] sm:$0xf0] }
  0xf0   : > { %v806_v18 = vpop.f32.mrf.mxu0  ;;  %v2135_v12 = vunpack.c.l.bf16 %v2405_v0 }
  0xf1   : > { %v976_v24 = vadd.f32 %v2779_v9, %v806_v18  ;;  %v2339_v27 = vpack.c.bf16 %v1480_v19, %v1479_v15  ;;  %v1157_v31 = vmul.f32 %v2669_v2, %v1054_v17  ;;  %2019 = vmatmul.msk.bf16.gmra.mxu1 %vm678_vm0, %v1832_v52  ;;  %v2067_v9 = vld [vmem:[%s2545_s30 + $0xd4] sm:$0xf0]  ;;  %v1449_v50 = vmax.f32 %v1385_v34, 0.0 }
  0xf2   : > { %v1820_v20 = vor.u32 %v2067_v9, %v1819_v33  ;;  %2036 = vmatmul.msk.bf16.gmra.mxu3 %vm678_vm0, %v1968_v29  ;;  %v2136_v18 = vunpack.c.h.bf16 %v2405_v0 }
  0xf3   : > { %v1126_v16 = vmul.f32 %v2669_v2, %v976_v24  ;;  %2450 = vst [vmem:[%s2715_s6 + $0x98] sm:$0xff] %v2339_v27   ;;  %v1225_v44 = vadd.f32 %v2684_v6, %v1157_v31  ;;  %v2421_v24 = vld [vmem:[%s2678_s25 + $0xa8] sm:$0xff]  }
  0xf4   : > { %v2101_v27 = vld [vmem:[%s2545_s30 + $0x1e4] sm:$0xf0]  ;;  %v2199_v33 = vunpack.c.l.bf16 %v2421_v24 }
  0xf5   : > { %v1194_v38 = vadd.f32 %v2684_v6, %v1126_v16  ;;  %v1417_v49 = vadd.f32 %v2195_v45, %v1225_v44  ;;  %v2855_v63 = vpop.f32.mrf.mxu3  ;;  %v1956_v35 = vor.u32 %v2101_v27, %v1955_v26 }
  0xf6   : > { %v886_v43 = vpop.f32.mrf.mxu2  ;;  %v2847_v53 = vpop.f32.mrf.mxu1 }
  0xf7   : > { %v1386_v41 = vadd.f32 %v2132_v23, %v1194_v38  ;;  %v1056_v4 = vadd.f32 %v2763_v46, %v886_v43  ;;  %v1481_v5 = vmax.f32 %v1417_v49, 0.0 }
  0xf8   : > { %v809_v47 = vpop.f32.mrf.mxu0 }
  0xf9   : > { %v1450_v51 = vmax.f32 %v1386_v41, 0.0  ;;  %v979_v37 = vadd.f32 %v2793_v32, %v809_v47  ;;  %v1158_v54 = vmul.f32 %v2669_v2, %v1056_v4  ;;  %v2072_v47 = vld [vmem:[%s2545_s30 + $0x104] sm:$0xf] }
  0xfb   : > { %v2264_v58 = vpack.c.bf16 %v1450_v51, %v1449_v50  ;;  %848 = vmatmul.bf16.gmra.mxu0 %v1820_v20  ;;  %v1226_v59 = vadd.f32 %v2684_v6, %v1158_v54  ;;  %928 = vmatmul.bf16.gmra.mxu2 %v1948_v48  ;;  %v1127_v46 = vmul.f32 %v2669_v2, %v979_v37  ;;  %v2200_v20 = vunpack.c.h.bf16 %v2421_v24  ;;  %v1845_v48 = vld [vmem:[%s2545_s30 + $0x108] sm:$0xf0]  ;;  %v2406_v51 = vld [vmem:[%s2678_s25 + $0x30] sm:$0xff]  }
  0xfc   : > { %v1848_v49 = vor.u32 %v2072_v47, %v1845_v48 }
  0xfd   : > { %2435 = vst [vmem:[%s2715_s6 + $0x20] sm:$0xff] %v2264_v58   ;;  %v1418_v32 = vadd.f32 %v2196_v57, %v1226_v59  ;;  %v1195_v11 = vadd.f32 %v2684_v6, %v1127_v46  ;;  %v2873_v29 = vpop.f32.mrf.mxu3  ;;  %v2139_v46 = vunpack.c.l.bf16 %v2406_v51 }
  0xfe   : > { %v889_v3 = vpop.f32.mrf.mxu2  ;;  %v2861_v15 = vpop.f32.mrf.mxu1 }
  0xff   : > { %v1482_v55 = vmax.f32 %v1418_v32, 0.0  ;;  %v1059_v7 = vadd.f32 %v2782_v13, %v889_v3  ;;  %v1827_v13 = vld [vmem:[%s2545_s30 + $0xe0] sm:$0xf]  ;;  %v1387_v22 = vadd.f32 %v2135_v12, %v1195_v11  ;;  %v2103_v12 = vld [vmem:[%s2545_s30 + $0x1f4] sm:$0xf0] }
 0x100   : > { %v811_v8 = vpop.f32.mrf.mxu0  ;;  %v1828_v23 = vor.u32 %v2069_v21, %v1827_v13 }
 0x101   : > { %v981_v14 = vadd.f32 %v2813_v62, %v811_v8  ;;  %v2344_v19 = vpack.c.bf16 %v1482_v55, %v1481_v5  ;;  %v1159_v52 = vmul.f32 %v2669_v2, %v1059_v7  ;;  %2020 = vmatmul.msk.bf16.gmra.mxu1 %vm678_vm0, %v1840_v42  ;;  %v1451_v38 = vmax.f32 %v1387_v22, 0.0  ;;  %v1835_v55 = vld [vmem:[%s2545_s30 + $0xf0] sm:$0xf]  ;;  %v2071_v7 = vld [vmem:[%s2545_s30 + $0xf4] sm:$0xf0] }
 0x102   : > { %v2140_v5 = vunpack.c.h.bf16 %v2406_v51  ;;  %v2422_v42 = vld [vmem:[%s2678_s25 + $0xb0] sm:$0xff]  }
 0x103   : > { %v1128_v17 = vmul.f32 %v2669_v2, %v981_v14  ;;  %2451 = vst [vmem:[%s2715_s6 + $0xa0] sm:$0xff] %v2344_v19   ;;  %v1227_v31 = vadd.f32 %v2684_v6, %v1159_v52  ;;  %v2203_v52 = vunpack.c.l.bf16 %v2422_v42 }
 0x105   : > { %v1196_v56 = vadd.f32 %v2684_v6, %v1128_v17  ;;  %v1419_v45 = vadd.f32 %v2199_v33, %v1227_v31  ;;  %v2892_v32 = vpop.f32.mrf.mxu3  ;;  %v1836_v17 = vor.u32 %v2071_v7, %v1835_v55 }
 0x106   : > { %v891_v16 = vpop.f32.mrf.mxu2  ;;  %v2878_v41 = vpop.f32.mrf.mxu1 }
 0x107   : > { %v1388_v62 = vadd.f32 %v2136_v18, %v1196_v56  ;;  %v1061_v9 = vadd.f32 %v2797_v36, %v891_v16  ;;  %v1483_v37 = vmax.f32 %v1419_v45, 0.0  ;;  %v2204_v16 = vunpack.c.h.bf16 %v2422_v42 }
 0x108   : > { %v814_v34 = vpop.f32.mrf.mxu0 }
 0x109   : > { %v1452_v39 = vmax.f32 %v1388_v62, 0.0  ;;  %v984_v40 = vadd.f32 %v2827_v25, %v814_v34  ;;  %v1160_v43 = vmul.f32 %v2669_v2, %v1061_v9 }
 0x10b   : > { %v2269_v44 = vpack.c.bf16 %v1452_v39, %v1451_v38  ;;  %853 = vmatmul.bf16.gmra.mxu0 %v1828_v23  ;;  %v1228_v4 = vadd.f32 %v2684_v6, %v1160_v43  ;;  %933 = vmatmul.bf16.gmra.mxu2 %v1956_v35  ;;  %v1129_v36 = vmul.f32 %v2669_v2, %v984_v40  ;;  %v2407_v35 = vld [vmem:[%s2678_s25 + $0x38] sm:$0xff]  }
 0x10c   : > { %v2144_v48 = vunpack.c.h.bf16 %v2407_v35 }
 0x10d   : > { %2436 = vst [vmem:[%s2715_s6 + $0x28] sm:$0xff] %v2269_v44   ;;  %v1420_v50 = vadd.f32 %v2200_v20, %v1228_v4  ;;  %v1197_v59 = vadd.f32 %v2684_v6, %v1129_v36  ;;  %v2908_v31 = vpop.f32.mrf.mxu3  ;;  %v2143_v44 = vunpack.c.l.bf16 %v2407_v35 }
 0x10e   : > { %v894_v25 = vpop.f32.mrf.mxu2  ;;  %v2890_v61 = vpop.f32.mrf.mxu1 }
 0x10f   : > { %v1484_v54 = vmax.f32 %v1420_v50, 0.0  ;;  %v1064_v57 = vadd.f32 %v2816_v1, %v894_v25  ;;  %v1389_v8 = vadd.f32 %v2139_v46, %v1197_v59  ;;  %v2423_v25 = vld [vmem:[%s2678_s25 + $0xb8] sm:$0xff]  }
 0x110   : > { %v816_v58 = vpop.f32.mrf.mxu0 }
 0x111   : > { %v986_v60 = vadd.f32 %v2847_v53, %v816_v58  ;;  %v2349_v0 = vpack.c.bf16 %v1484_v54, %v1483_v37  ;;  %v1161_v1 = vmul.f32 %v2669_v2, %v1064_v57  ;;  %2021 = vmatmul.msk.bf16.gmra.mxu1 %vm678_vm0, %v1848_v49  ;;  %v1963_v53 = vld [vmem:[%s2545_s30 + $0x1f0] sm:$0xf]  ;;  %v1453_v24 = vmax.f32 %v1389_v8, 0.0 }
 0x112   : > { %v1964_v22 = vor.u32 %v2103_v12, %v1963_v53  ;;  %v2408_v53 = vld [vmem:[%s2678_s25 + $0x40] sm:$0xff]  }
 0x113   : > { %v1130_v3 = vmul.f32 %v2669_v2, %v986_v60  ;;  %2452 = vst [vmem:[%s2715_s6 + $0xa8] sm:$0xff] %v2349_v0   ;;  %v1229_v18 = vadd.f32 %v2684_v6, %v1161_v1  ;;  %v2208_v1 = vunpack.c.h.bf16 %v2423_v25 }
 0x115   : > { %v1198_v11 = vadd.f32 %v2684_v6, %v1130_v3  ;;  %v1421_v33 = vadd.f32 %v2203_v52, %v1229_v18  ;;  %v1078_v54 = vpop.f32.mrf.mxu3  ;;  %v2147_v52 = vunpack.c.l.bf16 %v2408_v53 }
 0x116   : > { %v896_v19 = vpop.f32.mrf.mxu2  ;;  %v995_v27 = vpop.f32.mrf.mxu1 }
 0x117   : > { %v1390_v14 = vadd.f32 %v2140_v5, %v1198_v11  ;;  %v1066_v13 = vadd.f32 %v2832_v28, %v896_v19  ;;  %v1485_v38 = vmax.f32 %v1421_v33, 0.0 }
 0x118   : > { %v819_v21 = vpop.f32.mrf.mxu0 }
 0x119   : > { %v1454_v56 = vmax.f32 %v1390_v14, 0.0  ;;  %v989_v26 = vadd.f32 %v2861_v15, %v819_v21  ;;  %v1162_v62 = vmul.f32 %v2669_v2, %v1066_v13 }
 0x11b   : > { %v2274_v23 = vpack.c.bf16 %v1454_v56, %v1453_v24  ;;  %858 = vmatmul.bf16.gmra.mxu0 %v1836_v17  ;;  %v1230_v9 = vadd.f32 %v2684_v6, %v1162_v62  ;;  %938 = vmatmul.bf16.gmra.mxu2 %v1964_v22  ;;  %v1131_v28 = vmul.f32 %v2669_v2, %v989_v26  ;;  %v2148_v56 = vunpack.c.h.bf16 %v2408_v53 }
 0x11d   : > { %2437 = vst [vmem:[%s2715_s6 + $0x30] sm:$0xff] %v2274_v23   ;;  %v1422_v34 = vadd.f32 %v2204_v16, %v1230_v9  ;;  %v1199_v20 = vadd.f32 %v2684_v6, %v1131_v28  ;;  %v1080_v12 = vpop.f32.mrf.mxu3  ;;  %v2424_v16 = vld [vmem:[%s2678_s25 + $0xc0] sm:$0xff]  }
 0x11e   : > { %v899_v15 = vpop.f32.mrf.mxu2  ;;  %v998_v4 = vpop.f32.mrf.mxu1  ;;  %v2211_v28 = vunpack.c.l.bf16 %v2424_v16 }
 0x11f   : > { %v1486_v39 = vmax.f32 %v1422_v34, 0.0  ;;  %v1069_v40 = vadd.f32 %v2855_v63, %v899_v15  ;;  %v1391_v51 = vadd.f32 %v2143_v44, %v1199_v20  ;;  %v2212_v20 = vunpack.c.h.bf16 %v2424_v16 }
 0x120   : > { %v821_v43 = vpop.f32.mrf.mxu0 }
 0x121   : > { %v991_v45 = vadd.f32 %v2878_v41, %v821_v43  ;;  %v2354_v36 = vpack.c.bf16 %v1486_v39, %v1485_v38  ;;  %v1163_v50 = vmul.f32 %v2669_v2, %v1069_v40  ;;  %v2207_v41 = vunpack.c.l.bf16 %v2423_v25 }
 0x122   : > { %v1455_v46 = vmax.f32 %v1391_v51, 0.0 }
 0x123   : > { %v1132_v47 = vmul.f32 %v2669_v2, %v991_v45  ;;  %2453 = vst [vmem:[%s2715_s6 + $0xb0] sm:$0xff] %v2354_v36   ;;  %v1231_v58 = vadd.f32 %v2684_v6, %v1163_v50  ;;  %v2409_v50 = vld [vmem:[%s2678_s25 + $0x48] sm:$0xff]  }
 0x125   : > { %v1200_v37 = vadd.f32 %v2684_v6, %v1132_v47  ;;  %v1423_v7 = vadd.f32 %v2207_v41, %v1231_v58  ;;  %v1083_v40 = vpop.f32.mrf.mxu3 }
 0x126   : > { %v901_v57 = vpop.f32.mrf.mxu2  ;;  %v1000_v3 = vpop.f32.mrf.mxu1 }
 0x127   : > { %v1392_v63 = vadd.f32 %v2144_v48, %v1200_v37  ;;  %v1071_v49 = vadd.f32 %v2873_v29, %v901_v57  ;;  %v1487_v14 = vmax.f32 %v1423_v7, 0.0  ;;  %v2151_v57 = vunpack.c.l.bf16 %v2409_v50 }
 0x128   : > { %v824_v59 = vpop.f32.mrf.mxu0 }
 0x129   : > { %v1456_v60 = vmax.f32 %v1392_v63, 0.0  ;;  %v994_v0 = vadd.f32 %v2890_v61, %v824_v59  ;;  %v1164_v5 = vmul.f32 %v2669_v2, %v1071_v49 }
 0x12b   : > { %v2279_v55 = vpack.c.bf16 %v1456_v60, %v1455_v46  ;;  %v1232_v8 = vadd.f32 %v2684_v6, %v1164_v5  ;;  %v1133_v42 = vmul.f32 %v2669_v2, %v994_v0  ;;  %v2152_v46 = vunpack.c.h.bf16 %v2409_v50 }
 0x12d   : > { %2438 = vst [vmem:[%s2715_s6 + $0x38] sm:$0xff] %v2279_v55   ;;  %v1424_v11 = vadd.f32 %v2208_v1, %v1232_v8  ;;  %v1201_v18 = vadd.f32 %v2684_v6, %v1133_v42  ;;  %v1085_v60 = vpop.f32.mrf.mxu3  ;;  %v2425_v1 = vld [vmem:[%s2678_s25 + $0xc8] sm:$0xff]  }
 0x12e   : > { %v904_v29 = vpop.f32.mrf.mxu2  ;;  %v1003_v21 = vpop.f32.mrf.mxu1  ;;  %v2215_v42 = vunpack.c.l.bf16 %v2425_v1 }
 0x12f   : > { %v1488_v19 = vmax.f32 %v1424_v11, 0.0  ;;  %v1074_v61 = vadd.f32 %v2892_v32, %v904_v29  ;;  %v1393_v62 = vadd.f32 %v2147_v52, %v1201_v18 }
 0x130   : > { %v826_v17 = vpop.f32.mrf.mxu0 }
 0x131   : > { %v996_v13 = vadd.f32 %v995_v27, %v826_v17  ;;  %v2359_v22 = vpack.c.bf16 %v1488_v19, %v1487_v14  ;;  %v1165_v26 = vmul.f32 %v2669_v2, %v1074_v61  ;;  %v1457_v35 = vmax.f32 %v1393_v62, 0.0 }
 0x132   : > { %v2216_v17 = vunpack.c.h.bf16 %v2425_v1 }
 0x133   : > { %v1134_v24 = vmul.f32 %v2669_v2, %v996_v13  ;;  %2454 = vst [vmem:[%s2715_s6 + $0xb8] sm:$0xff] %v2359_v22   ;;  %v1233_v9 = vadd.f32 %v2684_v6, %v1165_v26  ;;  %v2410_v26 = vld [vmem:[%s2678_s25 + $0x50] sm:$0xff]  }
 0x135   : > { %v1202_v23 = vadd.f32 %v2684_v6, %v1134_v24  ;;  %v1425_v45 = vadd.f32 %v2211_v28, %v1233_v9  ;;  %v1088_v24 = vpop.f32.mrf.mxu3 }
 0x136   : > { %v906_v32 = vpop.f32.mrf.mxu2  ;;  %v1005_v39 = vpop.f32.mrf.mxu1 }
 0x137   : > { %v1394_v33 = vadd.f32 %v2148_v56, %v1202_v23  ;;  %v1076_v27 = vadd.f32 %v2908_v31, %v906_v32  ;;  %v1489_v51 = vmax.f32 %v1425_v45, 0.0  ;;  %v2155_v32 = vunpack.c.l.bf16 %v2410_v26 }
 0x138   : > { %v829_v34 = vpop.f32.mrf.mxu0 }
 0x139   : > { %v1458_v15 = vmax.f32 %v1394_v33, 0.0  ;;  %v999_v38 = vadd.f32 %v998_v4, %v829_v34  ;;  %v1166_v43 = vmul.f32 %v2669_v2, %v1076_v27 }
 0x13b   : > { %v2284_v44 = vpack.c.bf16 %v1458_v15, %v1457_v35  ;;  %v1234_v36 = vadd.f32 %v2684_v6, %v1166_v43  ;;  %v1135_v47 = vmul.f32 %v2669_v2, %v999_v38  ;;  %v2156_v35 = vunpack.c.h.bf16 %v2410_v26  ;;  %v2426_v43 = vld [vmem:[%s2678_s25 + $0xd0] sm:$0xff]  }
 0x13d   : > { %2439 = vst [vmem:[%s2715_s6 + $0x40] sm:$0xff] %v2284_v44   ;;  %v1426_v48 = vadd.f32 %v2212_v20, %v1234_v36  ;;  %v1203_v63 = vadd.f32 %v2684_v6, %v1135_v47  ;;  %v1090_v45 = vpop.f32.mrf.mxu3 }
 0x13e   : > { %v909_v31 = vpop.f32.mrf.mxu2  ;;  %v1008_v41 = vpop.f32.mrf.mxu1 }
 0x13f   : > { %v1490_v25 = vmax.f32 %v1426_v48, 0.0  ;;  %v1079_v4 = vadd.f32 %v1078_v54, %v909_v31  ;;  %v1395_v5 = vadd.f32 %v2151_v57, %v1203_v63 }
 0x140   : > { %v831_v37 = vpop.f32.mrf.mxu0 }
 0x141   : > { %v1001_v58 = vadd.f32 %v1000_v3, %v831_v37  ;;  %v2364_v49 = vpack.c.bf16 %v1490_v25, %v1489_v51  ;;  %v1167_v0 = vmul.f32 %v2669_v2, %v1079_v4  ;;  %v1459_v53 = vmax.f32 %v1395_v5, 0.0 }
 0x142   : > { %v2220_v37 = vunpack.c.h.bf16 %v2426_v43 }
 0x143   : > { %v1136_v59 = vmul.f32 %v2669_v2, %v1001_v58  ;;  %2455 = vst [vmem:[%s2715_s6 + $0xc0] sm:$0xff] %v2364_v49   ;;  %v1235_v8 = vadd.f32 %v2684_v6, %v1167_v0 }
 0x145   : > { %v1204_v55 = vadd.f32 %v2684_v6, %v1136_v59  ;;  %v1427_v52 = vadd.f32 %v2215_v42, %v1235_v8  ;;  %v1093_v42 = vpop.f32.mrf.mxu3 }
 0x146   : > { %v911_v7 = vpop.f32.mrf.mxu2  ;;  %v1010_v19 = vpop.f32.mrf.mxu1 }
 0x147   : > { %v1396_v54 = vadd.f32 %v2152_v46, %v1204_v55  ;;  %v1081_v3 = vadd.f32 %v1080_v12, %v911_v7  ;;  %v1491_v62 = vmax.f32 %v1427_v52, 0.0  ;;  %v2411_v46 = vld [vmem:[%s2678_s25 + $0x58] sm:$0xff]  }
 0x148   : > { %v834_v11 = vpop.f32.mrf.mxu0 }
 0x149   : > { %v1460_v29 = vmax.f32 %v1396_v54, 0.0  ;;  %v1004_v14 = vadd.f32 %v1003_v21, %v834_v11  ;;  %v1168_v61 = vmul.f32 %v2669_v2, %v1081_v3  ;;  %v2159_v54 = vunpack.c.l.bf16 %v2411_v46 }
 0x14b   : > { %v2289_v18 = vpack.c.bf16 %v1460_v29, %v1459_v53  ;;  %v1236_v13 = vadd.f32 %v2684_v6, %v1168_v61  ;;  %v1137_v22 = vmul.f32 %v2669_v2, %v1004_v14  ;;  %v2160_v53 = vunpack.c.h.bf16 %v2411_v46  ;;  %v2427_v61 = vld [vmem:[%s2678_s25 + $0xd8] sm:$0xff]  }
 0x14d   : > { %2440 = vst [vmem:[%s2715_s6 + $0x48] sm:$0xff] %v2289_v18   ;;  %v1428_v56 = vadd.f32 %v2216_v17, %v1236_v13  ;;  %v1205_v33 = vadd.f32 %v2684_v6, %v1137_v22  ;;  %v2223_v13 = vunpack.c.l.bf16 %v2427_v61 }
 0x14e   : > { %v914_v12 = vpop.f32.mrf.mxu2  ;;  %v1013_v28 = vpop.f32.mrf.mxu1 }
 0x14f   : > { %v1492_v16 = vmax.f32 %v1428_v56, 0.0  ;;  %v1084_v21 = vadd.f32 %v1083_v40, %v914_v12  ;;  %v1397_v38 = vadd.f32 %v2155_v32, %v1205_v33  ;;  %v1095_v33 = vpop.f32.mrf.mxu3 }
 0x150   : > { %v836_v23 = vpop.f32.mrf.mxu0 }
 0x151   : > { %v1006_v9 = vadd.f32 %v1005_v39, %v836_v23  ;;  %v2369_v27 = vpack.c.bf16 %v1492_v16, %v1491_v62  ;;  %v1169_v15 = vmul.f32 %v2669_v2, %v1084_v21  ;;  %v2219_v39 = vunpack.c.l.bf16 %v2426_v43 }
 0x152   : > { %v1461_v50 = vmax.f32 %v1397_v38, 0.0  ;;  %v2224_v21 = vunpack.c.h.bf16 %v2427_v61 }
 0x153   : > { %v1138_v34 = vmul.f32 %v2669_v2, %v1006_v9  ;;  %2456 = vst [vmem:[%s2715_s6 + $0xc8] sm:$0xff] %v2369_v27   ;;  %v1237_v36 = vadd.f32 %v2684_v6, %v1169_v15 }
 0x155   : > { %v1206_v20 = vadd.f32 %v2684_v6, %v1138_v34  ;;  %v1429_v57 = vadd.f32 %v2219_v39, %v1237_v36 }
 0x156   : > { %v916_v40 = vpop.f32.mrf.mxu2  ;;  %v1015_v25 = vpop.f32.mrf.mxu1 }
 0x157   : > { %v1398_v44 = vadd.f32 %v2156_v35, %v1206_v20  ;;  %v1086_v47 = vadd.f32 %v1085_v60, %v916_v40  ;;  %v1493_v60 = vmax.f32 %v1429_v57, 0.0  ;;  %v2412_v35 = vld [vmem:[%s2678_s25 + $0x60] sm:$0xff]  }
 0x158   : > { %v839_v48 = vpop.f32.mrf.mxu0  ;;  %v2163_v40 = vunpack.c.l.bf16 %v2412_v35 }
 0x159   : > { %v1462_v31 = vmax.f32 %v1398_v44, 0.0  ;;  %v1009_v51 = vadd.f32 %v1008_v41, %v839_v48  ;;  %v1170_v4 = vmul.f32 %v2669_v2, %v1086_v47  ;;  %v2164_v48 = vunpack.c.h.bf16 %v2412_v35 }
 0x15b   : > { %v2294_v63 = vpack.c.bf16 %v1462_v31, %v1461_v50  ;;  %v1238_v58 = vadd.f32 %v2684_v6, %v1170_v4  ;;  %v1139_v49 = vmul.f32 %v2669_v2, %v1009_v51  ;;  %v2972_v2 = vld [vmem:[%s3053_s2] ss:$0 sm:$0xff] }
 0x15c   : > { %v2428_v51 = vld [vmem:[%s2678_s25 + $0xe0] sm:$0xff]  }
 0x15d   : > { %2441 = vst [vmem:[%s2715_s6 + $0x50] sm:$0xff] %v2294_v63   ;;  %v1430_v59 = vadd.f32 %v2220_v37, %v1238_v58  ;;  %v1207_v55 = vadd.f32 %v2684_v6, %v1139_v49  ;;  %v2981_v6 = vld [vmem:[%s3054_s3] ss:$0 sm:$0xff]  ;;  %v1098_v37 = vpop.f32.mrf.mxu3 }
 0x15e   : > { %v919_v0 = vpop.f32.mrf.mxu2  ;;  %v1018_v8 = vpop.f32.mrf.mxu1 }
 0x15f   : > { %v1494_v5 = vmax.f32 %v1430_v59, 0.0  ;;  %v1089_v1 = vadd.f32 %v1088_v24, %v919_v0  ;;  %v1399_v14 = vadd.f32 %v2159_v54, %v1207_v55 }
 0x160   : > { %v841_v41 = vpop.f32.mrf.mxu0 }
 0x161   : > { %v1011_v7 = vadd.f32 %v1010_v19, %v841_v41  ;;  %v2374_v3 = vpack.c.bf16 %v1494_v5, %v1493_v60  ;;  %v1171_v29 = vmul.f32 %v2972_v2, %v1089_v1  ;;  %v1463_v56 = vmax.f32 %v1399_v14, 0.0 }
 0x162   : > { %v2228_v41 = vunpack.c.h.bf16 %v2428_v51 }
 0x163   : > { %v1140_v11 = vmul.f32 %v2972_v2, %v1011_v7  ;;  %2457 = vst [vmem:[%s2715_s6 + $0xd0] sm:$0xff] %v2374_v3   ;;  %v1239_v52 = vadd.f32 %v2981_v6, %v1171_v29 }
 0x165   : > { %v1208_v19 = vadd.f32 %v2981_v6, %v1140_v11  ;;  %v1431_v32 = vadd.f32 %v2223_v13, %v1239_v52  ;;  %v2413_v11 = vld [vmem:[%s2678_s25 + $0x68] sm:$0xff]   ;;  %v1100_v29 = vpop.f32.mrf.mxu3 }
 0x166   : > { %v921_v18 = vpop.f32.mrf.mxu2  ;;  %v1020_v62 = vpop.f32.mrf.mxu1 }
 0x167   : > { %v1400_v17 = vadd.f32 %v2160_v53, %v1208_v19  ;;  %v1091_v22 = vadd.f32 %v1090_v45, %v921_v18  ;;  %v1495_v38 = vmax.f32 %v1431_v32, 0.0  ;;  %v2167_v18 = vunpack.c.l.bf16 %v2413_v11 }
 0x168   : > { %v844_v24 = vpop.f32.mrf.mxu0 }
 0x169   : > { %v1464_v26 = vmax.f32 %v1400_v17, 0.0  ;;  %v1014_v12 = vadd.f32 %v1013_v28, %v844_v24  ;;  %v1172_v16 = vmul.f32 %v2972_v2, %v1091_v22 }
 0x16b   : > { %v2299_v23 = vpack.c.bf16 %v1464_v26, %v1463_v56  ;;  %v1240_v9 = vadd.f32 %v2981_v6, %v1172_v16  ;;  %v1141_v27 = vmul.f32 %v2972_v2, %v1014_v12  ;;  %v2168_v56 = vunpack.c.h.bf16 %v2413_v11  ;;  %v2429_v16 = vld [vmem:[%s2678_s25 + $0xe8] sm:$0xff]  }
 0x16d   : > { %2442 = vst [vmem:[%s2715_s6 + $0x58] sm:$0xff] %v2299_v23   ;;  %v1432_v34 = vadd.f32 %v2224_v21, %v1240_v9  ;;  %v1209_v44 = vadd.f32 %v2981_v6, %v1141_v27  ;;  %v2231_v9 = vunpack.c.l.bf16 %v2429_v16 }
 0x16e   : > { %v924_v15 = vpop.f32.mrf.mxu2  ;;  %v1023_v36 = vpop.f32.mrf.mxu1 }
 0x16f   : > { %v1496_v43 = vmax.f32 %v1432_v34, 0.0  ;;  %v1094_v28 = vadd.f32 %v1093_v42, %v924_v15  ;;  %v1401_v31 = vadd.f32 %v2163_v40, %v1209_v44  ;;  %v1103_v15 = vpop.f32.mrf.mxu3 }
 0x170   : > { %v846_v20 = vpop.f32.mrf.mxu0 }
 0x171   : > { %v1016_v45 = vadd.f32 %v1015_v25, %v846_v20  ;;  %v2379_v39 = vpack.c.bf16 %v1496_v43, %v1495_v38  ;;  %v1173_v50 = vmul.f32 %v2972_v2, %v1094_v28  ;;  %v2227_v25 = vunpack.c.l.bf16 %v2428_v51 }
 0x172   : > { %v1465_v46 = vmax.f32 %v1401_v31, 0.0  ;;  %v2232_v20 = vunpack.c.h.bf16 %v2429_v16 }
 0x173   : > { %v1142_v47 = vmul.f32 %v2972_v2, %v1016_v45  ;;  %2458 = vst [vmem:[%s2715_s6 + $0xd8] sm:$0xff] %v2379_v39   ;;  %v1241_v58 = vadd.f32 %v2981_v6, %v1173_v50 }
 0x175   : > { %v1210_v4 = vadd.f32 %v2981_v6, %v1142_v47  ;;  %v1433_v54 = vadd.f32 %v2227_v25, %v1241_v58 }
 0x176   : > { %v926_v57 = vpop.f32.mrf.mxu2  ;;  %v1025_v5 = vpop.f32.mrf.mxu1 }
 0x177   : > { %v1402_v63 = vadd.f32 %v2164_v48, %v1210_v4  ;;  %v1096_v49 = vadd.f32 %v1095_v33, %v926_v57  ;;  %v1497_v14 = vmax.f32 %v1433_v54, 0.0  ;;  %v2414_v48 = vld [vmem:[%s2678_s25 + $0x70] sm:$0xff]  }
 0x178   : > { %v849_v59 = vpop.f32.mrf.mxu0 }
 0x179   : > { %v1466_v0 = vmax.f32 %v1402_v63, 0.0  ;;  %v1019_v60 = vadd.f32 %v1018_v8, %v849_v59  ;;  %v1174_v1 = vmul.f32 %v2972_v2, %v1096_v49  ;;  %v2171_v63 = vunpack.c.l.bf16 %v2414_v48  ;;  %v1105_v59 = vpop.f32.mrf.mxu3 }
 0x17b   : > { %v2304_v55 = vpack.c.bf16 %v1466_v0, %v1465_v46  ;;  %v1242_v7 = vadd.f32 %v2981_v6, %v1174_v1  ;;  %v1143_v42 = vmul.f32 %v2972_v2, %v1019_v60  ;;  %v2172_v0 = vunpack.c.h.bf16 %v2414_v48 }
 0x17d   : > { %2443 = vst [vmem:[%s2715_s6 + $0x60] sm:$0xff] %v2304_v55   ;;  %v1434_v3 = vadd.f32 %v2228_v41, %v1242_v7  ;;  %v1211_v17 = vadd.f32 %v2981_v6, %v1143_v42  ;;  %v2430_v41 = vld [vmem:[%s2678_s25 + $0xf0] sm:$0xff]   ;;  %v2416_v7 = vld [vmem:[%s2678_s25 + $0x80] sm:$0xff]  }
 0x17e   : > { %v929_v53 = vpop.f32.mrf.mxu2  ;;  %v1028_v13 = vpop.f32.mrf.mxu1  ;;  %v2235_v11 = vunpack.c.l.bf16 %v2430_v41  ;;  %v2180_v16 = vunpack.c.h.bf16 %v2416_v7 }
 0x17f   : > { %v1498_v61 = vmax.f32 %v1434_v3, 0.0  ;;  %v1099_v8 = vadd.f32 %v1098_v37, %v929_v53  ;;  %v1403_v12 = vadd.f32 %v2167_v18, %v1211_v17 }
 0x180   : > { %v851_v19 = vpop.f32.mrf.mxu0 }
 0x181   : > { %v1021_v52 = vadd.f32 %v1020_v62, %v851_v19  ;;  %v2384_v22 = vpack.c.bf16 %v1498_v61, %v1497_v14  ;;  %v1175_v26 = vmul.f32 %v2972_v2, %v1099_v8  ;;  %v1467_v34 = vmax.f32 %v1403_v12, 0.0 }
 0x182   : > { %v2179_v61 = vunpack.c.l.bf16 %v2416_v7 }
 0x183   : > { %v1144_v24 = vmul.f32 %v2972_v2, %v1021_v52  ;;  %2459 = vst [vmem:[%s2715_s6 + $0xe0] sm:$0xff] %v2384_v22   ;;  %v1243_v32 = vadd.f32 %v2981_v6, %v1175_v26  ;;  %v2236_v52 = vunpack.c.h.bf16 %v2430_v41 }
 0x185   : > { %v1212_v21 = vadd.f32 %v2981_v6, %v1144_v24  ;;  %v1435_v40 = vadd.f32 %v2231_v9, %v1243_v32  ;;  %v2415_v32 = vld [vmem:[%s2678_s25 + $0x78] sm:$0xff]  }
 0x186   : > { %v931_v33 = vpop.f32.mrf.mxu2  ;;  %v3009_v43 = vpop.f32.mrf.mxu1 }
 0x187   : > { %v1404_v23 = vadd.f32 %v2168_v56, %v1212_v21  ;;  %v1101_v62 = vadd.f32 %v1100_v29, %v931_v33  ;;  %v1499_v31 = vmax.f32 %v1435_v40, 0.0  ;;  %v1108_v21 = vpop.f32.mrf.mxu3 }
 0x188   : > { %v854_v27 = vpop.f32.mrf.mxu0 }
 0x189   : > { %v1468_v35 = vmax.f32 %v1404_v23, 0.0  ;;  %v1024_v38 = vadd.f32 %v1023_v36, %v854_v27  ;;  %v1176_v28 = vmul.f32 %v2972_v2, %v1101_v62 }
 0x18b   : > { %v2309_v44 = vpack.c.bf16 %v1468_v35, %v1467_v34  ;;  %v1244_v45 = vadd.f32 %v2981_v6, %v1176_v28  ;;  %v1145_v39 = vmul.f32 %v2972_v2, %v1024_v38  ;;  %v2175_v28 = vunpack.c.l.bf16 %v2415_v32 }
 0x18d   : > { %2444 = vst [vmem:[%s2715_s6 + $0x68] sm:$0xff] %v2309_v44   ;;  %v1436_v47 = vadd.f32 %v2232_v20, %v1244_v45  ;;  %v1213_v37 = vadd.f32 %v2981_v6, %v1145_v39 }
 0x18e   : > { %v934_v50 = vpop.f32.mrf.mxu2  ;;  %v1033_v58 = vpop.f32.mrf.mxu1 }
 0x18f   : > { %v1500_v51 = vmax.f32 %v1436_v47, 0.0  ;;  %v1104_v36 = vadd.f32 %v1103_v15, %v934_v50  ;;  %v1034_v49 = vadd.f32 %v1033_v58, %v2689_v10  ;;  %v1405_v1 = vadd.f32 %v2171_v63, %v1213_v37 }
 0x190   : > { %v856_v4 = vpop.f32.mrf.mxu0  ;;  %v2176_v47 = vunpack.c.h.bf16 %v2415_v32 }
 0x191   : > { %v1026_v57 = vadd.f32 %v1025_v5, %v856_v4  ;;  %v2389_v25 = vpack.c.bf16 %v1500_v51, %v1499_v31  ;;  %v1177_v60 = vmul.f32 %v2972_v2, %v1104_v36  ;;  %v1149_v54 = vmul.f32 %v2972_v2, %v1034_v49  ;;  %v2431_v51 = vld [vmem:[%s2678_s25 + $0xf8] sm:$0xff]   ;;  %v1110_v4 = vpop.f32.mrf.mxu3 }
 0x192   : > { %v1469_v29 = vmax.f32 %v1405_v1, 0.0 }
 0x193   : > { %v1146_v46 = vmul.f32 %v2972_v2, %v1026_v57  ;;  %2460 = vst [vmem:[%s2715_s6 + $0xe8] sm:$0xff] %v2389_v25   ;;  %v1245_v3 = vadd.f32 %v2981_v6, %v1177_v60  ;;  %v1217_v17 = vadd.f32 %v2981_v6, %v1149_v54  ;;  %v2239_v57 = vunpack.c.l.bf16 %v2431_v51 }
 0x195   : > { %v1214_v55 = vadd.f32 %v2981_v6, %v1146_v46  ;;  %v1437_v56 = vadd.f32 %v2235_v11, %v1245_v3  ;;  %v1409_v23 = vadd.f32 %v2179_v61, %v1217_v17  ;;  %v2240_v46 = vunpack.c.h.bf16 %v2431_v51 }
 0x196   : > { %v936_v5 = vpop.f32.mrf.mxu2  ;;  %v1035_v19 = vpop.f32.mrf.mxu1 }
 0x197   : > { %v1406_v42 = vadd.f32 %v2172_v0, %v1214_v55  ;;  %v1106_v10 = vadd.f32 %v1105_v59, %v936_v5  ;;  %v1036_v22 = vadd.f32 %v1035_v19, %v2705_v30  ;;  %v1501_v27 = vmax.f32 %v1437_v56, 0.0 }
 0x198   : > { %v859_v53 = vpop.f32.mrf.mxu0  ;;  %v1473_v44 = vmax.f32 %v1409_v23, 0.0 }
 0x199   : > { %v1470_v14 = vmax.f32 %v1406_v42, 0.0  ;;  %v1029_v8 = vadd.f32 %v1028_v13, %v859_v53  ;;  %v1178_v18 = vmul.f32 %v2972_v2, %v1106_v10  ;;  %v1150_v12 = vmul.f32 %v2972_v2, %v1036_v22 }
 0x19b   : > { %v2314_v24 = vpack.c.bf16 %v1470_v14, %v1469_v29  ;;  %v1246_v26 = vadd.f32 %v2981_v6, %v1178_v18  ;;  %v1147_v13 = vmul.f32 %v2972_v2, %v1029_v8  ;;  %v1218_v9 = vadd.f32 %v2981_v6, %v1150_v12 }
 0x19d   : > { %2445 = vst [vmem:[%s2715_s6 + $0x70] sm:$0xff] %v2314_v24   ;;  %v1438_v33 = vadd.f32 %v2236_v52, %v1246_v26  ;;  %v1410_v34 = vadd.f32 %v2180_v16, %v1218_v9  ;;  %v1215_v38 = vadd.f32 %v2981_v6, %v1147_v13 }
 0x19e   : > { %v939_v62 = vpop.f32.mrf.mxu2 }
 0x19f   : > { %v1502_v30 = vmax.f32 %v1438_v33, 0.0  ;;  %v1109_v35 = vadd.f32 %v1108_v21, %v939_v62  ;;  %v1474_v45 = vmax.f32 %v1410_v34, 0.0  ;;  %v1407_v31 = vadd.f32 %v2175_v28, %v1215_v38 }
 0x1a0   : > { %v861_v15 = vpop.f32.mrf.mxu0 }
 0x1a1   : > { %v1031_v20 = vadd.f32 %v3009_v43, %v861_v15  ;;  %v2394_v40 = vpack.c.bf16 %v1502_v30, %v1501_v27  ;;  %v2324_v48 = vpack.c.bf16 %v1474_v45, %v1473_v44  ;;  %v1179_v50 = vmul.f32 %v2972_v2, %v1109_v35 }
 0x1a2   : > { %v1471_v25 = vmax.f32 %v1407_v31, 0.0 }
 0x1a3   : > { %v1148_v39 = vmul.f32 %v2972_v2, %v1031_v20  ;;  %2461 = vst [vmem:[%s2715_s6 + $0xf0] sm:$0xff] %v2394_v40   ;;  %v1247_v43 = vadd.f32 %v2981_v6, %v1179_v50 }
 0x1a4   : > { %2447 = vst [vmem:[%s2715_s6 + $0x80] sm:$0xff] %v2324_v48  }
 0x1a5   : > { %v1216_v36 = vadd.f32 %v2981_v6, %v1148_v39  ;;  %v1439_v60 = vadd.f32 %v2239_v57, %v1247_v43 }
 0x1a6   : > { %v941_v63 = vpop.f32.mrf.mxu2 }
 0x1a7   : > { %v1408_v37 = vadd.f32 %v2176_v47, %v1216_v36  ;;  %v1111_v58 = vadd.f32 %v1110_v4, %v941_v63  ;;  %v1503_v55 = vmax.f32 %v1439_v60, 0.0 }
 0x1a9   : > { %v1472_v49 = vmax.f32 %v1408_v37, 0.0  ;;  %v1180_v59 = vmul.f32 %v2972_v2, %v1111_v58 }
 0x1ab   : > { %v2319_v0 = vpack.c.bf16 %v1472_v49, %v1471_v25  ;;  %v1248_v1 = vadd.f32 %v2981_v6, %v1180_v59 }
 0x1ad   : > { %2446 = vst [vmem:[%s2715_s6 + $0x78] sm:$0xff] %v2319_v0   ;;  %v1440_v41 = vadd.f32 %v2240_v46, %v1248_v1 }
 0x1af   : > { %v1504_v54 = vmax.f32 %v1440_v41, 0.0 }
 0x1b1   : > { %v2399_v7 = vpack.c.bf16 %v1504_v54, %v1503_v55 }
 0x1b3   : > { %2462 = vst [vmem:[%s2715_s6 + $0xf8] sm:$0xff] %v2399_v7  }
 0x1b4 PF: > { %s15_s18 = sadd.s32 1, %s2490_s18  }
 0x1b5   : > { %p12_p4 = scmp.ge.s32.totalorder %s15_s18, 6  }
 0x1b7   :  { %14 = sbr.rel (!%p12_p4) target bundleno = 1 (0x1), region = 73 }

// kernel: _lambda_.14
= control target key start
LH: loop header
LB: loop body
LE: loop exit
PB: predicated region body
PF: predicated region fallthrough
CT: control target
= control target key end

     0   :  { %vm250_vm0 = vcmask 130048   ;;  %s1567_s1 = inlined_call_operand.vmem [shape: bf16[16,128], index: 1, kind: input, shape index: {}]   ;;  %s1568_s0 = inlined_call_operand.vmem [shape: bf16[512,16], index: 0, kind: input, shape index: {}]   ;;  %s1569_s2 = inlined_call_operand.vmem [shape: f32[1,128], index: 2, kind: input, shape index: {}]   ;;  %s1570_s3 = inlined_call_operand.vmem [shape: f32[1,128], index: 3, kind: input, shape index: {}]   ;;  %s1571_s4 = inlined_call_operand.vmem [shape: bf16[512,128], index: 4, kind: output, shape index: {}]  }
   0x1   :  { %v980_v0 = vld [vmem:[%s1567_s1] sm:$0xff]  ;;  %v949_v5 = vld [vmem:[%s1568_s0 + $0x8] sm:$0xff]  ;;  %v950_v9 = vld [vmem:[%s1568_s0 + $0x10] sm:$0xff] }
   0x2   :  { %v948_v1 = vld [vmem:[%s1568_s0] sm:$0xff]  ;;  %354 = vmatpush.bf16.msra.mxu0 %v980_v0  ;;  %1172 = vmatpush.bf16.msra.mxu1 %v980_v0  ;;  %v957_v6 = vld [vmem:[%s1568_s0 + $0x48] sm:$0xff]  ;;  %v958_v10 = vld [vmem:[%s1568_s0 + $0x50] sm:$0xff] }
   0x3   :  { %v956_v2 = vld [vmem:[%s1568_s0 + $0x40] sm:$0xff]  ;;  %1173 = vmatpush.bf16.msra.mxu2 %v980_v0  ;;  %1174 = vmatpush.bf16.msra.mxu3 %v980_v0  ;;  %v965_v7 = vld [vmem:[%s1568_s0 + $0x88] sm:$0xff]  ;;  %v966_v11 = vld [vmem:[%s1568_s0 + $0x90] sm:$0xff] }
   0x4   :  { %v964_v3 = vld [vmem:[%s1568_s0 + $0x80] sm:$0xff]  ;;  %v973_v8 = vld [vmem:[%s1568_s0 + $0xc8] sm:$0xff]  ;;  %v974_v12 = vld [vmem:[%s1568_s0 + $0xd0] sm:$0xff] }
   0x5   :  { %v972_v4 = vld [vmem:[%s1568_s0 + $0xc0] sm:$0xff]  ;;  %916 = vmatmul.msk.bf16.vlgmr.msra.gmra.mxu0 %vm250_vm0, %v948_v1  ;;  %924 = vmatmul.msk.bf16.vlgmr.msra.gmra.mxu1 %vm250_vm0, %v956_v2  ;;  %v951_v13 = vld [vmem:[%s1568_s0 + $0x18] sm:$0xff]  ;;  %v953_v21 = vld [vmem:[%s1568_s0 + $0x28] sm:$0xff] }
   0x6   :  { %932 = vmatmul.msk.bf16.vlgmr.msra.gmra.mxu2 %vm250_vm0, %v964_v3  ;;  %940 = vmatmul.msk.bf16.vlgmr.msra.gmra.mxu3 %vm250_vm0, %v972_v4  ;;  %v959_v14 = vld [vmem:[%s1568_s0 + $0x58] sm:$0xff]  ;;  %v952_v17 = vld [vmem:[%s1568_s0 + $0x20] sm:$0xff]  ;;  %v961_v22 = vld [vmem:[%s1568_s0 + $0x68] sm:$0xff] }
   0x7   :  { %v967_v15 = vld [vmem:[%s1568_s0 + $0x98] sm:$0xff]  ;;  %v960_v18 = vld [vmem:[%s1568_s0 + $0x60] sm:$0xff]  ;;  %v969_v23 = vld [vmem:[%s1568_s0 + $0xa8] sm:$0xff] }
   0x8   :  { %v975_v16 = vld [vmem:[%s1568_s0 + $0xd8] sm:$0xff]  ;;  %v968_v19 = vld [vmem:[%s1568_s0 + $0xa0] sm:$0xff]  ;;  %v977_v24 = vld [vmem:[%s1568_s0 + $0xe8] sm:$0xff] }
   0x9   :  { %v976_v20 = vld [vmem:[%s1568_s0 + $0xe0] sm:$0xff]  ;;  %v954_v25 = vld [vmem:[%s1568_s0 + $0x30] sm:$0xff]  ;;  %v955_v29 = vld [vmem:[%s1568_s0 + $0x38] sm:$0xff] }
   0xa   :  { %v962_v26 = vld [vmem:[%s1568_s0 + $0x70] sm:$0xff]  ;;  %v963_v30 = vld [vmem:[%s1568_s0 + $0x78] sm:$0xff]  ;;  %v1336_v35 = vld [vmem:[%s1569_s2] ss:$0 sm:$0xff] }
   0xb   :  { %v970_v27 = vld [vmem:[%s1568_s0 + $0xb0] sm:$0xff]  ;;  %v971_v31 = vld [vmem:[%s1568_s0 + $0xb8] sm:$0xff]  ;;  %v1342_v37 = vld [vmem:[%s1570_s3] ss:$0 sm:$0xff] }
   0xc   :  { %v978_v28 = vld [vmem:[%s1568_s0 + $0xf0] sm:$0xff]  ;;  %v979_v32 = vld [vmem:[%s1568_s0 + $0xf8] sm:$0xff] }
  0x15   :  { %917 = vmatmul.msk.bf16.gmra.mxu0 %vm250_vm0, %v949_v5  ;;  %925 = vmatmul.msk.bf16.gmra.mxu1 %vm250_vm0, %v957_v6 }
  0x16   :  { %933 = vmatmul.msk.bf16.gmra.mxu2 %vm250_vm0, %v965_v7  ;;  %941 = vmatmul.msk.bf16.gmra.mxu3 %vm250_vm0, %v973_v8 }
  0x25   :  { %918 = vmatmul.msk.bf16.gmra.mxu0 %vm250_vm0, %v950_v9  ;;  %926 = vmatmul.msk.bf16.gmra.mxu1 %vm250_vm0, %v958_v10 }
  0x26   :  { %934 = vmatmul.msk.bf16.gmra.mxu2 %vm250_vm0, %v966_v11  ;;  %942 = vmatmul.msk.bf16.gmra.mxu3 %vm250_vm0, %v974_v12 }
  0x35   :  { %919 = vmatmul.msk.bf16.gmra.mxu0 %vm250_vm0, %v951_v13  ;;  %927 = vmatmul.msk.bf16.gmra.mxu1 %vm250_vm0, %v959_v14 }
  0x36   :  { %935 = vmatmul.msk.bf16.gmra.mxu2 %vm250_vm0, %v967_v15  ;;  %943 = vmatmul.msk.bf16.gmra.mxu3 %vm250_vm0, %v975_v16 }
  0x45   :  { %920 = vmatmul.msk.bf16.gmra.mxu0 %vm250_vm0, %v952_v17  ;;  %928 = vmatmul.msk.bf16.gmra.mxu1 %vm250_vm0, %v960_v18 }
  0x46   :  { %936 = vmatmul.msk.bf16.gmra.mxu2 %vm250_vm0, %v968_v19  ;;  %944 = vmatmul.msk.bf16.gmra.mxu3 %vm250_vm0, %v976_v20 }
  0x55   :  { %921 = vmatmul.msk.bf16.gmra.mxu0 %vm250_vm0, %v953_v21  ;;  %929 = vmatmul.msk.bf16.gmra.mxu1 %vm250_vm0, %v961_v22 }
  0x56   :  { %937 = vmatmul.msk.bf16.gmra.mxu2 %vm250_vm0, %v969_v23  ;;  %945 = vmatmul.msk.bf16.gmra.mxu3 %vm250_vm0, %v977_v24 }
  0x65   :  { %922 = vmatmul.msk.bf16.gmra.mxu0 %vm250_vm0, %v954_v25  ;;  %930 = vmatmul.msk.bf16.gmra.mxu1 %vm250_vm0, %v962_v26 }
  0x66   :  { %938 = vmatmul.msk.bf16.gmra.mxu2 %vm250_vm0, %v970_v27  ;;  %946 = vmatmul.msk.bf16.gmra.mxu3 %vm250_vm0, %v978_v28 }
  0x75   :  { %923 = vmatmul.msk.bf16.gmra.mxu0 %vm250_vm0, %v955_v29  ;;  %931 = vmatmul.msk.bf16.gmra.mxu1 %vm250_vm0, %v963_v30 }
  0x76   :  { %939 = vmatmul.msk.bf16.gmra.mxu2 %vm250_vm0, %v971_v31  ;;  %947 = vmatmul.msk.bf16.gmra.mxu3 %vm250_vm0, %v979_v32 }
  0x82   :  { %v356_v33 = vpop.f32.mrf.mxu0  ;;  %v396_v34 = vpop.f32.mrf.mxu1 }
  0x83   :  { %v520_v36 = vmul.f32 %v1336_v35, %v356_v33  ;;  %v536_v38 = vmul.f32 %v1336_v35, %v396_v34 }
  0x85   :  { %v588_v45 = vadd.f32 %v1342_v37, %v520_v36  ;;  %v604_v46 = vadd.f32 %v1342_v37, %v536_v38 }
  0x89   :  { %v436_v39 = vpop.f32.mrf.mxu2  ;;  %v476_v40 = vpop.f32.mrf.mxu3 }
  0x8a   :  { %v358_v41 = vpop.f32.mrf.mxu0  ;;  %v398_v42 = vpop.f32.mrf.mxu1  ;;  %v552_v51 = vmul.f32 %v1336_v35, %v436_v39  ;;  %v568_v52 = vmul.f32 %v1336_v35, %v476_v40 }
  0x8b   :  { %v521_v43 = vmul.f32 %v1336_v35, %v358_v41  ;;  %v537_v44 = vmul.f32 %v1336_v35, %v398_v42 }
  0x8c   :  { %v620_v59 = vadd.f32 %v1342_v37, %v552_v51  ;;  %v636_v60 = vadd.f32 %v1342_v37, %v568_v52 }
  0x8d   :  { %v589_v47 = vadd.f32 %v1342_v37, %v521_v43  ;;  %v605_v48 = vadd.f32 %v1342_v37, %v537_v44 }
  0x8f   :  { %v984_v49 = vpack.c.bf16 %v589_v47, %v588_v45  ;;  %v1024_v50 = vpack.c.bf16 %v605_v48, %v604_v46 }
  0x91   :  { %985 = vst [vmem:[%s1571_s4] sm:$0xff] %v984_v49   ;;  %v438_v53 = vpop.f32.mrf.mxu2  ;;  %v478_v54 = vpop.f32.mrf.mxu3 }
  0x92   :  { %1148 = vst [vmem:[%s1571_s4 + $0x40] sm:$0xff] %v1024_v50   ;;  %v553_v55 = vmul.f32 %v1336_v35, %v438_v53  ;;  %v569_v56 = vmul.f32 %v1336_v35, %v478_v54  ;;  %v361_v57 = vpop.f32.mrf.mxu0  ;;  %v401_v58 = vpop.f32.mrf.mxu1 }
  0x93   :  { %v522_v1 = vmul.f32 %v1336_v35, %v361_v57  ;;  %v538_v2 = vmul.f32 %v1336_v35, %v401_v58 }
  0x94   :  { %v621_v61 = vadd.f32 %v1342_v37, %v553_v55  ;;  %v637_v62 = vadd.f32 %v1342_v37, %v569_v56 }
  0x95   :  { %v590_v9 = vadd.f32 %v1342_v37, %v522_v1  ;;  %v606_v10 = vadd.f32 %v1342_v37, %v538_v2 }
  0x96   :  { %v1064_v63 = vpack.c.bf16 %v621_v61, %v620_v59  ;;  %v1104_v0 = vpack.c.bf16 %v637_v62, %v636_v60 }
  0x98   :  { %1156 = vst [vmem:[%s1571_s4 + $0x80] sm:$0xff] %v1064_v63  }
  0x99   :  { %1164 = vst [vmem:[%s1571_s4 + $0xc0] sm:$0xff] %v1104_v0   ;;  %v441_v3 = vpop.f32.mrf.mxu2  ;;  %v481_v4 = vpop.f32.mrf.mxu3 }
  0x9a   :  { %v363_v5 = vpop.f32.mrf.mxu0  ;;  %v403_v6 = vpop.f32.mrf.mxu1  ;;  %v554_v15 = vmul.f32 %v1336_v35, %v441_v3  ;;  %v570_v16 = vmul.f32 %v1336_v35, %v481_v4 }
  0x9b   :  { %v523_v7 = vmul.f32 %v1336_v35, %v363_v5  ;;  %v539_v8 = vmul.f32 %v1336_v35, %v403_v6 }
  0x9c   :  { %v622_v23 = vadd.f32 %v1342_v37, %v554_v15  ;;  %v638_v24 = vadd.f32 %v1342_v37, %v570_v16 }
  0x9d   :  { %v591_v11 = vadd.f32 %v1342_v37, %v523_v7  ;;  %v607_v12 = vadd.f32 %v1342_v37, %v539_v8 }
  0x9f   :  { %v989_v13 = vpack.c.bf16 %v591_v11, %v590_v9  ;;  %v1029_v14 = vpack.c.bf16 %v607_v12, %v606_v10 }
  0xa1   :  { %1141 = vst [vmem:[%s1571_s4 + $0x8] sm:$0xff] %v989_v13   ;;  %v443_v17 = vpop.f32.mrf.mxu2  ;;  %v483_v18 = vpop.f32.mrf.mxu3 }
  0xa2   :  { %1149 = vst [vmem:[%s1571_s4 + $0x48] sm:$0xff] %v1029_v14   ;;  %v555_v19 = vmul.f32 %v1336_v35, %v443_v17  ;;  %v571_v20 = vmul.f32 %v1336_v35, %v483_v18  ;;  %v366_v21 = vpop.f32.mrf.mxu0  ;;  %v406_v22 = vpop.f32.mrf.mxu1 }
  0xa3   :  { %v524_v29 = vmul.f32 %v1336_v35, %v366_v21  ;;  %v540_v30 = vmul.f32 %v1336_v35, %v406_v22 }
  0xa4   :  { %v623_v25 = vadd.f32 %v1342_v37, %v555_v19  ;;  %v639_v26 = vadd.f32 %v1342_v37, %v571_v20 }
  0xa5   :  { %v592_v39 = vadd.f32 %v1342_v37, %v524_v29  ;;  %v608_v40 = vadd.f32 %v1342_v37, %v540_v30 }
  0xa6   :  { %v1069_v27 = vpack.c.bf16 %v623_v25, %v622_v23  ;;  %v1109_v28 = vpack.c.bf16 %v639_v26, %v638_v24 }
  0xa8   :  { %1157 = vst [vmem:[%s1571_s4 + $0x88] sm:$0xff] %v1069_v27  }
  0xa9   :  { %1165 = vst [vmem:[%s1571_s4 + $0xc8] sm:$0xff] %v1109_v28   ;;  %v446_v31 = vpop.f32.mrf.mxu2  ;;  %v486_v32 = vpop.f32.mrf.mxu3 }
  0xaa   :  { %v368_v33 = vpop.f32.mrf.mxu0  ;;  %v408_v34 = vpop.f32.mrf.mxu1  ;;  %v556_v45 = vmul.f32 %v1336_v35, %v446_v31  ;;  %v572_v46 = vmul.f32 %v1336_v35, %v486_v32 }
  0xab   :  { %v525_v36 = vmul.f32 %v1336_v35, %v368_v33  ;;  %v541_v38 = vmul.f32 %v1336_v35, %v408_v34 }
  0xac   :  { %v624_v53 = vadd.f32 %v1342_v37, %v556_v45  ;;  %v640_v54 = vadd.f32 %v1342_v37, %v572_v46 }
  0xad   :  { %v593_v41 = vadd.f32 %v1342_v37, %v525_v36  ;;  %v609_v42 = vadd.f32 %v1342_v37, %v541_v38 }
  0xaf   :  { %v994_v43 = vpack.c.bf16 %v593_v41, %v592_v39  ;;  %v1034_v44 = vpack.c.bf16 %v609_v42, %v608_v40 }
  0xb1   :  { %1142 = vst [vmem:[%s1571_s4 + $0x10] sm:$0xff] %v994_v43   ;;  %v448_v47 = vpop.f32.mrf.mxu2  ;;  %v488_v48 = vpop.f32.mrf.mxu3 }
  0xb2   :  { %1150 = vst [vmem:[%s1571_s4 + $0x50] sm:$0xff] %v1034_v44   ;;  %v557_v49 = vmul.f32 %v1336_v35, %v448_v47  ;;  %v573_v50 = vmul.f32 %v1336_v35, %v488_v48  ;;  %v371_v51 = vpop.f32.mrf.mxu0  ;;  %v411_v52 = vpop.f32.mrf.mxu1 }
  0xb3   :  { %v526_v59 = vmul.f32 %v1336_v35, %v371_v51  ;;  %v542_v60 = vmul.f32 %v1336_v35, %v411_v52 }
  0xb4   :  { %v625_v55 = vadd.f32 %v1342_v37, %v557_v49  ;;  %v641_v56 = vadd.f32 %v1342_v37, %v573_v50 }
  0xb5   :  { %v594_v3 = vadd.f32 %v1342_v37, %v526_v59  ;;  %v610_v4 = vadd.f32 %v1342_v37, %v542_v60 }
  0xb6   :  { %v1074_v57 = vpack.c.bf16 %v625_v55, %v624_v53  ;;  %v1114_v58 = vpack.c.bf16 %v641_v56, %v640_v54 }
  0xb8   :  { %1158 = vst [vmem:[%s1571_s4 + $0x90] sm:$0xff] %v1074_v57  }
  0xb9   :  { %1166 = vst [vmem:[%s1571_s4 + $0xd0] sm:$0xff] %v1114_v58   ;;  %v451_v61 = vpop.f32.mrf.mxu2  ;;  %v491_v62 = vpop.f32.mrf.mxu3 }
  0xba   :  { %v373_v63 = vpop.f32.mrf.mxu0  ;;  %v413_v0 = vpop.f32.mrf.mxu1  ;;  %v558_v9 = vmul.f32 %v1336_v35, %v451_v61  ;;  %v574_v10 = vmul.f32 %v1336_v35, %v491_v62 }
  0xbb   :  { %v527_v1 = vmul.f32 %v1336_v35, %v373_v63  ;;  %v543_v2 = vmul.f32 %v1336_v35, %v413_v0 }
  0xbc   :  { %v626_v17 = vadd.f32 %v1342_v37, %v558_v9  ;;  %v642_v18 = vadd.f32 %v1342_v37, %v574_v10 }
  0xbd   :  { %v595_v5 = vadd.f32 %v1342_v37, %v527_v1  ;;  %v611_v6 = vadd.f32 %v1342_v37, %v543_v2 }
  0xbf   :  { %v999_v7 = vpack.c.bf16 %v595_v5, %v594_v3  ;;  %v1039_v8 = vpack.c.bf16 %v611_v6, %v610_v4 }
  0xc1   :  { %1143 = vst [vmem:[%s1571_s4 + $0x18] sm:$0xff] %v999_v7   ;;  %v453_v11 = vpop.f32.mrf.mxu2  ;;  %v493_v12 = vpop.f32.mrf.mxu3 }
  0xc2   :  { %1151 = vst [vmem:[%s1571_s4 + $0x58] sm:$0xff] %v1039_v8   ;;  %v559_v13 = vmul.f32 %v1336_v35, %v453_v11  ;;  %v575_v14 = vmul.f32 %v1336_v35, %v493_v12  ;;  %v376_v15 = vpop.f32.mrf.mxu0  ;;  %v416_v16 = vpop.f32.mrf.mxu1 }
  0xc3   :  { %v528_v23 = vmul.f32 %v1336_v35, %v376_v15  ;;  %v544_v24 = vmul.f32 %v1336_v35, %v416_v16 }
  0xc4   :  { %v627_v19 = vadd.f32 %v1342_v37, %v559_v13  ;;  %v643_v20 = vadd.f32 %v1342_v37, %v575_v14 }
  0xc5   :  { %v596_v31 = vadd.f32 %v1342_v37, %v528_v23  ;;  %v612_v32 = vadd.f32 %v1342_v37, %v544_v24 }
  0xc6   :  { %v1079_v21 = vpack.c.bf16 %v627_v19, %v626_v17  ;;  %v1119_v22 = vpack.c.bf16 %v643_v20, %v642_v18 }
  0xc8   :  { %1159 = vst [vmem:[%s1571_s4 + $0x98] sm:$0xff] %v1079_v21  }
  0xc9   :  { %1167 = vst [vmem:[%s1571_s4 + $0xd8] sm:$0xff] %v1119_v22   ;;  %v456_v25 = vpop.f32.mrf.mxu2  ;;  %v496_v26 = vpop.f32.mrf.mxu3 }
  0xca   :  { %v378_v27 = vpop.f32.mrf.mxu0  ;;  %v418_v28 = vpop.f32.mrf.mxu1  ;;  %v560_v39 = vmul.f32 %v1336_v35, %v456_v25  ;;  %v576_v40 = vmul.f32 %v1336_v35, %v496_v26 }
  0xcb   :  { %v529_v29 = vmul.f32 %v1336_v35, %v378_v27  ;;  %v545_v30 = vmul.f32 %v1336_v35, %v418_v28 }
  0xcc   :  { %v628_v47 = vadd.f32 %v1342_v37, %v560_v39  ;;  %v644_v48 = vadd.f32 %v1342_v37, %v576_v40 }
  0xcd   :  { %v597_v33 = vadd.f32 %v1342_v37, %v529_v29  ;;  %v613_v34 = vadd.f32 %v1342_v37, %v545_v30 }
  0xcf   :  { %v1004_v36 = vpack.c.bf16 %v597_v33, %v596_v31  ;;  %v1044_v38 = vpack.c.bf16 %v613_v34, %v612_v32 }
  0xd1   :  { %1144 = vst [vmem:[%s1571_s4 + $0x20] sm:$0xff] %v1004_v36   ;;  %v458_v41 = vpop.f32.mrf.mxu2  ;;  %v498_v42 = vpop.f32.mrf.mxu3 }
  0xd2   :  { %1152 = vst [vmem:[%s1571_s4 + $0x60] sm:$0xff] %v1044_v38   ;;  %v561_v43 = vmul.f32 %v1336_v35, %v458_v41  ;;  %v577_v44 = vmul.f32 %v1336_v35, %v498_v42  ;;  %v381_v45 = vpop.f32.mrf.mxu0  ;;  %v421_v46 = vpop.f32.mrf.mxu1 }
  0xd3   :  { %v530_v53 = vmul.f32 %v1336_v35, %v381_v45  ;;  %v546_v54 = vmul.f32 %v1336_v35, %v421_v46 }
  0xd4   :  { %v629_v49 = vadd.f32 %v1342_v37, %v561_v43  ;;  %v645_v50 = vadd.f32 %v1342_v37, %v577_v44 }
  0xd5   :  { %v598_v61 = vadd.f32 %v1342_v37, %v530_v53  ;;  %v614_v62 = vadd.f32 %v1342_v37, %v546_v54 }
  0xd6   :  { %v1084_v51 = vpack.c.bf16 %v629_v49, %v628_v47  ;;  %v1124_v52 = vpack.c.bf16 %v645_v50, %v644_v48 }
  0xd8   :  { %1160 = vst [vmem:[%s1571_s4 + $0xa0] sm:$0xff] %v1084_v51  }
  0xd9   :  { %1168 = vst [vmem:[%s1571_s4 + $0xe0] sm:$0xff] %v1124_v52   ;;  %v461_v55 = vpop.f32.mrf.mxu2  ;;  %v501_v56 = vpop.f32.mrf.mxu3 }
  0xda   :  { %v383_v57 = vpop.f32.mrf.mxu0  ;;  %v423_v58 = vpop.f32.mrf.mxu1  ;;  %v562_v3 = vmul.f32 %v1336_v35, %v461_v55  ;;  %v578_v4 = vmul.f32 %v1336_v35, %v501_v56 }
  0xdb   :  { %v531_v59 = vmul.f32 %v1336_v35, %v383_v57  ;;  %v547_v60 = vmul.f32 %v1336_v35, %v423_v58 }
  0xdc   :  { %v630_v11 = vadd.f32 %v1342_v37, %v562_v3  ;;  %v646_v12 = vadd.f32 %v1342_v37, %v578_v4 }
  0xdd   :  { %v599_v63 = vadd.f32 %v1342_v37, %v531_v59  ;;  %v615_v0 = vadd.f32 %v1342_v37, %v547_v60 }
  0xdf   :  { %v1009_v1 = vpack.c.bf16 %v599_v63, %v598_v61  ;;  %v1049_v2 = vpack.c.bf16 %v615_v0, %v614_v62 }
  0xe1   :  { %1145 = vst [vmem:[%s1571_s4 + $0x28] sm:$0xff] %v1009_v1   ;;  %v463_v5 = vpop.f32.mrf.mxu2  ;;  %v503_v6 = vpop.f32.mrf.mxu3 }
  0xe2   :  { %1153 = vst [vmem:[%s1571_s4 + $0x68] sm:$0xff] %v1049_v2   ;;  %v563_v7 = vmul.f32 %v1336_v35, %v463_v5  ;;  %v579_v8 = vmul.f32 %v1336_v35, %v503_v6  ;;  %v386_v9 = vpop.f32.mrf.mxu0  ;;  %v426_v10 = vpop.f32.mrf.mxu1 }
  0xe3   :  { %v532_v17 = vmul.f32 %v1336_v35, %v386_v9  ;;  %v548_v18 = vmul.f32 %v1336_v35, %v426_v10 }
  0xe4   :  { %v631_v13 = vadd.f32 %v1342_v37, %v563_v7  ;;  %v647_v14 = vadd.f32 %v1342_v37, %v579_v8 }
  0xe5   :  { %v600_v25 = vadd.f32 %v1342_v37, %v532_v17  ;;  %v616_v26 = vadd.f32 %v1342_v37, %v548_v18 }
  0xe6   :  { %v1089_v15 = vpack.c.bf16 %v631_v13, %v630_v11  ;;  %v1129_v16 = vpack.c.bf16 %v647_v14, %v646_v12 }
  0xe8   :  { %1161 = vst [vmem:[%s1571_s4 + $0xa8] sm:$0xff] %v1089_v15  }
  0xe9   :  { %1169 = vst [vmem:[%s1571_s4 + $0xe8] sm:$0xff] %v1129_v16   ;;  %v466_v19 = vpop.f32.mrf.mxu2  ;;  %v506_v20 = vpop.f32.mrf.mxu3 }
  0xea   :  { %v388_v21 = vpop.f32.mrf.mxu0  ;;  %v428_v22 = vpop.f32.mrf.mxu1  ;;  %v564_v31 = vmul.f32 %v1336_v35, %v466_v19  ;;  %v580_v32 = vmul.f32 %v1336_v35, %v506_v20 }
  0xeb   :  { %v533_v23 = vmul.f32 %v1336_v35, %v388_v21  ;;  %v549_v24 = vmul.f32 %v1336_v35, %v428_v22 }
  0xec   :  { %v632_v41 = vadd.f32 %v1342_v37, %v564_v31  ;;  %v648_v42 = vadd.f32 %v1342_v37, %v580_v32 }
  0xed   :  { %v601_v27 = vadd.f32 %v1342_v37, %v533_v23  ;;  %v617_v28 = vadd.f32 %v1342_v37, %v549_v24 }
  0xef   :  { %v1014_v29 = vpack.c.bf16 %v601_v27, %v600_v25  ;;  %v1054_v30 = vpack.c.bf16 %v617_v28, %v616_v26 }
  0xf1   :  { %1146 = vst [vmem:[%s1571_s4 + $0x30] sm:$0xff] %v1014_v29   ;;  %v468_v33 = vpop.f32.mrf.mxu2  ;;  %v508_v34 = vpop.f32.mrf.mxu3 }
  0xf2   :  { %1154 = vst [vmem:[%s1571_s4 + $0x70] sm:$0xff] %v1054_v30   ;;  %v565_v36 = vmul.f32 %v1336_v35, %v468_v33  ;;  %v581_v38 = vmul.f32 %v1336_v35, %v508_v34  ;;  %v391_v39 = vpop.f32.mrf.mxu0  ;;  %v431_v40 = vpop.f32.mrf.mxu1 }
  0xf3   :  { %v534_v47 = vmul.f32 %v1336_v35, %v391_v39  ;;  %v550_v48 = vmul.f32 %v1336_v35, %v431_v40 }
  0xf4   :  { %v633_v43 = vadd.f32 %v1342_v37, %v565_v36  ;;  %v649_v44 = vadd.f32 %v1342_v37, %v581_v38 }
  0xf5   :  { %v602_v55 = vadd.f32 %v1342_v37, %v534_v47  ;;  %v618_v56 = vadd.f32 %v1342_v37, %v550_v48 }
  0xf6   :  { %v1094_v45 = vpack.c.bf16 %v633_v43, %v632_v41  ;;  %v1134_v46 = vpack.c.bf16 %v649_v44, %v648_v42 }
  0xf8   :  { %1162 = vst [vmem:[%s1571_s4 + $0xb0] sm:$0xff] %v1094_v45  }
  0xf9   :  { %1170 = vst [vmem:[%s1571_s4 + $0xf0] sm:$0xff] %v1134_v46   ;;  %v471_v49 = vpop.f32.mrf.mxu2  ;;  %v511_v50 = vpop.f32.mrf.mxu3 }
  0xfa   :  { %v393_v51 = vpop.f32.mrf.mxu0  ;;  %v433_v52 = vpop.f32.mrf.mxu1  ;;  %v566_v61 = vmul.f32 %v1336_v35, %v471_v49  ;;  %v582_v62 = vmul.f32 %v1336_v35, %v511_v50 }
  0xfb   :  { %v535_v53 = vmul.f32 %v1336_v35, %v393_v51  ;;  %v551_v54 = vmul.f32 %v1336_v35, %v433_v52 }
  0xfc   :  { %v634_v3 = vadd.f32 %v1342_v37, %v566_v61  ;;  %v650_v4 = vadd.f32 %v1342_v37, %v582_v62 }
  0xfd   :  { %v603_v57 = vadd.f32 %v1342_v37, %v535_v53  ;;  %v619_v58 = vadd.f32 %v1342_v37, %v551_v54 }
  0xff   :  { %v1019_v59 = vpack.c.bf16 %v603_v57, %v602_v55  ;;  %v1059_v60 = vpack.c.bf16 %v619_v58, %v618_v56 }
 0x101   :  { %1147 = vst [vmem:[%s1571_s4 + $0x38] sm:$0xff] %v1019_v59   ;;  %v473_v63 = vpop.f32.mrf.mxu2  ;;  %v513_v0 = vpop.f32.mrf.mxu3 }
 0x102   :  { %1155 = vst [vmem:[%s1571_s4 + $0x78] sm:$0xff] %v1059_v60   ;;  %v567_v1 = vmul.f32 %v1336_v35, %v473_v63  ;;  %v583_v2 = vmul.f32 %v1336_v35, %v513_v0 }
 0x104   :  { %v635_v5 = vadd.f32 %v1342_v37, %v567_v1  ;;  %v651_v6 = vadd.f32 %v1342_v37, %v583_v2 }
 0x106   :  { %v1099_v7 = vpack.c.bf16 %v635_v5, %v634_v3  ;;  %v1139_v8 = vpack.c.bf16 %v651_v6, %v650_v4 }
 0x108   :  { %1163 = vst [vmem:[%s1571_s4 + $0xb8] sm:$0xff] %v1099_v7  }
 0x109   :  { %1171 = vst [vmem:[%s1571_s4 + $0xf8] sm:$0xff] %v1139_v8  }

// kernel: _lambda_.13
= control target key start
LH: loop header
LB: loop body
LE: loop exit
PB: predicated region body
PF: predicated region fallthrough
CT: control target
= control target key end

     0   :  { %vm442_vm0 = vcmask 130048   ;;  %s2597_s1 = inlined_call_operand.vmem [shape: bf16[144,128], index: 1, kind: input, shape index: {}]   ;;  %s2598_s0 = inlined_call_operand.vmem [shape: bf16[512,144], index: 0, kind: input, shape index: {}]   ;;  %s2599_s2 = inlined_call_operand.vmem [shape: f32[1,128], index: 2, kind: input, shape index: {}]   ;;  %s2600_s3 = inlined_call_operand.vmem [shape: f32[1,128], index: 3, kind: input, shape index: {}]   ;;  %s2601_s4 = inlined_call_operand.vmem [shape: bf16[512,128], index: 4, kind: output, shape index: {}]  }
   0x1   :  { %v1604_v0 = vld [vmem:[%s2597_s1 + $0x38] sm:$0xff]  ;;  %v1605_v1 = vld [vmem:[%s2597_s1 + $0x40] sm:$0xff]  ;;  %v1213_v3 = vld [vmem:[%s2598_s0 + $0x8] sm:$0xf0] }
   0x2   :  { %v1533_v2 = vld [vmem:[%s2598_s0 + $0x4] sm:$0xf]  ;;  %539 = vmatpush.bf16.msra.mxu0 %v1604_v0  ;;  %1797 = vmatpush.bf16.msra.mxu2 %v1604_v0  ;;  %v1603_v5 = vld [vmem:[%s2597_s1 + $0x30] sm:$0xff]  ;;  %v1602_v6 = vld [vmem:[%s2597_s1 + $0x28] sm:$0xff] }
   0x3   :  { %v1216_v4 = vor.u32 %v1533_v2, %v1213_v3  ;;  %715 = vmatpush.bf16.msra.mxu1 %v1605_v1  ;;  %1805 = vmatpush.bf16.msra.mxu3 %v1605_v1  ;;  %v1567_v7 = vld [vmem:[%s2598_s0 + $0x114] sm:$0xf]  ;;  %v1349_v8 = vld [vmem:[%s2598_s0 + $0x118] sm:$0xf0]  ;;  %v1601_v10 = vld [vmem:[%s2597_s1 + $0x20] sm:$0xff] }
   0x4   :  { %v1352_v9 = vor.u32 %v1567_v7, %v1349_v8  ;;  %v1600_v11 = vld [vmem:[%s2597_s1 + $0x18] sm:$0xff]  ;;  %v1535_v12 = vld [vmem:[%s2598_s0 + $0x14] sm:$0xf]  ;;  %v1598_v16 = vld [vmem:[%s2597_s1 + $0x8] sm:$0xff] }
   0x5   :  { %v1221_v13 = vld [vmem:[%s2598_s0 + $0x18] sm:$0xf0]  ;;  %v1599_v15 = vld [vmem:[%s2597_s1 + $0x10] sm:$0xff]  ;;  %v1569_v17 = vld [vmem:[%s2598_s0 + $0x124] sm:$0xf] }
   0x6   :  { %1501 = vmatmul.msk.bf16.vlgmr.msra.gmra.mxu1 %vm442_vm0, %v1216_v4  ;;  %540 = vmatpush.bf16.msra.mxu0 %v1603_v5  ;;  %v1224_v14 = vor.u32 %v1535_v12, %v1221_v13  ;;  %v1357_v18 = vld [vmem:[%s2598_s0 + $0x128] sm:$0xf0]  ;;  %v1597_v20 = vld [vmem:[%s2597_s1] sm:$0xff]  ;;  %v1534_v22 = vld [vmem:[%s2598_s0 + $0x4] sm:$0xf0] }
   0x7   :  { %1798 = vmatpush.bf16.msra.mxu2 %v1603_v5  ;;  %1518 = vmatmul.msk.bf16.vlgmr.msra.gmra.mxu3 %vm442_vm0, %v1352_v9  ;;  %v1360_v19 = vor.u32 %v1569_v17, %v1357_v18  ;;  %v1211_v21 = vld [vmem:[%s2598_s0] sm:$0xf]  ;;  %v1566_v24 = vld [vmem:[%s2598_s0 + $0x104] sm:$0xf0]  ;;  %v1537_v27 = vld [vmem:[%s2598_s0 + $0x24] sm:$0xf] }
   0x8   :  { %v1339_v23 = vld [vmem:[%s2598_s0 + $0x100] sm:$0xf]  ;;  %v1212_v25 = vor.u32 %v1534_v22, %v1211_v21  ;;  %v1229_v28 = vld [vmem:[%s2598_s0 + $0x28] sm:$0xf0]  ;;  %v1571_v30 = vld [vmem:[%s2598_s0 + $0x134] sm:$0xf] }
   0x9   :  { %v1340_v26 = vor.u32 %v1566_v24, %v1339_v23  ;;  %v1232_v29 = vor.u32 %v1537_v27, %v1229_v28  ;;  %v1365_v31 = vld [vmem:[%s2598_s0 + $0x138] sm:$0xf0]  ;;  %v1219_v33 = vld [vmem:[%s2598_s0 + $0x10] sm:$0xf]  ;;  %v1536_v34 = vld [vmem:[%s2598_s0 + $0x14] sm:$0xf0] }
   0xa   :  { %541 = vmatpush.bf16.msra.mxu0 %v1602_v6  ;;  %v1368_v32 = vor.u32 %v1571_v30, %v1365_v31  ;;  %v1347_v35 = vld [vmem:[%s2598_s0 + $0x110] sm:$0xf]  ;;  %v1568_v36 = vld [vmem:[%s2598_s0 + $0x114] sm:$0xf0]  ;;  %v1220_v37 = vor.u32 %v1536_v34, %v1219_v33  ;;  %v1539_v39 = vld [vmem:[%s2598_s0 + $0x34] sm:$0xf] }
   0xb   :  { %1799 = vmatpush.bf16.msra.mxu2 %v1602_v6  ;;  %v1348_v38 = vor.u32 %v1568_v36, %v1347_v35  ;;  %v1237_v40 = vld [vmem:[%s2598_s0 + $0x38] sm:$0xf0]  ;;  %v1573_v42 = vld [vmem:[%s2598_s0 + $0x144] sm:$0xf]  ;;  %v1373_v43 = vld [vmem:[%s2598_s0 + $0x148] sm:$0xf0] }
   0xc   :  { %v1240_v41 = vor.u32 %v1539_v39, %v1237_v40  ;;  %v1376_v44 = vor.u32 %v1573_v42, %v1373_v43  ;;  %v1227_v45 = vld [vmem:[%s2598_s0 + $0x20] sm:$0xf]  ;;  %v1538_v46 = vld [vmem:[%s2598_s0 + $0x24] sm:$0xf0]  ;;  %v1541_v51 = vld [vmem:[%s2598_s0 + $0x44] sm:$0xf] }
   0xd   :  { %v1355_v47 = vld [vmem:[%s2598_s0 + $0x120] sm:$0xf]  ;;  %v1570_v48 = vld [vmem:[%s2598_s0 + $0x124] sm:$0xf0]  ;;  %v1228_v49 = vor.u32 %v1538_v46, %v1227_v45  ;;  %v1245_v52 = vld [vmem:[%s2598_s0 + $0x48] sm:$0xf0] }
   0xe   :  { %542 = vmatpush.bf16.msra.mxu0 %v1601_v10  ;;  %v1356_v50 = vor.u32 %v1570_v48, %v1355_v47  ;;  %v1248_v53 = vor.u32 %v1541_v51, %v1245_v52  ;;  %v1575_v54 = vld [vmem:[%s2598_s0 + $0x154] sm:$0xf]  ;;  %v1381_v55 = vld [vmem:[%s2598_s0 + $0x158] sm:$0xf0]  ;;  %v1235_v57 = vld [vmem:[%s2598_s0 + $0x30] sm:$0xf] }
   0xf   :  { %1800 = vmatpush.bf16.msra.mxu2 %v1601_v10  ;;  %v1384_v56 = vor.u32 %v1575_v54, %v1381_v55  ;;  %v1540_v58 = vld [vmem:[%s2598_s0 + $0x34] sm:$0xf0]  ;;  %v1363_v59 = vld [vmem:[%s2598_s0 + $0x130] sm:$0xf]  ;;  %v1543_v63 = vld [vmem:[%s2598_s0 + $0x54] sm:$0xf] }
  0x10   :  { %v1572_v60 = vld [vmem:[%s2598_s0 + $0x134] sm:$0xf0]  ;;  %v1236_v61 = vor.u32 %v1540_v58, %v1235_v57  ;;  %v1253_v0 = vld [vmem:[%s2598_s0 + $0x58] sm:$0xf0]  ;;  %v1577_v2 = vld [vmem:[%s2598_s0 + $0x164] sm:$0xf] }
  0x11   :  { %v1364_v62 = vor.u32 %v1572_v60, %v1363_v59  ;;  %v1256_v1 = vor.u32 %v1543_v63, %v1253_v0  ;;  %v1389_v3 = vld [vmem:[%s2598_s0 + $0x168] sm:$0xf0]  ;;  %v1243_v5 = vld [vmem:[%s2598_s0 + $0x40] sm:$0xf]  ;;  %v1542_v6 = vld [vmem:[%s2598_s0 + $0x44] sm:$0xf0] }
  0x12   :  { %543 = vmatpush.bf16.msra.mxu0 %v1600_v11  ;;  %v1392_v4 = vor.u32 %v1577_v2, %v1389_v3  ;;  %v1371_v7 = vld [vmem:[%s2598_s0 + $0x140] sm:$0xf]  ;;  %v1574_v8 = vld [vmem:[%s2598_s0 + $0x144] sm:$0xf0]  ;;  %v1244_v9 = vor.u32 %v1542_v6, %v1243_v5  ;;  %v1261_v12 = vld [vmem:[%s2598_s0 + $0x68] sm:$0xf0] }
  0x13   :  { %1801 = vmatpush.bf16.msra.mxu2 %v1600_v11  ;;  %v1372_v10 = vor.u32 %v1574_v8, %v1371_v7  ;;  %v1545_v11 = vld [vmem:[%s2598_s0 + $0x64] sm:$0xf]  ;;  %v1251_v17 = vld [vmem:[%s2598_s0 + $0x50] sm:$0xf]  ;;  %v1544_v18 = vld [vmem:[%s2598_s0 + $0x54] sm:$0xf0] }
  0x14   :  { %v1264_v13 = vor.u32 %v1545_v11, %v1261_v12  ;;  %v1252_v21 = vor.u32 %v1544_v18, %v1251_v17  ;;  %v1547_v23 = vld [vmem:[%s2598_s0 + $0x74] sm:$0xf]  ;;  %v1269_v24 = vld [vmem:[%s2598_s0 + $0x78] sm:$0xf0]  ;;  %v1405_v27 = vld [vmem:[%s2598_s0 + $0x188] sm:$0xf0] }
  0x15   :  { %v1546_v30 = vld [vmem:[%s2598_s0 + $0x64] sm:$0xf0]  ;;  %v1387_v31 = vld [vmem:[%s2598_s0 + $0x160] sm:$0xf]  ;;  %v1549_v35 = vld [vmem:[%s2598_s0 + $0x84] sm:$0xf] }
  0x16   :  { %1502 = vmatmul.msk.bf16.gmra.mxu1 %vm442_vm0, %v1224_v14  ;;  %544 = vmatpush.bf16.msra.mxu0 %v1599_v15  ;;  %v1579_v14 = vld [vmem:[%s2598_s0 + $0x174] sm:$0xf]  ;;  %v1277_v36 = vld [vmem:[%s2598_s0 + $0x88] sm:$0xf0]  ;;  %v1413_v40 = vld [vmem:[%s2598_s0 + $0x198] sm:$0xf0] }
  0x17   :  { %1802 = vmatpush.bf16.msra.mxu2 %v1599_v15  ;;  %1519 = vmatmul.msk.bf16.gmra.mxu3 %vm442_vm0, %v1360_v19  ;;  %v1397_v15 = vld [vmem:[%s2598_s0 + $0x178] sm:$0xf0]  ;;  %v1379_v19 = vld [vmem:[%s2598_s0 + $0x150] sm:$0xf]  ;;  %v1583_v39 = vld [vmem:[%s2598_s0 + $0x194] sm:$0xf] }
  0x18   :  { %v1267_v42 = vld [vmem:[%s2598_s0 + $0x70] sm:$0xf]  ;;  %v1548_v43 = vld [vmem:[%s2598_s0 + $0x74] sm:$0xf0]  ;;  %v1285_v51 = vld [vmem:[%s2598_s0 + $0x98] sm:$0xf0] }
  0x19   :  { %v1395_v45 = vld [vmem:[%s2598_s0 + $0x170] sm:$0xf]  ;;  %v1580_v46 = vld [vmem:[%s2598_s0 + $0x174] sm:$0xf0]  ;;  %v1268_v47 = vor.u32 %v1548_v43, %v1267_v42  ;;  %v1585_v55 = vld [vmem:[%s2598_s0 + $0x1a4] sm:$0xf] }
  0x1a   :  { %545 = vmatpush.bf16.msra.mxu0 %v1598_v16  ;;  %v1275_v58 = vld [vmem:[%s2598_s0 + $0x80] sm:$0xf]  ;;  %v1550_v59 = vld [vmem:[%s2598_s0 + $0x84] sm:$0xf0]  ;;  %v1553_v3 = vld [vmem:[%s2598_s0 + $0xa4] sm:$0xf] }
  0x1b   :  { %1803 = vmatpush.bf16.msra.mxu2 %v1598_v16  ;;  %v1400_v16 = vor.u32 %v1579_v14, %v1397_v15  ;;  %v1276_v63 = vor.u32 %v1550_v59, %v1275_v58  ;;  %v2125_v6 = vld [vmem:[%s2599_s2] ss:$0 sm:$0xff]  ;;  %v1587_v15 = vld [vmem:[%s2598_s0 + $0x1b4] sm:$0xf] }
  0x1e   :  { %546 = vmatpush.bf16.msra.mxu0 %v1597_v20 }
  0x1f   :  { %1804 = vmatpush.bf16.msra.mxu2 %v1597_v20  ;;  %v1576_v20 = vld [vmem:[%s2598_s0 + $0x154] sm:$0xf0] }
  0x20   :  { %v1380_v22 = vor.u32 %v1576_v20, %v1379_v19  ;;  %v1283_v20 = vld [vmem:[%s2598_s0 + $0x90] sm:$0xf] }
  0x21   :  { %547 = vmatmul.bf16.vlgmr.msra.gmra.mxu0 %v1212_v25  ;;  %v1272_v25 = vor.u32 %v1547_v23, %v1269_v24  ;;  %v1411_v24 = vld [vmem:[%s2598_s0 + $0x190] sm:$0xf] }
  0x22   :  { %627 = vmatmul.bf16.vlgmr.msra.gmra.mxu2 %v1340_v26  ;;  %v1581_v26 = vld [vmem:[%s2598_s0 + $0x184] sm:$0xf] }
  0x23   :  { %v1408_v28 = vor.u32 %v1581_v26, %v1405_v27 }
  0x26   :  { %1503 = vmatmul.msk.bf16.gmra.mxu1 %vm442_vm0, %v1232_v29  ;;  %v1259_v29 = vld [vmem:[%s2598_s0 + $0x60] sm:$0xf] }
  0x27   :  { %1520 = vmatmul.msk.bf16.gmra.mxu3 %vm442_vm0, %v1368_v32  ;;  %v1578_v32 = vld [vmem:[%s2598_s0 + $0x164] sm:$0xf0]  ;;  %v1260_v33 = vor.u32 %v1546_v30, %v1259_v29 }
  0x28   :  { %v1388_v34 = vor.u32 %v1578_v32, %v1387_v31 }
  0x31   :  { %552 = vmatmul.bf16.gmra.mxu0 %v1220_v37  ;;  %v1280_v37 = vor.u32 %v1549_v35, %v1277_v36  ;;  %v1301_v35 = vld [vmem:[%s2598_s0 + $0xb8] sm:$0xf0] }
  0x32   :  { %632 = vmatmul.bf16.gmra.mxu2 %v1348_v38 }
  0x36   :  { %1504 = vmatmul.msk.bf16.gmra.mxu1 %vm442_vm0, %v1240_v41  ;;  %v1416_v41 = vor.u32 %v1583_v39, %v1413_v40 }
  0x37   :  { %1521 = vmatmul.msk.bf16.gmra.mxu3 %vm442_vm0, %v1376_v44 }
  0x41   :  { %557 = vmatmul.bf16.gmra.mxu0 %v1228_v49  ;;  %v1396_v49 = vor.u32 %v1580_v46, %v1395_v45  ;;  %v1437_v45 = vld [vmem:[%s2598_s0 + $0x1c8] sm:$0xf0] }
  0x42   :  { %637 = vmatmul.bf16.gmra.mxu2 %v1356_v50  ;;  %v1551_v50 = vld [vmem:[%s2598_s0 + $0x94] sm:$0xf] }
  0x43   :  { %v1288_v52 = vor.u32 %v1551_v50, %v1285_v51  ;;  %v1291_v51 = vld [vmem:[%s2598_s0 + $0xa0] sm:$0xf] }
  0x46   :  { %1505 = vmatmul.msk.bf16.gmra.mxu1 %vm442_vm0, %v1248_v53 }
  0x47   :  { %1522 = vmatmul.msk.bf16.gmra.mxu3 %vm442_vm0, %v1384_v56  ;;  %v1421_v56 = vld [vmem:[%s2598_s0 + $0x1a8] sm:$0xf0] }
  0x48   :  { %v1424_v57 = vor.u32 %v1585_v55, %v1421_v56  ;;  %v1586_v56 = vld [vmem:[%s2598_s0 + $0x1a4] sm:$0xf0] }
  0x51   :  { %562 = vmatmul.bf16.gmra.mxu0 %v1236_v61  ;;  %v1403_v61 = vld [vmem:[%s2598_s0 + $0x180] sm:$0xf] }
  0x52   :  { %642 = vmatmul.bf16.gmra.mxu2 %v1364_v62  ;;  %v1582_v62 = vld [vmem:[%s2598_s0 + $0x184] sm:$0xf0] }
  0x53   :  { %v1404_v2 = vor.u32 %v1582_v62, %v1403_v61 }
  0x56   :  { %1506 = vmatmul.msk.bf16.gmra.mxu1 %vm442_vm0, %v1256_v1 }
  0x57   :  { %1523 = vmatmul.msk.bf16.gmra.mxu3 %vm442_vm0, %v1392_v4  ;;  %v1293_v4 = vld [vmem:[%s2598_s0 + $0xa8] sm:$0xf0] }
  0x58   :  { %v1296_v7 = vor.u32 %v1553_v3, %v1293_v4  ;;  %v1557_v4 = vld [vmem:[%s2598_s0 + $0xc4] sm:$0xf] }
  0x61   :  { %567 = vmatmul.bf16.gmra.mxu0 %v1244_v9 }
  0x62   :  { %647 = vmatmul.bf16.gmra.mxu2 %v1372_v10  ;;  %v2133_v10 = vld [vmem:[%s2600_s3] ss:$0 sm:$0xff] }
  0x66   :  { %1507 = vmatmul.msk.bf16.gmra.mxu1 %vm442_vm0, %v1264_v13 }
  0x67   :  { %1524 = vmatmul.msk.bf16.gmra.mxu3 %vm442_vm0, %v1400_v16  ;;  %v1429_v16 = vld [vmem:[%s2598_s0 + $0x1b8] sm:$0xf0] }
  0x68   :  { %v1432_v17 = vor.u32 %v1587_v15, %v1429_v16 }
  0x71   :  { %572 = vmatmul.bf16.gmra.mxu0 %v1252_v21  ;;  %v1552_v21 = vld [vmem:[%s2598_s0 + $0x94] sm:$0xf0] }
  0x72   :  { %652 = vmatmul.bf16.gmra.mxu2 %v1380_v22  ;;  %v1284_v29 = vor.u32 %v1552_v21, %v1283_v20 }
  0x76   :  { %1508 = vmatmul.msk.bf16.gmra.mxu1 %vm442_vm0, %v1272_v25  ;;  %v1584_v25 = vld [vmem:[%s2598_s0 + $0x194] sm:$0xf0] }
  0x77   :  { %1525 = vmatmul.msk.bf16.gmra.mxu3 %vm442_vm0, %v1408_v28  ;;  %v1412_v32 = vor.u32 %v1584_v25, %v1411_v24  ;;  %v1591_v24 = vld [vmem:[%s2598_s0 + $0x1d4] sm:$0xf]  ;;  %v1445_v25 = vld [vmem:[%s2598_s0 + $0x1d8] sm:$0xf0] }
  0x81   :  { %577 = vmatmul.bf16.gmra.mxu0 %v1260_v33 }
  0x82   :  { %657 = vmatmul.bf16.gmra.mxu2 %v1388_v34  ;;  %v1555_v34 = vld [vmem:[%s2598_s0 + $0xb4] sm:$0xf] }
  0x83   :  { %v717_v38 = vpop.f32.mrf.mxu1 }
  0x86   :  { %1509 = vmatmul.msk.bf16.gmra.mxu1 %vm442_vm0, %v1280_v37  ;;  %v1304_v37 = vor.u32 %v1555_v34, %v1301_v35  ;;  %v1588_v35 = vld [vmem:[%s2598_s0 + $0x1b4] sm:$0xf0] }
  0x87   :  { %1526 = vmatmul.msk.bf16.gmra.mxu3 %vm442_vm0, %v1416_v41 }
  0x8a   :  { %v2084_v48 = vpop.f32.mrf.mxu3 }
  0x8b   :  { %v719_v44 = vpop.f32.mrf.mxu1 }
  0x91   :  { %582 = vmatmul.bf16.gmra.mxu0 %v1268_v47 }
  0x92   :  { %662 = vmatmul.bf16.gmra.mxu2 %v1396_v49  ;;  %v2092_v54 = vpop.f32.mrf.mxu3 }
  0x93   :  { %v722_v53 = vpop.f32.mrf.mxu1 }
  0x96   :  { %1510 = vmatmul.msk.bf16.gmra.mxu1 %vm442_vm0, %v1288_v52  ;;  %v1554_v52 = vld [vmem:[%s2598_s0 + $0xa4] sm:$0xf0] }
  0x97   :  { %1527 = vmatmul.msk.bf16.gmra.mxu3 %vm442_vm0, %v1424_v57  ;;  %v1292_v61 = vor.u32 %v1554_v52, %v1291_v51 }
  0x9a   :  { %v2114_v0 = vpop.f32.mrf.mxu3 }
  0x9b   :  { %v724_v60 = vpop.f32.mrf.mxu1 }
  0x9e   :  { %v548_v1 = vpop.f32.mrf.mxu0 }
  0x9f   :  { %v718_v5 = vadd.f32 %v717_v38, %v548_v1 }
  0xa1   :  { %587 = vmatmul.bf16.gmra.mxu0 %v1276_v63  ;;  %v881_v9 = vmul.f32 %v2125_v6, %v718_v5  ;;  %v1309_v5 = vld [vmem:[%s2598_s0 + $0xc8] sm:$0xf0] }
  0xa2   :  { %667 = vmatmul.bf16.gmra.mxu2 %v1404_v2  ;;  %v2137_v12 = vpop.f32.mrf.mxu3 }
  0xa3   :  { %v2127_v8 = vpop.f32.mrf.mxu1  ;;  %v949_v18 = vadd.f32 %v2133_v10, %v881_v9 }
  0xa5   :  { %v2135_v11 = vpop.f32.mrf.mxu2  ;;  %v1013_v26 = vmax.f32 %v949_v18, 0.0 }
  0xa6   :  { %1511 = vmatmul.msk.bf16.gmra.mxu1 %vm442_vm0, %v1296_v7  ;;  %v550_v13 = vpop.f32.mrf.mxu0 }
  0xa7   :  { %v720_v14 = vadd.f32 %v719_v44, %v550_v13  ;;  %1528 = vmatmul.msk.bf16.gmra.mxu3 %vm442_vm0, %v1432_v17  ;;  %v1589_v44 = vld [vmem:[%s2598_s0 + $0x1c4] sm:$0xf] }
  0xa8   :  { %v1440_v47 = vor.u32 %v1589_v44, %v1437_v45 }
  0xa9   :  { %v882_v19 = vmul.f32 %v2125_v6, %v720_v14  ;;  %v1312_v14 = vor.u32 %v1557_v4, %v1309_v5 }
  0xaa   :  { %v2166_v30 = vpop.f32.mrf.mxu3 }
  0xab   :  { %v950_v22 = vadd.f32 %v2133_v10, %v882_v19  ;;  %v2156_v23 = vpop.f32.mrf.mxu1 }
  0xad   :  { %v1014_v27 = vmax.f32 %v950_v22, 0.0  ;;  %v2164_v28 = vpop.f32.mrf.mxu2 }
  0xae   :  { %v553_v31 = vpop.f32.mrf.mxu0 }
  0xaf   :  { %v1609_v33 = vpack.c.bf16 %v1014_v27, %v1013_v26  ;;  %v723_v36 = vadd.f32 %v722_v53, %v553_v31  ;;  %v1448_v27 = vor.u32 %v1591_v24, %v1445_v25 }
  0xb1   :  { %1610 = vst [vmem:[%s2601_s4] sm:$0xff] %v1609_v33   ;;  %592 = vmatmul.bf16.gmra.mxu0 %v1284_v29  ;;  %v883_v39 = vmul.f32 %v2125_v6, %v723_v36 }
  0xb2   :  { %672 = vmatmul.bf16.gmra.mxu2 %v1412_v32  ;;  %v2180_v41 = vpop.f32.mrf.mxu3  ;;  %v1556_v32 = vld [vmem:[%s2598_s0 + $0xb4] sm:$0xf0] }
  0xb3   :  { %v2177_v38 = vpop.f32.mrf.mxu1  ;;  %v951_v49 = vadd.f32 %v2133_v10, %v883_v39 }
  0xb5   :  { %v633_v40 = vpop.f32.mrf.mxu2  ;;  %v1015_v58 = vmax.f32 %v951_v49, 0.0  ;;  %v1559_v49 = vld [vmem:[%s2598_s0 + $0xd4] sm:$0xf] }
  0xb6   :  { %1512 = vmatmul.msk.bf16.gmra.mxu1 %vm442_vm0, %v1304_v37  ;;  %v555_v42 = vpop.f32.mrf.mxu0  ;;  %v803_v46 = vadd.f32 %v2084_v48, %v633_v40  ;;  %v1419_v48 = vld [vmem:[%s2598_s0 + $0x1a0] sm:$0xf] }
  0xb7   :  { %v725_v43 = vadd.f32 %v724_v60, %v555_v42  ;;  %1529 = vmatmul.msk.bf16.gmra.mxu3 %vm442_vm0, %v1440_v47  ;;  %v1420_v2 = vor.u32 %v1586_v56, %v1419_v48 }
  0xb8   :  { %v915_v57 = vmul.f32 %v2125_v6, %v803_v46 }
  0xb9   :  { %v884_v50 = vmul.f32 %v2125_v6, %v725_v43 }
  0xba   :  { %v2209_v62 = vpop.f32.mrf.mxu3  ;;  %v983_v7 = vadd.f32 %v2133_v10, %v915_v57 }
  0xbb   :  { %v952_v53 = vadd.f32 %v2133_v10, %v884_v50  ;;  %v2200_v55 = vpop.f32.mrf.mxu1  ;;  %v1317_v50 = vld [vmem:[%s2598_s0 + $0xd8] sm:$0xf0] }
  0xbc   :  { %v1047_v16 = vmax.f32 %v983_v7, 0.0  ;;  %v1320_v48 = vor.u32 %v1559_v49, %v1317_v50 }
  0xbd   :  { %v1016_v59 = vmax.f32 %v952_v53, 0.0  ;;  %v635_v60 = vpop.f32.mrf.mxu2 }
  0xbe   :  { %v805_v63 = vadd.f32 %v2092_v54, %v635_v60  ;;  %v558_v1 = vpop.f32.mrf.mxu0 }
  0xbf   :  { %v1614_v3 = vpack.c.bf16 %v1016_v59, %v1015_v58  ;;  %v728_v54 = vadd.f32 %v2127_v8, %v558_v1 }
  0xc0   :  { %v916_v9 = vmul.f32 %v2125_v6, %v805_v63 }
  0xc1   :  { %1766 = vst [vmem:[%s2601_s4 + $0x8] sm:$0xff] %v1614_v3   ;;  %597 = vmatmul.bf16.gmra.mxu0 %v1292_v61  ;;  %v885_v18 = vmul.f32 %v2125_v6, %v728_v54  ;;  %v1453_v3 = vld [vmem:[%s2598_s0 + $0x1e8] sm:$0xf0]  ;;  %v1558_v54 = vld [vmem:[%s2598_s0 + $0xc4] sm:$0xf0] }
  0xc2   :  { %v984_v13 = vadd.f32 %v2133_v10, %v916_v9  ;;  %677 = vmatmul.bf16.gmra.mxu2 %v1420_v2  ;;  %v2228_v20 = vpop.f32.mrf.mxu3  ;;  %v1593_v2 = vld [vmem:[%s2598_s0 + $0x1e4] sm:$0xf] }
  0xc3   :  { %v2225_v15 = vpop.f32.mrf.mxu1  ;;  %v953_v29 = vadd.f32 %v2133_v10, %v885_v18  ;;  %v1456_v5 = vor.u32 %v1593_v2, %v1453_v3 }
  0xc4   :  { %v1048_v17 = vmax.f32 %v984_v13, 0.0 }
  0xc5   :  { %v638_v19 = vpop.f32.mrf.mxu2  ;;  %v1017_v37 = vmax.f32 %v953_v29, 0.0  ;;  %v1325_v29 = vld [vmem:[%s2598_s0 + $0xe8] sm:$0xf0] }
  0xc6   :  { %v1694_v21 = vpack.c.bf16 %v1048_v17, %v1047_v16  ;;  %1513 = vmatmul.msk.bf16.gmra.mxu1 %vm442_vm0, %v1312_v14  ;;  %v560_v22 = vpop.f32.mrf.mxu0  ;;  %v808_v26 = vadd.f32 %v2114_v0, %v638_v19  ;;  %v1427_v0 = vld [vmem:[%s2598_s0 + $0x1b0] sm:$0xf]  ;;  %v1590_v16 = vld [vmem:[%s2598_s0 + $0x1c4] sm:$0xf0] }
  0xc7   :  { %v730_v8 = vadd.f32 %v2156_v23, %v560_v22  ;;  %v1299_v23 = vld [vmem:[%s2598_s0 + $0xb0] sm:$0xf]  ;;  %1530 = vmatmul.msk.bf16.gmra.mxu3 %vm442_vm0, %v1448_v27  ;;  %v1428_v46 = vor.u32 %v1588_v35, %v1427_v0  ;;  %v1561_v27 = vld [vmem:[%s2598_s0 + $0xe4] sm:$0xf] }
  0xc8   :  { %1782 = vst [vmem:[%s2601_s4 + $0x88] sm:$0xff] %v1694_v21   ;;  %v917_v36 = vmul.f32 %v2125_v6, %v808_v26  ;;  %v1300_v42 = vor.u32 %v1556_v32, %v1299_v23  ;;  %v1328_v0 = vor.u32 %v1561_v27, %v1325_v29  ;;  %v1323_v27 = vld [vmem:[%s2598_s0 + $0xe0] sm:$0xf]  ;;  %v1562_v29 = vld [vmem:[%s2598_s0 + $0xe4] sm:$0xf0] }
  0xc9   :  { %v886_v31 = vmul.f32 %v2125_v6, %v730_v8 }
  0xca   :  { %v2261_v43 = vpop.f32.mrf.mxu3  ;;  %v985_v51 = vadd.f32 %v2133_v10, %v917_v36 }
  0xcb   :  { %v954_v33 = vadd.f32 %v2133_v10, %v886_v31  ;;  %v2252_v34 = vpop.f32.mrf.mxu1 }
  0xcc   :  { %v1049_v57 = vmax.f32 %v985_v51, 0.0 }
  0xcd   :  { %v1018_v39 = vmax.f32 %v954_v33, 0.0  ;;  %v640_v40 = vpop.f32.mrf.mxu2 }
  0xce   :  { %v810_v44 = vadd.f32 %v2137_v12, %v640_v40  ;;  %v563_v45 = vpop.f32.mrf.mxu0 }
  0xcf   :  { %v1619_v47 = vpack.c.bf16 %v1018_v39, %v1017_v37  ;;  %v733_v12 = vadd.f32 %v2177_v38, %v563_v45 }
  0xd0   :  { %v918_v52 = vmul.f32 %v2125_v6, %v810_v44 }
  0xd1   :  { %1767 = vst [vmem:[%s2601_s4 + $0x10] sm:$0xff] %v1619_v47   ;;  %602 = vmatmul.bf16.gmra.mxu0 %v1300_v42  ;;  %v887_v59 = vmul.f32 %v2125_v6, %v733_v12  ;;  %v1560_v12 = vld [vmem:[%s2598_s0 + $0xd4] sm:$0xf0] }
  0xd2   :  { %v986_v53 = vadd.f32 %v2133_v10, %v918_v52  ;;  %682 = vmatmul.bf16.gmra.mxu2 %v1428_v46  ;;  %v2280_v61 = vpop.f32.mrf.mxu3  ;;  %v1461_v46 = vld [vmem:[%s2598_s0 + $0x1f8] sm:$0xf0]  ;;  %v1315_v52 = vld [vmem:[%s2598_s0 + $0xd0] sm:$0xf] }
  0xd3   :  { %v2277_v56 = vpop.f32.mrf.mxu1  ;;  %v955_v7 = vadd.f32 %v2133_v10, %v887_v59 }
  0xd4   :  { %v1050_v58 = vmax.f32 %v986_v53, 0.0 }
  0xd5   :  { %v643_v60 = vpop.f32.mrf.mxu2  ;;  %v1019_v18 = vmax.f32 %v955_v7, 0.0  ;;  %v1333_v7 = vld [vmem:[%s2598_s0 + $0xf8] sm:$0xf0] }
  0xd6   :  { %v1699_v63 = vpack.c.bf16 %v1050_v58, %v1049_v57  ;;  %1514 = vmatmul.msk.bf16.gmra.mxu1 %vm442_vm0, %v1320_v48  ;;  %v565_v1 = vpop.f32.mrf.mxu0  ;;  %v813_v4 = vadd.f32 %v2166_v30, %v643_v60  ;;  %v1435_v30 = vld [vmem:[%s2598_s0 + $0x1c0] sm:$0xf]  ;;  %v1443_v48 = vld [vmem:[%s2598_s0 + $0x1d0] sm:$0xf]  ;;  %v1592_v57 = vld [vmem:[%s2598_s0 + $0x1d4] sm:$0xf0] }
  0xd7   :  { %v735_v38 = vadd.f32 %v2200_v55, %v565_v1  ;;  %v1307_v55 = vld [vmem:[%s2598_s0 + $0xc0] sm:$0xf]  ;;  %1531 = vmatmul.msk.bf16.gmra.mxu3 %vm442_vm0, %v1456_v5  ;;  %v1436_v25 = vor.u32 %v1590_v16, %v1435_v30  ;;  %v1316_v1 = vor.u32 %v1560_v12, %v1315_v52  ;;  %v1444_v3 = vor.u32 %v1592_v57, %v1443_v48  ;;  %v1563_v5 = vld [vmem:[%s2598_s0 + $0xf4] sm:$0xf] }
  0xd8   :  { %1783 = vst [vmem:[%s2601_s4 + $0x90] sm:$0xff] %v1699_v63   ;;  %v919_v17 = vmul.f32 %v2125_v6, %v813_v4  ;;  %v1308_v22 = vor.u32 %v1558_v54, %v1307_v55 }
  0xd9   :  { %v888_v9 = vmul.f32 %v2125_v6, %v735_v38 }
  0xda   :  { %v2320_v31 = vpop.f32.mrf.mxu3  ;;  %v987_v23 = vadd.f32 %v2133_v10, %v919_v17 }
  0xdb   :  { %v956_v13 = vadd.f32 %v2133_v10, %v888_v9  ;;  %v2304_v14 = vpop.f32.mrf.mxu1 }
  0xdc   :  { %v1051_v36 = vmax.f32 %v987_v23, 0.0 }
  0xdd   :  { %v1020_v19 = vmax.f32 %v956_v13, 0.0  ;;  %v645_v21 = vpop.f32.mrf.mxu2  ;;  %v1336_v13 = vor.u32 %v1563_v5, %v1333_v7  ;;  %v1459_v5 = vld [vmem:[%s2598_s0 + $0x1f0] sm:$0xf] }
  0xde   :  { %v815_v8 = vadd.f32 %v2180_v41, %v645_v21  ;;  %v568_v24 = vpop.f32.mrf.mxu0 }
  0xdf   :  { %v1624_v26 = vpack.c.bf16 %v1020_v19, %v1019_v18  ;;  %v738_v41 = vadd.f32 %v2225_v15, %v568_v24  ;;  %v1595_v15 = vld [vmem:[%s2598_s0 + $0x1f4] sm:$0xf] }
  0xe0   :  { %v920_v32 = vmul.f32 %v2125_v6, %v815_v8  ;;  %v1464_v49 = vor.u32 %v1595_v15, %v1461_v46  ;;  %v1565_v15 = vld [vmem:[%s2598_s0 + $0x104] sm:$0xf]  ;;  %v1341_v46 = vld [vmem:[%s2598_s0 + $0x108] sm:$0xf0] }
  0xe1   :  { %1768 = vst [vmem:[%s2601_s4 + $0x18] sm:$0xff] %v1624_v26   ;;  %607 = vmatmul.bf16.gmra.mxu0 %v1308_v22  ;;  %v889_v39 = vmul.f32 %v2125_v6, %v738_v41 }
  0xe2   :  { %v988_v33 = vadd.f32 %v2133_v10, %v920_v32  ;;  %687 = vmatmul.bf16.gmra.mxu2 %v1436_v25  ;;  %v1594_v32 = vld [vmem:[%s2598_s0 + $0x1e4] sm:$0xf0] }
  0xe3   :  { %v2329_v35 = vpop.f32.mrf.mxu1  ;;  %v957_v50 = vadd.f32 %v2133_v10, %v889_v39 }
  0xe4   :  { %v1052_v37 = vmax.f32 %v988_v33, 0.0 }
  0xe5   :  { %v648_v40 = vpop.f32.mrf.mxu2  ;;  %v1021_v59 = vmax.f32 %v957_v50, 0.0 }
  0xe6   :  { %v1704_v42 = vpack.c.bf16 %v1052_v37, %v1051_v36  ;;  %1515 = vmatmul.msk.bf16.gmra.mxu1 %vm442_vm0, %v1328_v0  ;;  %v570_v44 = vpop.f32.mrf.mxu0  ;;  %v818_v47 = vadd.f32 %v2209_v62, %v648_v40  ;;  %v1324_v37 = vor.u32 %v1562_v29, %v1323_v27 }
  0xe7   :  { %v740_v45 = vadd.f32 %v2252_v34, %v570_v44  ;;  %v2346_v34 = vpop.f32.mrf.mxu3  ;;  %1532 = vmatmul.msk.bf16.gmra.mxu3 %vm442_vm0, %v1464_v49 }
  0xe8   :  { %1784 = vst [vmem:[%s2601_s4 + $0x98] sm:$0xff] %v1704_v42   ;;  %v921_v58 = vmul.f32 %v2125_v6, %v818_v47 }
  0xe9   :  { %v890_v51 = vmul.f32 %v2125_v6, %v740_v45 }
  0xea   :  { %v989_v9 = vadd.f32 %v2133_v10, %v921_v58 }
  0xeb   :  { %v958_v53 = vadd.f32 %v2133_v10, %v890_v51  ;;  %v2356_v62 = vpop.f32.mrf.mxu1  ;;  %v1344_v51 = vor.u32 %v1565_v15, %v1341_v46 }
  0xec   :  { %v1053_v17 = vmax.f32 %v989_v9, 0.0 }
  0xed   :  { %v1022_v60 = vmax.f32 %v958_v53, 0.0  ;;  %v650_v63 = vpop.f32.mrf.mxu2 }
  0xee   :  { %v820_v38 = vadd.f32 %v2228_v20, %v650_v63  ;;  %v573_v2 = vpop.f32.mrf.mxu0 }
  0xef   :  { %v1629_v4 = vpack.c.bf16 %v1022_v60, %v1021_v59  ;;  %v743_v20 = vadd.f32 %v2277_v56, %v573_v2  ;;  %v2381_v16 = vpop.f32.mrf.mxu3  ;;  %v1331_v2 = vld [vmem:[%s2598_s0 + $0xf0] sm:$0xf] }
  0xf0   :  { %v922_v55 = vmul.f32 %v2125_v6, %v820_v38 }
  0xf1   :  { %1769 = vst [vmem:[%s2601_s4 + $0x20] sm:$0xff] %v1629_v4   ;;  %612 = vmatmul.bf16.gmra.mxu0 %v1316_v1  ;;  %v891_v19 = vmul.f32 %v2125_v6, %v743_v20 }
  0xf2   :  { %v990_v54 = vadd.f32 %v2133_v10, %v922_v55  ;;  %692 = vmatmul.bf16.gmra.mxu2 %v1444_v3 }
  0xf3   :  { %v2379_v30 = vpop.f32.mrf.mxu1  ;;  %v959_v25 = vadd.f32 %v2133_v10, %v891_v19 }
  0xf4   :  { %v1054_v18 = vmax.f32 %v990_v54, 0.0 }
  0xf5   :  { %v653_v21 = vpop.f32.mrf.mxu2  ;;  %v1023_v33 = vmax.f32 %v959_v25, 0.0 }
  0xf6   :  { %v1709_v22 = vpack.c.bf16 %v1054_v18, %v1053_v17  ;;  %1516 = vmatmul.msk.bf16.gmra.mxu1 %vm442_vm0, %v1336_v13  ;;  %v575_v8 = vpop.f32.mrf.mxu0  ;;  %v823_v24 = vadd.f32 %v2261_v43, %v653_v21  ;;  %v1451_v43 = vld [vmem:[%s2598_s0 + $0x1e0] sm:$0xf] }
  0xf7   :  { %v745_v56 = vadd.f32 %v2304_v14, %v575_v8  ;;  %v2408_v39 = vpop.f32.mrf.mxu3  ;;  %v1452_v44 = vor.u32 %v1594_v32, %v1451_v43 }
  0xf8   :  { %1785 = vst [vmem:[%s2601_s4 + $0xa0] sm:$0xff] %v1709_v22   ;;  %v923_v41 = vmul.f32 %v2125_v6, %v823_v24 }
  0xf9   :  { %v892_v26 = vmul.f32 %v2125_v6, %v745_v56 }
  0xfa   :  { %v991_v47 = vadd.f32 %v2133_v10, %v923_v41 }
  0xfb   :  { %v960_v14 = vadd.f32 %v2133_v10, %v892_v26  ;;  %v2399_v23 = vpop.f32.mrf.mxu1 }
  0xfc   :  { %v1055_v12 = vmax.f32 %v991_v47, 0.0 }
  0xfd   :  { %v1024_v0 = vmax.f32 %v960_v14, 0.0  ;;  %v655_v36 = vpop.f32.mrf.mxu2 }
  0xfe   :  { %v825_v40 = vadd.f32 %v2280_v61, %v655_v36  ;;  %v578_v42 = vpop.f32.mrf.mxu0 }
  0xff   :  { %v1634_v45 = vpack.c.bf16 %v1024_v0, %v1023_v33  ;;  %v748_v61 = vadd.f32 %v2329_v35, %v578_v42  ;;  %v2427_v63 = vpop.f32.mrf.mxu3 }
 0x100   :  { %v924_v49 = vmul.f32 %v2125_v6, %v825_v40 }
 0x101   :  { %1770 = vst [vmem:[%s2601_s4 + $0x28] sm:$0xff] %v1634_v45   ;;  %617 = vmatmul.bf16.gmra.mxu0 %v1324_v37  ;;  %v893_v48 = vmul.f32 %v2125_v6, %v748_v61 }
 0x102   :  { %v992_v50 = vadd.f32 %v2133_v10, %v924_v49  ;;  %697 = vmatmul.bf16.gmra.mxu2 %v1452_v44 }
 0x103   :  { %v757_v52 = vpop.f32.mrf.mxu1  ;;  %v961_v1 = vadd.f32 %v2133_v10, %v893_v48 }
 0x104   :  { %v1056_v53 = vmax.f32 %v992_v50, 0.0 }
 0x105   :  { %v658_v57 = vpop.f32.mrf.mxu2  ;;  %v1025_v9 = vmax.f32 %v961_v1, 0.0 }
 0x106   :  { %v1714_v58 = vpack.c.bf16 %v1056_v53, %v1055_v12  ;;  %1517 = vmatmul.msk.bf16.gmra.mxu1 %vm442_vm0, %v1344_v51  ;;  %v580_v59 = vpop.f32.mrf.mxu0  ;;  %v828_v35 = vadd.f32 %v2320_v31, %v658_v57  ;;  %v1596_v31 = vld [vmem:[%s2598_s0 + $0x1f4] sm:$0xf0] }
 0x107   :  { %v750_v60 = vadd.f32 %v2356_v62, %v580_v59  ;;  %v1564_v62 = vld [vmem:[%s2598_s0 + $0xf4] sm:$0xf0]  ;;  %v1460_v18 = vor.u32 %v1596_v31, %v1459_v5  ;;  %v839_v56 = vpop.f32.mrf.mxu3 }
 0x108   :  { %1786 = vst [vmem:[%s2601_s4 + $0xa8] sm:$0xff] %v1714_v58   ;;  %v925_v7 = vmul.f32 %v2125_v6, %v828_v35  ;;  %v1332_v54 = vor.u32 %v1564_v62, %v1331_v2 }
 0x109   :  { %v894_v38 = vmul.f32 %v2125_v6, %v750_v60 }
 0x10a   :  { %v993_v21 = vadd.f32 %v2133_v10, %v925_v7 }
 0x10b   :  { %v962_v3 = vadd.f32 %v2133_v10, %v894_v38  ;;  %v759_v4 = vpop.f32.mrf.mxu1 }
 0x10d   :  { %v1026_v55 = vmax.f32 %v962_v3, 0.0  ;;  %v660_v20 = vpop.f32.mrf.mxu2 }
 0x10e   :  { %v830_v13 = vadd.f32 %v2346_v34, %v660_v20  ;;  %v583_v17 = vpop.f32.mrf.mxu0  ;;  %v1057_v34 = vmax.f32 %v993_v21, 0.0 }
 0x10f   :  { %v1639_v19 = vpack.c.bf16 %v1026_v55, %v1025_v9  ;;  %v753_v8 = vadd.f32 %v2379_v30, %v583_v17  ;;  %v842_v37 = vpop.f32.mrf.mxu3 }
 0x110   :  { %v926_v22 = vmul.f32 %v2125_v6, %v830_v13 }
 0x111   :  { %1771 = vst [vmem:[%s2601_s4 + $0x30] sm:$0xff] %v1639_v19   ;;  %622 = vmatmul.bf16.gmra.mxu0 %v1332_v54  ;;  %v895_v27 = vmul.f32 %v2125_v6, %v753_v8 }
 0x112   :  { %v994_v24 = vadd.f32 %v2133_v10, %v926_v22  ;;  %702 = vmatmul.bf16.gmra.mxu2 %v1460_v18 }
 0x113   :  { %v762_v25 = vpop.f32.mrf.mxu1  ;;  %v963_v41 = vadd.f32 %v2133_v10, %v895_v27 }
 0x114   :  { %v1058_v26 = vmax.f32 %v994_v24, 0.0 }
 0x115   :  { %v663_v29 = vpop.f32.mrf.mxu2  ;;  %v1027_v42 = vmax.f32 %v963_v41, 0.0 }
 0x116   :  { %v1719_v14 = vpack.c.bf16 %v1058_v26, %v1057_v34  ;;  %v585_v43 = vpop.f32.mrf.mxu0  ;;  %v833_v30 = vadd.f32 %v2381_v16, %v663_v29 }
 0x117   :  { %v755_v32 = vadd.f32 %v2399_v23, %v585_v43 }
 0x118   :  { %1787 = vst [vmem:[%s2601_s4 + $0xb0] sm:$0xff] %v1719_v14   ;;  %v927_v40 = vmul.f32 %v2125_v6, %v833_v30 }
 0x119   :  { %v896_v33 = vmul.f32 %v2125_v6, %v755_v32 }
 0x11a   :  { %v995_v47 = vadd.f32 %v2133_v10, %v927_v40 }
 0x11b   :  { %v964_v0 = vadd.f32 %v2133_v10, %v896_v33  ;;  %v764_v36 = vpop.f32.mrf.mxu1 }
 0x11c   :  { %v1059_v51 = vmax.f32 %v995_v47, 0.0 }
 0x11d   :  { %v1028_v44 = vmax.f32 %v964_v0, 0.0  ;;  %v665_v45 = vpop.f32.mrf.mxu2 }
 0x11e   :  { %v835_v23 = vadd.f32 %v2408_v39, %v665_v45  ;;  %v588_v15 = vpop.f32.mrf.mxu0  ;;  %v844_v39 = vpop.f32.mrf.mxu3 }
 0x11f   :  { %v1644_v46 = vpack.c.bf16 %v1028_v44, %v1027_v42  ;;  %v758_v49 = vadd.f32 %v757_v52, %v588_v15 }
 0x120   :  { %v928_v16 = vmul.f32 %v2125_v6, %v835_v23 }
 0x121   :  { %1772 = vst [vmem:[%s2601_s4 + $0x38] sm:$0xff] %v1644_v46   ;;  %v897_v53 = vmul.f32 %v2125_v6, %v758_v49 }
 0x122   :  { %v996_v61 = vadd.f32 %v2133_v10, %v928_v16 }
 0x123   :  { %v767_v50 = vpop.f32.mrf.mxu1  ;;  %v965_v52 = vadd.f32 %v2133_v10, %v897_v53 }
 0x124   :  { %v1060_v12 = vmax.f32 %v996_v61, 0.0 }
 0x125   :  { %v668_v48 = vpop.f32.mrf.mxu2  ;;  %v1029_v62 = vmax.f32 %v965_v52, 0.0 }
 0x126   :  { %v1724_v57 = vpack.c.bf16 %v1060_v12, %v1059_v51  ;;  %v590_v58 = vpop.f32.mrf.mxu0  ;;  %v838_v60 = vadd.f32 %v2427_v63, %v668_v48  ;;  %v847_v9 = vpop.f32.mrf.mxu3 }
 0x127   :  { %v760_v59 = vadd.f32 %v759_v4, %v590_v58 }
 0x128   :  { %1788 = vst [vmem:[%s2601_s4 + $0xb8] sm:$0xff] %v1724_v57   ;;  %v929_v2 = vmul.f32 %v2125_v6, %v838_v60 }
 0x129   :  { %v898_v35 = vmul.f32 %v2125_v6, %v760_v59 }
 0x12a   :  { %v997_v55 = vadd.f32 %v2133_v10, %v929_v2 }
 0x12b   :  { %v966_v1 = vadd.f32 %v2133_v10, %v898_v35  ;;  %v769_v38 = vpop.f32.mrf.mxu1 }
 0x12c   :  { %v1061_v17 = vmax.f32 %v997_v55, 0.0 }
 0x12d   :  { %v1030_v3 = vmax.f32 %v966_v1, 0.0  ;;  %v670_v5 = vpop.f32.mrf.mxu2 }
 0x12e   :  { %v840_v31 = vadd.f32 %v839_v56, %v670_v5  ;;  %v593_v4 = vpop.f32.mrf.mxu0  ;;  %v849_v26 = vpop.f32.mrf.mxu3 }
 0x12f   :  { %v1649_v7 = vpack.c.bf16 %v1030_v3, %v1029_v62  ;;  %v763_v20 = vadd.f32 %v762_v25, %v593_v4 }
 0x130   :  { %v930_v63 = vmul.f32 %v2125_v6, %v840_v31 }
 0x131   :  { %1773 = vst [vmem:[%s2601_s4 + $0x40] sm:$0xff] %v1649_v7   ;;  %v899_v19 = vmul.f32 %v2125_v6, %v763_v20 }
 0x132   :  { %v998_v54 = vadd.f32 %v2133_v10, %v930_v63 }
 0x133   :  { %v772_v13 = vpop.f32.mrf.mxu1  ;;  %v967_v34 = vadd.f32 %v2133_v10, %v899_v19 }
 0x134   :  { %v1062_v18 = vmax.f32 %v998_v54, 0.0 }
 0x135   :  { %v673_v21 = vpop.f32.mrf.mxu2  ;;  %v1031_v43 = vmax.f32 %v967_v34, 0.0 }
 0x136   :  { %v1729_v22 = vpack.c.bf16 %v1062_v18, %v1061_v17  ;;  %v595_v8 = vpop.f32.mrf.mxu0  ;;  %v843_v24 = vadd.f32 %v842_v37, %v673_v21  ;;  %v852_v45 = vpop.f32.mrf.mxu3 }
 0x137   :  { %v765_v56 = vadd.f32 %v764_v36, %v595_v8 }
 0x138   :  { %1789 = vst [vmem:[%s2601_s4 + $0xc0] sm:$0xff] %v1729_v22   ;;  %v931_v14 = vmul.f32 %v2125_v6, %v843_v24 }
 0x139   :  { %v900_v25 = vmul.f32 %v2125_v6, %v765_v56 }
 0x13a   :  { %v999_v36 = vadd.f32 %v2133_v10, %v931_v14 }
 0x13b   :  { %v968_v27 = vadd.f32 %v2133_v10, %v900_v25  ;;  %v774_v29 = vpop.f32.mrf.mxu1 }
 0x13c   :  { %v1063_v23 = vmax.f32 %v999_v36, 0.0 }
 0x13d   :  { %v1032_v32 = vmax.f32 %v968_v27, 0.0  ;;  %v675_v30 = vpop.f32.mrf.mxu2 }
 0x13e   :  { %v845_v41 = vadd.f32 %v844_v39, %v675_v30  ;;  %v598_v33 = vpop.f32.mrf.mxu0  ;;  %v854_v60 = vpop.f32.mrf.mxu3 }
 0x13f   :  { %v1654_v0 = vpack.c.bf16 %v1032_v32, %v1031_v43  ;;  %v768_v40 = vadd.f32 %v767_v50, %v598_v33 }
 0x140   :  { %v932_v37 = vmul.f32 %v2125_v6, %v845_v41 }
 0x141   :  { %1774 = vst [vmem:[%s2601_s4 + $0x48] sm:$0xff] %v1654_v0   ;;  %v901_v46 = vmul.f32 %v2125_v6, %v768_v40 }
 0x142   :  { %v1000_v42 = vadd.f32 %v2133_v10, %v932_v37 }
 0x143   :  { %v777_v44 = vpop.f32.mrf.mxu1  ;;  %v969_v12 = vadd.f32 %v2133_v10, %v901_v46 }
 0x144   :  { %v1064_v15 = vmax.f32 %v1000_v42, 0.0 }
 0x145   :  { %v678_v47 = vpop.f32.mrf.mxu2  ;;  %v1033_v57 = vmax.f32 %v969_v12, 0.0 }
 0x146   :  { %v1734_v16 = vpack.c.bf16 %v1064_v15, %v1063_v23  ;;  %v600_v49 = vpop.f32.mrf.mxu0  ;;  %v848_v51 = vadd.f32 %v847_v9, %v678_v47  ;;  %v857_v54 = vpop.f32.mrf.mxu3 }
 0x147   :  { %v770_v61 = vadd.f32 %v769_v38, %v600_v49 }
 0x148   :  { %1790 = vst [vmem:[%s2601_s4 + $0xc8] sm:$0xff] %v1734_v16   ;;  %v933_v39 = vmul.f32 %v2125_v6, %v848_v51 }
 0x149   :  { %v902_v50 = vmul.f32 %v2125_v6, %v770_v61 }
 0x14a   :  { %v1001_v38 = vadd.f32 %v2133_v10, %v933_v39 }
 0x14b   :  { %v970_v53 = vadd.f32 %v2133_v10, %v902_v50  ;;  %v779_v48 = vpop.f32.mrf.mxu1 }
 0x14c   :  { %v1065_v31 = vmax.f32 %v1001_v38, 0.0 }
 0x14d   :  { %v1034_v58 = vmax.f32 %v970_v53, 0.0  ;;  %v680_v59 = vpop.f32.mrf.mxu2 }
 0x14e   :  { %v850_v52 = vadd.f32 %v849_v26, %v680_v59  ;;  %v603_v35 = vpop.f32.mrf.mxu0  ;;  %v859_v43 = vpop.f32.mrf.mxu3 }
 0x14f   :  { %v1659_v1 = vpack.c.bf16 %v1034_v58, %v1033_v57  ;;  %v773_v62 = vadd.f32 %v772_v13, %v603_v35 }
 0x150   :  { %v934_v2 = vmul.f32 %v2125_v6, %v850_v52 }
 0x151   :  { %1775 = vst [vmem:[%s2601_s4 + $0x50] sm:$0xff] %v1659_v1   ;;  %v903_v7 = vmul.f32 %v2125_v6, %v773_v62 }
 0x152   :  { %v1002_v3 = vadd.f32 %v2133_v10, %v934_v2 }
 0x153   :  { %v782_v5 = vpop.f32.mrf.mxu1  ;;  %v971_v18 = vadd.f32 %v2133_v10, %v903_v7 }
 0x154   :  { %v1066_v4 = vmax.f32 %v1002_v3, 0.0 }
 0x155   :  { %v683_v9 = vpop.f32.mrf.mxu2  ;;  %v1035_v8 = vmax.f32 %v971_v18, 0.0 }
 0x156   :  { %v1739_v55 = vpack.c.bf16 %v1066_v4, %v1065_v31  ;;  %v605_v63 = vpop.f32.mrf.mxu0  ;;  %v853_v17 = vadd.f32 %v852_v45, %v683_v9  ;;  %v862_v47 = vpop.f32.mrf.mxu3 }
 0x157   :  { %v775_v20 = vadd.f32 %v774_v29, %v605_v63 }
 0x158   :  { %1791 = vst [vmem:[%s2601_s4 + $0xd0] sm:$0xff] %v1739_v55   ;;  %v935_v22 = vmul.f32 %v2125_v6, %v853_v17 }
 0x159   :  { %v904_v13 = vmul.f32 %v2125_v6, %v775_v20 }
 0x15a   :  { %v1003_v27 = vadd.f32 %v2133_v10, %v935_v22 }
 0x15b   :  { %v972_v19 = vadd.f32 %v2133_v10, %v904_v13  ;;  %v784_v21 = vpop.f32.mrf.mxu1 }
 0x15c   :  { %v1067_v41 = vmax.f32 %v1003_v27, 0.0 }
 0x15d   :  { %v1036_v56 = vmax.f32 %v972_v19, 0.0  ;;  %v685_v24 = vpop.f32.mrf.mxu2 }
 0x15e   :  { %v855_v34 = vadd.f32 %v854_v60, %v685_v24  ;;  %v608_v25 = vpop.f32.mrf.mxu0  ;;  %v864_v38 = vpop.f32.mrf.mxu3 }
 0x15f   :  { %v1664_v26 = vpack.c.bf16 %v1036_v56, %v1035_v8  ;;  %v778_v14 = vadd.f32 %v777_v44, %v608_v25 }
 0x160   :  { %v936_v29 = vmul.f32 %v2125_v6, %v855_v34 }
 0x161   :  { %1776 = vst [vmem:[%s2601_s4 + $0x58] sm:$0xff] %v1664_v26   ;;  %v905_v0 = vmul.f32 %v2125_v6, %v778_v14 }
 0x162   :  { %v1004_v32 = vadd.f32 %v2133_v10, %v936_v29 }
 0x163   :  { %v787_v30 = vpop.f32.mrf.mxu1  ;;  %v973_v23 = vadd.f32 %v2133_v10, %v905_v0 }
 0x164   :  { %v1068_v33 = vmax.f32 %v1004_v32, 0.0 }
 0x165   :  { %v688_v36 = vpop.f32.mrf.mxu2  ;;  %v1037_v49 = vmax.f32 %v973_v23, 0.0 }
 0x166   :  { %v1744_v37 = vpack.c.bf16 %v1068_v33, %v1067_v41  ;;  %v610_v40 = vpop.f32.mrf.mxu0  ;;  %v858_v45 = vadd.f32 %v857_v54, %v688_v36  ;;  %v867_v19 = vpop.f32.mrf.mxu3 }
 0x167   :  { %v780_v42 = vadd.f32 %v779_v48, %v610_v40 }
 0x168   :  { %1792 = vst [vmem:[%s2601_s4 + $0xd8] sm:$0xff] %v1744_v37   ;;  %v937_v16 = vmul.f32 %v2125_v6, %v858_v45 }
 0x169   :  { %v906_v44 = vmul.f32 %v2125_v6, %v780_v42 }
 0x16a   :  { %v1005_v48 = vadd.f32 %v2133_v10, %v937_v16 }
 0x16b   :  { %v974_v15 = vadd.f32 %v2133_v10, %v906_v44  ;;  %v789_v46 = vpop.f32.mrf.mxu1 }
 0x16c   :  { %v1069_v60 = vmax.f32 %v1005_v48, 0.0 }
 0x16d   :  { %v1038_v61 = vmax.f32 %v974_v15, 0.0  ;;  %v690_v51 = vpop.f32.mrf.mxu2 }
 0x16e   :  { %v860_v12 = vadd.f32 %v859_v43, %v690_v51  ;;  %v613_v50 = vpop.f32.mrf.mxu0  ;;  %v869_v33 = vpop.f32.mrf.mxu3 }
 0x16f   :  { %v1669_v53 = vpack.c.bf16 %v1038_v61, %v1037_v49  ;;  %v783_v57 = vadd.f32 %v782_v5, %v613_v50 }
 0x170   :  { %v938_v39 = vmul.f32 %v2125_v6, %v860_v12 }
 0x171   :  { %1777 = vst [vmem:[%s2601_s4 + $0x60] sm:$0xff] %v1669_v53   ;;  %v907_v35 = vmul.f32 %v2125_v6, %v783_v57 }
 0x172   :  { %v1006_v58 = vadd.f32 %v2133_v10, %v938_v39 }
 0x173   :  { %v792_v59 = vpop.f32.mrf.mxu1  ;;  %v975_v4 = vadd.f32 %v2133_v10, %v907_v35 }
 0x174   :  { %v1070_v52 = vmax.f32 %v1006_v58, 0.0 }
 0x175   :  { %v693_v1 = vpop.f32.mrf.mxu2  ;;  %v1039_v63 = vmax.f32 %v975_v4, 0.0 }
 0x176   :  { %v1749_v2 = vpack.c.bf16 %v1070_v52, %v1069_v60  ;;  %v615_v62 = vpop.f32.mrf.mxu0  ;;  %v863_v31 = vadd.f32 %v862_v47, %v693_v1  ;;  %v872_v39 = vpop.f32.mrf.mxu3  ;;  %v1808_v52 = vld [vmem:[%s2599_s2] ss:$0 sm:$0xff] }
 0x177   :  { %v785_v3 = vadd.f32 %v784_v21, %v615_v62 }
 0x178   :  { %1793 = vst [vmem:[%s2601_s4 + $0xe0] sm:$0xff] %v1749_v2   ;;  %v939_v55 = vmul.f32 %v2125_v6, %v863_v31  ;;  %v1809_v2 = vld [vmem:[%s2600_s3] ss:$0 sm:$0xff] }
 0x179   :  { %v908_v5 = vmul.f32 %v2125_v6, %v785_v3 }
 0x17a   :  { %v1007_v21 = vadd.f32 %v2133_v10, %v939_v55 }
 0x17b   :  { %v976_v7 = vadd.f32 %v2133_v10, %v908_v5  ;;  %v794_v9 = vpop.f32.mrf.mxu1 }
 0x17c   :  { %v1071_v34 = vmax.f32 %v1007_v21, 0.0 }
 0x17d   :  { %v1040_v20 = vmax.f32 %v976_v7, 0.0  ;;  %v695_v54 = vpop.f32.mrf.mxu2 }
 0x17e   :  { %v865_v17 = vadd.f32 %v864_v38, %v695_v54  ;;  %v618_v18 = vpop.f32.mrf.mxu0  ;;  %v874_v7 = vpop.f32.mrf.mxu3 }
 0x17f   :  { %v1674_v13 = vpack.c.bf16 %v1040_v20, %v1039_v63  ;;  %v788_v8 = vadd.f32 %v787_v30, %v618_v18 }
 0x180   :  { %v940_v22 = vmul.f32 %v2125_v6, %v865_v17 }
 0x181   :  { %1778 = vst [vmem:[%s2601_s4 + $0x68] sm:$0xff] %v1674_v13   ;;  %v909_v26 = vmul.f32 %v2125_v6, %v788_v8 }
 0x182   :  { %v1008_v56 = vadd.f32 %v2133_v10, %v940_v22 }
 0x183   :  { %v797_v24 = vpop.f32.mrf.mxu1  ;;  %v977_v30 = vadd.f32 %v2133_v10, %v909_v26 }
 0x184   :  { %v1072_v25 = vmax.f32 %v1008_v56, 0.0  ;;  %v798_v14 = vadd.f32 %v797_v24, %v2135_v11 }
 0x185   :  { %v698_v27 = vpop.f32.mrf.mxu2  ;;  %v1041_v45 = vmax.f32 %v977_v30, 0.0 }
 0x186   :  { %v1754_v29 = vpack.c.bf16 %v1072_v25, %v1071_v34  ;;  %v620_v43 = vpop.f32.mrf.mxu0  ;;  %v868_v41 = vadd.f32 %v867_v19, %v698_v27  ;;  %v913_v36 = vmul.f32 %v2125_v6, %v798_v14 }
 0x187   :  { %v790_v32 = vadd.f32 %v789_v46, %v620_v43 }
 0x188   :  { %1794 = vst [vmem:[%s2601_s4 + $0xe8] sm:$0xff] %v1754_v29   ;;  %v941_v42 = vmul.f32 %v2125_v6, %v868_v41  ;;  %v981_v15 = vadd.f32 %v2133_v10, %v913_v36 }
 0x189   :  { %v910_v0 = vmul.f32 %v2125_v6, %v790_v32 }
 0x18a   :  { %v1009_v61 = vadd.f32 %v2133_v10, %v941_v42  ;;  %v1045_v50 = vmax.f32 %v981_v15, 0.0 }
 0x18b   :  { %v978_v37 = vadd.f32 %v2133_v10, %v910_v0  ;;  %v799_v40 = vpop.f32.mrf.mxu1 }
 0x18c   :  { %v800_v11 = vadd.f32 %v799_v40, %v2164_v28  ;;  %v1073_v57 = vmax.f32 %v1009_v61, 0.0 }
 0x18d   :  { %v1042_v23 = vmax.f32 %v978_v37, 0.0  ;;  %v700_v44 = vpop.f32.mrf.mxu2 }
 0x18e   :  { %v914_v46 = vmul.f32 %v2125_v6, %v800_v11  ;;  %v870_v47 = vadd.f32 %v869_v33, %v700_v44  ;;  %v623_v16 = vpop.f32.mrf.mxu0 }
 0x18f   :  { %v1679_v49 = vpack.c.bf16 %v1042_v23, %v1041_v45  ;;  %v793_v28 = vadd.f32 %v792_v59, %v623_v16 }
 0x190   :  { %v982_v51 = vadd.f32 %v2133_v10, %v914_v46  ;;  %v942_v12 = vmul.f32 %v2125_v6, %v870_v47 }
 0x191   :  { %1779 = vst [vmem:[%s2601_s4 + $0x70] sm:$0xff] %v1679_v49   ;;  %v911_v35 = vmul.f32 %v1808_v52, %v793_v28 }
 0x192   :  { %v1046_v53 = vmax.f32 %v982_v51, 0.0  ;;  %v1010_v48 = vadd.f32 %v2133_v10, %v942_v12 }
 0x193   :  { %v979_v62 = vadd.f32 %v1809_v2, %v911_v35 }
 0x194   :  { %v1689_v58 = vpack.c.bf16 %v1046_v53, %v1045_v50  ;;  %v1074_v60 = vmax.f32 %v1010_v48, 0.0 }
 0x195   :  { %v703_v1 = vpop.f32.mrf.mxu2  ;;  %v1043_v5 = vmax.f32 %v979_v62, 0.0 }
 0x196   :  { %1781 = vst [vmem:[%s2601_s4 + $0x80] sm:$0xff] %v1689_v58   ;;  %v1759_v6 = vpack.c.bf16 %v1074_v60, %v1073_v57  ;;  %v625_v59 = vpop.f32.mrf.mxu0  ;;  %v873_v10 = vadd.f32 %v872_v39, %v703_v1 }
 0x197   :  { %v795_v38 = vadd.f32 %v794_v9, %v625_v59 }
 0x198   :  { %1795 = vst [vmem:[%s2601_s4 + $0xf0] sm:$0xff] %v1759_v6   ;;  %v943_v4 = vmul.f32 %v1808_v52, %v873_v10 }
 0x199   :  { %v912_v3 = vmul.f32 %v1808_v52, %v795_v38 }
 0x19a   :  { %v1011_v9 = vadd.f32 %v1809_v2, %v943_v4 }
 0x19b   :  { %v980_v31 = vadd.f32 %v1809_v2, %v912_v3 }
 0x19c   :  { %v1075_v13 = vmax.f32 %v1011_v9, 0.0 }
 0x19d   :  { %v1044_v55 = vmax.f32 %v980_v31, 0.0  ;;  %v705_v63 = vpop.f32.mrf.mxu2 }
 0x19e   :  { %v875_v20 = vadd.f32 %v874_v7, %v705_v63 }
 0x19f   :  { %v1684_v54 = vpack.c.bf16 %v1044_v55, %v1043_v5 }
 0x1a0   :  { %v944_v17 = vmul.f32 %v1808_v52, %v875_v20 }
 0x1a1   :  { %1780 = vst [vmem:[%s2601_s4 + $0x78] sm:$0xff] %v1684_v54  }
 0x1a2   :  { %v1012_v18 = vadd.f32 %v1809_v2, %v944_v17 }
 0x1a4   :  { %v1076_v19 = vmax.f32 %v1012_v18, 0.0 }
 0x1a6   :  { %v1764_v21 = vpack.c.bf16 %v1076_v19, %v1075_v13 }
 0x1a8   :  { %1796 = vst [vmem:[%s2601_s4 + $0xf8] sm:$0xff] %v1764_v21  }

// kernel: _lambda_.17
= control target key start
LH: loop header
LB: loop body
LE: loop exit
PB: predicated region body
PF: predicated region fallthrough
CT: control target
= control target key end

     0   :  { %vm90_vm0 = vcmask 261120   ;;  %s446_s1 = inlined_call_operand.vmem [shape: bf16[32,128], index: 1, kind: input, shape index: {}]   ;;  %s447_s0 = inlined_call_operand.vmem [shape: bf16[128,32], index: 0, kind: input, shape index: {}]   ;;  %s448_s2 = inlined_call_operand.vmem [shape: f32[1,128], index: 2, kind: input, shape index: {}]   ;;  %s449_s3 = inlined_call_operand.vmem [shape: f32[1,128], index: 3, kind: input, shape index: {}]   ;;  %s450_s4 = inlined_call_operand.vmem [shape: bf16[128,128], index: 4, kind: output, shape index: {}]  }
   0x1   :  { %v297_v0 = vld [vmem:[%s446_s1 + $0x8] sm:$0xff]  ;;  %v296_v1 = vld [vmem:[%s446_s1] sm:$0xff]  ;;  %v290_v3 = vld [vmem:[%s447_s0 + $0x10] sm:$0xff] }
   0x2   :  { %121 = vmatpush.bf16.msra.mxu0 %v297_v0  ;;  %345 = vmatpush.bf16.msra.mxu1 %v297_v0  ;;  %v288_v2 = vld [vmem:[%s447_s0] sm:$0xff]  ;;  %v294_v5 = vld [vmem:[%s447_s0 + $0x30] sm:$0xff]  ;;  %v289_v6 = vld [vmem:[%s447_s0 + $0x8] sm:$0xff] }
   0x3   :  { %346 = vmatpush.bf16.msra.mxu2 %v297_v0  ;;  %347 = vmatpush.bf16.msra.mxu3 %v297_v0  ;;  %v292_v4 = vld [vmem:[%s447_s0 + $0x20] sm:$0xff]  ;;  %v291_v7 = vld [vmem:[%s447_s0 + $0x18] sm:$0xff]  ;;  %v293_v8 = vld [vmem:[%s447_s0 + $0x28] sm:$0xff] }
   0x4   :  { %v295_v9 = vld [vmem:[%s447_s0 + $0x38] sm:$0xff]  ;;  %v351_v12 = vld [vmem:[%s448_s2] ss:$0 sm:$0xff] }
   0x5   :  { %v352_v14 = vld [vmem:[%s449_s3] ss:$0 sm:$0xff] }
   0x6   :  { %122 = vmatpush.bf16.msra.mxu0 %v296_v1  ;;  %348 = vmatpush.bf16.msra.mxu1 %v296_v1 }
   0x7   :  { %349 = vmatpush.bf16.msra.mxu2 %v296_v1  ;;  %350 = vmatpush.bf16.msra.mxu3 %v296_v1 }
   0x9   :  { %280 = vmatmul.msk.bf16.vlgmr.msra.gmra.mxu0 %vm90_vm0, %v288_v2  ;;  %282 = vmatmul.msk.bf16.vlgmr.msra.gmra.mxu1 %vm90_vm0, %v290_v3 }
   0xa   :  { %284 = vmatmul.msk.bf16.vlgmr.msra.gmra.mxu2 %vm90_vm0, %v292_v4  ;;  %286 = vmatmul.msk.bf16.vlgmr.msra.gmra.mxu3 %vm90_vm0, %v294_v5 }
  0x19   :  { %281 = vmatmul.msk.bf16.gmra.mxu0 %vm90_vm0, %v289_v6  ;;  %283 = vmatmul.msk.bf16.gmra.mxu1 %vm90_vm0, %v291_v7 }
  0x1a   :  { %285 = vmatmul.msk.bf16.gmra.mxu2 %vm90_vm0, %v293_v8  ;;  %287 = vmatmul.msk.bf16.gmra.mxu3 %vm90_vm0, %v295_v9 }
  0x86   :  { %v124_v10 = vpop.f32.mrf.mxu0  ;;  %v134_v11 = vpop.f32.mrf.mxu1 }
  0x87   :  { %v168_v13 = vmul.f32 %v351_v12, %v124_v10  ;;  %v172_v15 = vmul.f32 %v351_v12, %v134_v11 }
  0x89   :  { %v188_v22 = vadd.f32 %v352_v14, %v168_v13  ;;  %v192_v23 = vadd.f32 %v352_v14, %v172_v15 }
  0x8d   :  { %v144_v16 = vpop.f32.mrf.mxu2  ;;  %v154_v17 = vpop.f32.mrf.mxu3 }
  0x8e   :  { %v126_v18 = vpop.f32.mrf.mxu0  ;;  %v136_v19 = vpop.f32.mrf.mxu1  ;;  %v176_v28 = vmul.f32 %v351_v12, %v144_v16  ;;  %v180_v29 = vmul.f32 %v351_v12, %v154_v17 }
  0x8f   :  { %v169_v20 = vmul.f32 %v351_v12, %v126_v18  ;;  %v173_v21 = vmul.f32 %v351_v12, %v136_v19 }
  0x90   :  { %v196_v36 = vadd.f32 %v352_v14, %v176_v28  ;;  %v200_v37 = vadd.f32 %v352_v14, %v180_v29 }
  0x91   :  { %v189_v24 = vadd.f32 %v352_v14, %v169_v20  ;;  %v193_v25 = vadd.f32 %v352_v14, %v173_v21 }
  0x93   :  { %v301_v26 = vpack.c.bf16 %v189_v24, %v188_v22  ;;  %v311_v27 = vpack.c.bf16 %v193_v25, %v192_v23 }
  0x95   :  { %302 = vst [vmem:[%s450_s4] sm:$0xff] %v301_v26   ;;  %v146_v30 = vpop.f32.mrf.mxu2  ;;  %v156_v31 = vpop.f32.mrf.mxu3 }
  0x96   :  { %339 = vst [vmem:[%s450_s4 + $0x10] sm:$0xff] %v311_v27   ;;  %v177_v32 = vmul.f32 %v351_v12, %v146_v30  ;;  %v181_v33 = vmul.f32 %v351_v12, %v156_v31  ;;  %v129_v34 = vpop.f32.mrf.mxu0  ;;  %v139_v35 = vpop.f32.mrf.mxu1 }
  0x97   :  { %v170_v42 = vmul.f32 %v351_v12, %v129_v34  ;;  %v174_v43 = vmul.f32 %v351_v12, %v139_v35 }
  0x98   :  { %v197_v38 = vadd.f32 %v352_v14, %v177_v32  ;;  %v201_v39 = vadd.f32 %v352_v14, %v181_v33 }
  0x99   :  { %v190_v50 = vadd.f32 %v352_v14, %v170_v42  ;;  %v194_v51 = vadd.f32 %v352_v14, %v174_v43 }
  0x9a   :  { %v321_v40 = vpack.c.bf16 %v197_v38, %v196_v36  ;;  %v331_v41 = vpack.c.bf16 %v201_v39, %v200_v37 }
  0x9c   :  { %341 = vst [vmem:[%s450_s4 + $0x20] sm:$0xff] %v321_v40  }
  0x9d   :  { %343 = vst [vmem:[%s450_s4 + $0x30] sm:$0xff] %v331_v41   ;;  %v149_v44 = vpop.f32.mrf.mxu2  ;;  %v159_v45 = vpop.f32.mrf.mxu3 }
  0x9e   :  { %v131_v46 = vpop.f32.mrf.mxu0  ;;  %v141_v47 = vpop.f32.mrf.mxu1  ;;  %v178_v56 = vmul.f32 %v351_v12, %v149_v44  ;;  %v182_v57 = vmul.f32 %v351_v12, %v159_v45 }
  0x9f   :  { %v171_v48 = vmul.f32 %v351_v12, %v131_v46  ;;  %v175_v49 = vmul.f32 %v351_v12, %v141_v47 }
  0xa0   :  { %v198_v62 = vadd.f32 %v352_v14, %v178_v56  ;;  %v202_v63 = vadd.f32 %v352_v14, %v182_v57 }
  0xa1   :  { %v191_v52 = vadd.f32 %v352_v14, %v171_v48  ;;  %v195_v53 = vadd.f32 %v352_v14, %v175_v49 }
  0xa3   :  { %v306_v54 = vpack.c.bf16 %v191_v52, %v190_v50  ;;  %v316_v55 = vpack.c.bf16 %v195_v53, %v194_v51 }
  0xa5   :  { %338 = vst [vmem:[%s450_s4 + $0x8] sm:$0xff] %v306_v54   ;;  %v151_v58 = vpop.f32.mrf.mxu2  ;;  %v161_v59 = vpop.f32.mrf.mxu3 }
  0xa6   :  { %340 = vst [vmem:[%s450_s4 + $0x18] sm:$0xff] %v316_v55   ;;  %v179_v60 = vmul.f32 %v351_v12, %v151_v58  ;;  %v183_v61 = vmul.f32 %v351_v12, %v161_v59 }
  0xa8   :  { %v199_v0 = vadd.f32 %v352_v14, %v179_v60  ;;  %v203_v1 = vadd.f32 %v352_v14, %v183_v61 }
  0xaa   :  { %v326_v2 = vpack.c.bf16 %v199_v0, %v198_v62  ;;  %v336_v3 = vpack.c.bf16 %v203_v1, %v202_v63 }
  0xac   :  { %342 = vst [vmem:[%s450_s4 + $0x28] sm:$0xff] %v326_v2  }
  0xad   :  { %344 = vst [vmem:[%s450_s4 + $0x38] sm:$0xff] %v336_v3  }

// kernel: _lambda_.15
= control target key start
LH: loop header
LB: loop body
LE: loop exit
PB: predicated region body
PF: predicated region fallthrough
CT: control target
= control target key end

     0   :  { %vm773_vm0 = vcmask 261120   ;;  %s4019_s1 = inlined_call_operand.vmem [shape: bf16[288,128], index: 1, kind: input, shape index: {}]   ;;  %s4020_s0 = inlined_call_operand.vmem [shape: bf16[512,288], index: 0, kind: input, shape index: {}]   ;;  %s4021_s2 = inlined_call_operand.vmem [shape: f32[1,128], index: 2, kind: input, shape index: {}]   ;;  %s4022_s3 = inlined_call_operand.vmem [shape: f32[1,128], index: 3, kind: input, shape index: {}]   ;;  %s4023_s4 = inlined_call_operand.vmem [shape: bf16[512,128], index: 4, kind: input, shape index: {}]   ;;  %s4024_s5 = inlined_call_operand.vmem [shape: bf16[512,128], index: 5, kind: output, shape index: {}]  }
   0x1   :  { %v2492_v0 = vld [vmem:[%s4019_s1 + $0x38] sm:$0xff]  ;;  %v2916_v2 = vld [vmem:[%s4019_s1 + $0x88] sm:$0xff]  ;;  %v2491_v3 = vld [vmem:[%s4019_s1 + $0x30] sm:$0xff] }
   0x2   :  { %v2911_v1 = vld [vmem:[%s4019_s1 + $0x78] sm:$0xff]  ;;  %870 = vmatpush.bf16.msra.mxu0 %v2492_v0  ;;  %2853 = vmatpush.bf16.msra.mxu3 %v2492_v0  ;;  %v2924_v4 = vld [vmem:[%s4019_s1 + $0x70] sm:$0xff]  ;;  %v2931_v5 = vld [vmem:[%s4019_s1 + $0x80] sm:$0xff] }
   0x3   :  { %1039 = vmatpush.bf16.msra.mxu1 %v2911_v1  ;;  %1214 = vmatpush.bf16.msra.mxu2 %v2916_v2  ;;  %v1911_v6 = vld [vmem:[%s4020_s0 + $0x8] sm:$0xf]  ;;  %v2391_v7 = vld [vmem:[%s4020_s0 + $0x10] sm:$0xf0]  ;;  %v2489_v11 = vld [vmem:[%s4019_s1 + $0x20] sm:$0xff] }
   0x4   :  { %v1912_v8 = vor.u32 %v2391_v7, %v1911_v6  ;;  %v2490_v9 = vld [vmem:[%s4019_s1 + $0x28] sm:$0xff]  ;;  %v2497_v12 = vld [vmem:[%s4019_s1 + $0x60] sm:$0xff]  ;;  %v2488_v13 = vld [vmem:[%s4019_s1 + $0x18] sm:$0xff] }
   0x5   :  { %v2498_v10 = vld [vmem:[%s4019_s1 + $0x68] sm:$0xff]  ;;  %v2496_v14 = vld [vmem:[%s4019_s1 + $0x58] sm:$0xff]  ;;  %v2487_v15 = vld [vmem:[%s4019_s1 + $0x10] sm:$0xff] }
   0x6   :  { %871 = vmatpush.bf16.msra.mxu0 %v2491_v3  ;;  %2854 = vmatpush.bf16.msra.mxu3 %v2491_v3  ;;  %v2495_v16 = vld [vmem:[%s4019_s1 + $0x50] sm:$0xff]  ;;  %v1923_v17 = vld [vmem:[%s4020_s0 + $0x20] sm:$0xf]  ;;  %v2394_v18 = vld [vmem:[%s4020_s0 + $0x28] sm:$0xf0] }
   0x7   :  { %1040 = vmatpush.bf16.msra.mxu1 %v2924_v4  ;;  %1215 = vmatpush.bf16.msra.mxu2 %v2931_v5  ;;  %v1924_v19 = vor.u32 %v2394_v18, %v1923_v17  ;;  %v2486_v20 = vld [vmem:[%s4019_s1 + $0x8] sm:$0xff]  ;;  %v2485_v22 = vld [vmem:[%s4019_s1] sm:$0xff]  ;;  %v1905_v29 = vld [vmem:[%s4020_s0 + $0xc] sm:$0xf0] }
   0x8   :  { %v2494_v21 = vld [vmem:[%s4019_s1 + $0x48] sm:$0xff]  ;;  %v2493_v23 = vld [vmem:[%s4019_s1 + $0x40] sm:$0xff]  ;;  %v1935_v33 = vld [vmem:[%s4020_s0 + $0x38] sm:$0xf] }
   0x9   :  { %v1903_v24 = vld [vmem:[%s4020_s0] sm:$0xf]  ;;  %v2390_v25 = vld [vmem:[%s4020_s0 + $0x8] sm:$0xf0]  ;;  %v2389_v28 = vld [vmem:[%s4020_s0 + $0x4] sm:$0xf] }
   0xa   :  { %2357 = vmatmul.msk.bf16.vlgmr.msra.gmra.mxu2 %vm773_vm0, %v1912_v8  ;;  %872 = vmatpush.bf16.msra.mxu0 %v2490_v9  ;;  %v2191_v26 = vld [vmem:[%s4020_s0 + $0x240] sm:$0xf]  ;;  %v2462_v27 = vld [vmem:[%s4020_s0 + $0x248] sm:$0xf0]  ;;  %v1904_v30 = vor.u32 %v2390_v25, %v1903_v24  ;;  %v1908_v32 = vor.u32 %v2389_v28, %v1905_v29  ;;  %v2397_v34 = vld [vmem:[%s4020_s0 + $0x40] sm:$0xf0] }
   0xb   :  { %2855 = vmatpush.bf16.msra.mxu3 %v2490_v9  ;;  %1041 = vmatpush.bf16.msra.mxu1 %v2498_v10  ;;  %v2192_v31 = vor.u32 %v2462_v27, %v2191_v26  ;;  %v1936_v35 = vor.u32 %v2397_v34, %v1935_v33  ;;  %v1915_v36 = vld [vmem:[%s4020_s0 + $0x18] sm:$0xf]  ;;  %v2393_v37 = vld [vmem:[%s4020_s0 + $0x20] sm:$0xf0]  ;;  %v2392_v40 = vld [vmem:[%s4020_s0 + $0x1c] sm:$0xf] }
   0xc   :  { %v2203_v38 = vld [vmem:[%s4020_s0 + $0x258] sm:$0xf]  ;;  %v2465_v39 = vld [vmem:[%s4020_s0 + $0x260] sm:$0xf0]  ;;  %v1917_v41 = vld [vmem:[%s4020_s0 + $0x24] sm:$0xf0]  ;;  %v1916_v42 = vor.u32 %v2393_v37, %v1915_v36 }
   0xd   :  { %v2204_v43 = vor.u32 %v2465_v39, %v2203_v38  ;;  %v1920_v44 = vor.u32 %v2392_v40, %v1917_v41  ;;  %v1947_v45 = vld [vmem:[%s4020_s0 + $0x50] sm:$0xf]  ;;  %v2400_v46 = vld [vmem:[%s4020_s0 + $0x58] sm:$0xf0]  ;;  %v2395_v52 = vld [vmem:[%s4020_s0 + $0x34] sm:$0xf] }
   0xe   :  { %873 = vmatpush.bf16.msra.mxu0 %v2489_v11  ;;  %v1948_v47 = vor.u32 %v2400_v46, %v1947_v45  ;;  %v1927_v48 = vld [vmem:[%s4020_s0 + $0x30] sm:$0xf]  ;;  %v2396_v49 = vld [vmem:[%s4020_s0 + $0x38] sm:$0xf0]  ;;  %v1929_v53 = vld [vmem:[%s4020_s0 + $0x3c] sm:$0xf0] }
   0xf   :  { %2856 = vmatpush.bf16.msra.mxu3 %v2489_v11  ;;  %1042 = vmatpush.bf16.msra.mxu1 %v2497_v12  ;;  %v2215_v50 = vld [vmem:[%s4020_s0 + $0x270] sm:$0xf]  ;;  %v2468_v51 = vld [vmem:[%s4020_s0 + $0x278] sm:$0xf0]  ;;  %v1928_v54 = vor.u32 %v2396_v49, %v1927_v48  ;;  %v1932_v56 = vor.u32 %v2395_v52, %v1929_v53  ;;  %v1959_v57 = vld [vmem:[%s4020_s0 + $0x68] sm:$0xf] }
  0x10   :  { %v2216_v55 = vor.u32 %v2468_v51, %v2215_v50  ;;  %v2403_v58 = vld [vmem:[%s4020_s0 + $0x70] sm:$0xf0]  ;;  %v1939_v60 = vld [vmem:[%s4020_s0 + $0x48] sm:$0xf]  ;;  %v2398_v0 = vld [vmem:[%s4020_s0 + $0x4c] sm:$0xf] }
  0x11   :  { %v1960_v59 = vor.u32 %v2403_v58, %v1959_v57  ;;  %v2399_v61 = vld [vmem:[%s4020_s0 + $0x50] sm:$0xf0]  ;;  %v2227_v62 = vld [vmem:[%s4020_s0 + $0x288] sm:$0xf]  ;;  %v2406_v6 = vld [vmem:[%s4020_s0 + $0x88] sm:$0xf0] }
  0x12   :  { %874 = vmatpush.bf16.msra.mxu0 %v2488_v13  ;;  %v2471_v63 = vld [vmem:[%s4020_s0 + $0x290] sm:$0xf0]  ;;  %v1951_v8 = vld [vmem:[%s4020_s0 + $0x60] sm:$0xf]  ;;  %v2402_v9 = vld [vmem:[%s4020_s0 + $0x68] sm:$0xf0] }
  0x13   :  { %2857 = vmatpush.bf16.msra.mxu3 %v2488_v13  ;;  %1043 = vmatpush.bf16.msra.mxu1 %v2496_v14  ;;  %v2228_v3 = vor.u32 %v2471_v63, %v2227_v62  ;;  %v2474_v11 = vld [vmem:[%s4020_s0 + $0x2a8] sm:$0xf0]  ;;  %v1953_v13 = vld [vmem:[%s4020_s0 + $0x6c] sm:$0xf0]  ;;  %v1983_v17 = vld [vmem:[%s4020_s0 + $0x98] sm:$0xf] }
  0x14   :  { %v2409_v18 = vld [vmem:[%s4020_s0 + $0xa0] sm:$0xf0]  ;;  %v2404_v24 = vld [vmem:[%s4020_s0 + $0x7c] sm:$0xf]  ;;  %v1965_v25 = vld [vmem:[%s4020_s0 + $0x84] sm:$0xf0] }
  0x15   :  { %v1968_v28 = vor.u32 %v2404_v24, %v1965_v25  ;;  %v1995_v29 = vld [vmem:[%s4020_s0 + $0xb0] sm:$0xf]  ;;  %v2408_v33 = vld [vmem:[%s4020_s0 + $0x98] sm:$0xf0]  ;;  %v2407_v36 = vld [vmem:[%s4020_s0 + $0x94] sm:$0xf] }
  0x16   :  { %875 = vmatpush.bf16.msra.mxu0 %v2487_v15  ;;  %v2263_v34 = vld [vmem:[%s4020_s0 + $0x2d0] sm:$0xf]  ;;  %v1977_v37 = vld [vmem:[%s4020_s0 + $0x9c] sm:$0xf0]  ;;  %v2007_v41 = vld [vmem:[%s4020_s0 + $0xc8] sm:$0xf] }
  0x17   :  { %2858 = vmatpush.bf16.msra.mxu3 %v2487_v15  ;;  %1044 = vmatpush.bf16.msra.mxu1 %v2495_v16  ;;  %v1980_v40 = vor.u32 %v2407_v36, %v1977_v37  ;;  %v2411_v45 = vld [vmem:[%s4020_s0 + $0xb0] sm:$0xf0]  ;;  %v2275_v46 = vld [vmem:[%s4020_s0 + $0x2e8] sm:$0xf]  ;;  %v2410_v48 = vld [vmem:[%s4020_s0 + $0xac] sm:$0xf] }
  0x18   :  { %v1989_v49 = vld [vmem:[%s4020_s0 + $0xb4] sm:$0xf0]  ;;  %v1999_v58 = vld [vmem:[%s4020_s0 + $0xc0] sm:$0xf]  ;;  %v2461_v62 = vld [vmem:[%s4020_s0 + $0x244] sm:$0xf] }
  0x19   :  { %v1992_v53 = vor.u32 %v2410_v48, %v1989_v49  ;;  %v2193_v63 = vld [vmem:[%s4020_s0 + $0x24c] sm:$0xf0]  ;;  %v2417_v24 = vld [vmem:[%s4020_s0 + $0xe0] sm:$0xf0]  ;;  %v2416_v25 = vld [vmem:[%s4020_s0 + $0xdc] sm:$0xf] }
  0x1a   :  { %2358 = vmatmul.msk.bf16.gmra.mxu2 %vm773_vm0, %v1924_v19  ;;  %876 = vmatpush.bf16.msra.mxu0 %v2486_v20  ;;  %v1984_v19 = vor.u32 %v2409_v18, %v1983_v17  ;;  %v2504_v17 = vld [vmem:[%s4023_s4] sm:$0xff]  }
  0x1b   :  { %2859 = vmatpush.bf16.msra.mxu3 %v2486_v20  ;;  %1045 = vmatpush.bf16.msra.mxu1 %v2494_v21  ;;  %v1963_v20 = vld [vmem:[%s4020_s0 + $0x78] sm:$0xf] }
  0x1e   :  { %877 = vmatpush.bf16.msra.mxu0 %v2485_v22 }
  0x1f   :  { %2860 = vmatpush.bf16.msra.mxu3 %v2485_v22  ;;  %1046 = vmatpush.bf16.msra.mxu1 %v2493_v23  ;;  %v2251_v22 = vld [vmem:[%s4020_s0 + $0x2b8] sm:$0xf] }
  0x21   :  { %878 = vmatmul.bf16.vlgmr.msra.gmra.mxu0 %v1904_v30  ;;  %v2412_v30 = vld [vmem:[%s4020_s0 + $0xb8] sm:$0xf0] }
  0x22   :  { %998 = vmatmul.bf16.vlgmr.msra.gmra.mxu3 %v2192_v31  ;;  %1047 = vmatmul.bf16.vlgmr.msra.gmra.mxu1 %v1908_v32  ;;  %v1996_v31 = vor.u32 %v2412_v30, %v1995_v29  ;;  %v1975_v32 = vld [vmem:[%s4020_s0 + $0x90] sm:$0xf]  ;;  %v2506_v30 = vunpack.c.h.bf16 %v2504_v17 }
  0x23   :  { %2861 = vmatpush.bf16.msrb.mxu3 %v2911_v1  ;;  %v1941_v1 = vld [vmem:[%s4020_s0 + $0x54] sm:$0xf0]  ;;  %v1976_v38 = vor.u32 %v2408_v33, %v1975_v32 }
  0x27   :  { %2862 = vmatpush.bf16.msrb.mxu3 %v2924_v4  ;;  %v1944_v4 = vor.u32 %v2398_v0, %v1941_v1 }
  0x2a   :  { %2359 = vmatmul.msk.bf16.gmra.mxu2 %vm773_vm0, %v1936_v35  ;;  %v2480_v35 = vld [vmem:[%s4020_s0 + $0x2d8] sm:$0xf0] }
  0x2b   :  { %2863 = vmatpush.bf16.msrb.mxu3 %v2498_v10  ;;  %v2239_v10 = vld [vmem:[%s4020_s0 + $0x2a0] sm:$0xf]  ;;  %v2264_v39 = vor.u32 %v2480_v35, %v2263_v34 }
  0x2c   :  { %v2240_v15 = vor.u32 %v2474_v11, %v2239_v10  ;;  %v2421_v10 = vld [vmem:[%s4020_s0 + $0x100] sm:$0xf0] }
  0x2f   :  { %2864 = vmatpush.bf16.msrb.mxu3 %v2497_v12  ;;  %v2401_v12 = vld [vmem:[%s4020_s0 + $0x64] sm:$0xf] }
  0x31   :  { %883 = vmatmul.bf16.gmra.mxu0 %v1916_v42  ;;  %v2415_v42 = vld [vmem:[%s4020_s0 + $0xd0] sm:$0xf0] }
  0x32   :  { %1003 = vmatmul.bf16.gmra.mxu3 %v2204_v43  ;;  %1052 = vmatmul.bf16.gmra.mxu1 %v1920_v44  ;;  %v2008_v43 = vor.u32 %v2415_v42, %v2007_v41  ;;  %v1987_v44 = vld [vmem:[%s4020_s0 + $0xa8] sm:$0xf] }
  0x33   :  { %2865 = vmatpush.bf16.msrb.mxu3 %v2496_v14  ;;  %v1952_v14 = vor.u32 %v2402_v9, %v1951_v8  ;;  %v1988_v51 = vor.u32 %v2411_v45, %v1987_v44  ;;  %v3210_v8 = vld [vmem:[%s4021_s2] ss:$0 sm:$0xff]  ;;  %v2031_v9 = vld [vmem:[%s4020_s0 + $0xf8] sm:$0xf]  ;;  %v2043_v45 = vld [vmem:[%s4020_s0 + $0x110] sm:$0xf] }
  0x37   :  { %2866 = vmatpush.bf16.msrb.mxu3 %v2495_v16  ;;  %v1956_v16 = vor.u32 %v2401_v12, %v1953_v13 }
  0x3a   :  { %2360 = vmatmul.msk.bf16.gmra.mxu2 %vm773_vm0, %v1948_v47  ;;  %v2483_v47 = vld [vmem:[%s4020_s0 + $0x2f0] sm:$0xf0] }
  0x3b   :  { %2867 = vmatpush.bf16.msrb.mxu3 %v2494_v21  ;;  %v2405_v21 = vld [vmem:[%s4020_s0 + $0x80] sm:$0xf0]  ;;  %v2276_v52 = vor.u32 %v2483_v47, %v2275_v46  ;;  %v2424_v46 = vld [vmem:[%s4020_s0 + $0x118] sm:$0xf0] }
  0x3c   :  { %v1964_v26 = vor.u32 %v2405_v21, %v1963_v20  ;;  %v2505_v21 = vunpack.c.l.bf16 %v2504_v17 }
  0x3f   :  { %2868 = vmatpush.bf16.msrb.mxu3 %v2493_v23  ;;  %v2477_v23 = vld [vmem:[%s4020_s0 + $0x2c0] sm:$0xf0] }
  0x40   :  { %v2252_v27 = vor.u32 %v2477_v23, %v2251_v22  ;;  %v2011_v23 = vld [vmem:[%s4020_s0 + $0xd8] sm:$0xf] }
  0x41   :  { %888 = vmatmul.bf16.gmra.mxu0 %v1928_v54  ;;  %v2019_v54 = vld [vmem:[%s4020_s0 + $0xe0] sm:$0xf]  ;;  %v2012_v33 = vor.u32 %v2417_v24, %v2011_v23 }
  0x42   :  { %1008 = vmatmul.bf16.gmra.mxu3 %v2216_v55  ;;  %1057 = vmatmul.bf16.gmra.mxu1 %v1932_v56  ;;  %v2418_v55 = vld [vmem:[%s4020_s0 + $0xe8] sm:$0xf0] }
  0x43   :  { %2869 = vmatpush.bf16.msra.mxu3 %v2916_v2  ;;  %v1940_v2 = vor.u32 %v2399_v61, %v1939_v60  ;;  %v2020_v57 = vor.u32 %v2418_v55, %v2019_v54  ;;  %v2413_v60 = vld [vmem:[%s4020_s0 + $0xc4] sm:$0xf]  ;;  %v2001_v61 = vld [vmem:[%s4020_s0 + $0xcc] sm:$0xf0] }
  0x47   :  { %2870 = vmatpush.bf16.msra.mxu3 %v2931_v5  ;;  %v1971_v5 = vld [vmem:[%s4020_s0 + $0x80] sm:$0xf] }
  0x48   :  { %v1972_v7 = vor.u32 %v2406_v6, %v1971_v5 }
  0x4a   :  { %2361 = vmatmul.msk.bf16.gmra.mxu2 %vm773_vm0, %v1960_v59  ;;  %v2414_v59 = vld [vmem:[%s4020_s0 + $0xc8] sm:$0xf0] }
  0x4b   :  { %v2000_v1 = vor.u32 %v2414_v59, %v1999_v58  ;;  %v2023_v59 = vld [vmem:[%s4020_s0 + $0xf0] sm:$0xf] }
  0x51   :  { %893 = vmatmul.bf16.gmra.mxu0 %v1940_v2 }
  0x52   :  { %1013 = vmatmul.bf16.gmra.mxu3 %v2228_v3  ;;  %1062 = vmatmul.bf16.gmra.mxu1 %v1944_v4  ;;  %v2004_v3 = vor.u32 %v2413_v60, %v2001_v61  ;;  %v2196_v4 = vor.u32 %v2461_v62, %v2193_v63  ;;  %v2420_v60 = vld [vmem:[%s4020_s0 + $0xf8] sm:$0xf0]  ;;  %v2419_v61 = vld [vmem:[%s4020_s0 + $0xf4] sm:$0xf]  ;;  %v2025_v62 = vld [vmem:[%s4020_s0 + $0xfc] sm:$0xf0] }
  0x53   :  { %v2467_v63 = vld [vmem:[%s4020_s0 + $0x274] sm:$0xf] }
  0x5a   :  { %2362 = vmatmul.msk.bf16.gmra.mxu2 %vm773_vm0, %v1972_v7 }
  0x61   :  { %898 = vmatmul.bf16.gmra.mxu0 %v1952_v14  ;;  %v3224_v14 = vld [vmem:[%s4022_s3] ss:$0 sm:$0xff] }
  0x62   :  { %1018 = vmatmul.bf16.gmra.mxu3 %v2240_v15  ;;  %1067 = vmatmul.bf16.gmra.mxu1 %v1956_v16  ;;  %v2032_v16 = vor.u32 %v2421_v10, %v2031_v9  ;;  %v2028_v10 = vor.u32 %v2419_v61, %v2025_v62 }
  0x6a   :  { %2363 = vmatmul.msk.bf16.gmra.mxu2 %vm773_vm0, %v1984_v19 }
  0x71   :  { %903 = vmatmul.bf16.gmra.mxu0 %v1964_v26  ;;  %v2013_v26 = vld [vmem:[%s4020_s0 + $0xe4] sm:$0xf0] }
  0x72   :  { %1023 = vmatmul.bf16.gmra.mxu3 %v2252_v27  ;;  %1072 = vmatmul.bf16.gmra.mxu1 %v1968_v28  ;;  %v2464_v27 = vld [vmem:[%s4020_s0 + $0x25c] sm:$0xf]  ;;  %v2205_v28 = vld [vmem:[%s4020_s0 + $0x264] sm:$0xf0]  ;;  %v2016_v37 = vor.u32 %v2416_v25, %v2013_v26 }
  0x7a   :  { %2364 = vmatmul.msk.bf16.gmra.mxu2 %vm773_vm0, %v1996_v31 }
  0x81   :  { %908 = vmatmul.bf16.gmra.mxu0 %v1976_v38  ;;  %v2208_v38 = vor.u32 %v2464_v27, %v2205_v28  ;;  %v2792_v28 = vld [vmem:[%s4023_s4 + $0x10] sm:$0xff]  }
  0x82   :  { %1028 = vmatmul.bf16.gmra.mxu3 %v2264_v39  ;;  %1077 = vmatmul.bf16.gmra.mxu1 %v1980_v40 }
  0x8a   :  { %2365 = vmatmul.msk.bf16.gmra.mxu2 %vm773_vm0, %v2008_v43 }
  0x8d   :  { %v1217_v50 = vpop.f32.mrf.mxu2 }
  0x91   :  { %913 = vmatmul.bf16.gmra.mxu0 %v1988_v51 }
  0x92   :  { %1033 = vmatmul.bf16.gmra.mxu3 %v2276_v52  ;;  %1082 = vmatmul.bf16.gmra.mxu1 %v1992_v53  ;;  %v2044_v52 = vor.u32 %v2424_v46, %v2043_v45  ;;  %v2791_v53 = vld [vmem:[%s4023_s4 + $0x8] sm:$0xff]  }
  0x95   :  { %v1219_v56 = vpop.f32.mrf.mxu2 }
  0x9a   :  { %2366 = vmatmul.msk.bf16.gmra.mxu2 %vm773_vm0, %v2020_v57  ;;  %v2509_v57 = vunpack.c.l.bf16 %v2791_v53 }
  0x9d   :  { %v1222_v0 = vpop.f32.mrf.mxu2 }
  0x9e   :  { %v879_v2 = vpop.f32.mrf.mxu0 }
  0x9f   :  { %v1048_v5 = vpop.f32.mrf.mxu1 }
  0xa0   :  { %v1049_v6 = vadd.f32 %v1048_v5, %v879_v2  ;;  %v2510_v2 = vunpack.c.h.bf16 %v2791_v53  ;;  %v2024_v5 = vor.u32 %v2420_v60, %v2023_v59  ;;  %v2430_v59 = vld [vmem:[%s4020_s0 + $0x148] sm:$0xf0] }
  0xa1   :  { %918 = vmatmul.bf16.gmra.mxu0 %v2000_v1 }
  0xa2   :  { %v1218_v7 = vadd.f32 %v1217_v50, %v1049_v6  ;;  %1087 = vmatmul.bf16.gmra.mxu1 %v2004_v3  ;;  %1167 = vmatmul.bf16.vlgmr.msrb.gmra.mxu3 %v2196_v4 }
  0xa4   :  { %v1381_v13 = vmul.f32 %v3210_v8, %v1218_v7 }
  0xa5   :  { %v3218_v11 = vpop.f32.mrf.mxu3  ;;  %v1224_v12 = vpop.f32.mrf.mxu2 }
  0xa6   :  { %v881_v15 = vpop.f32.mrf.mxu0  ;;  %v1449_v20 = vadd.f32 %v3224_v14, %v1381_v13 }
  0xa7   :  { %v1050_v18 = vpop.f32.mrf.mxu1 }
  0xa8   :  { %v1051_v19 = vadd.f32 %v1050_v18, %v881_v15  ;;  %v1641_v34 = vadd.f32 %v2505_v21, %v1449_v20  ;;  %v2055_v20 = vld [vmem:[%s4020_s0 + $0x128] sm:$0xf]  ;;  %v2427_v21 = vld [vmem:[%s4020_s0 + $0x130] sm:$0xf0] }
  0xa9   :  { %v2056_v27 = vor.u32 %v2427_v21, %v2055_v20 }
  0xaa   :  { %v1220_v22 = vadd.f32 %v1219_v56, %v1051_v19  ;;  %2367 = vmatmul.msk.bf16.gmra.mxu2 %vm773_vm0, %v2032_v16  ;;  %v1705_v42 = vmax.f32 %v1641_v34, 0.0 }
  0xac   :  { %v1382_v29 = vmul.f32 %v3210_v8, %v1220_v22 }
  0xad   :  { %v3250_v31 = vpop.f32.mrf.mxu3  ;;  %v1227_v32 = vpop.f32.mrf.mxu2 }
  0xae   :  { %v1450_v35 = vadd.f32 %v3224_v14, %v1382_v29  ;;  %v884_v36 = vpop.f32.mrf.mxu0 }
  0xaf   :  { %v1053_v39 = vpop.f32.mrf.mxu1 }
  0xb0   :  { %v1642_v40 = vadd.f32 %v2506_v30, %v1450_v35  ;;  %v1054_v41 = vadd.f32 %v1053_v39, %v884_v36  ;;  %v2035_v35 = vld [vmem:[%s4020_s0 + $0x108] sm:$0xf]  ;;  %v2423_v36 = vld [vmem:[%s4020_s0 + $0x110] sm:$0xf0]  ;;  %v2470_v39 = vld [vmem:[%s4020_s0 + $0x28c] sm:$0xf] }
  0xb1   :  { %923 = vmatmul.bf16.gmra.mxu0 %v2012_v33  ;;  %v2513_v33 = vunpack.c.l.bf16 %v2792_v28  ;;  %v2036_v45 = vor.u32 %v2423_v36, %v2035_v35  ;;  %v2079_v36 = vld [vmem:[%s4020_s0 + $0x158] sm:$0xf] }
  0xb2   :  { %v1706_v43 = vmax.f32 %v1642_v40, 0.0  ;;  %v1223_v44 = vadd.f32 %v1222_v0, %v1054_v41  ;;  %1092 = vmatmul.bf16.gmra.mxu1 %v2016_v37  ;;  %1172 = vmatmul.bf16.gmra.mxu3 %v2208_v38  ;;  %v2217_v0 = vld [vmem:[%s4020_s0 + $0x27c] sm:$0xf0]  ;;  %v2422_v37 = vld [vmem:[%s4020_s0 + $0x10c] sm:$0xf] }
  0xb3   :  { %v2037_v38 = vld [vmem:[%s4020_s0 + $0x114] sm:$0xf0] }
  0xb4   :  { %v2634_v47 = vpack.c.bf16 %v1706_v43, %v1705_v42  ;;  %v1383_v50 = vmul.f32 %v3210_v8, %v1223_v44  ;;  %v2229_v40 = vld [vmem:[%s4020_s0 + $0x294] sm:$0xf0]  ;;  %v2514_v42 = vunpack.c.h.bf16 %v2792_v28 }
  0xb5   :  { %v3259_v48 = vpop.f32.mrf.mxu3  ;;  %v1229_v49 = vpop.f32.mrf.mxu2 }
  0xb6   :  { %2635 = vst [vmem:[%s4024_s5] sm:$0xff] %v2634_v47   ;;  %v886_v51 = vpop.f32.mrf.mxu0  ;;  %v1451_v56 = vadd.f32 %v3224_v14, %v1383_v50  ;;  %v2040_v50 = vor.u32 %v2422_v37, %v2037_v38  ;;  %v2433_v37 = vld [vmem:[%s4020_s0 + $0x160] sm:$0xf0] }
  0xb7   :  { %v1055_v54 = vpop.f32.mrf.mxu1 }
  0xb8   :  { %v1056_v55 = vadd.f32 %v1055_v54, %v886_v51  ;;  %v1643_v6 = vadd.f32 %v2509_v57, %v1451_v56  ;;  %v2232_v51 = vor.u32 %v2470_v39, %v2229_v40 }
  0xba   :  { %v1225_v58 = vadd.f32 %v1224_v12, %v1056_v55  ;;  %2368 = vmatmul.msk.bf16.gmra.mxu2 %vm773_vm0, %v2044_v52  ;;  %v2220_v12 = vor.u32 %v2467_v63, %v2217_v0  ;;  %v1707_v17 = vmax.f32 %v1643_v6, 0.0 }
  0xbc   :  { %v1384_v1 = vmul.f32 %v3210_v8, %v1225_v58  ;;  %v2067_v58 = vld [vmem:[%s4020_s0 + $0x140] sm:$0xf] }
  0xbd   :  { %v3289_v3 = vpop.f32.mrf.mxu3  ;;  %v1232_v4 = vpop.f32.mrf.mxu2 }
  0xbe   :  { %v1452_v7 = vadd.f32 %v3224_v14, %v1384_v1  ;;  %v889_v9 = vpop.f32.mrf.mxu0  ;;  %v2068_v1 = vor.u32 %v2430_v59, %v2067_v58 }
  0xbf   :  { %v1058_v13 = vpop.f32.mrf.mxu1 }
  0xc0   :  { %v1644_v15 = vadd.f32 %v2510_v2, %v1452_v7  ;;  %v1059_v16 = vadd.f32 %v1058_v13, %v889_v9  ;;  %v2793_v2 = vld [vmem:[%s4023_s4 + $0x18] sm:$0xff]   ;;  %v2425_v13 = vld [vmem:[%s4020_s0 + $0x124] sm:$0xf] }
  0xc1   :  { %928 = vmatmul.bf16.gmra.mxu0 %v2024_v5  ;;  %v2517_v7 = vunpack.c.l.bf16 %v2793_v2 }
  0xc2   :  { %v1708_v18 = vmax.f32 %v1644_v15, 0.0  ;;  %v1228_v19 = vadd.f32 %v1227_v32, %v1059_v16  ;;  %1097 = vmatmul.bf16.gmra.mxu1 %v2028_v10  ;;  %1177 = vmatmul.bf16.gmra.mxu3 %v2220_v12  ;;  %v2047_v10 = vld [vmem:[%s4020_s0 + $0x120] sm:$0xf]  ;;  %v2426_v12 = vld [vmem:[%s4020_s0 + $0x128] sm:$0xf0] }
  0xc3   :  { %v2049_v15 = vld [vmem:[%s4020_s0 + $0x12c] sm:$0xf0]  ;;  %v2473_v16 = vld [vmem:[%s4020_s0 + $0x2a4] sm:$0xf] }
  0xc4   :  { %v2639_v22 = vpack.c.bf16 %v1708_v18, %v1707_v17  ;;  %v1385_v25 = vmul.f32 %v3210_v8, %v1228_v19  ;;  %v2241_v17 = vld [vmem:[%s4020_s0 + $0x2ac] sm:$0xf0]  ;;  %v2518_v19 = vunpack.c.h.bf16 %v2793_v2 }
  0xc5   :  { %v3298_v23 = vpop.f32.mrf.mxu3  ;;  %v1234_v24 = vpop.f32.mrf.mxu2  ;;  %v2244_v28 = vor.u32 %v2473_v16, %v2241_v17  ;;  %v2436_v16 = vld [vmem:[%s4020_s0 + $0x178] sm:$0xf0] }
  0xc6   :  { %2822 = vst [vmem:[%s4024_s5 + $0x8] sm:$0xff] %v2639_v22   ;;  %v891_v26 = vpop.f32.mrf.mxu0  ;;  %v1453_v32 = vadd.f32 %v3224_v14, %v1385_v25  ;;  %v2048_v22 = vor.u32 %v2426_v12, %v2047_v10 }
  0xc7   :  { %v1060_v29 = vpop.f32.mrf.mxu1 }
  0xc8   :  { %v1061_v30 = vadd.f32 %v1060_v29, %v891_v26  ;;  %v1645_v46 = vadd.f32 %v2513_v33, %v1453_v32 }
  0xca   :  { %v1230_v34 = vadd.f32 %v1229_v49, %v1061_v30  ;;  %2369 = vmatmul.msk.bf16.gmra.mxu2 %vm773_vm0, %v2056_v27  ;;  %v1709_v55 = vmax.f32 %v1645_v46, 0.0  ;;  %v2052_v27 = vor.u32 %v2425_v13, %v2049_v15  ;;  %v2091_v15 = vld [vmem:[%s4020_s0 + $0x170] sm:$0xf] }
  0xcc   :  { %v1386_v41 = vmul.f32 %v3210_v8, %v1230_v34 }
  0xcd   :  { %v3328_v43 = vpop.f32.mrf.mxu3  ;;  %v1237_v44 = vpop.f32.mrf.mxu2 }
  0xce   :  { %v1454_v47 = vadd.f32 %v3224_v14, %v1386_v41  ;;  %v894_v49 = vpop.f32.mrf.mxu0 }
  0xcf   :  { %v1063_v52 = vpop.f32.mrf.mxu1 }
  0xd0   :  { %v1646_v53 = vadd.f32 %v2514_v42, %v1454_v47  ;;  %v1064_v54 = vadd.f32 %v1063_v52, %v894_v49  ;;  %v2059_v52 = vld [vmem:[%s4020_s0 + $0x138] sm:$0xf] }
  0xd1   :  { %933 = vmatmul.bf16.gmra.mxu0 %v2036_v45  ;;  %v2794_v45 = vld [vmem:[%s4023_s4 + $0x20] sm:$0xff]  }
  0xd2   :  { %v1710_v56 = vmax.f32 %v1646_v53, 0.0  ;;  %v1233_v57 = vadd.f32 %v1232_v4, %v1064_v54  ;;  %1102 = vmatmul.bf16.gmra.mxu1 %v2040_v50  ;;  %1182 = vmatmul.bf16.gmra.mxu3 %v2232_v51  ;;  %v2521_v50 = vunpack.c.l.bf16 %v2794_v45  ;;  %v2429_v53 = vld [vmem:[%s4020_s0 + $0x140] sm:$0xf0]  ;;  %v2428_v54 = vld [vmem:[%s4020_s0 + $0x13c] sm:$0xf]  ;;  %v2522_v59 = vunpack.c.h.bf16 %v2794_v45 }
  0xd4   :  { %v2644_v60 = vpack.c.bf16 %v1710_v56, %v1709_v55  ;;  %v1387_v63 = vmul.f32 %v3210_v8, %v1233_v57  ;;  %v2061_v55 = vld [vmem:[%s4020_s0 + $0x144] sm:$0xf0]  ;;  %v2476_v56 = vld [vmem:[%s4020_s0 + $0x2bc] sm:$0xf] }
  0xd5   :  { %v3337_v61 = vpop.f32.mrf.mxu3  ;;  %v1239_v62 = vpop.f32.mrf.mxu2  ;;  %v2253_v57 = vld [vmem:[%s4020_s0 + $0x2c4] sm:$0xf0] }
  0xd6   :  { %2823 = vst [vmem:[%s4024_s5 + $0x10] sm:$0xff] %v2644_v60   ;;  %v896_v0 = vpop.f32.mrf.mxu0  ;;  %v1455_v6 = vadd.f32 %v3224_v14, %v1387_v63  ;;  %v2060_v63 = vor.u32 %v2429_v53, %v2059_v52 }
  0xd7   :  { %v1065_v4 = vpop.f32.mrf.mxu1 }
  0xd8   :  { %v1066_v5 = vadd.f32 %v1065_v4, %v896_v0  ;;  %v2064_v4 = vor.u32 %v2428_v54, %v2061_v55 }
  0xda   :  { %v1235_v9 = vadd.f32 %v1234_v24, %v1066_v5  ;;  %2370 = vmatmul.msk.bf16.gmra.mxu2 %vm773_vm0, %v2068_v1  ;;  %v1647_v24 = vadd.f32 %v2517_v7, %v1455_v6  ;;  %v2256_v5 = vor.u32 %v2476_v56, %v2253_v57  ;;  %v2103_v57 = vld [vmem:[%s4020_s0 + $0x188] sm:$0xf] }
  0xdc   :  { %v1388_v18 = vmul.f32 %v3210_v8, %v1235_v9  ;;  %v1711_v33 = vmax.f32 %v1647_v24, 0.0  ;;  %v2092_v24 = vor.u32 %v2436_v16, %v2091_v15  ;;  %v2434_v15 = vld [vmem:[%s4020_s0 + $0x16c] sm:$0xf]  ;;  %v2085_v16 = vld [vmem:[%s4020_s0 + $0x174] sm:$0xf0] }
  0xdd   :  { %v3367_v20 = vpop.f32.mrf.mxu3  ;;  %v1242_v21 = vpop.f32.mrf.mxu2 }
  0xde   :  { %v1456_v25 = vadd.f32 %v3224_v14, %v1388_v18  ;;  %v899_v26 = vpop.f32.mrf.mxu0 }
  0xdf   :  { %v1068_v29 = vpop.f32.mrf.mxu1 }
  0xe0   :  { %v1648_v30 = vadd.f32 %v2518_v19, %v1456_v25  ;;  %v1069_v32 = vadd.f32 %v1068_v29, %v899_v26  ;;  %v2795_v25 = vld [vmem:[%s4023_s4 + $0x28] sm:$0xff]  }
  0xe1   :  { %938 = vmatmul.bf16.gmra.mxu0 %v2048_v22  ;;  %v2525_v29 = vunpack.c.l.bf16 %v2795_v25 }
  0xe2   :  { %v1712_v34 = vmax.f32 %v1648_v30, 0.0  ;;  %v1238_v35 = vadd.f32 %v1237_v44, %v1069_v32  ;;  %1107 = vmatmul.bf16.gmra.mxu1 %v2052_v27  ;;  %1187 = vmatmul.bf16.gmra.mxu3 %v2244_v28  ;;  %v2080_v44 = vor.u32 %v2433_v37, %v2079_v36  ;;  %v2071_v32 = vld [vmem:[%s4020_s0 + $0x150] sm:$0xf]  ;;  %v2479_v36 = vld [vmem:[%s4020_s0 + $0x2d4] sm:$0xf] }
  0xe3   :  { %v2265_v37 = vld [vmem:[%s4020_s0 + $0x2dc] sm:$0xf0] }
  0xe4   :  { %v2649_v38 = vpack.c.bf16 %v1712_v34, %v1711_v33  ;;  %v1389_v41 = vmul.f32 %v3210_v8, %v1238_v35  ;;  %v2432_v33 = vld [vmem:[%s4020_s0 + $0x158] sm:$0xf0]  ;;  %v2431_v34 = vld [vmem:[%s4020_s0 + $0x154] sm:$0xf]  ;;  %v2073_v35 = vld [vmem:[%s4020_s0 + $0x15c] sm:$0xf0] }
  0xe5   :  { %v3376_v39 = vpop.f32.mrf.mxu3  ;;  %v1244_v40 = vpop.f32.mrf.mxu2 }
  0xe6   :  { %2824 = vst [vmem:[%s4024_s5 + $0x18] sm:$0xff] %v2649_v38   ;;  %v901_v42 = vpop.f32.mrf.mxu0  ;;  %v1457_v49 = vadd.f32 %v3224_v14, %v1389_v41 }
  0xe7   :  { %v1070_v46 = vpop.f32.mrf.mxu1 }
  0xe8   :  { %v1071_v47 = vadd.f32 %v1070_v46, %v901_v42  ;;  %v1649_v0 = vadd.f32 %v2521_v50, %v1457_v49  ;;  %v2076_v49 = vor.u32 %v2431_v34, %v2073_v35  ;;  %v2268_v50 = vor.u32 %v2479_v36, %v2265_v37 }
  0xea   :  { %v1240_v51 = vadd.f32 %v1239_v62, %v1071_v47  ;;  %2371 = vmatmul.msk.bf16.gmra.mxu2 %vm773_vm0, %v2080_v44  ;;  %v1713_v10 = vmax.f32 %v1649_v0, 0.0  ;;  %v2072_v44 = vor.u32 %v2432_v33, %v2071_v32 }
  0xec   :  { %v1390_v58 = vmul.f32 %v3210_v8, %v1240_v51 }
  0xed   :  { %v3406_v60 = vpop.f32.mrf.mxu3  ;;  %v1247_v62 = vpop.f32.mrf.mxu2 }
  0xee   :  { %v1458_v1 = vadd.f32 %v3224_v14, %v1390_v58  ;;  %v904_v2 = vpop.f32.mrf.mxu0  ;;  %v2439_v58 = vld [vmem:[%s4020_s0 + $0x190] sm:$0xf0] }
  0xef   :  { %v1073_v6 = vpop.f32.mrf.mxu1 }
  0xf0   :  { %v1650_v7 = vadd.f32 %v2522_v59, %v1458_v1  ;;  %v1074_v9 = vadd.f32 %v1073_v6, %v904_v2  ;;  %v2104_v2 = vor.u32 %v2439_v58, %v2103_v57  ;;  %v2095_v57 = vld [vmem:[%s4020_s0 + $0x180] sm:$0xf]  ;;  %v2438_v58 = vld [vmem:[%s4020_s0 + $0x188] sm:$0xf0] }
  0xf1   :  { %943 = vmatmul.bf16.gmra.mxu0 %v2060_v63 }
  0xf2   :  { %v1714_v12 = vmax.f32 %v1650_v7, 0.0  ;;  %v1243_v13 = vadd.f32 %v1242_v21, %v1074_v9  ;;  %1112 = vmatmul.bf16.gmra.mxu1 %v2064_v4  ;;  %1192 = vmatmul.bf16.gmra.mxu3 %v2256_v5  ;;  %v2796_v4 = vld [vmem:[%s4023_s4 + $0x30] sm:$0xff]  }
  0xf3   :  { %v2529_v9 = vunpack.c.l.bf16 %v2796_v4 }
  0xf4   :  { %v2654_v17 = vpack.c.bf16 %v1714_v12, %v1713_v10  ;;  %v1391_v21 = vmul.f32 %v3210_v8, %v1243_v13  ;;  %v2083_v12 = vld [vmem:[%s4020_s0 + $0x168] sm:$0xf]  ;;  %v2435_v13 = vld [vmem:[%s4020_s0 + $0x170] sm:$0xf0] }
  0xf5   :  { %v3415_v18 = vpop.f32.mrf.mxu3  ;;  %v1249_v19 = vpop.f32.mrf.mxu2 }
  0xf6   :  { %2825 = vst [vmem:[%s4024_s5 + $0x20] sm:$0xff] %v2654_v17   ;;  %v906_v22 = vpop.f32.mrf.mxu0  ;;  %v1459_v28 = vadd.f32 %v3224_v14, %v1391_v21  ;;  %v2482_v17 = vld [vmem:[%s4020_s0 + $0x2ec] sm:$0xf] }
  0xf7   :  { %v1075_v26 = vpop.f32.mrf.mxu1 }
  0xf8   :  { %v1076_v27 = vadd.f32 %v1075_v26, %v906_v22  ;;  %v1651_v45 = vadd.f32 %v2525_v29, %v1459_v28  ;;  %v2530_v22 = vunpack.c.h.bf16 %v2796_v4  ;;  %v2084_v26 = vor.u32 %v2435_v13, %v2083_v12 }
  0xfa   :  { %v1245_v30 = vadd.f32 %v1244_v40, %v1076_v27  ;;  %2372 = vmatmul.msk.bf16.gmra.mxu2 %vm773_vm0, %v2092_v24  ;;  %v2526_v40 = vunpack.c.h.bf16 %v2795_v25  ;;  %v1715_v54 = vmax.f32 %v1651_v45, 0.0 }
  0xfc   :  { %v1392_v38 = vmul.f32 %v3210_v8, %v1245_v30  ;;  %v2088_v30 = vor.u32 %v2434_v15, %v2085_v16 }
  0xfd   :  { %v3445_v41 = vpop.f32.mrf.mxu3  ;;  %v1252_v42 = vpop.f32.mrf.mxu2 }
  0xfe   :  { %v1460_v46 = vadd.f32 %v3224_v14, %v1392_v38  ;;  %v909_v47 = vpop.f32.mrf.mxu0 }
  0xff   :  { %v1078_v51 = vpop.f32.mrf.mxu1 }
 0x100   :  { %v1652_v52 = vadd.f32 %v2526_v40, %v1460_v46  ;;  %v1079_v53 = vadd.f32 %v1078_v51, %v909_v47  ;;  %v2115_v40 = vld [vmem:[%s4020_s0 + $0x1a0] sm:$0xf]  ;;  %v2797_v51 = vld [vmem:[%s4023_s4 + $0x38] sm:$0xff]  }
 0x101   :  { %948 = vmatmul.bf16.gmra.mxu0 %v2072_v44  ;;  %v2442_v44 = vld [vmem:[%s4020_s0 + $0x1a8] sm:$0xf0]  ;;  %v2534_v4 = vunpack.c.h.bf16 %v2797_v51 }
 0x102   :  { %v1716_v55 = vmax.f32 %v1652_v52, 0.0  ;;  %v1248_v56 = vadd.f32 %v1247_v62, %v1079_v53  ;;  %1117 = vmatmul.bf16.gmra.mxu1 %v2076_v49  ;;  %1197 = vmatmul.bf16.gmra.mxu3 %v2268_v50  ;;  %v2116_v50 = vor.u32 %v2442_v44, %v2115_v40 }
 0x104   :  { %v2659_v59 = vpack.c.bf16 %v1716_v55, %v1715_v54  ;;  %v1393_v62 = vmul.f32 %v3210_v8, %v1248_v56  ;;  %v2533_v55 = vunpack.c.l.bf16 %v2797_v51  ;;  %v2472_v51 = vld [vmem:[%s4020_s0 + $0x298] sm:$0xf0] }
 0x105   :  { %v3454_v63 = vpop.f32.mrf.mxu3  ;;  %v1254_v0 = vpop.f32.mrf.mxu2 }
 0x106   :  { %2826 = vst [vmem:[%s4024_s5 + $0x28] sm:$0xff] %v2659_v59   ;;  %v911_v1 = vpop.f32.mrf.mxu0  ;;  %v1461_v7 = vadd.f32 %v3224_v14, %v1393_v62  ;;  %v2437_v59 = vld [vmem:[%s4020_s0 + $0x184] sm:$0xf]  ;;  %v2097_v62 = vld [vmem:[%s4020_s0 + $0x18c] sm:$0xf0] }
 0x107   :  { %v1080_v5 = vpop.f32.mrf.mxu1  ;;  %v2100_v13 = vor.u32 %v2437_v59, %v2097_v62 }
 0x108   :  { %v1081_v6 = vadd.f32 %v1080_v5, %v911_v1  ;;  %v1653_v27 = vadd.f32 %v2529_v9, %v1461_v7  ;;  %v2469_v1 = vld [vmem:[%s4020_s0 + $0x280] sm:$0xf0]  ;;  %v2096_v7 = vor.u32 %v2438_v58, %v2095_v57 }
 0x10a   :  { %v1250_v10 = vadd.f32 %v1249_v19, %v1081_v6  ;;  %2373 = vmatmul.msk.bf16.gmra.mxu2 %vm773_vm0, %v2104_v2  ;;  %v2277_v19 = vld [vmem:[%s4020_s0 + $0x2f4] sm:$0xf0]  ;;  %v1717_v36 = vmax.f32 %v1653_v27, 0.0 }
 0x10b   :  { %v2280_v32 = vor.u32 %v2482_v17, %v2277_v19  ;;  %v2127_v27 = vld [vmem:[%s4020_s0 + $0x1b8] sm:$0xf] }
 0x10c   :  { %v1394_v21 = vmul.f32 %v3210_v8, %v1250_v10 }
 0x10d   :  { %v3484_v24 = vpop.f32.mrf.mxu3  ;;  %v1257_v25 = vpop.f32.mrf.mxu2 }
 0x10e   :  { %v1462_v28 = vadd.f32 %v3224_v14, %v1394_v21  ;;  %v914_v29 = vpop.f32.mrf.mxu0 }
 0x10f   :  { %v1083_v33 = vpop.f32.mrf.mxu1 }
 0x110   :  { %v1654_v34 = vadd.f32 %v2530_v22, %v1462_v28  ;;  %v1084_v35 = vadd.f32 %v1083_v33, %v914_v29  ;;  %v2445_v28 = vld [vmem:[%s4020_s0 + $0x1c0] sm:$0xf0] }
 0x111   :  { %953 = vmatmul.bf16.gmra.mxu0 %v2084_v26 }
 0x112   :  { %v1718_v37 = vmax.f32 %v1654_v34, 0.0  ;;  %v1253_v38 = vadd.f32 %v1252_v42, %v1084_v35  ;;  %1122 = vmatmul.bf16.gmra.mxu1 %v2088_v30  ;;  %1202 = vmatmul.bf16.gmra.mxu3 %v2280_v32  ;;  %v2128_v34 = vor.u32 %v2445_v28, %v2127_v27  ;;  %v2798_v35 = vld [vmem:[%s4023_s4 + $0x40] sm:$0xff]  }
 0x113   :  { %v2537_v40 = vunpack.c.l.bf16 %v2798_v35 }
 0x114   :  { %v2664_v45 = vpack.c.bf16 %v1718_v37, %v1717_v36  ;;  %v1395_v42 = vmul.f32 %v3210_v8, %v1253_v38 }
 0x115   :  { %v3493_v46 = vpop.f32.mrf.mxu3  ;;  %v1259_v47 = vpop.f32.mrf.mxu2 }
 0x116   :  { %2827 = vst [vmem:[%s4024_s5 + $0x30] sm:$0xff] %v2664_v45   ;;  %v916_v49 = vpop.f32.mrf.mxu0  ;;  %v1463_v54 = vadd.f32 %v3224_v14, %v1395_v42  ;;  %v2107_v45 = vld [vmem:[%s4020_s0 + $0x198] sm:$0xf]  ;;  %v2441_v42 = vld [vmem:[%s4020_s0 + $0x1a0] sm:$0xf0] }
 0x117   :  { %v1085_v52 = vpop.f32.mrf.mxu1 }
 0x118   :  { %v1086_v53 = vadd.f32 %v1085_v52, %v916_v49  ;;  %v1655_v9 = vadd.f32 %v2533_v55, %v1463_v54  ;;  %v2440_v49 = vld [vmem:[%s4020_s0 + $0x19c] sm:$0xf] }
 0x11a   :  { %v1255_v56 = vadd.f32 %v1254_v0, %v1086_v53  ;;  %2374 = vmatmul.msk.bf16.gmra.mxu2 %vm773_vm0, %v2116_v50  ;;  %v2223_v0 = vld [vmem:[%s4020_s0 + $0x278] sm:$0xf]  ;;  %v1719_v21 = vmax.f32 %v1655_v9, 0.0  ;;  %v2109_v50 = vld [vmem:[%s4020_s0 + $0x1a4] sm:$0xf0]  ;;  %v2538_v53 = vunpack.c.h.bf16 %v2798_v35 }
 0x11b   :  { %v2224_v15 = vor.u32 %v2469_v1, %v2223_v0  ;;  %v2112_v62 = vor.u32 %v2440_v49, %v2109_v50  ;;  %v2443_v35 = vld [vmem:[%s4020_s0 + $0x1b4] sm:$0xf] }
 0x11c   :  { %v1396_v2 = vmul.f32 %v3210_v8, %v1255_v56  ;;  %v2108_v56 = vor.u32 %v2441_v42, %v2107_v45 }
 0x11d   :  { %v3523_v5 = vpop.f32.mrf.mxu3  ;;  %v1262_v6 = vpop.f32.mrf.mxu2 }
 0x11e   :  { %v1464_v10 = vadd.f32 %v3224_v14, %v1396_v2  ;;  %v919_v12 = vpop.f32.mrf.mxu0 }
 0x11f   :  { %v1088_v16 = vpop.f32.mrf.mxu1 }
 0x120   :  { %v1656_v17 = vadd.f32 %v2534_v4, %v1464_v10  ;;  %v1089_v19 = vadd.f32 %v1088_v16, %v919_v12  ;;  %v2139_v12 = vld [vmem:[%s4020_s0 + $0x1d0] sm:$0xf] }
 0x121   :  { %958 = vmatmul.bf16.gmra.mxu0 %v2096_v7 }
 0x122   :  { %v1720_v22 = vmax.f32 %v1656_v17, 0.0  ;;  %v1258_v26 = vadd.f32 %v1257_v25, %v1089_v19  ;;  %1127 = vmatmul.bf16.gmra.mxu1 %v2100_v13  ;;  %2383 = vmatmul.msk.bf16.vlgmr.msra.gmra.mxu3 %vm773_vm0, %v2224_v15  ;;  %v2448_v13 = vld [vmem:[%s4020_s0 + $0x1d8] sm:$0xf0] }
 0x124   :  { %v2669_v29 = vpack.c.bf16 %v1720_v22, %v1719_v21  ;;  %v1397_v25 = vmul.f32 %v3210_v8, %v1258_v26  ;;  %v2140_v21 = vor.u32 %v2448_v13, %v2139_v12  ;;  %v2799_v22 = vld [vmem:[%s4023_s4 + $0x48] sm:$0xff]   ;;  %v2800_v12 = vld [vmem:[%s4023_s4 + $0x50] sm:$0xff]  }
 0x125   :  { %v3533_v30 = vpop.f32.mrf.mxu3  ;;  %v1264_v32 = vpop.f32.mrf.mxu2 }
 0x126   :  { %2828 = vst [vmem:[%s4024_s5 + $0x38] sm:$0xff] %v2669_v29   ;;  %v921_v33 = vpop.f32.mrf.mxu0  ;;  %v1465_v38 = vadd.f32 %v3224_v14, %v1397_v25  ;;  %v2541_v29 = vunpack.c.l.bf16 %v2799_v22 }
 0x127   :  { %v1090_v36 = vpop.f32.mrf.mxu1 }
 0x128   :  { %v1091_v37 = vadd.f32 %v1090_v36, %v921_v33  ;;  %v1657_v57 = vadd.f32 %v2537_v40, %v1465_v38  ;;  %v2119_v33 = vld [vmem:[%s4020_s0 + $0x1b0] sm:$0xf]  ;;  %v2121_v36 = vld [vmem:[%s4020_s0 + $0x1bc] sm:$0xf0]  ;;  %v2542_v40 = vunpack.c.h.bf16 %v2799_v22  ;;  %v2131_v22 = vld [vmem:[%s4020_s0 + $0x1c8] sm:$0xf] }
 0x12a   :  { %v1260_v44 = vadd.f32 %v1259_v47, %v1091_v37  ;;  %2375 = vmatmul.msk.bf16.gmra.mxu2 %vm773_vm0, %v2128_v34  ;;  %v2235_v47 = vld [vmem:[%s4020_s0 + $0x290] sm:$0xf]  ;;  %v1721_v7 = vmax.f32 %v1657_v57, 0.0  ;;  %v2444_v34 = vld [vmem:[%s4020_s0 + $0x1b8] sm:$0xf0] }
 0x12b   :  { %v2236_v0 = vor.u32 %v2472_v51, %v2235_v47  ;;  %v2475_v37 = vld [vmem:[%s4020_s0 + $0x2b0] sm:$0xf0]  ;;  %v2120_v42 = vor.u32 %v2444_v34, %v2119_v33  ;;  %v2124_v51 = vor.u32 %v2443_v35, %v2121_v36  ;;  %v2546_v33 = vunpack.c.h.bf16 %v2800_v12 }
 0x12c   :  { %v1398_v52 = vmul.f32 %v3210_v8, %v1260_v44 }
 0x12d   :  { %v3563_v54 = vpop.f32.mrf.mxu3  ;;  %v1267_v55 = vpop.f32.mrf.mxu2 }
 0x12e   :  { %v1466_v58 = vadd.f32 %v3224_v14, %v1398_v52  ;;  %v924_v59 = vpop.f32.mrf.mxu0 }
 0x12f   :  { %v1093_v1 = vpop.f32.mrf.mxu1 }
 0x130   :  { %v1658_v2 = vadd.f32 %v2538_v53, %v1466_v58  ;;  %v1094_v4 = vadd.f32 %v1093_v1, %v924_v59  ;;  %v2451_v1 = vld [vmem:[%s4020_s0 + $0x1f0] sm:$0xf0] }
 0x131   :  { %963 = vmatmul.bf16.gmra.mxu0 %v2108_v56 }
 0x132   :  { %v1722_v9 = vmax.f32 %v1658_v2, 0.0  ;;  %v1263_v10 = vadd.f32 %v1262_v6, %v1094_v4  ;;  %1132 = vmatmul.bf16.gmra.mxu1 %v2112_v62  ;;  %2384 = vmatmul.msk.bf16.gmra.mxu3 %vm773_vm0, %v2236_v0  ;;  %v2151_v0 = vld [vmem:[%s4020_s0 + $0x1e8] sm:$0xf] }
 0x134   :  { %v2674_v15 = vpack.c.bf16 %v1722_v9, %v1721_v7  ;;  %v1399_v6 = vmul.f32 %v3210_v8, %v1263_v10  ;;  %v2152_v10 = vor.u32 %v2451_v1, %v2151_v0 }
 0x135   :  { %v3573_v16 = vpop.f32.mrf.mxu3  ;;  %v1269_v17 = vpop.f32.mrf.mxu2 }
 0x136   :  { %2829 = vst [vmem:[%s4024_s5 + $0x40] sm:$0xff] %v2674_v15   ;;  %v926_v19 = vpop.f32.mrf.mxu0  ;;  %v1467_v28 = vadd.f32 %v3224_v14, %v1399_v6 }
 0x137   :  { %v1095_v26 = vpop.f32.mrf.mxu1 }
 0x138   :  { %v1096_v27 = vadd.f32 %v1095_v26, %v926_v19  ;;  %v1659_v49 = vadd.f32 %v2541_v29, %v1467_v28  ;;  %v2545_v19 = vunpack.c.l.bf16 %v2800_v12  ;;  %v2447_v26 = vld [vmem:[%s4020_s0 + $0x1d0] sm:$0xf0]  ;;  %v2133_v28 = vld [vmem:[%s4020_s0 + $0x1d4] sm:$0xf0]  ;;  %v2478_v29 = vld [vmem:[%s4020_s0 + $0x2c8] sm:$0xf0] }
 0x139   :  { %v2132_v36 = vor.u32 %v2447_v26, %v2131_v22  ;;  %v2481_v22 = vld [vmem:[%s4020_s0 + $0x2e0] sm:$0xf0] }
 0x13a   :  { %v1265_v25 = vadd.f32 %v1264_v32, %v1096_v27  ;;  %2376 = vmatmul.msk.bf16.gmra.mxu2 %vm773_vm0, %v2140_v21  ;;  %v2247_v32 = vld [vmem:[%s4020_s0 + $0x2a8] sm:$0xf]  ;;  %v1723_v58 = vmax.f32 %v1659_v49, 0.0  ;;  %v2446_v27 = vld [vmem:[%s4020_s0 + $0x1cc] sm:$0xf] }
 0x13b   :  { %v2248_v52 = vor.u32 %v2475_v37, %v2247_v32 }
 0x13c   :  { %v1400_v38 = vmul.f32 %v3210_v8, %v1265_v25 }
 0x13d   :  { %v3603_v44 = vpop.f32.mrf.mxu3  ;;  %v1272_v45 = vpop.f32.mrf.mxu2 }
 0x13e   :  { %v1468_v50 = vadd.f32 %v3224_v14, %v1400_v38  ;;  %v929_v47 = vpop.f32.mrf.mxu0 }
 0x13f   :  { %v1098_v53 = vpop.f32.mrf.mxu1 }
 0x140   :  { %v1660_v56 = vadd.f32 %v2542_v40, %v1468_v50  ;;  %v1099_v57 = vadd.f32 %v1098_v53, %v929_v47  ;;  %v2136_v40 = vor.u32 %v2446_v27, %v2133_v28 }
 0x141   :  { %968 = vmatmul.bf16.gmra.mxu0 %v2120_v42 }
 0x142   :  { %v1724_v59 = vmax.f32 %v1660_v56, 0.0  ;;  %v1268_v62 = vadd.f32 %v1267_v55, %v1099_v57  ;;  %1137 = vmatmul.bf16.gmra.mxu1 %v2124_v51  ;;  %2385 = vmatmul.msk.bf16.gmra.mxu3 %vm773_vm0, %v2248_v52  ;;  %v2163_v56 = vld [vmem:[%s4020_s0 + $0x200] sm:$0xf]  ;;  %v2454_v57 = vld [vmem:[%s4020_s0 + $0x208] sm:$0xf0] }
 0x143   :  { %v2164_v1 = vor.u32 %v2454_v57, %v2163_v56 }
 0x144   :  { %v2679_v2 = vpack.c.bf16 %v1724_v59, %v1723_v58  ;;  %v1401_v55 = vmul.f32 %v3210_v8, %v1268_v62 }
 0x145   :  { %v3613_v4 = vpop.f32.mrf.mxu3  ;;  %v1274_v7 = vpop.f32.mrf.mxu2 }
 0x146   :  { %2830 = vst [vmem:[%s4024_s5 + $0x48] sm:$0xff] %v2679_v2   ;;  %v931_v9 = vpop.f32.mrf.mxu0  ;;  %v1469_v6 = vadd.f32 %v3224_v14, %v1401_v55  ;;  %v2801_v2 = vld [vmem:[%s4023_s4 + $0x58] sm:$0xff]  }
 0x147   :  { %v1100_v13 = vpop.f32.mrf.mxu1  ;;  %v2549_v12 = vunpack.c.l.bf16 %v2801_v2  ;;  %v2550_v27 = vunpack.c.h.bf16 %v2801_v2 }
 0x148   :  { %v1101_v15 = vadd.f32 %v1100_v13, %v931_v9  ;;  %v1661_v32 = vadd.f32 %v2545_v19, %v1469_v6  ;;  %v2450_v6 = vld [vmem:[%s4020_s0 + $0x1e8] sm:$0xf0]  ;;  %v2449_v19 = vld [vmem:[%s4020_s0 + $0x1e4] sm:$0xf] }
 0x14a   :  { %v1270_v21 = vadd.f32 %v1269_v17, %v1101_v15  ;;  %2377 = vmatmul.msk.bf16.gmra.mxu2 %vm773_vm0, %v2152_v10  ;;  %v2259_v17 = vld [vmem:[%s4020_s0 + $0x2c0] sm:$0xf]  ;;  %v1725_v51 = vmax.f32 %v1661_v32, 0.0 }
 0x14b   :  { %v2260_v42 = vor.u32 %v2478_v29, %v2259_v17  ;;  %v2143_v15 = vld [vmem:[%s4020_s0 + $0x1e0] sm:$0xf] }
 0x14c   :  { %v1402_v25 = vmul.f32 %v3210_v8, %v1270_v21  ;;  %v2145_v21 = vld [vmem:[%s4020_s0 + $0x1ec] sm:$0xf0]  ;;  %v2144_v29 = vor.u32 %v2450_v6, %v2143_v15  ;;  %v2484_v15 = vld [vmem:[%s4020_s0 + $0x2f8] sm:$0xf0]  ;;  %v3725_v6 = vld [vmem:[%s4021_s2] ss:$0 sm:$0xff] }
 0x14d   :  { %v3643_v34 = vpop.f32.mrf.mxu3  ;;  %v1277_v35 = vpop.f32.mrf.mxu2  ;;  %v2148_v32 = vor.u32 %v2449_v19, %v2145_v21 }
 0x14e   :  { %v1470_v37 = vadd.f32 %v3224_v14, %v1402_v25  ;;  %v934_v38 = vpop.f32.mrf.mxu0 }
 0x14f   :  { %v1103_v49 = vpop.f32.mrf.mxu1 }
 0x150   :  { %v1662_v50 = vadd.f32 %v2546_v33, %v1470_v37  ;;  %v1104_v47 = vadd.f32 %v1103_v49, %v934_v38 }
 0x151   :  { %973 = vmatmul.bf16.gmra.mxu0 %v2132_v36 }
 0x152   :  { %v1726_v52 = vmax.f32 %v1662_v50, 0.0  ;;  %v1273_v53 = vadd.f32 %v1272_v45, %v1104_v47  ;;  %1142 = vmatmul.bf16.gmra.mxu1 %v2136_v40  ;;  %2386 = vmatmul.msk.bf16.gmra.mxu3 %vm773_vm0, %v2260_v42 }
 0x154   :  { %v2684_v58 = vpack.c.bf16 %v1726_v52, %v1725_v51  ;;  %v1403_v45 = vmul.f32 %v3210_v8, %v1273_v53  ;;  %v2175_v51 = vld [vmem:[%s4020_s0 + $0x218] sm:$0xf]  ;;  %v2457_v52 = vld [vmem:[%s4020_s0 + $0x220] sm:$0xf0] }
 0x155   :  { %v3653_v59 = vpop.f32.mrf.mxu3  ;;  %v1279_v62 = vpop.f32.mrf.mxu2 }
 0x156   :  { %2831 = vst [vmem:[%s4024_s5 + $0x50] sm:$0xff] %v2684_v58   ;;  %v936_v0 = vpop.f32.mrf.mxu0  ;;  %v1471_v10 = vadd.f32 %v3224_v14, %v1403_v45  ;;  %v2176_v45 = vor.u32 %v2457_v52, %v2175_v51  ;;  %v2460_v51 = vld [vmem:[%s4020_s0 + $0x238] sm:$0xf0] }
 0x157   :  { %v1105_v55 = vpop.f32.mrf.mxu1 }
 0x158   :  { %v1106_v9 = vadd.f32 %v1105_v55, %v936_v0  ;;  %v1663_v25 = vadd.f32 %v2549_v12, %v1471_v10  ;;  %v2802_v0 = vld [vmem:[%s4023_s4 + $0x60] sm:$0xff]   ;;  %v2155_v12 = vld [vmem:[%s4020_s0 + $0x1f8] sm:$0xf] }
 0x159   :  { %v2554_v21 = vunpack.c.h.bf16 %v2802_v0 }
 0x15a   :  { %v1275_v13 = vadd.f32 %v1274_v7, %v1106_v9  ;;  %2378 = vmatmul.msk.bf16.gmra.mxu2 %vm773_vm0, %v2164_v1  ;;  %v2271_v7 = vld [vmem:[%s4020_s0 + $0x2d8] sm:$0xf]  ;;  %v1727_v49 = vmax.f32 %v1663_v25, 0.0  ;;  %v2553_v9 = vunpack.c.l.bf16 %v2802_v0  ;;  %v2803_v0 = vld [vmem:[%s4023_s4 + $0x68] sm:$0xff]  }
 0x15b   :  { %v2272_v37 = vor.u32 %v2481_v22, %v2271_v7 }
 0x15c   :  { %v1404_v26 = vmul.f32 %v3210_v8, %v1275_v13  ;;  %v2452_v13 = vld [vmem:[%s4020_s0 + $0x1fc] sm:$0xf] }
 0x15d   :  { %v3683_v28 = vpop.f32.mrf.mxu3  ;;  %v1282_v17 = vpop.f32.mrf.mxu2 }
 0x15e   :  { %v1472_v33 = vadd.f32 %v3224_v14, %v1404_v26  ;;  %v939_v36 = vpop.f32.mrf.mxu0 }
 0x15f   :  { %v1108_v38 = vpop.f32.mrf.mxu1 }
 0x160   :  { %v1664_v40 = vadd.f32 %v2550_v27, %v1472_v33  ;;  %v1109_v42 = vadd.f32 %v1108_v38, %v939_v36 }
 0x161   :  { %978 = vmatmul.bf16.gmra.mxu0 %v2144_v29  ;;  %v3733_v29 = vld [vmem:[%s4022_s3] ss:$0 sm:$0xff] }
 0x162   :  { %v1728_v50 = vmax.f32 %v1664_v40, 0.0  ;;  %v1278_v47 = vadd.f32 %v1277_v35, %v1109_v42  ;;  %1147 = vmatmul.bf16.gmra.mxu1 %v2148_v32  ;;  %2387 = vmatmul.msk.bf16.gmra.mxu3 %vm773_vm0, %v2272_v37 }
 0x164   :  { %v2689_v53 = vpack.c.bf16 %v1728_v50, %v1727_v49  ;;  %v1405_v35 = vmul.f32 %v3210_v8, %v1278_v47  ;;  %v2453_v8 = vld [vmem:[%s4020_s0 + $0x200] sm:$0xf0]  ;;  %v2187_v47 = vld [vmem:[%s4020_s0 + $0x230] sm:$0xf] }
 0x165   :  { %v3693_v56 = vpop.f32.mrf.mxu3  ;;  %v1284_v57 = vpop.f32.mrf.mxu2  ;;  %v2156_v26 = vor.u32 %v2453_v8, %v2155_v12  ;;  %v2167_v12 = vld [vmem:[%s4020_s0 + $0x210] sm:$0xf]  ;;  %v2456_v8 = vld [vmem:[%s4020_s0 + $0x218] sm:$0xf0] }
 0x166   :  { %2832 = vst [vmem:[%s4024_s5 + $0x58] sm:$0xff] %v2689_v53   ;;  %v941_v58 = vpop.f32.mrf.mxu0  ;;  %v1473_v55 = vadd.f32 %v3224_v14, %v1405_v35  ;;  %v2157_v14 = vld [vmem:[%s4020_s0 + $0x204] sm:$0xf0] }
 0x167   :  { %v1110_v1 = vpop.f32.mrf.mxu1  ;;  %v2160_v36 = vor.u32 %v2452_v13, %v2157_v14  ;;  %v2455_v13 = vld [vmem:[%s4020_s0 + $0x214] sm:$0xf]  ;;  %v2169_v14 = vld [vmem:[%s4020_s0 + $0x21c] sm:$0xf0] }
 0x168   :  { %v1111_v2 = vadd.f32 %v1110_v1, %v941_v58  ;;  %v1665_v27 = vadd.f32 %v2553_v9, %v1473_v55  ;;  %v2557_v9 = vunpack.c.l.bf16 %v2803_v0 }
 0x16a   :  { %v1280_v10 = vadd.f32 %v1279_v62, %v1111_v2  ;;  %2379 = vmatmul.msk.bf16.gmra.mxu2 %vm773_vm0, %v2176_v45  ;;  %v2283_v62 = vld [vmem:[%s4020_s0 + $0x2f0] sm:$0xf]  ;;  %v1729_v42 = vmax.f32 %v1665_v27, 0.0  ;;  %v2188_v45 = vor.u32 %v2460_v51, %v2187_v47 }
 0x16b   :  { %v2284_v32 = vor.u32 %v2484_v15, %v2283_v62  ;;  %v2558_v62 = vunpack.c.h.bf16 %v2803_v0 }
 0x16c   :  { %v1406_v19 = vmul.f32 %v3725_v6, %v1280_v10 }
 0x16d   :  { %v3728_v7 = vpop.f32.mrf.mxu3  ;;  %v1287_v22 = vpop.f32.mrf.mxu2 }
 0x16e   :  { %v1474_v25 = vadd.f32 %v3733_v29, %v1406_v19  ;;  %v944_v33 = vpop.f32.mrf.mxu0 }
 0x16f   :  { %v1113_v37 = vpop.f32.mrf.mxu1 }
 0x170   :  { %v1666_v38 = vadd.f32 %v2554_v21, %v1474_v25  ;;  %v1114_v40 = vadd.f32 %v1113_v37, %v944_v33  ;;  %v2168_v21 = vor.u32 %v2456_v8, %v2167_v12  ;;  %v2172_v33 = vor.u32 %v2455_v13, %v2169_v14  ;;  %v2459_v12 = vld [vmem:[%s4020_s0 + $0x230] sm:$0xf0]  ;;  %v2458_v8 = vld [vmem:[%s4020_s0 + $0x22c] sm:$0xf]  ;;  %v2181_v13 = vld [vmem:[%s4020_s0 + $0x234] sm:$0xf0] }
 0x171   :  { %983 = vmatmul.bf16.gmra.mxu0 %v2156_v26 }
 0x172   :  { %v1730_v49 = vmax.f32 %v1666_v38, 0.0  ;;  %v1283_v50 = vadd.f32 %v1282_v17, %v1114_v40  ;;  %1152 = vmatmul.bf16.gmra.mxu1 %v2160_v36  ;;  %2388 = vmatmul.msk.bf16.gmra.mxu3 %vm773_vm0, %v2284_v32 }
 0x174   :  { %v2694_v52 = vpack.c.bf16 %v1730_v49, %v1729_v42  ;;  %v1407_v17 = vmul.f32 %v3725_v6, %v1283_v50  ;;  %v2199_v49 = vld [vmem:[%s4020_s0 + $0x248] sm:$0xf]  ;;  %v2463_v50 = vld [vmem:[%s4020_s0 + $0x250] sm:$0xf0] }
 0x175   :  { %v3743_v53 = vpop.f32.mrf.mxu3  ;;  %v1289_v35 = vpop.f32.mrf.mxu2 }
 0x176   :  { %2833 = vst [vmem:[%s4024_s5 + $0x60] sm:$0xff] %v2694_v52   ;;  %v946_v58 = vpop.f32.mrf.mxu0  ;;  %v1475_v55 = vadd.f32 %v3733_v29, %v1407_v17 }
 0x177   :  { %v1115_v1 = vpop.f32.mrf.mxu1 }
 0x178   :  { %v1116_v2 = vadd.f32 %v1115_v1, %v946_v58  ;;  %v1667_v26 = vadd.f32 %v2557_v9, %v1475_v55  ;;  %v2200_v58 = vor.u32 %v2463_v50, %v2199_v49  ;;  %v2211_v49 = vld [vmem:[%s4020_s0 + $0x260] sm:$0xf]  ;;  %v2466_v50 = vld [vmem:[%s4020_s0 + $0x268] sm:$0xf0] }
 0x17a   :  { %v1285_v10 = vadd.f32 %v1284_v57, %v1116_v2  ;;  %2380 = vmatmul.msk.bf16.gmra.mxu2 %vm773_vm0, %v2188_v45  ;;  %v1731_v38 = vmax.f32 %v1667_v26, 0.0  ;;  %v2804_v45 = vld [vmem:[%s4023_s4 + $0x70] sm:$0xff]  }
 0x17b   :  { %v2561_v55 = vunpack.c.l.bf16 %v2804_v45  ;;  %v2562_v14 = vunpack.c.h.bf16 %v2804_v45  ;;  %v2212_v45 = vor.u32 %v2466_v50, %v2211_v49  ;;  %v2806_v50 = vld [vmem:[%s4023_s4 + $0x80] sm:$0xff]  }
 0x17c   :  { %v1408_v57 = vmul.f32 %v3725_v6, %v1285_v10  ;;  %v2179_v10 = vld [vmem:[%s4020_s0 + $0x228] sm:$0xf] }
 0x17d   :  { %v3767_v15 = vpop.f32.mrf.mxu3  ;;  %v1292_v19 = vpop.f32.mrf.mxu2 }
 0x17e   :  { %v1476_v27 = vadd.f32 %v3733_v29, %v1408_v57  ;;  %v949_v25 = vpop.f32.mrf.mxu0 }
 0x17f   :  { %v1118_v36 = vpop.f32.mrf.mxu1 }
 0x180   :  { %v1668_v32 = vadd.f32 %v2558_v62, %v1476_v27  ;;  %v1119_v37 = vadd.f32 %v1118_v36, %v949_v25 }
 0x181   :  { %988 = vmatmul.bf16.gmra.mxu0 %v2168_v21  ;;  %v2180_v21 = vor.u32 %v2459_v12, %v2179_v10 }
 0x182   :  { %v1732_v40 = vmax.f32 %v1668_v32, 0.0  ;;  %v1288_v42 = vadd.f32 %v1287_v22, %v1119_v37  ;;  %1157 = vmatmul.bf16.gmra.mxu1 %v2172_v33  ;;  %v2184_v33 = vor.u32 %v2458_v8, %v2181_v13 }
 0x184   :  { %v2699_v47 = vpack.c.bf16 %v1732_v40, %v1731_v38  ;;  %v1409_v17 = vmul.f32 %v3725_v6, %v1288_v42 }
 0x185   :  { %v3776_v51 = vpop.f32.mrf.mxu3  ;;  %v1294_v52 = vpop.f32.mrf.mxu2 }
 0x186   :  { %2834 = vst [vmem:[%s4024_s5 + $0x68] sm:$0xff] %v2699_v47   ;;  %v951_v22 = vpop.f32.mrf.mxu0  ;;  %v1477_v2 = vadd.f32 %v3733_v29, %v1409_v17 }
 0x187   :  { %v1120_v0 = vpop.f32.mrf.mxu1 }
 0x188   :  { %v1121_v1 = vadd.f32 %v1120_v0, %v951_v22  ;;  %v1669_v26 = vadd.f32 %v2561_v55, %v1477_v2  ;;  %v2805_v0 = vld [vmem:[%s4023_s4 + $0x78] sm:$0xff]  }
 0x189   :  { %v2566_v8 = vunpack.c.h.bf16 %v2805_v0 }
 0x18a   :  { %v1290_v9 = vadd.f32 %v1289_v35, %v1121_v1  ;;  %2381 = vmatmul.msk.bf16.gmra.mxu2 %vm773_vm0, %v2200_v58  ;;  %v1733_v38 = vmax.f32 %v1669_v26, 0.0 }
 0x18c   :  { %v1410_v35 = vmul.f32 %v3725_v6, %v1290_v9  ;;  %v2565_v9 = vunpack.c.l.bf16 %v2805_v0 }
 0x18d   :  { %v3800_v57 = vpop.f32.mrf.mxu3  ;;  %v1297_v62 = vpop.f32.mrf.mxu2 }
 0x18e   :  { %v1478_v27 = vadd.f32 %v3733_v29, %v1410_v35  ;;  %v954_v25 = vpop.f32.mrf.mxu0 }
 0x18f   :  { %v1123_v36 = vpop.f32.mrf.mxu1 }
 0x190   :  { %v1670_v32 = vadd.f32 %v2562_v14, %v1478_v27  ;;  %v1124_v37 = vadd.f32 %v1123_v36, %v954_v25 }
 0x191   :  { %993 = vmatmul.bf16.gmra.mxu0 %v2180_v21 }
 0x192   :  { %v1734_v40 = vmax.f32 %v1670_v32, 0.0  ;;  %v1293_v42 = vadd.f32 %v1292_v19, %v1124_v37  ;;  %1162 = vmatmul.bf16.gmra.mxu1 %v2184_v33 }
 0x194   :  { %v2704_v47 = vpack.c.bf16 %v1734_v40, %v1733_v38  ;;  %v1411_v58 = vmul.f32 %v3725_v6, %v1293_v42 }
 0x195   :  { %v3809_v17 = vpop.f32.mrf.mxu3  ;;  %v1299_v22 = vpop.f32.mrf.mxu2 }
 0x196   :  { %2835 = vst [vmem:[%s4024_s5 + $0x70] sm:$0xff] %v2704_v47   ;;  %v956_v19 = vpop.f32.mrf.mxu0  ;;  %v1479_v55 = vadd.f32 %v3733_v29, %v1411_v58 }
 0x197   :  { %v1125_v1 = vpop.f32.mrf.mxu1 }
 0x198   :  { %v1126_v2 = vadd.f32 %v1125_v1, %v956_v19  ;;  %v1671_v14 = vadd.f32 %v2565_v9, %v1479_v55  ;;  %v2816_v1 = vld [vmem:[%s4023_s4 + $0xd0] sm:$0xff]   ;;  %v2570_v9 = vunpack.c.h.bf16 %v2806_v50 }
 0x19a   :  { %v1295_v10 = vadd.f32 %v1294_v52, %v1126_v2  ;;  %2382 = vmatmul.msk.bf16.gmra.mxu2 %vm773_vm0, %v2212_v45  ;;  %v1735_v36 = vmax.f32 %v1671_v14, 0.0  ;;  %v1179_v52 = vadd.f32 %v3613_v4, %v3298_v23  ;;  %v2569_v23 = vunpack.c.l.bf16 %v2806_v50 }
 0x19b   :  { %v1181_v2 = vadd.f32 %v3643_v34, %v3328_v43 }
 0x19c   :  { %v1412_v12 = vmul.f32 %v3725_v6, %v1295_v10 }
 0x19d   :  { %v3821_v13 = vpop.f32.mrf.mxu3  ;;  %v1302_v35 = vpop.f32.mrf.mxu2 }
 0x19e   :  { %v1480_v21 = vadd.f32 %v3733_v29, %v1412_v12  ;;  %v959_v26 = vpop.f32.mrf.mxu0 }
 0x19f   :  { %v1128_v27 = vpop.f32.mrf.mxu1 }
 0x1a0   :  { %v1672_v25 = vadd.f32 %v2566_v8, %v1480_v21  ;;  %v1129_v33 = vadd.f32 %v1128_v27, %v959_v26  ;;  %v2609_v21 = vunpack.c.l.bf16 %v2816_v1 }
 0x1a2   :  { %v1736_v32 = vmax.f32 %v1672_v25, 0.0  ;;  %v1298_v37 = vadd.f32 %v1297_v62, %v1129_v33 }
 0x1a4   :  { %v2709_v38 = vpack.c.bf16 %v1736_v32, %v1735_v36  ;;  %v1413_v40 = vmul.f32 %v3725_v6, %v1298_v37  ;;  %v2610_v32 = vunpack.c.h.bf16 %v2816_v1 }
 0x1a5   :  { %v1304_v42 = vpop.f32.mrf.mxu2  ;;  %v1347_v49 = vpop.f32.mrf.mxu3 }
 0x1a6   :  { %2836 = vst [vmem:[%s4024_s5 + $0x78] sm:$0xff] %v2709_v38   ;;  %v1348_v47 = vadd.f32 %v1347_v49, %v1179_v52  ;;  %v961_v58 = vpop.f32.mrf.mxu0  ;;  %v1481_v45 = vadd.f32 %v3733_v29, %v1413_v40  ;;  %v1184_v49 = vadd.f32 %v3653_v59, %v3337_v61 }
 0x1a7   :  { %v1130_v19 = vpop.f32.mrf.mxu1 }
 0x1a8   :  { %v1131_v62 = vadd.f32 %v1130_v19, %v961_v58  ;;  %v1433_v4 = vmul.f32 %v3725_v6, %v1348_v47  ;;  %v1673_v10 = vadd.f32 %v2569_v23, %v1481_v45 }
 0x1aa   :  { %v1300_v0 = vadd.f32 %v1299_v22, %v1131_v62  ;;  %v1501_v14 = vadd.f32 %v3733_v29, %v1433_v4  ;;  %v1737_v43 = vmax.f32 %v1673_v10, 0.0  ;;  %v2807_v4 = vld [vmem:[%s4023_s4 + $0x88] sm:$0xff]  }
 0x1ac   :  { %v1414_v55 = vmul.f32 %v3725_v6, %v1300_v0  ;;  %v1693_v34 = vadd.f32 %v2609_v21, %v1501_v14  ;;  %v1186_v14 = vadd.f32 %v3683_v28, %v3367_v20 }
 0x1ad   :  { %v1307_v12 = vpop.f32.mrf.mxu2  ;;  %v1349_v8 = vpop.f32.mrf.mxu3 }
 0x1ae   :  { %v1482_v26 = vadd.f32 %v3733_v29, %v1414_v55  ;;  %v1350_v27 = vadd.f32 %v1349_v8, %v1181_v2  ;;  %v964_v22 = vpop.f32.mrf.mxu0  ;;  %v1757_v45 = vmax.f32 %v1693_v34, 0.0  ;;  %v2573_v55 = vunpack.c.l.bf16 %v2807_v4  ;;  %v2817_v8 = vld [vmem:[%s4023_s4 + $0xd8] sm:$0xff]  }
 0x1af   :  { %v1133_v25 = vpop.f32.mrf.mxu1 }
 0x1b0   :  { %v1674_v33 = vadd.f32 %v2570_v9, %v1482_v26  ;;  %v1434_v36 = vmul.f32 %v3725_v6, %v1350_v27  ;;  %v1134_v37 = vadd.f32 %v1133_v25, %v964_v22  ;;  %v2574_v26 = vunpack.c.h.bf16 %v2807_v4 }
 0x1b2   :  { %v1738_v52 = vmax.f32 %v1674_v33, 0.0  ;;  %v1502_v38 = vadd.f32 %v3733_v29, %v1434_v36  ;;  %v1303_v40 = vadd.f32 %v1302_v35, %v1134_v37  ;;  %v2613_v36 = vunpack.c.l.bf16 %v2817_v8 }
 0x1b4   :  { %v2714_v50 = vpack.c.bf16 %v1738_v52, %v1737_v43  ;;  %v1694_v47 = vadd.f32 %v2610_v32, %v1502_v38  ;;  %v1415_v58 = vmul.f32 %v3725_v6, %v1303_v40  ;;  %v2614_v38 = vunpack.c.h.bf16 %v2817_v8 }
 0x1b5   :  { %v1309_v19 = vpop.f32.mrf.mxu2  ;;  %v1352_v62 = vpop.f32.mrf.mxu3 }
 0x1b6   :  { %2837 = vst [vmem:[%s4024_s5 + $0x80] sm:$0xff] %v2714_v50   ;;  %v1758_v23 = vmax.f32 %v1694_v47, 0.0  ;;  %v1353_v35 = vadd.f32 %v1352_v62, %v1184_v49  ;;  %v966_v0 = vpop.f32.mrf.mxu0  ;;  %v1483_v2 = vadd.f32 %v3733_v29, %v1415_v58  ;;  %v1189_v58 = vadd.f32 %v3693_v56, %v3376_v39 }
 0x1b7   :  { %v1135_v1 = vpop.f32.mrf.mxu1 }
 0x1b8   :  { %v2764_v61 = vpack.c.bf16 %v1758_v23, %v1757_v45  ;;  %v1136_v59 = vadd.f32 %v1135_v1, %v966_v0  ;;  %v1435_v9 = vmul.f32 %v3725_v6, %v1353_v35  ;;  %v1675_v27 = vadd.f32 %v2573_v55, %v1483_v2 }
 0x1ba   :  { %2847 = vst [vmem:[%s4024_s5 + $0xd0] sm:$0xff] %v2764_v61   ;;  %v1305_v10 = vadd.f32 %v1304_v42, %v1136_v59  ;;  %v1503_v33 = vadd.f32 %v3733_v29, %v1435_v9  ;;  %v1739_v20 = vmax.f32 %v1675_v27, 0.0  ;;  %v2808_v61 = vld [vmem:[%s4023_s4 + $0x90] sm:$0xff]  }
 0x1bb   :  { %v2577_v9 = vunpack.c.l.bf16 %v2808_v61  ;;  %v2578_v27 = vunpack.c.h.bf16 %v2808_v61  ;;  %v2809_v61 = vld [vmem:[%s4023_s4 + $0x98] sm:$0xff]  }
 0x1bc   :  { %v1416_v21 = vmul.f32 %v3725_v6, %v1305_v10  ;;  %v1695_v28 = vadd.f32 %v2613_v36, %v1503_v33 }
 0x1bd   :  { %v1312_v22 = vpop.f32.mrf.mxu2  ;;  %v1354_v25 = vpop.f32.mrf.mxu3 }
 0x1be   :  { %v1484_v32 = vadd.f32 %v3733_v29, %v1416_v21  ;;  %v1355_v37 = vadd.f32 %v1354_v25, %v1186_v14  ;;  %v969_v42 = vpop.f32.mrf.mxu0  ;;  %v1759_v0 = vmax.f32 %v1695_v28, 0.0  ;;  %v2818_v14 = vld [vmem:[%s4023_s4 + $0xe0] sm:$0xff]   ;;  %v1191_v21 = vadd.f32 %v3728_v7, %v3406_v60 }
 0x1bf   :  { %v1138_v43 = vpop.f32.mrf.mxu1 }
 0x1c0   :  { %v1676_v34 = vadd.f32 %v2574_v26, %v1484_v32  ;;  %v1436_v52 = vmul.f32 %v3725_v6, %v1355_v37  ;;  %v1139_v40 = vadd.f32 %v1138_v43, %v969_v42  ;;  %v2617_v37 = vunpack.c.l.bf16 %v2818_v14 }
 0x1c2   :  { %v1740_v49 = vmax.f32 %v1676_v34, 0.0  ;;  %v1504_v50 = vadd.f32 %v3733_v29, %v1436_v52  ;;  %v1308_v47 = vadd.f32 %v1307_v12, %v1139_v40  ;;  %v2618_v40 = vunpack.c.h.bf16 %v2818_v14 }
 0x1c3   :  { %v2582_v14 = vunpack.c.h.bf16 %v2809_v61 }
 0x1c4   :  { %v2719_v62 = vpack.c.bf16 %v1740_v49, %v1739_v20  ;;  %v1696_v45 = vadd.f32 %v2614_v38, %v1504_v50  ;;  %v1417_v23 = vmul.f32 %v3725_v6, %v1308_v47  ;;  %v1194_v47 = vadd.f32 %v3743_v53, %v3415_v18 }
 0x1c5   :  { %v1314_v4 = vpop.f32.mrf.mxu2  ;;  %v1357_v35 = vpop.f32.mrf.mxu3 }
 0x1c6   :  { %2838 = vst [vmem:[%s4024_s5 + $0x88] sm:$0xff] %v2719_v62   ;;  %v1760_v1 = vmax.f32 %v1696_v45, 0.0  ;;  %v1358_v12 = vadd.f32 %v1357_v35, %v1189_v58  ;;  %v971_v59 = vpop.f32.mrf.mxu0  ;;  %v1485_v55 = vadd.f32 %v3733_v29, %v1417_v23 }
 0x1c7   :  { %v1140_v2 = vpop.f32.mrf.mxu1 }
 0x1c8   :  { %v2769_v39 = vpack.c.bf16 %v1760_v1, %v1759_v0  ;;  %v1141_v56 = vadd.f32 %v1140_v2, %v971_v59  ;;  %v1437_v10 = vmul.f32 %v3725_v6, %v1358_v12  ;;  %v1677_v25 = vadd.f32 %v2577_v9, %v1485_v55  ;;  %v2819_v9 = vld [vmem:[%s4023_s4 + $0xe8] sm:$0xff]  }
 0x1ca   :  { %2848 = vst [vmem:[%s4024_s5 + $0xd8] sm:$0xff] %v2769_v39   ;;  %v1310_v8 = vadd.f32 %v1309_v19, %v1141_v56  ;;  %v1505_v32 = vadd.f32 %v3733_v29, %v1437_v10  ;;  %v1741_v60 = vmax.f32 %v1677_v25, 0.0  ;;  %v2581_v39 = vunpack.c.l.bf16 %v2809_v61 }
 0x1cb   :  { %v1196_v10 = vadd.f32 %v3767_v15, %v3445_v41 }
 0x1cc   :  { %v1418_v26 = vmul.f32 %v3725_v6, %v1310_v8  ;;  %v1697_v7 = vadd.f32 %v2617_v37, %v1505_v32 }
 0x1cd   :  { %v1317_v33 = vpop.f32.mrf.mxu2  ;;  %v1359_v36 = vpop.f32.mrf.mxu3 }
 0x1ce   :  { %v1486_v42 = vadd.f32 %v3733_v29, %v1418_v26  ;;  %v1360_v43 = vadd.f32 %v1359_v36, %v1191_v21  ;;  %v974_v19 = vpop.f32.mrf.mxu0  ;;  %v1761_v0 = vmax.f32 %v1697_v7, 0.0  ;;  %v2621_v36 = vunpack.c.l.bf16 %v2819_v9 }
 0x1cf   :  { %v1143_v34 = vpop.f32.mrf.mxu1 }
 0x1d0   :  { %v1678_v52 = vadd.f32 %v2578_v27, %v1486_v42  ;;  %v1438_v38 = vmul.f32 %v3725_v6, %v1360_v43  ;;  %v1144_v20 = vadd.f32 %v1143_v34, %v974_v19  ;;  %v2622_v34 = vunpack.c.h.bf16 %v2819_v9 }
 0x1d2   :  { %v1742_v28 = vmax.f32 %v1678_v52, 0.0  ;;  %v1506_v49 = vadd.f32 %v3733_v29, %v1438_v38  ;;  %v1313_v50 = vadd.f32 %v1312_v22, %v1144_v20 }
 0x1d4   :  { %v2724_v58 = vpack.c.bf16 %v1742_v28, %v1741_v60  ;;  %v1698_v62 = vadd.f32 %v2618_v40, %v1506_v49  ;;  %v1419_v45 = vmul.f32 %v3725_v6, %v1313_v50  ;;  %v1199_v60 = vadd.f32 %v3776_v51, %v3454_v63 }
 0x1d5   :  { %v1319_v23 = vpop.f32.mrf.mxu2  ;;  %v1362_v35 = vpop.f32.mrf.mxu3 }
 0x1d6   :  { %2839 = vst [vmem:[%s4024_s5 + $0x90] sm:$0xff] %v2724_v58   ;;  %v1762_v1 = vmax.f32 %v1698_v62, 0.0  ;;  %v1363_v22 = vadd.f32 %v1362_v35, %v1194_v47  ;;  %v976_v12 = vpop.f32.mrf.mxu0  ;;  %v1487_v2 = vadd.f32 %v3733_v29, %v1419_v45  ;;  %v2810_v45 = vld [vmem:[%s4023_s4 + $0xa0] sm:$0xff]  }
 0x1d7   :  { %v1145_v59 = vpop.f32.mrf.mxu1  ;;  %v2585_v61 = vunpack.c.l.bf16 %v2810_v45 }
 0x1d8   :  { %v2774_v18 = vpack.c.bf16 %v1762_v1, %v1761_v0  ;;  %v1146_v53 = vadd.f32 %v1145_v59, %v976_v12  ;;  %v1439_v56 = vmul.f32 %v3725_v6, %v1363_v22  ;;  %v1679_v21 = vadd.f32 %v2581_v39, %v1487_v2  ;;  %v2820_v59 = vld [vmem:[%s4023_s4 + $0xf0] sm:$0xff]  }
 0x1d9   :  { %v2586_v2 = vunpack.c.h.bf16 %v2810_v45  ;;  %v1206_v45 = vadd.f32 %v3821_v13, %v3523_v5 }
 0x1da   :  { %2849 = vst [vmem:[%s4024_s5 + $0xe0] sm:$0xff] %v2774_v18   ;;  %v1315_v55 = vadd.f32 %v1314_v4, %v1146_v53  ;;  %v1507_v25 = vadd.f32 %v3733_v29, %v1439_v56  ;;  %v1743_v41 = vmax.f32 %v1679_v21, 0.0  ;;  %v1201_v18 = vadd.f32 %v3800_v57, %v3484_v24 }
 0x1dc   :  { %v1420_v8 = vmul.f32 %v3725_v6, %v1315_v55  ;;  %v1699_v15 = vadd.f32 %v2621_v36, %v1507_v25  ;;  %v2626_v36 = vunpack.c.h.bf16 %v2820_v59 }
 0x1dd   :  { %v1322_v26 = vpop.f32.mrf.mxu2  ;;  %v1364_v27 = vpop.f32.mrf.mxu3 }
 0x1de   :  { %v1488_v32 = vadd.f32 %v3733_v29, %v1420_v8  ;;  %v1365_v37 = vadd.f32 %v1364_v27, %v1196_v10  ;;  %v979_v4 = vpop.f32.mrf.mxu0  ;;  %v1763_v58 = vmax.f32 %v1699_v15, 0.0  ;;  %v2625_v10 = vunpack.c.l.bf16 %v2820_v59 }
 0x1df   :  { %v1148_v42 = vpop.f32.mrf.mxu1 }
 0x1e0   :  { %v1680_v43 = vadd.f32 %v2582_v14, %v1488_v32  ;;  %v1440_v19 = vmul.f32 %v3725_v6, %v1365_v37  ;;  %v1149_v52 = vadd.f32 %v1148_v42, %v979_v4 }
 0x1e2   :  { %v1744_v38 = vmax.f32 %v1680_v43, 0.0  ;;  %v1508_v40 = vadd.f32 %v3733_v29, %v1440_v19  ;;  %v1318_v20 = vadd.f32 %v1317_v33, %v1149_v52  ;;  %v1204_v43 = vadd.f32 %v3809_v17, %v3493_v46 }
 0x1e4   :  { %v2729_v7 = vpack.c.bf16 %v1744_v38, %v1743_v41  ;;  %v1700_v28 = vadd.f32 %v2622_v34, %v1508_v40  ;;  %v1421_v49 = vmul.f32 %v3725_v6, %v1318_v20  ;;  %v2811_v20 = vld [vmem:[%s4023_s4 + $0xa8] sm:$0xff]  }
 0x1e5   :  { %v1324_v50 = vpop.f32.mrf.mxu2  ;;  %v1367_v47 = vpop.f32.mrf.mxu3 }
 0x1e6   :  { %2840 = vst [vmem:[%s4024_s5 + $0x98] sm:$0xff] %v2729_v7   ;;  %v1764_v62 = vmax.f32 %v1700_v28, 0.0  ;;  %v1368_v33 = vadd.f32 %v1367_v47, %v1199_v60  ;;  %v981_v35 = vpop.f32.mrf.mxu0  ;;  %v1489_v1 = vadd.f32 %v3733_v29, %v1421_v49  ;;  %v2589_v49 = vunpack.c.l.bf16 %v2811_v20 }
 0x1e7   :  { %v1150_v0 = vpop.f32.mrf.mxu1 }
 0x1e8   :  { %v2779_v63 = vpack.c.bf16 %v1764_v62, %v1763_v58  ;;  %v1151_v51 = vadd.f32 %v1150_v0, %v981_v35  ;;  %v1441_v22 = vmul.f32 %v3725_v6, %v1368_v33  ;;  %v1681_v39 = vadd.f32 %v2585_v61, %v1489_v1  ;;  %v2821_v62 = vld [vmem:[%s4023_s4 + $0xf8] sm:$0xff]  }
 0x1e9   :  { %v2590_v35 = vunpack.c.h.bf16 %v2811_v20  ;;  %v2629_v61 = vunpack.c.l.bf16 %v2821_v62 }
 0x1ea   :  { %2850 = vst [vmem:[%s4024_s5 + $0xe8] sm:$0xff] %v2779_v63   ;;  %v1320_v12 = vadd.f32 %v1319_v23, %v1151_v51  ;;  %v1509_v9 = vadd.f32 %v3733_v29, %v1441_v22  ;;  %v1745_v24 = vmax.f32 %v1681_v39, 0.0 }
 0x1ec   :  { %v1422_v53 = vmul.f32 %v3725_v6, %v1320_v12  ;;  %v1701_v57 = vadd.f32 %v2625_v10, %v1509_v9 }
 0x1ed   :  { %v1327_v56 = vpop.f32.mrf.mxu2  ;;  %v1369_v55 = vpop.f32.mrf.mxu3 }
 0x1ee   :  { %v1490_v8 = vadd.f32 %v3733_v29, %v1422_v53  ;;  %v1370_v14 = vadd.f32 %v1369_v55, %v1201_v18  ;;  %v984_v23 = vpop.f32.mrf.mxu0  ;;  %v1765_v38 = vmax.f32 %v1701_v57, 0.0 }
 0x1ef   :  { %v1153_v21 = vpop.f32.mrf.mxu1 }
 0x1f0   :  { %v1682_v27 = vadd.f32 %v2586_v2, %v1490_v8  ;;  %v1442_v25 = vmul.f32 %v3725_v6, %v1370_v14  ;;  %v1154_v32 = vadd.f32 %v1153_v21, %v984_v23  ;;  %v2630_v2 = vunpack.c.h.bf16 %v2821_v62 }
 0x1f2   :  { %v1746_v37 = vmax.f32 %v1682_v27, 0.0  ;;  %v1510_v4 = vadd.f32 %v3733_v29, %v1442_v25  ;;  %v1323_v42 = vadd.f32 %v1322_v26, %v1154_v32  ;;  %v2812_v32 = vld [vmem:[%s4023_s4 + $0xb0] sm:$0xff]  }
 0x1f4   :  { %v2734_v19 = vpack.c.bf16 %v1746_v37, %v1745_v24  ;;  %v1702_v34 = vadd.f32 %v2626_v36, %v1510_v4  ;;  %v1423_v52 = vmul.f32 %v3725_v6, %v1323_v42  ;;  %v2593_v4 = vunpack.c.l.bf16 %v2812_v32 }
 0x1f5   :  { %v1329_v41 = vpop.f32.mrf.mxu2  ;;  %v1372_v15 = vpop.f32.mrf.mxu3 }
 0x1f6   :  { %2841 = vst [vmem:[%s4024_s5 + $0xa0] sm:$0xff] %v2734_v19   ;;  %v1766_v40 = vmax.f32 %v1702_v34, 0.0  ;;  %v1373_v26 = vadd.f32 %v1372_v15, %v1204_v43  ;;  %v986_v60 = vpop.f32.mrf.mxu0  ;;  %v1491_v28 = vadd.f32 %v3733_v29, %v1423_v52  ;;  %v1169_v43 = vadd.f32 %v3533_v30, %v3218_v11  ;;  %v2814_v11 = vld [vmem:[%s4023_s4 + $0xc0] sm:$0xff]  }
 0x1f7   :  { %v1155_v7 = vpop.f32.mrf.mxu1  ;;  %v2594_v34 = vunpack.c.h.bf16 %v2812_v32 }
 0x1f8   :  { %v2784_v46 = vpack.c.bf16 %v1766_v40, %v1765_v38  ;;  %v1156_v17 = vadd.f32 %v1155_v7, %v986_v60  ;;  %v1443_v47 = vmul.f32 %v3725_v6, %v1373_v26  ;;  %v1683_v0 = vadd.f32 %v2589_v49, %v1491_v28 }
 0x1fa   :  { %2851 = vst [vmem:[%s4024_s5 + $0xf0] sm:$0xff] %v2784_v46   ;;  %v1325_v58 = vadd.f32 %v1324_v50, %v1156_v17  ;;  %v1511_v1 = vadd.f32 %v3733_v29, %v1443_v47  ;;  %v1747_v5 = vmax.f32 %v1683_v0, 0.0  ;;  %v2813_v0 = vld [vmem:[%s4023_s4 + $0xb8] sm:$0xff]  }
 0x1fc   :  { %v1424_v33 = vmul.f32 %v3725_v6, %v1325_v58  ;;  %v1703_v13 = vadd.f32 %v2629_v61, %v1511_v1  ;;  %v2601_v58 = vunpack.c.l.bf16 %v2814_v11 }
 0x1fd   :  { %v1332_v63 = vpop.f32.mrf.mxu2  ;;  %v1374_v51 = vpop.f32.mrf.mxu3 }
 0x1fe   :  { %v1492_v22 = vadd.f32 %v3733_v29, %v1424_v33  ;;  %v1375_v12 = vadd.f32 %v1374_v51, %v1206_v45  ;;  %v989_v50 = vpop.f32.mrf.mxu0  ;;  %v1767_v21 = vmax.f32 %v1703_v13, 0.0 }
 0x1ff   :  { %v1158_v59 = vpop.f32.mrf.mxu1 }
 0x200   :  { %v1684_v18 = vadd.f32 %v2590_v35, %v1492_v22  ;;  %v1444_v53 = vmul.f32 %v3725_v6, %v1375_v12  ;;  %v1159_v39 = vadd.f32 %v1158_v59, %v989_v50  ;;  %v2597_v22 = vunpack.c.l.bf16 %v2813_v0 }
 0x201   :  { %v1174_v59 = vadd.f32 %v3573_v16, %v3259_v48  ;;  %v2815_v16 = vld [vmem:[%s4023_s4 + $0xc8] sm:$0xff]  }
 0x202   :  { %v1748_v55 = vmax.f32 %v1684_v18, 0.0  ;;  %v1512_v9 = vadd.f32 %v3733_v29, %v1444_v53  ;;  %v1328_v10 = vadd.f32 %v1327_v56, %v1159_v39 }
 0x204   :  { %v2739_v8 = vpack.c.bf16 %v1748_v55, %v1747_v5  ;;  %v1704_v14 = vadd.f32 %v2630_v2, %v1512_v9  ;;  %v1425_v25 = vmul.f32 %v3725_v6, %v1328_v10  ;;  %v2598_v2 = vunpack.c.h.bf16 %v2813_v0 }
 0x205   :  { %v1334_v23 = vpop.f32.mrf.mxu2 }
 0x206   :  { %2842 = vst [vmem:[%s4024_s5 + $0xa8] sm:$0xff] %v2739_v8   ;;  %v1768_v27 = vmax.f32 %v1704_v14, 0.0  ;;  %v991_v36 = vpop.f32.mrf.mxu0  ;;  %v1493_v56 = vadd.f32 %v3733_v29, %v1425_v25 }
 0x207   :  { %v1160_v24 = vpop.f32.mrf.mxu1 }
 0x208   :  { %v2789_v57 = vpack.c.bf16 %v1768_v27, %v1767_v21  ;;  %v1161_v37 = vadd.f32 %v1160_v24, %v991_v36  ;;  %v1685_v15 = vadd.f32 %v2593_v4, %v1493_v56  ;;  %v1176_v27 = vadd.f32 %v3603_v44, %v3289_v3 }
 0x209   :  { %v2605_v24 = vunpack.c.l.bf16 %v2815_v16  ;;  %v2606_v56 = vunpack.c.h.bf16 %v2815_v16 }
 0x20a   :  { %2852 = vst [vmem:[%s4024_s5 + $0xf8] sm:$0xff] %v2789_v57   ;;  %v1330_v42 = vadd.f32 %v1329_v41, %v1161_v37  ;;  %v1749_v17 = vmax.f32 %v1685_v15, 0.0  ;;  %v1171_v41 = vadd.f32 %v3563_v54, %v3250_v31  ;;  %v2602_v54 = vunpack.c.h.bf16 %v2814_v11 }
 0x20c   :  { %v1426_v19 = vmul.f32 %v3725_v6, %v1330_v42 }
 0x20d   :  { %v1337_v52 = vpop.f32.mrf.mxu2 }
 0x20e   :  { %v1494_v38 = vadd.f32 %v3733_v29, %v1426_v19  ;;  %v1338_v40 = vadd.f32 %v1337_v52, %v1169_v43  ;;  %v994_v20 = vpop.f32.mrf.mxu0 }
 0x20f   :  { %v1163_v26 = vpop.f32.mrf.mxu1 }
 0x210   :  { %v1686_v60 = vadd.f32 %v2594_v34, %v1494_v38  ;;  %v1164_v7 = vadd.f32 %v1163_v26, %v994_v20  ;;  %v1429_v46 = vmul.f32 %v3725_v6, %v1338_v40 }
 0x212   :  { %v1750_v28 = vmax.f32 %v1686_v60, 0.0  ;;  %v1333_v30 = vadd.f32 %v1332_v63, %v1164_v7  ;;  %v1497_v47 = vadd.f32 %v3733_v29, %v1429_v46 }
 0x214   :  { %v2744_v49 = vpack.c.bf16 %v1750_v28, %v1749_v17  ;;  %v1427_v45 = vmul.f32 %v3725_v6, %v1333_v30  ;;  %v1689_v1 = vadd.f32 %v2601_v58, %v1497_v47 }
 0x215   :  { %v1339_v62 = vpop.f32.mrf.mxu2 }
 0x216   :  { %2843 = vst [vmem:[%s4024_s5 + $0xb0] sm:$0xff] %v2744_v49   ;;  %v1340_v33 = vadd.f32 %v1339_v62, %v1171_v41  ;;  %v996_v35 = vpop.f32.mrf.mxu0  ;;  %v1495_v61 = vadd.f32 %v3733_v29, %v1427_v45  ;;  %v1753_v39 = vmax.f32 %v1689_v1, 0.0 }
 0x217   :  { %v1165_v63 = vpop.f32.mrf.mxu1 }
 0x218   :  { %v1430_v31 = vmul.f32 %v3725_v6, %v1340_v33  ;;  %v1166_v51 = vadd.f32 %v1165_v63, %v996_v35  ;;  %v1687_v13 = vadd.f32 %v2597_v22, %v1495_v61 }
 0x21a   :  { %v1498_v12 = vadd.f32 %v3733_v29, %v1430_v31  ;;  %v1335_v50 = vadd.f32 %v1334_v23, %v1166_v51  ;;  %v1751_v21 = vmax.f32 %v1687_v13, 0.0 }
 0x21c   :  { %v1690_v18 = vadd.f32 %v2602_v54, %v1498_v12  ;;  %v1428_v53 = vmul.f32 %v3725_v6, %v1335_v50 }
 0x21d   :  { %v1342_v5 = vpop.f32.mrf.mxu2 }
 0x21e   :  { %v1754_v55 = vmax.f32 %v1690_v18, 0.0  ;;  %v1496_v9 = vadd.f32 %v3733_v29, %v1428_v53  ;;  %v1343_v10 = vadd.f32 %v1342_v5, %v1174_v59 }
 0x220   :  { %v2754_v8 = vpack.c.bf16 %v1754_v55, %v1753_v39  ;;  %v1688_v14 = vadd.f32 %v2598_v2, %v1496_v9  ;;  %v1431_v48 = vmul.f32 %v3725_v6, %v1343_v10 }
 0x222   :  { %2845 = vst [vmem:[%s4024_s5 + $0xc0] sm:$0xff] %v2754_v8   ;;  %v1752_v23 = vmax.f32 %v1688_v14, 0.0  ;;  %v1499_v32 = vadd.f32 %v3733_v29, %v1431_v48 }
 0x224   :  { %v2749_v25 = vpack.c.bf16 %v1752_v23, %v1751_v21  ;;  %v1691_v4 = vadd.f32 %v2605_v24, %v1499_v32 }
 0x225   :  { %v1344_v36 = vpop.f32.mrf.mxu2 }
 0x226   :  { %2844 = vst [vmem:[%s4024_s5 + $0xb8] sm:$0xff] %v2749_v25   ;;  %v1345_v57 = vadd.f32 %v1344_v36, %v1176_v27  ;;  %v1755_v19 = vmax.f32 %v1691_v4, 0.0 }
 0x228   :  { %v1432_v37 = vmul.f32 %v3725_v6, %v1345_v57 }
 0x22a   :  { %v1500_v42 = vadd.f32 %v3733_v29, %v1432_v37 }
 0x22c   :  { %v1692_v43 = vadd.f32 %v2606_v56, %v1500_v42 }
 0x22e   :  { %v1756_v34 = vmax.f32 %v1692_v43, 0.0 }
 0x230   :  { %v2759_v3 = vpack.c.bf16 %v1756_v34, %v1755_v19 }
 0x232   :  { %2846 = vst [vmem:[%s4024_s5 + $0xc8] sm:$0xff] %v2759_v3  }

// kernel: _lambda_.16
= control target key start
LH: loop header
LB: loop body
LE: loop exit
PB: predicated region body
PF: predicated region fallthrough
CT: control target
= control target key end

     0   :  { %vm314_vm0 = vcmask 261120   ;;  %s1175_s1 = inlined_call_operand.vmem [shape: bf16[288,128], index: 1, kind: input, shape index: {}]   ;;  %s1176_s0 = inlined_call_operand.vmem [shape: bf16[128,288], index: 0, kind: input, shape index: {}]   ;;  %s1177_s2 = inlined_call_operand.vmem [shape: f32[1,128], index: 2, kind: input, shape index: {}]   ;;  %s1178_s3 = inlined_call_operand.vmem [shape: f32[1,128], index: 3, kind: input, shape index: {}]   ;;  %s1179_s4 = inlined_call_operand.vmem [shape: bf16[128,128], index: 4, kind: output, shape index: {}]  }
   0x1   :  { %v785_v0 = vld [vmem:[%s1175_s1 + $0x38] sm:$0xff]  ;;  %v795_v2 = vld [vmem:[%s1175_s1 + $0x88] sm:$0xff]  ;;  %v784_v3 = vld [vmem:[%s1175_s1 + $0x30] sm:$0xff] }
   0x2   :  { %v892_v1 = vld [vmem:[%s1175_s1 + $0x78] sm:$0xff]  ;;  %339 = vmatpush.bf16.msra.mxu0 %v785_v0  ;;  %843 = vmatpush.bf16.msra.mxu3 %v785_v0  ;;  %v903_v4 = vld [vmem:[%s1175_s1 + $0x70] sm:$0xff]  ;;  %v794_v5 = vld [vmem:[%s1175_s1 + $0x80] sm:$0xff] }
   0x3   :  { %388 = vmatpush.bf16.msra.mxu1 %v892_v1  ;;  %443 = vmatpush.bf16.msra.mxu2 %v795_v2  ;;  %v588_v6 = vld [vmem:[%s1176_s0 + $0x8] sm:$0xf]  ;;  %v756_v7 = vld [vmem:[%s1176_s0 + $0x10] sm:$0xf0]  ;;  %v782_v11 = vld [vmem:[%s1175_s1 + $0x20] sm:$0xff] }
   0x4   :  { %v589_v8 = vor.u32 %v756_v7, %v588_v6  ;;  %v783_v9 = vld [vmem:[%s1175_s1 + $0x28] sm:$0xff]  ;;  %v790_v12 = vld [vmem:[%s1175_s1 + $0x60] sm:$0xff]  ;;  %v781_v13 = vld [vmem:[%s1175_s1 + $0x18] sm:$0xff] }
   0x5   :  { %v791_v10 = vld [vmem:[%s1175_s1 + $0x68] sm:$0xff]  ;;  %v789_v14 = vld [vmem:[%s1175_s1 + $0x58] sm:$0xff]  ;;  %v780_v15 = vld [vmem:[%s1175_s1 + $0x10] sm:$0xff] }
   0x6   :  { %340 = vmatpush.bf16.msra.mxu0 %v784_v3  ;;  %844 = vmatpush.bf16.msra.mxu3 %v784_v3  ;;  %v788_v16 = vld [vmem:[%s1175_s1 + $0x50] sm:$0xff]  ;;  %v600_v17 = vld [vmem:[%s1176_s0 + $0x20] sm:$0xf]  ;;  %v759_v18 = vld [vmem:[%s1176_s0 + $0x28] sm:$0xf0] }
   0x7   :  { %389 = vmatpush.bf16.msra.mxu1 %v903_v4  ;;  %444 = vmatpush.bf16.msra.mxu2 %v794_v5  ;;  %v601_v19 = vor.u32 %v759_v18, %v600_v17  ;;  %v779_v20 = vld [vmem:[%s1175_s1 + $0x8] sm:$0xff]  ;;  %v778_v22 = vld [vmem:[%s1175_s1] sm:$0xff]  ;;  %v652_v26 = vld [vmem:[%s1176_s0 + $0x90] sm:$0xf] }
   0x8   :  { %v787_v21 = vld [vmem:[%s1175_s1 + $0x48] sm:$0xff]  ;;  %v786_v23 = vld [vmem:[%s1175_s1 + $0x40] sm:$0xff]  ;;  %v773_v27 = vld [vmem:[%s1176_s0 + $0x98] sm:$0xf0] }
   0x9   :  { %v580_v24 = vld [vmem:[%s1176_s0] sm:$0xf]  ;;  %v755_v25 = vld [vmem:[%s1176_s0 + $0x8] sm:$0xf0]  ;;  %v754_v28 = vld [vmem:[%s1176_s0 + $0x4] sm:$0xf]  ;;  %v653_v31 = vor.u32 %v773_v27, %v652_v26 }
   0xa   :  { %746 = vmatmul.msk.bf16.vlgmr.msra.gmra.mxu2 %vm314_vm0, %v589_v8  ;;  %341 = vmatpush.bf16.msra.mxu0 %v783_v9  ;;  %v582_v29 = vld [vmem:[%s1176_s0 + $0xc] sm:$0xf0]  ;;  %v581_v30 = vor.u32 %v755_v25, %v580_v24  ;;  %v612_v33 = vld [vmem:[%s1176_s0 + $0x38] sm:$0xf]  ;;  %v762_v34 = vld [vmem:[%s1176_s0 + $0x40] sm:$0xf0] }
   0xb   :  { %845 = vmatpush.bf16.msra.mxu3 %v783_v9  ;;  %390 = vmatpush.bf16.msra.mxu1 %v791_v10  ;;  %v585_v32 = vor.u32 %v754_v28, %v582_v29  ;;  %v613_v35 = vor.u32 %v762_v34, %v612_v33  ;;  %v592_v36 = vld [vmem:[%s1176_s0 + $0x18] sm:$0xf]  ;;  %v758_v37 = vld [vmem:[%s1176_s0 + $0x20] sm:$0xf0]  ;;  %v664_v38 = vld [vmem:[%s1176_s0 + $0xa8] sm:$0xf] }
   0xc   :  { %v776_v39 = vld [vmem:[%s1176_s0 + $0xb0] sm:$0xf0]  ;;  %v757_v40 = vld [vmem:[%s1176_s0 + $0x1c] sm:$0xf]  ;;  %v594_v41 = vld [vmem:[%s1176_s0 + $0x24] sm:$0xf0]  ;;  %v593_v42 = vor.u32 %v758_v37, %v592_v36 }
   0xd   :  { %v665_v43 = vor.u32 %v776_v39, %v664_v38  ;;  %v597_v44 = vor.u32 %v757_v40, %v594_v41  ;;  %v624_v45 = vld [vmem:[%s1176_s0 + $0x50] sm:$0xf]  ;;  %v765_v46 = vld [vmem:[%s1176_s0 + $0x58] sm:$0xf0]  ;;  %v760_v50 = vld [vmem:[%s1176_s0 + $0x34] sm:$0xf] }
   0xe   :  { %342 = vmatpush.bf16.msra.mxu0 %v782_v11  ;;  %v625_v47 = vor.u32 %v765_v46, %v624_v45  ;;  %v604_v48 = vld [vmem:[%s1176_s0 + $0x30] sm:$0xf]  ;;  %v761_v49 = vld [vmem:[%s1176_s0 + $0x38] sm:$0xf0]  ;;  %v606_v51 = vld [vmem:[%s1176_s0 + $0x3c] sm:$0xf0] }
   0xf   :  { %846 = vmatpush.bf16.msra.mxu3 %v782_v11  ;;  %391 = vmatpush.bf16.msra.mxu1 %v790_v12  ;;  %v772_v52 = vld [vmem:[%s1176_s0 + $0x94] sm:$0xf]  ;;  %v654_v53 = vld [vmem:[%s1176_s0 + $0x9c] sm:$0xf0]  ;;  %v605_v54 = vor.u32 %v761_v49, %v604_v48  ;;  %v609_v55 = vor.u32 %v760_v50, %v606_v51  ;;  %v636_v57 = vld [vmem:[%s1176_s0 + $0x68] sm:$0xf] }
  0x10   :  { %v657_v56 = vor.u32 %v772_v52, %v654_v53  ;;  %v768_v58 = vld [vmem:[%s1176_s0 + $0x70] sm:$0xf0]  ;;  %v616_v60 = vld [vmem:[%s1176_s0 + $0x48] sm:$0xf]  ;;  %v763_v62 = vld [vmem:[%s1176_s0 + $0x4c] sm:$0xf] }
  0x11   :  { %v637_v59 = vor.u32 %v768_v58, %v636_v57  ;;  %v764_v61 = vld [vmem:[%s1176_s0 + $0x50] sm:$0xf0]  ;;  %v618_v63 = vld [vmem:[%s1176_s0 + $0x54] sm:$0xf0]  ;;  %v775_v0 = vld [vmem:[%s1176_s0 + $0xac] sm:$0xf] }
  0x12   :  { %343 = vmatpush.bf16.msra.mxu0 %v781_v13  ;;  %v617_v2 = vor.u32 %v764_v61, %v616_v60  ;;  %v621_v3 = vor.u32 %v763_v62, %v618_v63  ;;  %v648_v5 = vld [vmem:[%s1176_s0 + $0x80] sm:$0xf]  ;;  %v771_v6 = vld [vmem:[%s1176_s0 + $0x88] sm:$0xf0]  ;;  %v630_v11 = vld [vmem:[%s1176_s0 + $0x6c] sm:$0xf0] }
  0x13   :  { %847 = vmatpush.bf16.msra.mxu3 %v781_v13  ;;  %392 = vmatpush.bf16.msra.mxu1 %v789_v14  ;;  %v649_v7 = vor.u32 %v771_v6, %v648_v5  ;;  %v628_v8 = vld [vmem:[%s1176_s0 + $0x60] sm:$0xf]  ;;  %v767_v9 = vld [vmem:[%s1176_s0 + $0x68] sm:$0xf0]  ;;  %v640_v17 = vld [vmem:[%s1176_s0 + $0x78] sm:$0xf] }
  0x14   :  { %v770_v18 = vld [vmem:[%s1176_s0 + $0x80] sm:$0xf0]  ;;  %v777_v24 = vld [vmem:[%s1176_s0 + $0xb8] sm:$0xf0]  ;;  %v1103_v33 = vld [vmem:[%s1177_s2] ss:$0 sm:$0xff] }
  0x15   :  { %v1109_v38 = vld [vmem:[%s1178_s3] ss:$0 sm:$0xff] }
  0x16   :  { %344 = vmatpush.bf16.msra.mxu0 %v780_v15 }
  0x17   :  { %848 = vmatpush.bf16.msra.mxu3 %v780_v15  ;;  %393 = vmatpush.bf16.msra.mxu1 %v788_v16  ;;  %v774_v15 = vld [vmem:[%s1176_s0 + $0xa0] sm:$0xf0] }
  0x1a   :  { %747 = vmatmul.msk.bf16.gmra.mxu2 %vm314_vm0, %v601_v19  ;;  %345 = vmatpush.bf16.msra.mxu0 %v779_v20  ;;  %v769_v19 = vld [vmem:[%s1176_s0 + $0x7c] sm:$0xf] }
  0x1b   :  { %849 = vmatpush.bf16.msra.mxu3 %v779_v20  ;;  %394 = vmatpush.bf16.msra.mxu1 %v787_v21  ;;  %v642_v20 = vld [vmem:[%s1176_s0 + $0x84] sm:$0xf0] }
  0x1e   :  { %346 = vmatpush.bf16.msra.mxu0 %v778_v22 }
  0x1f   :  { %850 = vmatpush.bf16.msra.mxu3 %v778_v22  ;;  %395 = vmatpush.bf16.msra.mxu1 %v786_v23  ;;  %v645_v22 = vor.u32 %v769_v19, %v642_v20 }
  0x21   :  { %347 = vmatmul.bf16.vlgmr.msra.gmra.mxu0 %v581_v30 }
  0x22   :  { %377 = vmatmul.bf16.vlgmr.msra.gmra.mxu3 %v653_v31  ;;  %396 = vmatmul.bf16.vlgmr.msra.gmra.mxu1 %v585_v32 }
  0x23   :  { %851 = vmatpush.bf16.msrb.mxu3 %v892_v1  ;;  %v666_v1 = vld [vmem:[%s1176_s0 + $0xb4] sm:$0xf0] }
  0x27   :  { %852 = vmatpush.bf16.msrb.mxu3 %v903_v4  ;;  %v669_v4 = vor.u32 %v775_v0, %v666_v1 }
  0x2a   :  { %748 = vmatmul.msk.bf16.gmra.mxu2 %vm314_vm0, %v613_v35 }
  0x2b   :  { %853 = vmatpush.bf16.msrb.mxu3 %v791_v10  ;;  %v766_v10 = vld [vmem:[%s1176_s0 + $0x64] sm:$0xf] }
  0x2c   :  { %v633_v13 = vor.u32 %v766_v10, %v630_v11 }
  0x2f   :  { %854 = vmatpush.bf16.msrb.mxu3 %v790_v12  ;;  %v629_v12 = vor.u32 %v767_v9, %v628_v8 }
  0x31   :  { %352 = vmatmul.bf16.gmra.mxu0 %v593_v42 }
  0x32   :  { %382 = vmatmul.bf16.gmra.mxu3 %v665_v43  ;;  %401 = vmatmul.bf16.gmra.mxu1 %v597_v44 }
  0x33   :  { %855 = vmatpush.bf16.msrb.mxu3 %v789_v14  ;;  %v660_v14 = vld [vmem:[%s1176_s0 + $0x98] sm:$0xf] }
  0x37   :  { %856 = vmatpush.bf16.msrb.mxu3 %v788_v16  ;;  %v661_v16 = vor.u32 %v774_v15, %v660_v14 }
  0x3a   :  { %749 = vmatmul.msk.bf16.gmra.mxu2 %vm314_vm0, %v625_v47 }
  0x3b   :  { %857 = vmatpush.bf16.msrb.mxu3 %v787_v21  ;;  %v641_v21 = vor.u32 %v770_v18, %v640_v17 }
  0x3f   :  { %858 = vmatpush.bf16.msrb.mxu3 %v786_v23  ;;  %v672_v23 = vld [vmem:[%s1176_s0 + $0xb0] sm:$0xf] }
  0x40   :  { %v673_v25 = vor.u32 %v777_v24, %v672_v23 }
  0x41   :  { %357 = vmatmul.bf16.gmra.mxu0 %v605_v54 }
  0x42   :  { %406 = vmatmul.bf16.gmra.mxu1 %v609_v55  ;;  %426 = vmatmul.bf16.vlgmr.msrb.gmra.mxu3 %v657_v56 }
  0x4a   :  { %750 = vmatmul.msk.bf16.gmra.mxu2 %vm314_vm0, %v637_v59 }
  0x51   :  { %362 = vmatmul.bf16.gmra.mxu0 %v617_v2 }
  0x52   :  { %411 = vmatmul.bf16.gmra.mxu1 %v621_v3  ;;  %431 = vmatmul.bf16.gmra.mxu3 %v669_v4 }
  0x5a   :  { %751 = vmatmul.msk.bf16.gmra.mxu2 %vm314_vm0, %v649_v7 }
  0x61   :  { %367 = vmatmul.bf16.gmra.mxu0 %v629_v12 }
  0x62   :  { %416 = vmatmul.bf16.gmra.mxu1 %v633_v13 }
  0x6a   :  { %752 = vmatmul.msk.bf16.gmra.mxu2 %vm314_vm0, %v661_v16 }
  0x71   :  { %372 = vmatmul.bf16.gmra.mxu0 %v641_v21 }
  0x72   :  { %421 = vmatmul.bf16.gmra.mxu1 %v645_v22 }
  0x7a   :  { %753 = vmatmul.msk.bf16.gmra.mxu2 %vm314_vm0, %v673_v25 }
  0x8d   :  { %v446_v26 = vpop.f32.mrf.mxu2 }
  0x95   :  { %v448_v27 = vpop.f32.mrf.mxu2 }
  0x9d   :  { %v451_v28 = vpop.f32.mrf.mxu2 }
  0x9e   :  { %v348_v29 = vpop.f32.mrf.mxu0 }
  0x9f   :  { %v397_v30 = vpop.f32.mrf.mxu1 }
  0xa0   :  { %v398_v31 = vadd.f32 %v397_v30, %v348_v29 }
  0xa2   :  { %v447_v32 = vadd.f32 %v446_v26, %v398_v31 }
  0xa4   :  { %v490_v37 = vmul.f32 %v1103_v33, %v447_v32 }
  0xa5   :  { %v453_v34 = vpop.f32.mrf.mxu2  ;;  %v1118_v58 = vpop.f32.mrf.mxu3 }
  0xa6   :  { %v350_v35 = vpop.f32.mrf.mxu0  ;;  %v510_v41 = vadd.f32 %v1109_v38, %v490_v37 }
  0xa7   :  { %v399_v36 = vpop.f32.mrf.mxu1 }
  0xa8   :  { %v400_v39 = vadd.f32 %v399_v36, %v350_v35  ;;  %v526_v47 = vmax.f32 %v510_v41, 0.0 }
  0xaa   :  { %v449_v40 = vadd.f32 %v448_v27, %v400_v39 }
  0xac   :  { %v491_v42 = vmul.f32 %v1103_v33, %v449_v40 }
  0xad   :  { %v456_v43 = vpop.f32.mrf.mxu2  ;;  %v380_v6 = vpop.f32.mrf.mxu3 }
  0xae   :  { %v511_v44 = vadd.f32 %v1109_v38, %v491_v42  ;;  %v353_v45 = vpop.f32.mrf.mxu0 }
  0xaf   :  { %v402_v46 = vpop.f32.mrf.mxu1 }
  0xb0   :  { %v527_v48 = vmax.f32 %v511_v44, 0.0  ;;  %v403_v49 = vadd.f32 %v402_v46, %v353_v45 }
  0xb2   :  { %v799_v50 = vpack.c.bf16 %v527_v48, %v526_v47  ;;  %v452_v51 = vadd.f32 %v451_v28, %v403_v49 }
  0xb4   :  { %800 = vst [vmem:[%s1179_s4] sm:$0xff] %v799_v50   ;;  %v492_v55 = vmul.f32 %v1103_v33, %v452_v51 }
  0xb5   :  { %v458_v52 = vpop.f32.mrf.mxu2  ;;  %v1130_v18 = vpop.f32.mrf.mxu3 }
  0xb6   :  { %v355_v53 = vpop.f32.mrf.mxu0  ;;  %v512_v59 = vadd.f32 %v1109_v38, %v492_v55 }
  0xb7   :  { %v404_v54 = vpop.f32.mrf.mxu1 }
  0xb8   :  { %v405_v56 = vadd.f32 %v404_v54, %v355_v53  ;;  %v528_v1 = vmax.f32 %v512_v59, 0.0 }
  0xba   :  { %v454_v57 = vadd.f32 %v453_v34, %v405_v56 }
  0xbc   :  { %v493_v60 = vmul.f32 %v1103_v33, %v454_v57 }
  0xbd   :  { %v461_v61 = vpop.f32.mrf.mxu2  ;;  %v1136_v30 = vpop.f32.mrf.mxu3 }
  0xbe   :  { %v513_v62 = vadd.f32 %v1109_v38, %v493_v60  ;;  %v358_v63 = vpop.f32.mrf.mxu0 }
  0xbf   :  { %v407_v0 = vpop.f32.mrf.mxu1 }
  0xc0   :  { %v529_v2 = vmax.f32 %v513_v62, 0.0  ;;  %v408_v3 = vadd.f32 %v407_v0, %v358_v63 }
  0xc2   :  { %v804_v4 = vpack.c.bf16 %v529_v2, %v528_v1  ;;  %v457_v5 = vadd.f32 %v456_v43, %v408_v3 }
  0xc4   :  { %836 = vst [vmem:[%s1179_s4 + $0x8] sm:$0xff] %v804_v4   ;;  %v494_v10 = vmul.f32 %v1103_v33, %v457_v5 }
  0xc5   :  { %v463_v7 = vpop.f32.mrf.mxu2  ;;  %v427_v44 = vpop.f32.mrf.mxu3 }
  0xc6   :  { %v360_v8 = vpop.f32.mrf.mxu0  ;;  %v514_v13 = vadd.f32 %v1109_v38, %v494_v10  ;;  %v428_v56 = vadd.f32 %v427_v44, %v1118_v58 }
  0xc7   :  { %v409_v9 = vpop.f32.mrf.mxu1 }
  0xc8   :  { %v410_v11 = vadd.f32 %v409_v9, %v360_v8  ;;  %v530_v20 = vmax.f32 %v514_v13, 0.0 }
  0xca   :  { %v459_v12 = vadd.f32 %v458_v52, %v410_v11 }
  0xcc   :  { %v495_v14 = vmul.f32 %v1103_v33, %v459_v12 }
  0xcd   :  { %v466_v15 = vpop.f32.mrf.mxu2  ;;  %v429_v54 = vpop.f32.mrf.mxu3 }
  0xce   :  { %v515_v16 = vadd.f32 %v1109_v38, %v495_v14  ;;  %v363_v17 = vpop.f32.mrf.mxu0  ;;  %v430_v2 = vadd.f32 %v429_v54, %v380_v6 }
  0xcf   :  { %v412_v19 = vpop.f32.mrf.mxu1 }
  0xd0   :  { %v531_v21 = vmax.f32 %v515_v16, 0.0  ;;  %v413_v22 = vadd.f32 %v412_v19, %v363_v17 }
  0xd2   :  { %v809_v23 = vpack.c.bf16 %v531_v21, %v530_v20  ;;  %v462_v24 = vadd.f32 %v461_v61, %v413_v22 }
  0xd4   :  { %837 = vst [vmem:[%s1179_s4 + $0x10] sm:$0xff] %v809_v23   ;;  %v496_v28 = vmul.f32 %v1103_v33, %v462_v24 }
  0xd5   :  { %v468_v25 = vpop.f32.mrf.mxu2  ;;  %v432_v8 = vpop.f32.mrf.mxu3 }
  0xd6   :  { %v365_v26 = vpop.f32.mrf.mxu0  ;;  %v516_v32 = vadd.f32 %v1109_v38, %v496_v28  ;;  %v433_v21 = vadd.f32 %v432_v8, %v1130_v18 }
  0xd7   :  { %v414_v27 = vpop.f32.mrf.mxu1 }
  0xd8   :  { %v415_v29 = vadd.f32 %v414_v27, %v365_v26  ;;  %v532_v40 = vmax.f32 %v516_v32, 0.0 }
  0xda   :  { %v464_v31 = vadd.f32 %v463_v7, %v415_v29 }
  0xdc   :  { %v497_v34 = vmul.f32 %v1103_v33, %v464_v31 }
  0xdd   :  { %v471_v35 = vpop.f32.mrf.mxu2  ;;  %v434_v27 = vpop.f32.mrf.mxu3 }
  0xde   :  { %v517_v36 = vadd.f32 %v1109_v38, %v497_v34  ;;  %v368_v37 = vpop.f32.mrf.mxu0  ;;  %v435_v29 = vadd.f32 %v434_v27, %v1136_v30 }
  0xdf   :  { %v417_v39 = vpop.f32.mrf.mxu1 }
  0xe0   :  { %v533_v41 = vmax.f32 %v517_v36, 0.0  ;;  %v418_v42 = vadd.f32 %v417_v39, %v368_v37 }
  0xe2   :  { %v814_v43 = vpack.c.bf16 %v533_v41, %v532_v40  ;;  %v467_v45 = vadd.f32 %v466_v15, %v418_v42 }
  0xe4   :  { %838 = vst [vmem:[%s1179_s4 + $0x18] sm:$0xff] %v814_v43   ;;  %v498_v49 = vmul.f32 %v1103_v33, %v467_v45 }
  0xe5   :  { %v473_v46 = vpop.f32.mrf.mxu2 }
  0xe6   :  { %v370_v47 = vpop.f32.mrf.mxu0  ;;  %v518_v52 = vadd.f32 %v1109_v38, %v498_v49 }
  0xe7   :  { %v419_v48 = vpop.f32.mrf.mxu1 }
  0xe8   :  { %v420_v50 = vadd.f32 %v419_v48, %v370_v47  ;;  %v534_v61 = vmax.f32 %v518_v52, 0.0 }
  0xea   :  { %v469_v51 = vadd.f32 %v468_v25, %v420_v50 }
  0xec   :  { %v499_v53 = vmul.f32 %v1103_v33, %v469_v51 }
  0xed   :  { %v476_v55 = vpop.f32.mrf.mxu2 }
  0xee   :  { %v519_v57 = vadd.f32 %v1109_v38, %v499_v53  ;;  %v373_v59 = vpop.f32.mrf.mxu0  ;;  %v477_v63 = vadd.f32 %v476_v55, %v428_v56 }
  0xef   :  { %v422_v60 = vpop.f32.mrf.mxu1 }
  0xf0   :  { %v535_v62 = vmax.f32 %v519_v57, 0.0  ;;  %v423_v0 = vadd.f32 %v422_v60, %v373_v59  ;;  %v502_v3 = vmul.f32 %v1103_v33, %v477_v63 }
  0xf2   :  { %v819_v1 = vpack.c.bf16 %v535_v62, %v534_v61  ;;  %v472_v4 = vadd.f32 %v471_v35, %v423_v0  ;;  %v522_v10 = vadd.f32 %v1109_v38, %v502_v3 }
  0xf4   :  { %839 = vst [vmem:[%s1179_s4 + $0x20] sm:$0xff] %v819_v1   ;;  %v500_v11 = vmul.f32 %v1103_v33, %v472_v4  ;;  %v538_v15 = vmax.f32 %v522_v10, 0.0 }
  0xf5   :  { %v478_v5 = vpop.f32.mrf.mxu2 }
  0xf6   :  { %v479_v7 = vadd.f32 %v478_v5, %v430_v2  ;;  %v375_v58 = vpop.f32.mrf.mxu0  ;;  %v520_v16 = vadd.f32 %v1109_v38, %v500_v11 }
  0xf7   :  { %v424_v9 = vpop.f32.mrf.mxu1 }
  0xf8   :  { %v503_v12 = vmul.f32 %v1103_v33, %v479_v7  ;;  %v425_v13 = vadd.f32 %v424_v9, %v375_v58  ;;  %v536_v24 = vmax.f32 %v520_v16, 0.0 }
  0xfa   :  { %v523_v6 = vadd.f32 %v1109_v38, %v503_v12  ;;  %v474_v14 = vadd.f32 %v473_v46, %v425_v13 }
  0xfc   :  { %v539_v17 = vmax.f32 %v523_v6, 0.0  ;;  %v501_v19 = vmul.f32 %v1103_v33, %v474_v14 }
  0xfd   :  { %v481_v20 = vpop.f32.mrf.mxu2 }
  0xfe   :  { %v829_v22 = vpack.c.bf16 %v539_v17, %v538_v15  ;;  %v521_v23 = vadd.f32 %v1109_v38, %v501_v19  ;;  %v482_v26 = vadd.f32 %v481_v20, %v433_v21 }
 0x100   :  { %841 = vst [vmem:[%s1179_s4 + $0x30] sm:$0xff] %v829_v22   ;;  %v537_v25 = vmax.f32 %v521_v23, 0.0  ;;  %v504_v18 = vmul.f32 %v1103_v33, %v482_v26 }
 0x102   :  { %v824_v28 = vpack.c.bf16 %v537_v25, %v536_v24  ;;  %v524_v34 = vadd.f32 %v1109_v38, %v504_v18 }
 0x104   :  { %840 = vst [vmem:[%s1179_s4 + $0x28] sm:$0xff] %v824_v28   ;;  %v540_v37 = vmax.f32 %v524_v34, 0.0 }
 0x105   :  { %v483_v31 = vpop.f32.mrf.mxu2 }
 0x106   :  { %v484_v32 = vadd.f32 %v483_v31, %v435_v29 }
 0x108   :  { %v505_v35 = vmul.f32 %v1103_v33, %v484_v32 }
 0x10a   :  { %v525_v36 = vadd.f32 %v1109_v38, %v505_v35 }
 0x10c   :  { %v541_v39 = vmax.f32 %v525_v36, 0.0 }
 0x10e   :  { %v834_v40 = vpack.c.bf16 %v541_v39, %v540_v37 }
 0x110   :  { %842 = vst [vmem:[%s1179_s4 + $0x38] sm:$0xff] %v834_v40  }

// kernel: _lambda_.18
= control target key start
LH: loop header
LB: loop body
LE: loop exit
PB: predicated region body
PF: predicated region fallthrough
CT: control target
= control target key end

     0   :  { %vm557_vm0 = vcmask 523264   ;;  %s1979_s1 = inlined_call_operand.vmem [shape: bf16[576,128], index: 1, kind: input, shape index: {}]   ;;  %s1980_s0 = inlined_call_operand.vmem [shape: bf16[128,576], index: 0, kind: input, shape index: {}]   ;;  %s1981_s2 = inlined_call_operand.vmem [shape: f32[1,128], index: 2, kind: input, shape index: {}]   ;;  %s1982_s3 = inlined_call_operand.vmem [shape: f32[1,128], index: 3, kind: input, shape index: {}]   ;;  %s1983_s4 = inlined_call_operand.vmem [shape: bf16[128,128], index: 4, kind: input, shape index: {}]   ;;  %s1984_s5 = inlined_call_operand.vmem [shape: bf16[128,128], index: 5, kind: output, shape index: {}]  }
   0x1   :  { %v1326_v0 = vld [vmem:[%s1979_s1 + $0x38] sm:$0xff]  ;;  %v1325_v1 = vld [vmem:[%s1979_s1 + $0x30] sm:$0xff]  ;;  %v1324_v2 = vld [vmem:[%s1979_s1 + $0x28] sm:$0xff] }
   0x2   :  { %1441 = vmatpush.bf16.msra.mxu1 %v1326_v0  ;;  %1442 = vmatpush.bf16.msra.mxu2 %v1326_v0  ;;  %v1323_v3 = vld [vmem:[%s1979_s1 + $0x20] sm:$0xff]  ;;  %v1322_v4 = vld [vmem:[%s1979_s1 + $0x18] sm:$0xff]  ;;  %v1321_v5 = vld [vmem:[%s1979_s1 + $0x10] sm:$0xff] }
   0x3   :  { %1443 = vmatpush.bf16.msra.mxu3 %v1326_v0  ;;  %582 = vmatpush.bf16.msra.mxu0 %v1326_v0  ;;  %v1320_v6 = vld [vmem:[%s1979_s1 + $0x8] sm:$0xff]  ;;  %v1319_v7 = vld [vmem:[%s1979_s1] sm:$0xff]  ;;  %v1009_v8 = vld [vmem:[%s1980_s0 + $0x50] sm:$0xf] }
   0x4   :  { %v1291_v9 = vld [vmem:[%s1980_s0 + $0x60] sm:$0xf0]  ;;  %v1049_v10 = vld [vmem:[%s1980_s0 + $0xa0] sm:$0xf]  ;;  %v1301_v11 = vld [vmem:[%s1980_s0 + $0xb0] sm:$0xf0] }
   0x5   :  { %v1089_v12 = vld [vmem:[%s1980_s0 + $0xf0] sm:$0xf]  ;;  %v1311_v13 = vld [vmem:[%s1980_s0 + $0x100] sm:$0xf0]  ;;  %v969_v14 = vld [vmem:[%s1980_s0] sm:$0xf]  ;;  %v1010_v18 = vor.u32 %v1291_v9, %v1009_v8  ;;  %v1050_v19 = vor.u32 %v1301_v11, %v1049_v10 }
   0x6   :  { %1444 = vmatpush.bf16.msra.mxu1 %v1325_v1  ;;  %1445 = vmatpush.bf16.msra.mxu2 %v1325_v1  ;;  %v1281_v15 = vld [vmem:[%s1980_s0 + $0x10] sm:$0xf0]  ;;  %v1342_v16 = vld [vmem:[%s1979_s1 + $0xb8] sm:$0xff]  ;;  %v1090_v20 = vor.u32 %v1311_v13, %v1089_v12  ;;  %v1340_v28 = vld [vmem:[%s1979_s1 + $0xa8] sm:$0xff] }
   0x7   :  { %1446 = vmatpush.bf16.msra.mxu3 %v1325_v1  ;;  %583 = vmatpush.bf16.msra.mxu0 %v1325_v1  ;;  %v1334_v17 = vld [vmem:[%s1979_s1 + $0x78] sm:$0xff]  ;;  %v970_v21 = vor.u32 %v1281_v15, %v969_v14  ;;  %v1341_v24 = vld [vmem:[%s1979_s1 + $0xb0] sm:$0xff]  ;;  %v1332_v29 = vld [vmem:[%s1979_s1 + $0x68] sm:$0xff] }
   0x8   :  { %v1350_v22 = vld [vmem:[%s1979_s1 + $0xf8] sm:$0xff]  ;;  %v1333_v25 = vld [vmem:[%s1979_s1 + $0x70] sm:$0xff]  ;;  %v1348_v30 = vld [vmem:[%s1979_s1 + $0xe8] sm:$0xff] }
   0x9   :  { %v1354_v23 = vld [vmem:[%s1979_s1 + $0x118] sm:$0xff]  ;;  %v1349_v26 = vld [vmem:[%s1979_s1 + $0xf0] sm:$0xff]  ;;  %v1352_v31 = vld [vmem:[%s1979_s1 + $0x108] sm:$0xff] }
   0xa   :  { %1447 = vmatpush.bf16.msra.mxu1 %v1324_v2  ;;  %1448 = vmatpush.bf16.msra.mxu2 %v1324_v2  ;;  %v1353_v27 = vld [vmem:[%s1979_s1 + $0x110] sm:$0xff]  ;;  %v1339_v32 = vld [vmem:[%s1979_s1 + $0xa0] sm:$0xff]  ;;  %v1029_v35 = vld [vmem:[%s1980_s0 + $0x78] sm:$0xf] }
   0xb   :  { %1449 = vmatpush.bf16.msra.mxu3 %v1324_v2  ;;  %584 = vmatpush.bf16.msra.mxu0 %v1324_v2  ;;  %v1331_v33 = vld [vmem:[%s1979_s1 + $0x60] sm:$0xff]  ;;  %v1296_v36 = vld [vmem:[%s1980_s0 + $0x88] sm:$0xf0]  ;;  %v1069_v37 = vld [vmem:[%s1980_s0 + $0xc8] sm:$0xf] }
   0xc   :  { %v1347_v34 = vld [vmem:[%s1979_s1 + $0xe0] sm:$0xff]  ;;  %v1306_v38 = vld [vmem:[%s1980_s0 + $0xd8] sm:$0xf0]  ;;  %v1109_v39 = vld [vmem:[%s1980_s0 + $0x118] sm:$0xf]  ;;  %v1030_v46 = vor.u32 %v1296_v36, %v1029_v35 }
   0xd   :  { %v1316_v40 = vld [vmem:[%s1980_s0 + $0x128] sm:$0xf0]  ;;  %v989_v41 = vld [vmem:[%s1980_s0 + $0x28] sm:$0xf]  ;;  %v1286_v42 = vld [vmem:[%s1980_s0 + $0x38] sm:$0xf0]  ;;  %v1070_v47 = vor.u32 %v1306_v38, %v1069_v37 }
   0xe   :  { %1450 = vmatpush.bf16.msra.mxu1 %v1323_v3  ;;  %1451 = vmatpush.bf16.msra.mxu2 %v1323_v3  ;;  %v1351_v43 = vld [vmem:[%s1979_s1 + $0x100] sm:$0xff]  ;;  %v1338_v44 = vld [vmem:[%s1979_s1 + $0x98] sm:$0xff]  ;;  %v1110_v48 = vor.u32 %v1316_v40, %v1109_v39  ;;  %v990_v49 = vor.u32 %v1286_v42, %v989_v41  ;;  %v1337_v51 = vld [vmem:[%s1979_s1 + $0x90] sm:$0xff] }
   0xf   :  { %1452 = vmatpush.bf16.msra.mxu3 %v1323_v3  ;;  %585 = vmatpush.bf16.msra.mxu0 %v1323_v3  ;;  %v1330_v45 = vld [vmem:[%s1979_s1 + $0x58] sm:$0xff]  ;;  %v1329_v52 = vld [vmem:[%s1979_s1 + $0x50] sm:$0xff]  ;;  %v1336_v54 = vld [vmem:[%s1979_s1 + $0x88] sm:$0xff] }
  0x10   :  { %v1346_v50 = vld [vmem:[%s1979_s1 + $0xd8] sm:$0xff]  ;;  %v1345_v53 = vld [vmem:[%s1979_s1 + $0xd0] sm:$0xff]  ;;  %v1328_v55 = vld [vmem:[%s1979_s1 + $0x48] sm:$0xff] }
  0x11   :  { %v1344_v56 = vld [vmem:[%s1979_s1 + $0xc8] sm:$0xff]  ;;  %v1335_v57 = vld [vmem:[%s1979_s1 + $0x80] sm:$0xff]  ;;  %v971_v61 = vld [vmem:[%s1980_s0 + $0x14] sm:$0xf0] }
  0x12   :  { %1453 = vmatpush.bf16.msra.mxu1 %v1322_v4  ;;  %1454 = vmatpush.bf16.msra.mxu2 %v1322_v4  ;;  %v1327_v58 = vld [vmem:[%s1979_s1 + $0x40] sm:$0xff]  ;;  %v977_v62 = vld [vmem:[%s1980_s0 + $0x8] sm:$0xf]  ;;  %v1282_v63 = vld [vmem:[%s1980_s0 + $0x18] sm:$0xf0] }
  0x13   :  { %1455 = vmatpush.bf16.msra.mxu3 %v1322_v4  ;;  %586 = vmatpush.bf16.msra.mxu0 %v1322_v4  ;;  %v1343_v59 = vld [vmem:[%s1979_s1 + $0xc0] sm:$0xff]  ;;  %v1280_v0 = vld [vmem:[%s1980_s0 + $0xc] sm:$0xf]  ;;  %v985_v2 = vld [vmem:[%s1980_s0 + $0x10] sm:$0xf] }
  0x14   :  { %v1279_v60 = vld [vmem:[%s1980_s0 + $0x4] sm:$0xf]  ;;  %v979_v1 = vld [vmem:[%s1980_s0 + $0x1c] sm:$0xf0]  ;;  %v1284_v8 = vld [vmem:[%s1980_s0 + $0x2c] sm:$0xf] }
  0x15   :  { %v1283_v3 = vld [vmem:[%s1980_s0 + $0x20] sm:$0xf0]  ;;  %v974_v4 = vor.u32 %v1279_v60, %v971_v61  ;;  %v991_v9 = vld [vmem:[%s1980_s0 + $0x3c] sm:$0xf0]  ;;  %v997_v10 = vld [vmem:[%s1980_s0 + $0x30] sm:$0xf] }
  0x16   :  { %1456 = vmatpush.bf16.msra.mxu1 %v1321_v5  ;;  %1457 = vmatpush.bf16.msra.mxu2 %v1321_v5  ;;  %v1287_v11 = vld [vmem:[%s1980_s0 + $0x40] sm:$0xf0]  ;;  %v1285_v12 = vld [vmem:[%s1980_s0 + $0x34] sm:$0xf]  ;;  %v999_v13 = vld [vmem:[%s1980_s0 + $0x44] sm:$0xf0] }
  0x17   :  { %1458 = vmatpush.bf16.msra.mxu3 %v1321_v5  ;;  %587 = vmatpush.bf16.msra.mxu0 %v1321_v5  ;;  %v978_v5 = vor.u32 %v1282_v63, %v977_v62  ;;  %v1005_v14 = vld [vmem:[%s1980_s0 + $0x38] sm:$0xf]  ;;  %v1288_v15 = vld [vmem:[%s1980_s0 + $0x48] sm:$0xf0]  ;;  %v1297_v35 = vld [vmem:[%s1980_s0 + $0x90] sm:$0xf0] }
  0x18   :  { %v1295_v36 = vld [vmem:[%s1980_s0 + $0x84] sm:$0xf]  ;;  %v1039_v37 = vld [vmem:[%s1980_s0 + $0x94] sm:$0xf0]  ;;  %v1045_v38 = vld [vmem:[%s1980_s0 + $0x88] sm:$0xf] }
  0x19   :  { %v1298_v39 = vld [vmem:[%s1980_s0 + $0x98] sm:$0xf0]  ;;  %v1042_v42 = vor.u32 %v1295_v36, %v1039_v37  ;;  %v1305_v60 = vld [vmem:[%s1980_s0 + $0xd4] sm:$0xf]  ;;  %v1079_v61 = vld [vmem:[%s1980_s0 + $0xe4] sm:$0xf0] }
  0x1a   :  { %1459 = vmatpush.bf16.msra.mxu1 %v1320_v6  ;;  %1460 = vmatpush.bf16.msra.mxu2 %v1320_v6  ;;  %v1085_v62 = vld [vmem:[%s1980_s0 + $0xd8] sm:$0xf]  ;;  %v1308_v63 = vld [vmem:[%s1980_s0 + $0xe8] sm:$0xf0] }
  0x1b   :  { %1461 = vmatpush.bf16.msra.mxu3 %v1320_v6  ;;  %588 = vmatpush.bf16.msra.mxu0 %v1320_v6  ;;  %v982_v6 = vor.u32 %v1280_v0, %v979_v1 }
  0x1e   :  { %1462 = vmatpush.bf16.msra.mxu1 %v1319_v7  ;;  %1463 = vmatpush.bf16.msra.mxu2 %v1319_v7 }
  0x1f   :  { %1464 = vmatpush.bf16.msra.mxu3 %v1319_v7  ;;  %589 = vmatpush.bf16.msra.mxu0 %v1319_v7  ;;  %v986_v7 = vor.u32 %v1283_v3, %v985_v2  ;;  %v1082_v2 = vor.u32 %v1305_v60, %v1079_v61  ;;  %v1086_v3 = vor.u32 %v1308_v63, %v1085_v62  ;;  %v1356_v61 = vld [vmem:[%s1983_s4] sm:$0xff]  }
  0x21   :  { %600 = vmatmul.bf16.vlgmr.msra.gmra.mxu1 %v1010_v18  ;;  %610 = vmatmul.bf16.vlgmr.msra.gmra.mxu2 %v1050_v19  ;;  %v1002_v18 = vor.u32 %v1285_v12, %v999_v13  ;;  %v1006_v19 = vor.u32 %v1288_v15, %v1005_v14 }
  0x22   :  { %680 = vmatpush.bf16.msrb.mxu2 %v1342_v16  ;;  %631 = vmatpush.bf16.msrb.mxu1 %v1334_v17  ;;  %v994_v16 = vor.u32 %v1284_v8, %v991_v9  ;;  %v998_v17 = vor.u32 %v1287_v11, %v997_v10  ;;  %v1310_v8 = vld [vmem:[%s1980_s0 + $0xfc] sm:$0xf]  ;;  %v1099_v9 = vld [vmem:[%s1980_s0 + $0x10c] sm:$0xf0]  ;;  %v1105_v10 = vld [vmem:[%s1980_s0 + $0x100] sm:$0xf] }
  0x23   :  { %620 = vmatmul.bf16.vlgmr.msra.gmra.mxu3 %v1090_v20  ;;  %590 = vmatmul.bf16.vlgmr.msra.gmra.mxu0 %v970_v21  ;;  %v1289_v20 = vld [vmem:[%s1980_s0 + $0x54] sm:$0xf]  ;;  %v1011_v21 = vld [vmem:[%s1980_s0 + $0x64] sm:$0xf0]  ;;  %v1102_v15 = vor.u32 %v1310_v8, %v1099_v9 }
  0x24   :  { %729 = vmatpush.bf16.msrb.mxu3 %v1350_v22  ;;  %782 = vmatpush.bf16.msrb.mxu0 %v1354_v23  ;;  %v1017_v22 = vld [vmem:[%s1980_s0 + $0x58] sm:$0xf]  ;;  %v1292_v23 = vld [vmem:[%s1980_s0 + $0x68] sm:$0xf0]  ;;  %v1313_v11 = vld [vmem:[%s1980_s0 + $0x110] sm:$0xf0] }
  0x26   :  { %681 = vmatpush.bf16.msrb.mxu2 %v1341_v24  ;;  %632 = vmatpush.bf16.msrb.mxu1 %v1333_v25  ;;  %v1290_v24 = vld [vmem:[%s1980_s0 + $0x5c] sm:$0xf]  ;;  %v1019_v25 = vld [vmem:[%s1980_s0 + $0x6c] sm:$0xf0] }
  0x28   :  { %730 = vmatpush.bf16.msrb.mxu3 %v1349_v26  ;;  %783 = vmatpush.bf16.msrb.mxu0 %v1353_v27  ;;  %v1025_v26 = vld [vmem:[%s1980_s0 + $0x60] sm:$0xf]  ;;  %v1293_v27 = vld [vmem:[%s1980_s0 + $0x70] sm:$0xf0] }
  0x2a   :  { %682 = vmatpush.bf16.msrb.mxu2 %v1340_v28  ;;  %633 = vmatpush.bf16.msrb.mxu1 %v1332_v29  ;;  %v1014_v28 = vor.u32 %v1289_v20, %v1011_v21  ;;  %v1018_v29 = vor.u32 %v1292_v23, %v1017_v22  ;;  %v1314_v22 = vld [vmem:[%s1980_s0 + $0x11c] sm:$0xf]  ;;  %v1111_v23 = vld [vmem:[%s1980_s0 + $0x12c] sm:$0xf0] }
  0x2c   :  { %731 = vmatpush.bf16.msrb.mxu3 %v1348_v30  ;;  %784 = vmatpush.bf16.msrb.mxu0 %v1352_v31  ;;  %v1022_v30 = vor.u32 %v1290_v24, %v1019_v25  ;;  %v1026_v31 = vor.u32 %v1293_v27, %v1025_v26  ;;  %v1117_v24 = vld [vmem:[%s1980_s0 + $0x120] sm:$0xf]  ;;  %v1317_v25 = vld [vmem:[%s1980_s0 + $0x130] sm:$0xf0]  ;;  %v1315_v26 = vld [vmem:[%s1980_s0 + $0x124] sm:$0xf] }
  0x2d   :  { %v1119_v27 = vld [vmem:[%s1980_s0 + $0x134] sm:$0xf0] }
  0x2e   :  { %683 = vmatpush.bf16.msrb.mxu2 %v1339_v32  ;;  %634 = vmatpush.bf16.msrb.mxu1 %v1331_v33  ;;  %v1294_v32 = vld [vmem:[%s1980_s0 + $0x7c] sm:$0xf]  ;;  %v1031_v33 = vld [vmem:[%s1980_s0 + $0x8c] sm:$0xf0] }
  0x2f   :  { %v1034_v40 = vor.u32 %v1294_v32, %v1031_v33  ;;  %v1114_v32 = vor.u32 %v1314_v22, %v1111_v23  ;;  %v1118_v33 = vor.u32 %v1317_v25, %v1117_v24 }
  0x30   :  { %732 = vmatpush.bf16.msrb.mxu3 %v1347_v34  ;;  %785 = vmatpush.bf16.msrb.mxu0 %v1351_v43  ;;  %v1037_v34 = vld [vmem:[%s1980_s0 + $0x80] sm:$0xf]  ;;  %v1046_v43 = vor.u32 %v1298_v39, %v1045_v38 }
  0x31   :  { %605 = vmatmul.bf16.gmra.mxu1 %v1030_v46  ;;  %615 = vmatmul.bf16.gmra.mxu2 %v1070_v47  ;;  %v1038_v41 = vor.u32 %v1297_v35, %v1037_v34  ;;  %v1057_v46 = vld [vmem:[%s1980_s0 + $0xa8] sm:$0xf]  ;;  %v1302_v47 = vld [vmem:[%s1980_s0 + $0xb8] sm:$0xf0]  ;;  %v1122_v35 = vor.u32 %v1315_v26, %v1119_v27 }
  0x32   :  { %684 = vmatpush.bf16.msrb.mxu2 %v1338_v44  ;;  %635 = vmatpush.bf16.msrb.mxu1 %v1330_v45  ;;  %v1299_v44 = vld [vmem:[%s1980_s0 + $0xa4] sm:$0xf]  ;;  %v1051_v45 = vld [vmem:[%s1980_s0 + $0xb4] sm:$0xf0] }
  0x33   :  { %625 = vmatmul.bf16.gmra.mxu3 %v1110_v48  ;;  %595 = vmatmul.bf16.gmra.mxu0 %v990_v49  ;;  %v1300_v48 = vld [vmem:[%s1980_s0 + $0xac] sm:$0xf]  ;;  %v1059_v49 = vld [vmem:[%s1980_s0 + $0xbc] sm:$0xf0] }
  0x34   :  { %733 = vmatpush.bf16.msrb.mxu3 %v1346_v50  ;;  %v1065_v50 = vld [vmem:[%s1980_s0 + $0xb0] sm:$0xf] }
  0x36   :  { %685 = vmatpush.bf16.msrb.mxu2 %v1337_v51  ;;  %636 = vmatpush.bf16.msrb.mxu1 %v1329_v52  ;;  %v1303_v51 = vld [vmem:[%s1980_s0 + $0xc0] sm:$0xf0]  ;;  %v1054_v52 = vor.u32 %v1299_v44, %v1051_v45 }
  0x38   :  { %734 = vmatpush.bf16.msrb.mxu3 %v1345_v53  ;;  %v1058_v53 = vor.u32 %v1302_v47, %v1057_v46 }
  0x3a   :  { %686 = vmatpush.bf16.msrb.mxu2 %v1336_v54  ;;  %637 = vmatpush.bf16.msrb.mxu1 %v1328_v55  ;;  %v1062_v54 = vor.u32 %v1300_v48, %v1059_v49  ;;  %v1066_v55 = vor.u32 %v1303_v51, %v1065_v50 }
  0x3c   :  { %735 = vmatpush.bf16.msrb.mxu3 %v1344_v56  ;;  %v1304_v56 = vld [vmem:[%s1980_s0 + $0xcc] sm:$0xf] }
  0x3e   :  { %687 = vmatpush.bf16.msrb.mxu2 %v1335_v57  ;;  %638 = vmatpush.bf16.msrb.mxu1 %v1327_v58  ;;  %v1071_v57 = vld [vmem:[%s1980_s0 + $0xdc] sm:$0xf0]  ;;  %v1077_v58 = vld [vmem:[%s1980_s0 + $0xd0] sm:$0xf] }
  0x3f   :  { %v1074_v0 = vor.u32 %v1304_v56, %v1071_v57 }
  0x40   :  { %736 = vmatpush.bf16.msrb.mxu3 %v1343_v59  ;;  %v1307_v59 = vld [vmem:[%s1980_s0 + $0xe0] sm:$0xf0] }
  0x41   :  { %639 = vmatmul.bf16.vlgmr.msrb.gmra.mxu1 %v974_v4  ;;  %688 = vmatmul.bf16.vlgmr.msrb.gmra.mxu2 %v978_v5  ;;  %v1078_v1 = vor.u32 %v1307_v59, %v1077_v58  ;;  %v1309_v4 = vld [vmem:[%s1980_s0 + $0xf4] sm:$0xf]  ;;  %v1091_v5 = vld [vmem:[%s1980_s0 + $0x104] sm:$0xf0]  ;;  %v1886_v58 = vld [vmem:[%s1982_s3] ss:$0 sm:$0xff] }
  0x42   :  { %v1094_v12 = vor.u32 %v1309_v4, %v1091_v5  ;;  %v1358_v5 = vunpack.c.h.bf16 %v1356_v61 }
  0x43   :  { %737 = vmatmul.bf16.vlgmr.msrb.gmra.mxu3 %v982_v6  ;;  %1271 = vmatmul.msk.bf16.vlgmr.msrb.gmra.mxu0 %vm557_vm0, %v986_v7  ;;  %v1097_v6 = vld [vmem:[%s1980_s0 + $0xf8] sm:$0xf]  ;;  %v1312_v7 = vld [vmem:[%s1980_s0 + $0x108] sm:$0xf0] }
  0x44   :  { %v1098_v13 = vor.u32 %v1312_v7, %v1097_v6 }
  0x51   :  { %644 = vmatmul.bf16.gmra.mxu1 %v994_v16  ;;  %693 = vmatmul.bf16.gmra.mxu2 %v998_v17  ;;  %v1106_v16 = vor.u32 %v1313_v11, %v1105_v10 }
  0x53   :  { %742 = vmatmul.bf16.gmra.mxu3 %v1002_v18  ;;  %1272 = vmatmul.msk.bf16.gmra.mxu0 %vm557_vm0, %v1006_v19 }
  0x61   :  { %649 = vmatmul.bf16.gmra.mxu1 %v1014_v28  ;;  %698 = vmatmul.bf16.gmra.mxu2 %v1018_v29  ;;  %v1125_v28 = vld [vmem:[%s1980_s0 + $0x128] sm:$0xf]  ;;  %v1318_v29 = vld [vmem:[%s1980_s0 + $0x138] sm:$0xf0] }
  0x62   :  { %v1126_v36 = vor.u32 %v1318_v29, %v1125_v28  ;;  %v1427_v29 = vld [vmem:[%s1983_s4 + $0x8] sm:$0xff]  }
  0x63   :  { %747 = vmatmul.bf16.gmra.mxu3 %v1022_v30  ;;  %1273 = vmatmul.msk.bf16.gmra.mxu0 %vm557_vm0, %v1026_v31 }
  0x71   :  { %654 = vmatmul.bf16.gmra.mxu1 %v1034_v40  ;;  %703 = vmatmul.bf16.gmra.mxu2 %v1038_v41 }
  0x73   :  { %752 = vmatmul.bf16.gmra.mxu3 %v1042_v42  ;;  %1274 = vmatmul.msk.bf16.gmra.mxu0 %vm557_vm0, %v1046_v43 }
  0x81   :  { %659 = vmatmul.bf16.gmra.mxu1 %v1054_v52  ;;  %708 = vmatmul.bf16.gmra.mxu2 %v1058_v53 }
  0x83   :  { %757 = vmatmul.bf16.gmra.mxu3 %v1062_v54  ;;  %1275 = vmatmul.msk.bf16.gmra.mxu0 %vm557_vm0, %v1066_v55  ;;  %v1880_v54 = vld [vmem:[%s1981_s2] ss:$0 sm:$0xff] }
  0x91   :  { %664 = vmatmul.bf16.gmra.mxu1 %v1074_v0  ;;  %713 = vmatmul.bf16.gmra.mxu2 %v1078_v1 }
  0x93   :  { %762 = vmatmul.bf16.gmra.mxu3 %v1082_v2  ;;  %1276 = vmatmul.msk.bf16.gmra.mxu0 %vm557_vm0, %v1086_v3  ;;  %v1357_v2 = vunpack.c.l.bf16 %v1356_v61 }
  0x9e   :  { %v1827_v14 = vpop.f32.mrf.mxu1 }
  0xa0   :  { %v591_v17 = vpop.f32.mrf.mxu0 }
  0xa1   :  { %669 = vmatmul.bf16.gmra.mxu1 %v1094_v12  ;;  %718 = vmatmul.bf16.gmra.mxu2 %v1098_v13 }
  0xa3   :  { %767 = vmatmul.bf16.gmra.mxu3 %v1102_v15  ;;  %1277 = vmatmul.msk.bf16.gmra.mxu0 %vm557_vm0, %v1106_v16 }
  0xa4   :  { %v1830_v18 = vpop.f32.mrf.mxu2 }
  0xa6   :  { %v1832_v19 = vpop.f32.mrf.mxu3  ;;  %v1834_v20 = vpop.f32.mrf.mxu1 }
  0xa8   :  { %v593_v21 = vpop.f32.mrf.mxu0 }
  0xac   :  { %v1860_v30 = vpop.f32.mrf.mxu2 }
  0xae   :  { %v1862_v31 = vpop.f32.mrf.mxu3  ;;  %v1864_v34 = vpop.f32.mrf.mxu1 }
  0xb0   :  { %v596_v37 = vpop.f32.mrf.mxu0 }
  0xb1   :  { %674 = vmatmul.bf16.gmra.mxu1 %v1114_v32  ;;  %723 = vmatmul.bf16.gmra.mxu2 %v1118_v33 }
  0xb3   :  { %772 = vmatmul.bf16.gmra.mxu3 %v1122_v35  ;;  %1278 = vmatmul.msk.bf16.gmra.mxu0 %vm557_vm0, %v1126_v36 }
  0xb4   :  { %v1867_v38 = vpop.f32.mrf.mxu2 }
  0xb6   :  { %v1869_v39 = vpop.f32.mrf.mxu3  ;;  %v1871_v40 = vpop.f32.mrf.mxu1 }
  0xb8   :  { %v598_v41 = vpop.f32.mrf.mxu0 }
  0xbc   :  { %v1873_v42 = vpop.f32.mrf.mxu2 }
  0xbe   :  { %v1875_v43 = vpop.f32.mrf.mxu3  ;;  %v640_v44 = vpop.f32.mrf.mxu1 }
  0xbf   :  { %v641_v46 = vadd.f32 %v640_v44, %v591_v17 }
  0xc0   :  { %v787_v45 = vpop.f32.mrf.mxu0 }
  0xc4   :  { %v689_v47 = vpop.f32.mrf.mxu2 }
  0xc5   :  { %v690_v48 = vadd.f32 %v689_v47, %v641_v46 }
  0xc6   :  { %v738_v49 = vpop.f32.mrf.mxu3  ;;  %v642_v50 = vpop.f32.mrf.mxu1 }
  0xc7   :  { %v739_v51 = vadd.f32 %v738_v49, %v690_v48  ;;  %v643_v55 = vadd.f32 %v642_v50, %v593_v21 }
  0xc8   :  { %v789_v52 = vpop.f32.mrf.mxu0 }
  0xc9   :  { %v788_v53 = vadd.f32 %v787_v45, %v739_v51  ;;  %v1362_v45 = vunpack.c.h.bf16 %v1427_v29 }
  0xcb   :  { %v831_v57 = vmul.f32 %v1880_v54, %v788_v53 }
  0xcc   :  { %v691_v56 = vpop.f32.mrf.mxu2 }
  0xcd   :  { %v692_v59 = vadd.f32 %v691_v56, %v643_v55  ;;  %v851_v1 = vadd.f32 %v1886_v58, %v831_v57 }
  0xce   :  { %v740_v60 = vpop.f32.mrf.mxu3  ;;  %v645_v62 = vpop.f32.mrf.mxu1 }
  0xcf   :  { %v741_v63 = vadd.f32 %v740_v60, %v692_v59  ;;  %v646_v6 = vadd.f32 %v645_v62, %v596_v37  ;;  %v899_v8 = vadd.f32 %v1357_v2, %v851_v1  ;;  %v1361_v37 = vunpack.c.l.bf16 %v1427_v29  ;;  %v1428_v2 = vld [vmem:[%s1983_s4 + $0x10] sm:$0xff]  }
  0xd0   :  { %v792_v0 = vpop.f32.mrf.mxu0 }
  0xd1   :  { %v790_v3 = vadd.f32 %v789_v52, %v741_v63  ;;  %v915_v17 = vmax.f32 %v899_v8, 0.0 }
  0xd3   :  { %v832_v4 = vmul.f32 %v1880_v54, %v790_v3 }
  0xd4   :  { %v694_v7 = vpop.f32.mrf.mxu2 }
  0xd5   :  { %v852_v9 = vadd.f32 %v1886_v58, %v832_v4  ;;  %v695_v10 = vadd.f32 %v694_v7, %v646_v6  ;;  %v1365_v7 = vunpack.c.l.bf16 %v1428_v2 }
  0xd6   :  { %v743_v11 = vpop.f32.mrf.mxu3  ;;  %v647_v12 = vpop.f32.mrf.mxu1 }
  0xd7   :  { %v900_v13 = vadd.f32 %v1358_v5, %v852_v9  ;;  %v744_v15 = vadd.f32 %v743_v11, %v695_v10  ;;  %v648_v24 = vadd.f32 %v647_v12, %v598_v41  ;;  %v1366_v9 = vunpack.c.h.bf16 %v1428_v2 }
  0xd8   :  { %v794_v16 = vpop.f32.mrf.mxu0 }
  0xd9   :  { %v916_v21 = vmax.f32 %v900_v13, 0.0  ;;  %v793_v22 = vadd.f32 %v792_v0, %v744_v15 }
  0xdb   :  { %v1390_v23 = vpack.c.bf16 %v916_v21, %v915_v17  ;;  %v833_v26 = vmul.f32 %v1880_v54, %v793_v22 }
  0xdc   :  { %v696_v25 = vpop.f32.mrf.mxu2 }
  0xdd   :  { %1391 = vst [vmem:[%s1984_s5] sm:$0xff] %v1390_v23   ;;  %v697_v27 = vadd.f32 %v696_v25, %v648_v24  ;;  %v853_v36 = vadd.f32 %v1886_v58, %v833_v26 }
  0xde   :  { %v745_v28 = vpop.f32.mrf.mxu3  ;;  %v650_v32 = vpop.f32.mrf.mxu1 }
  0xdf   :  { %v746_v33 = vadd.f32 %v745_v28, %v697_v27  ;;  %v651_v46 = vadd.f32 %v650_v32, %v1827_v14  ;;  %v901_v48 = vadd.f32 %v1361_v37, %v853_v36 }
  0xe0   :  { %v797_v35 = vpop.f32.mrf.mxu0 }
  0xe1   :  { %v795_v41 = vadd.f32 %v794_v16, %v746_v33  ;;  %v917_v57 = vmax.f32 %v901_v48, 0.0 }
  0xe3   :  { %v834_v44 = vmul.f32 %v1880_v54, %v795_v41 }
  0xe4   :  { %v699_v47 = vpop.f32.mrf.mxu2 }
  0xe5   :  { %v854_v49 = vadd.f32 %v1886_v58, %v834_v44  ;;  %v700_v50 = vadd.f32 %v699_v47, %v651_v46 }
  0xe6   :  { %v748_v51 = vpop.f32.mrf.mxu3  ;;  %v652_v52 = vpop.f32.mrf.mxu1 }
  0xe7   :  { %v902_v53 = vadd.f32 %v1362_v45, %v854_v49  ;;  %v749_v55 = vadd.f32 %v748_v51, %v700_v50  ;;  %v653_v62 = vadd.f32 %v652_v52, %v1834_v20 }
  0xe8   :  { %v799_v56 = vpop.f32.mrf.mxu0 }
  0xe9   :  { %v918_v59 = vmax.f32 %v902_v53, 0.0  ;;  %v798_v60 = vadd.f32 %v797_v35, %v749_v55  ;;  %v1429_v35 = vld [vmem:[%s1983_s4 + $0x18] sm:$0xff]  }
  0xea   :  { %v1369_v45 = vunpack.c.l.bf16 %v1429_v35  ;;  %v1370_v47 = vunpack.c.h.bf16 %v1429_v35 }
  0xeb   :  { %v1395_v61 = vpack.c.bf16 %v918_v59, %v917_v57  ;;  %v835_v14 = vmul.f32 %v1880_v54, %v798_v60 }
  0xec   :  { %v701_v63 = vpop.f32.mrf.mxu2 }
  0xed   :  { %1434 = vst [vmem:[%s1984_s5 + $0x8] sm:$0xff] %v1395_v61   ;;  %v702_v0 = vadd.f32 %v701_v63, %v653_v62  ;;  %v855_v6 = vadd.f32 %v1886_v58, %v835_v14 }
  0xee   :  { %v750_v1 = vpop.f32.mrf.mxu3  ;;  %v655_v3 = vpop.f32.mrf.mxu1 }
  0xef   :  { %v751_v4 = vadd.f32 %v750_v1, %v702_v0  ;;  %v656_v10 = vadd.f32 %v655_v3, %v1864_v34  ;;  %v903_v12 = vadd.f32 %v1365_v7, %v855_v6  ;;  %v1430_v3 = vld [vmem:[%s1983_s4 + $0x20] sm:$0xff]  }
  0xf0   :  { %v802_v5 = vpop.f32.mrf.mxu0 }
  0xf1   :  { %v800_v20 = vadd.f32 %v799_v56, %v751_v4  ;;  %v919_v24 = vmax.f32 %v903_v12, 0.0 }
  0xf3   :  { %v836_v8 = vmul.f32 %v1880_v54, %v800_v20  ;;  %v1373_v20 = vunpack.c.l.bf16 %v1430_v3 }
  0xf4   :  { %v704_v11 = vpop.f32.mrf.mxu2 }
  0xf5   :  { %v856_v13 = vadd.f32 %v1886_v58, %v836_v8  ;;  %v705_v15 = vadd.f32 %v704_v11, %v656_v10 }
  0xf6   :  { %v753_v16 = vpop.f32.mrf.mxu3  ;;  %v657_v17 = vpop.f32.mrf.mxu1 }
  0xf7   :  { %v904_v21 = vadd.f32 %v1366_v9, %v856_v13  ;;  %v754_v22 = vadd.f32 %v753_v16, %v705_v15  ;;  %v658_v28 = vadd.f32 %v657_v17, %v1871_v40  ;;  %v1374_v9 = vunpack.c.h.bf16 %v1430_v3 }
  0xf8   :  { %v804_v23 = vpop.f32.mrf.mxu0 }
  0xf9   :  { %v920_v25 = vmax.f32 %v904_v21, 0.0  ;;  %v803_v26 = vadd.f32 %v802_v5, %v754_v22 }
  0xfb   :  { %v1400_v27 = vpack.c.bf16 %v920_v25, %v919_v24  ;;  %v837_v34 = vmul.f32 %v1880_v54, %v803_v26 }
  0xfc   :  { %v706_v29 = vpop.f32.mrf.mxu2 }
  0xfd   :  { %1435 = vst [vmem:[%s1984_s5 + $0x10] sm:$0xff] %v1400_v27   ;;  %v707_v32 = vadd.f32 %v706_v29, %v658_v28  ;;  %v857_v44 = vadd.f32 %v1886_v58, %v837_v34 }
  0xfe   :  { %v755_v33 = vpop.f32.mrf.mxu3  ;;  %v660_v36 = vpop.f32.mrf.mxu1 }
  0xff   :  { %v756_v37 = vadd.f32 %v755_v33, %v707_v32  ;;  %v661_v48 = vadd.f32 %v660_v36, %v1830_v18  ;;  %v905_v50 = vadd.f32 %v1369_v45, %v857_v44  ;;  %v1431_v33 = vld [vmem:[%s1983_s4 + $0x28] sm:$0xff]  }
 0x100   :  { %v807_v41 = vpop.f32.mrf.mxu0 }
 0x101   :  { %v805_v40 = vadd.f32 %v804_v23, %v756_v37  ;;  %v921_v60 = vmax.f32 %v905_v50, 0.0 }
 0x103   :  { %v838_v46 = vmul.f32 %v1880_v54, %v805_v40  ;;  %v1378_v40 = vunpack.c.h.bf16 %v1431_v33 }
 0x104   :  { %v709_v49 = vpop.f32.mrf.mxu2 }
 0x105   :  { %v858_v51 = vadd.f32 %v1886_v58, %v838_v46  ;;  %v710_v52 = vadd.f32 %v709_v49, %v661_v48 }
 0x106   :  { %v758_v53 = vpop.f32.mrf.mxu3  ;;  %v662_v55 = vpop.f32.mrf.mxu1 }
 0x107   :  { %v906_v56 = vadd.f32 %v1370_v47, %v858_v51  ;;  %v759_v57 = vadd.f32 %v758_v53, %v710_v52  ;;  %v663_v14 = vadd.f32 %v662_v55, %v1860_v30 }
 0x108   :  { %v809_v59 = vpop.f32.mrf.mxu0 }
 0x109   :  { %v922_v61 = vmax.f32 %v906_v56, 0.0  ;;  %v808_v62 = vadd.f32 %v807_v41, %v759_v57  ;;  %v1377_v41 = vunpack.c.l.bf16 %v1431_v33 }
 0x10b   :  { %v1405_v63 = vpack.c.bf16 %v922_v61, %v921_v60  ;;  %v839_v18 = vmul.f32 %v1880_v54, %v808_v62 }
 0x10c   :  { %v711_v0 = vpop.f32.mrf.mxu2 }
 0x10d   :  { %1436 = vst [vmem:[%s1984_s5 + $0x18] sm:$0xff] %v1405_v63   ;;  %v712_v1 = vadd.f32 %v711_v0, %v663_v14  ;;  %v859_v7 = vadd.f32 %v1886_v58, %v839_v18  ;;  %v1432_v18 = vld [vmem:[%s1983_s4 + $0x30] sm:$0xff]  }
 0x10e   :  { %v760_v2 = vpop.f32.mrf.mxu3  ;;  %v665_v4 = vpop.f32.mrf.mxu1 }
 0x10f   :  { %v761_v5 = vadd.f32 %v760_v2, %v712_v1  ;;  %v666_v10 = vadd.f32 %v665_v4, %v1867_v38  ;;  %v907_v12 = vadd.f32 %v1373_v20, %v859_v7  ;;  %v1381_v4 = vunpack.c.l.bf16 %v1432_v18 }
 0x110   :  { %v812_v6 = vpop.f32.mrf.mxu0 }
 0x111   :  { %v810_v30 = vadd.f32 %v809_v59, %v761_v5  ;;  %v923_v24 = vmax.f32 %v907_v12, 0.0 }
 0x113   :  { %v840_v8 = vmul.f32 %v1880_v54, %v810_v30 }
 0x114   :  { %v714_v11 = vpop.f32.mrf.mxu2 }
 0x115   :  { %v860_v13 = vadd.f32 %v1886_v58, %v840_v8  ;;  %v715_v15 = vadd.f32 %v714_v11, %v666_v10 }
 0x116   :  { %v763_v16 = vpop.f32.mrf.mxu3  ;;  %v667_v17 = vpop.f32.mrf.mxu1 }
 0x117   :  { %v908_v21 = vadd.f32 %v1374_v9, %v860_v13  ;;  %v764_v22 = vadd.f32 %v763_v16, %v715_v15  ;;  %v668_v28 = vadd.f32 %v667_v17, %v1873_v42 }
 0x118   :  { %v814_v23 = vpop.f32.mrf.mxu0 }
 0x119   :  { %v924_v25 = vmax.f32 %v908_v21, 0.0  ;;  %v813_v26 = vadd.f32 %v812_v6, %v764_v22  ;;  %v1382_v6 = vunpack.c.h.bf16 %v1432_v18 }
 0x11b   :  { %v1410_v27 = vpack.c.bf16 %v924_v25, %v923_v24  ;;  %v841_v38 = vmul.f32 %v1880_v54, %v813_v26  ;;  %v1433_v26 = vld [vmem:[%s1983_s4 + $0x38] sm:$0xff]  }
 0x11c   :  { %v716_v29 = vpop.f32.mrf.mxu2  ;;  %v1386_v33 = vunpack.c.h.bf16 %v1433_v26 }
 0x11d   :  { %1437 = vst [vmem:[%s1984_s5 + $0x20] sm:$0xff] %v1410_v27   ;;  %v717_v34 = vadd.f32 %v716_v29, %v668_v28  ;;  %v861_v37 = vadd.f32 %v1886_v58, %v841_v38 }
 0x11e   :  { %v765_v32 = vpop.f32.mrf.mxu3  ;;  %v670_v35 = vpop.f32.mrf.mxu1 }
 0x11f   :  { %v766_v36 = vadd.f32 %v765_v32, %v717_v34  ;;  %v671_v46 = vadd.f32 %v670_v35, %v1832_v19  ;;  %v909_v48 = vadd.f32 %v1377_v41, %v861_v37  ;;  %v1385_v34 = vunpack.c.l.bf16 %v1433_v26 }
 0x120   :  { %v817_v42 = vpop.f32.mrf.mxu0 }
 0x121   :  { %v815_v44 = vadd.f32 %v814_v23, %v766_v36  ;;  %v925_v56 = vmax.f32 %v909_v48, 0.0 }
 0x123   :  { %v842_v45 = vmul.f32 %v1880_v54, %v815_v44 }
 0x124   :  { %v719_v47 = vpop.f32.mrf.mxu2 }
 0x125   :  { %v862_v49 = vadd.f32 %v1886_v58, %v842_v45  ;;  %v720_v50 = vadd.f32 %v719_v47, %v671_v46 }
 0x126   :  { %v768_v51 = vpop.f32.mrf.mxu3  ;;  %v672_v52 = vpop.f32.mrf.mxu1 }
 0x127   :  { %v910_v53 = vadd.f32 %v1378_v40, %v862_v49  ;;  %v769_v55 = vadd.f32 %v768_v51, %v720_v50  ;;  %v673_v61 = vadd.f32 %v672_v52, %v1862_v31 }
 0x128   :  { %v819_v62 = vpop.f32.mrf.mxu0 }
 0x129   :  { %v926_v57 = vmax.f32 %v910_v53, 0.0  ;;  %v818_v59 = vadd.f32 %v817_v42, %v769_v55 }
 0x12b   :  { %v1415_v60 = vpack.c.bf16 %v926_v57, %v925_v56  ;;  %v843_v19 = vmul.f32 %v1880_v54, %v818_v59 }
 0x12c   :  { %v721_v63 = vpop.f32.mrf.mxu2 }
 0x12d   :  { %1438 = vst [vmem:[%s1984_s5 + $0x28] sm:$0xff] %v1415_v60   ;;  %v722_v14 = vadd.f32 %v721_v63, %v673_v61  ;;  %v863_v3 = vadd.f32 %v1886_v58, %v843_v19 }
 0x12e   :  { %v770_v0 = vpop.f32.mrf.mxu3  ;;  %v675_v1 = vpop.f32.mrf.mxu1 }
 0x12f   :  { %v771_v2 = vadd.f32 %v770_v0, %v722_v14  ;;  %v676_v7 = vadd.f32 %v675_v1, %v1869_v39  ;;  %v911_v30 = vadd.f32 %v1381_v4, %v863_v3 }
 0x130   :  { %v822_v11 = vpop.f32.mrf.mxu0 }
 0x131   :  { %v820_v31 = vadd.f32 %v819_v62, %v771_v2  ;;  %v927_v16 = vmax.f32 %v911_v30, 0.0 }
 0x133   :  { %v844_v5 = vmul.f32 %v1880_v54, %v820_v31 }
 0x134   :  { %v724_v20 = vpop.f32.mrf.mxu2 }
 0x135   :  { %v864_v8 = vadd.f32 %v1886_v58, %v844_v5  ;;  %v725_v9 = vadd.f32 %v724_v20, %v676_v7 }
 0x136   :  { %v773_v10 = vpop.f32.mrf.mxu3  ;;  %v677_v15 = vpop.f32.mrf.mxu1 }
 0x137   :  { %v912_v12 = vadd.f32 %v1382_v6, %v864_v8  ;;  %v774_v13 = vadd.f32 %v773_v10, %v725_v9  ;;  %v678_v23 = vadd.f32 %v677_v15, %v1875_v43 }
 0x138   :  { %v824_v29 = vpop.f32.mrf.mxu0 }
 0x139   :  { %v928_v17 = vmax.f32 %v912_v12, 0.0  ;;  %v823_v21 = vadd.f32 %v822_v11, %v774_v13 }
 0x13b   :  { %v1420_v22 = vpack.c.bf16 %v928_v17, %v927_v16  ;;  %v845_v39 = vmul.f32 %v1880_v54, %v823_v21 }
 0x13c   :  { %v726_v24 = vpop.f32.mrf.mxu2 }
 0x13d   :  { %1439 = vst [vmem:[%s1984_s5 + $0x30] sm:$0xff] %v1420_v22   ;;  %v727_v25 = vadd.f32 %v726_v24, %v678_v23  ;;  %v865_v38 = vadd.f32 %v1886_v58, %v845_v39 }
 0x13e   :  { %v775_v27 = vpop.f32.mrf.mxu3 }
 0x13f   :  { %v776_v28 = vadd.f32 %v775_v27, %v727_v25  ;;  %v913_v35 = vadd.f32 %v1385_v34, %v865_v38 }
 0x141   :  { %v825_v32 = vadd.f32 %v824_v29, %v776_v28  ;;  %v929_v41 = vmax.f32 %v913_v35, 0.0 }
 0x143   :  { %v846_v43 = vmul.f32 %v1880_v54, %v825_v32 }
 0x145   :  { %v866_v36 = vadd.f32 %v1886_v58, %v846_v43 }
 0x147   :  { %v914_v37 = vadd.f32 %v1386_v33, %v866_v36 }
 0x149   :  { %v930_v44 = vmax.f32 %v914_v37, 0.0 }
 0x14b   :  { %v1425_v42 = vpack.c.bf16 %v930_v44, %v929_v41 }
 0x14d   :  { %1440 = vst [vmem:[%s1984_s5 + $0x38] sm:$0xff] %v1425_v42  }

// kernel: _lambda_.19
= control target key start
LH: loop header
LB: loop body
LE: loop exit
PB: predicated region body
PF: predicated region fallthrough
CT: control target
= control target key end

     0   :  { %v214_v11 = vmov 64.0   ;;  %s314_s0 = inlined_call_operand.vmem [shape: bf16[2,64,128], index: 0, kind: input, shape index: {}]   ;;  %s315_s1 = inlined_call_operand.vmem [shape: f32[128,128], index: 1, kind: input, shape index: {}]   ;;  %s316_s2 = inlined_call_operand.vmem [shape: f32[1,128], index: 2, kind: input, shape index: {}]   ;;  %s317_s3 = inlined_call_operand.hbm [shape: f32[2,128], index: 3, kind: output, shape index: {}]  }
   0x1   :  { %v97_v0 = vld [vmem:[%s315_s1 + $0x78] sm:$0xff]  ;;  %v96_v1 = vld [vmem:[%s315_s1 + $0x70] sm:$0xff]  ;;  %v95_v2 = vld [vmem:[%s315_s1 + $0x68] sm:$0xff]  ;;  %186 = vrcp.f32 %v214_v11 }
   0x2   :  { %107 = vmatpush.msra.mxu0 %v97_v0  ;;  %v94_v3 = vld [vmem:[%s315_s1 + $0x60] sm:$0xff]  ;;  %v176_v5 = vld [vmem:[%s314_s0 + $0x8] sm:$0xff]   ;;  %v93_v6 = vld [vmem:[%s315_s1 + $0x58] sm:$0xff] }
   0x3   :  { %v145_v4 = vld [vmem:[%s314_s0] sm:$0xff]   ;;  %v180_v10 = vld [vmem:[%s314_s0 + $0x28] sm:$0xff]   ;;  %v92_v12 = vld [vmem:[%s315_s1 + $0x50] sm:$0xff]  ;;  %v150_v13 = vunpack.c.l.bf16 %v176_v5 }
   0x4   :  { %108 = vmatpush.msra.mxu0 %v96_v1  ;;  %v146_v7 = vunpack.c.l.bf16 %v145_v4  ;;  %v147_v8 = vunpack.c.h.bf16 %v145_v4  ;;  %v179_v9 = vld [vmem:[%s314_s0 + $0x20] sm:$0xff]   ;;  %v166_v16 = vunpack.c.l.bf16 %v180_v10 }
   0x5   :  { %v162_v14 = vunpack.c.l.bf16 %v179_v9  ;;  %v163_v15 = vunpack.c.h.bf16 %v179_v9 }
   0x6   :  { %109 = vmatpush.msra.mxu0 %v95_v2 }
   0x8   :  { %110 = vmatpush.msra.mxu0 %v94_v3 }
   0x9   :  { %8 = vsyncpa [#allocation3], 0  ;;  %v177_v17 = vld [vmem:[%s314_s0 + $0x10] sm:$0xff]   ;;  %v91_v19 = vld [vmem:[%s315_s1 + $0x48] sm:$0xff]  ;;  %v151_v20 = vunpack.c.h.bf16 %v176_v5  ;;  %v167_v21 = vunpack.c.h.bf16 %v180_v10  ;;  %v47_v22 = vadd.f32 %v147_v8, %v146_v7  ;;  %v60_v23 = vadd.f32 %v163_v15, %v162_v14  ;;  %v187_v29 = vpop.eup %186  ;;  %s215_s6 = smov [#allocation2]   ;;  %s135_s10 = sshll.u32 %s317_s3, 4  ;;  %s136_s10 = int_to_ptr.hbm [resolvable:$true] %s135_s10 }
   0xa   :  { %111 = vmatpush.msra.mxu0 %v93_v6  ;;  %v181_v18 = vld [vmem:[%s314_s0 + $0x30] sm:$0xff]   ;;  %v90_v24 = vld [vmem:[%s315_s1 + $0x40] sm:$0xff]  ;;  %v154_v25 = vunpack.c.l.bf16 %v177_v17  ;;  %v178_v30 = vld [vmem:[%s314_s0 + $0x18] sm:$0xff]   ;;  %v155_v33 = vunpack.c.h.bf16 %v177_v17  ;;  %v74_v42 = vmul.f32 64.0, %v187_v29  ;;  %vm78_vm0 = vweird.f32 %v187_v29  ;;  %s133_s7 = sshll.u32 %s215_s6, 4  ;;  %s134_s7 = int_to_ptr.vmem [resolvable:$true] %s133_s7 }
   0xb   :  { %v170_v26 = vunpack.c.l.bf16 %v181_v18  ;;  %v48_v27 = vadd.f32 %v150_v13, %v47_v22  ;;  %v61_v28 = vadd.f32 %v166_v16, %v60_v23  ;;  %v182_v31 = vld [vmem:[%s314_s0 + $0x38] sm:$0xff]   ;;  %v171_v34 = vunpack.c.h.bf16 %v181_v18  ;;  %v88_v37 = vld [vmem:[%s315_s1 + $0x30] sm:$0xff]  ;;  %v87_v43 = vld [vmem:[%s315_s1 + $0x28] sm:$0xff] }
   0xc   :  { %112 = vmatpush.msra.mxu0 %v92_v12  ;;  %v89_v32 = vld [vmem:[%s315_s1 + $0x38] sm:$0xff]  ;;  %v158_v38 = vunpack.c.l.bf16 %v178_v30  ;;  %v174_v39 = vunpack.c.l.bf16 %v182_v31  ;;  %v159_v44 = vunpack.c.h.bf16 %v178_v30  ;;  %v175_v45 = vunpack.c.h.bf16 %v182_v31  ;;  %v86_v48 = vld [vmem:[%s315_s1 + $0x20] sm:$0xff]  ;;  %v84_v55 = vld [vmem:[%s315_s1 + $0x10] sm:$0xff] }
   0xd   :  { %v49_v35 = vadd.f32 %v151_v20, %v48_v27  ;;  %v62_v36 = vadd.f32 %v167_v21, %v61_v28  ;;  %v75_v51 = vsub.f32 1.0, %v74_v42  ;;  %v85_v52 = vld [vmem:[%s315_s1 + $0x18] sm:$0xff]  ;;  %v83_v59 = vld [vmem:[%s315_s1 + $0x8] sm:$0xff]  ;;  %v82_v62 = vld [vmem:[%s315_s1] sm:$0xff]  ;;  %vm104_vm1 = vcmask 1041409  }
   0xe   :  { %113 = vmatpush.msra.mxu0 %v91_v19  ;;  %v185_v12 = vld [vmem:[%s316_s2] ss:$0 sm:$0xff] }
   0xf   :  { %v50_v40 = vadd.f32 %v154_v25, %v49_v35  ;;  %v63_v41 = vadd.f32 %v170_v26, %v62_v36  ;;  %v76_v58 = vmul.f32 %v187_v29, %v75_v51 }
  0x10   :  { %114 = vmatpush.msra.mxu0 %v90_v24 }
  0x11   :  { %v51_v46 = vadd.f32 %v155_v33, %v50_v40  ;;  %v64_v47 = vadd.f32 %v171_v34, %v63_v41  ;;  %v77_v1 = vadd.f32 %v187_v29, %v76_v58 }
  0x12   :  { %115 = vmatpush.msra.mxu0 %v89_v32 }
  0x13   :  { %v52_v49 = vadd.f32 %v158_v38, %v51_v46  ;;  %v65_v50 = vadd.f32 %v174_v39, %v64_v47  ;;  %v79_v6 = vsel %vm78_vm0, %v187_v29, %v77_v1 }
  0x14   :  { %116 = vmatpush.msra.mxu0 %v88_v37 }
  0x15   :  { %v53_v53 = vadd.f32 %v159_v44, %v52_v49  ;;  %v66_v54 = vadd.f32 %v175_v45, %v65_v50 }
  0x16   :  { %117 = vmatpush.msra.mxu0 %v87_v43 }
  0x17   :  { %v54_v56 = vrot.slane %v53_v53, 4  ;;  %v67_v57 = vrot.slane %v66_v54, 4 }
  0x18   :  { %118 = vmatpush.msra.mxu0 %v86_v48 }
  0x19   :  { %v55_v60 = vadd.f32 %v54_v56, %v53_v53  ;;  %v68_v61 = vadd.f32 %v67_v57, %v66_v54 }
  0x1a   :  { %119 = vmatpush.msra.mxu0 %v85_v52 }
  0x1b   :  { %v56_v63 = vrot.slane %v55_v60, 2  ;;  %v69_v0 = vrot.slane %v68_v61, 2 }
  0x1c   :  { %120 = vmatpush.msra.mxu0 %v84_v55 }
  0x1d   :  { %v57_v2 = vadd.f32 %v56_v63, %v55_v60  ;;  %v70_v3 = vadd.f32 %v69_v0, %v68_v61 }
  0x1e   :  { %121 = vmatpush.msra.mxu0 %v83_v59 }
  0x1f   :  { %v58_v4 = vrot.slane %v57_v2, 1  ;;  %v71_v5 = vrot.slane %v70_v3, 1 }
  0x20   :  { %122 = vmatpush.msra.mxu0 %v82_v62 }
  0x21   :  { %v59_v7 = vadd.f32 %v58_v4, %v57_v2  ;;  %v72_v8 = vadd.f32 %v71_v5, %v70_v3 }
  0x23   :  { %v80_v9 = vmul.f32 %v79_v6, %v59_v7  ;;  %v81_v10 = vmul.f32 %v79_v6, %v72_v8 }
  0x25   :  { %v105_v11 = vsel %vm104_vm1, %v81_v10, %v80_v9 }
  0x26   :  { %123 = vmatmul.f32.vlgmr.msra.gmra.mxu0 %v105_v11 }
  0xa3   :  { %v124_v13 = vpop.f32.mrf.mxu0 }
  0xa4   :  { %v125_v14 = vadd.f32 %v185_v12, %v124_v13 }
  0xa6   :  { %127 = vst [vmem:[#allocation2] sm:$0x3] %v125_v14 }
  0xa7   :  { %138 = dma.vmem_to_hbm [thread:$0]  %s134_s7, 32, %s136_s10, [#allocation3]  }
  0xa8   :  { %212 = dma.done.wait [#allocation3], 32  }
  0xa9   :  { %213 = vsyncadd [#allocation3], 4294967264 }
  0xaa   :  { %143 = vsyncpa [#allocation3], 1 }

</bundles_post_ra>
